<compile_context>
chip_gen: v7x
topology: tpu7x:2x2x1
jax: 0.10.0
libtpu: 0.0.40
codegen_flags: <defaults>
</compile_context>

<pallas_src>
import jax
import jax.numpy as jnp
from jax import lax
from jax.experimental import pallas as pl
from jax.experimental.pallas import tpu as pltpu

BN_EPS = 1e-5


# ----------------------------------------------------------------------------
# Kernel: one grid step == one full residual layer (conv1+BN+ReLU, conv2+BN,
# +residual, ReLU), activations resident in VMEM across steps.
# ----------------------------------------------------------------------------
def _res_tower_kernel(x_ref, w_ref, g_ref, b_ref, o_ref, xp_ref, res_ref):
    l = pl.program_id(0)
    last = pl.num_programs(0) - 1
    B, Hp, Wp, C = xp_ref.shape
    H, W = Hp - 2, Wp - 2
    M = B * H * W

    # Step 0 prologue: zero ONLY the 1-px halo frame (interior is overwritten
    # right after), load the f32 input, keep the residual in f32.
    @pl.when(l == 0)
    def _():
        zrow = jnp.zeros((B, 1, Wp, C), xp_ref.dtype)
        xp_ref[:, 0:1, :, :] = zrow
        xp_ref[:, Hp - 1:Hp, :, :] = zrow
        zcol = jnp.zeros((B, H, 1, C), xp_ref.dtype)
        xp_ref[:, 1:1 + H, 0:1, :] = zcol
        xp_ref[:, 1:1 + H, Wp - 1:Wp, :] = zcol
        x0 = x_ref[...]                                             # f32
        xp_ref[:, 1:1 + H, 1:1 + W, :] = x0.astype(xp_ref.dtype)    # bf16 taps
        res_ref[...] = x0.reshape(M, C)                             # f32 residual

    def conv_bn(j):
        # im2col: 9 bf16 shifted windows -> ONE big-K MXU matmul (f32 acc).
        taps = [xp_ref[:, ky:ky + H, kx:kx + W, :].reshape(M, C)
                for ky in range(3) for kx in range(3)]
        patches = jnp.concatenate(taps, axis=-1)                    # (M, 9C) bf16
        acc = jnp.dot(patches, w_ref[0, j, :, :],
                      preferred_element_type=jnp.float32)           # (M, C) f32
        # BatchNorm2d (training-mode batch stats, biased var), folded epilogue.
        mean = jnp.mean(acc, axis=0, keepdims=True)                 # (1, C)
        var = jnp.mean((acc - mean) ** 2, axis=0, keepdims=True)    # (1, C)
        scale = g_ref[0, j, :, :] * lax.rsqrt(var + BN_EPS)         # (1, C)
        shift = b_ref[0, j, :, :] - mean * scale                    # (1, C)
        return acc * scale + shift                                  # (M, C) f32

    # conv1 -> BN1 -> ReLU; stays resident in VMEM (bf16) as conv2's input.
    h = jnp.maximum(conv_bn(0), 0.0)
    xp_ref[:, 1:1 + H, 1:1 + W, :] = h.reshape(B, H, W, C).astype(xp_ref.dtype)

    # conv2 -> BN2 -> +residual (f32) -> ReLU.
    out = jnp.maximum(conv_bn(1) + res_ref[...], 0.0)               # (M, C) f32

    # Feed the next layer only if there is one (saves stores on the last step).
    @pl.when(l < last)
    def _():
        xp_ref[:, 1:1 + H, 1:1 + W, :] = out.reshape(B, H, W, C).astype(xp_ref.dtype)
        res_ref[...] = out

    # Write the resident output block only once, on the final step.
    @pl.when(l == last)
    def _():
        o_ref[...] = out.reshape(B, H, W, C)


# ----------------------------------------------------------------------------
# Wrappers
# ----------------------------------------------------------------------------
def residual_tower(x_nchw, w_stack, gamma_stack, beta_stack):
    """Fused stack of L residual layers in a single pallas_call.

    x_nchw      : (B, C, H, W) float32 (PyTorch layout).
    w_stack     : (L, 2, 3, 3, C, C) conv weights, HWIO, [conv1, conv2] per layer.
    gamma/beta  : (L, 2, C) BatchNorm affine parameters.
    Returns (B, C, H, W) float32.
    """
    B, C, H, W = x_nchw.shape
    L = w_stack.shape[0]

    x = jnp.transpose(x_nchw, (0, 2, 3, 1)).astype(jnp.float32)       # NHWC (glue)
    w2d = w_stack.reshape(L, 2, 9 * C, C).astype(jnp.bfloat16)        # im2col weights
    g = gamma_stack.reshape(L, 2, 1, C).astype(jnp.float32)
    b = beta_stack.reshape(L, 2, 1, C).astype(jnp.float32)

    M = B * H * W
    flops = L * 2 * (2 * M * (9 * C) * C + 8 * M * C)
    bytes_accessed = x.size * 4 + w2d.size * 2 + g.size * 4 + b.size * 4 + x.size * 4

    grid_spec = pltpu.PrefetchScalarGridSpec(
        num_scalar_prefetch=0,
        grid=(L,),
        in_specs=[
            pl.BlockSpec((B, H, W, C), lambda l: (0, 0, 0, 0)),       # x: VMEM-resident
            pl.BlockSpec((1, 2, 9 * C, C), lambda l: (l, 0, 0, 0)),   # streamed weights
            pl.BlockSpec((1, 2, 1, C), lambda l: (l, 0, 0, 0)),       # gamma
            pl.BlockSpec((1, 2, 1, C), lambda l: (l, 0, 0, 0)),       # beta
        ],
        out_specs=pl.BlockSpec((B, H, W, C), lambda l: (0, 0, 0, 0)),
        scratch_shapes=[
            pltpu.VMEM((B, H + 2, W + 2, C), jnp.bfloat16),           # padded acts (bf16)
            pltpu.VMEM((M, C), jnp.float32),                          # residual (f32)
        ],
    )

    out = pl.pallas_call(
        _res_tower_kernel,
        out_shape=jax.ShapeDtypeStruct((B, H, W, C), jnp.float32),
        grid_spec=grid_spec,
        compiler_params=pltpu.CompilerParams(
            dimension_semantics=("arbitrary",),        # layers are sequentially dependent
            vmem_limit_bytes=32 * 1024 * 1024),
        cost_estimate=pl.CostEstimate(
            flops=flops, transcendentals=2 * L * C, bytes_accessed=bytes_accessed),
    )(x, w2d, g, b)
    return jnp.transpose(out, (0, 3, 1, 2))                           # back to NCHW


def residual_layer(x_nchw, w1, g1, b1, w2, g2, b2):
    """Exactly one PyTorch ResidualLayer forward (weights in (3,3,Cin,Cout) HWIO)."""
    return residual_tower(x_nchw,
                          jnp.stack([w1, w2])[None],
                          jnp.stack([g1, g2])[None],
                          jnp.stack([b1, b2])[None])


# ----------------------------------------------------------------------------
# Pure-JAX reference (same bf16 quantization points as the kernel: bf16 conv
# inputs/weights with f32 accumulation, f32 residual and BN math)
# ----------------------------------------------------------------------------
def _ref_conv_bn(x_nhwc, w, gamma, beta):
    acc = lax.conv_general_dilated(
        x_nhwc.astype(jnp.bfloat16), w.astype(jnp.bfloat16),
        window_strides=(1, 1), padding="SAME",
        dimension_numbers=("NHWC", "HWIO", "NHWC"),
        preferred_element_type=jnp.float32)
    mean = jnp.mean(acc, axis=(0, 1, 2), keepdims=True)
    var = jnp.mean((acc - mean) ** 2, axis=(0, 1, 2), keepdims=True)
    scale = gamma * lax.rsqrt(var + BN_EPS)
    shift = beta - mean * scale
    return acc * scale + shift


def ref_residual_layer(x_nchw, w1, g1, b1, w2, g2, b2):
    x = jnp.transpose(x_nchw, (0, 2, 3, 1)).astype(jnp.float32)
    res = x
    h = jnp.maximum(_ref_conv_bn(x, w1, g1, b1), 0.0)
    y = jnp.maximum(_ref_conv_bn(h, w2, g2, b2) + res, 0.0)
    return jnp.transpose(y, (0, 3, 1, 2))


# ----------------------------------------------------------------------------
# Main
# ----------------------------------------------------------------------------
if __name__ == "__main__":
    key = jax.random.PRNGKey(0)
    ks = jax.random.split(key, 7)
    B, C, H, W = 4, 128, 8, 8          # lane-aligned channels; 8x8 chess board

    x = jax.random.normal(ks[0], (B, C, H, W), jnp.float32)
    w1 = 0.05 * jax.random.normal(ks[1], (3, 3, C, C), jnp.float32)
    w2 = 0.05 * jax.random.normal(ks[2], (3, 3, C, C), jnp.float32)
    g1 = 1.0 + 0.1 * jax.random.normal(ks[3], (C,), jnp.float32)
    b1 = 0.1 * jax.random.normal(ks[4], (C,), jnp.float32)
    g2 = 1.0 + 0.1 * jax.random.normal(ks[5], (C,), jnp.float32)
    b2 = 0.1 * jax.random.normal(ks[6], (C,), jnp.float32)

    # Single ResidualLayer (the module spec).
    fwd = jax.jit(residual_layer)
    out = fwd(x, w1, g1, b1, w2, g2, b2)
    jax.block_until_ready(out)

    ref = ref_residual_layer(x, w1, g1, b1, w2, g2, b2)
    assert out.shape == (B, C, H, W)
    assert bool(jnp.all(jnp.isfinite(out)))
    err = float(jnp.max(jnp.abs(out - ref)))
    assert err < 2e-2, f"kernel vs reference max abs err = {err}"

    # Stacked tower of 2 residual layers: exercises the multi-step grid with
    # streamed (double-buffered) weights and VMEM-resident activations.
    wT = jnp.stack([jnp.stack([w1, w2]), jnp.stack([w2, w1])])   # (2, 2, 3, 3, C, C)
    gT = jnp.stack([jnp.stack([g1, g2]), jnp.stack([g2, g1])])   # (2, 2, C)
    bT = jnp.stack([jnp.stack([b1, b2]), jnp.stack([b2, b1])])   # (2, 2, C)
    out2 = jax.jit(residual_tower)(x, wT, gT, bT)
    jax.block_until_ready(out2)
    ref2 = ref_residual_layer(ref, w2, g2, b2, w1, g1, b1)
    assert bool(jnp.all(jnp.isfinite(out2)))
    err2 = float(jnp.max(jnp.abs(out2 - ref2)))
    assert err2 < 2e-2, f"tower vs reference max abs err = {err2}"

    print("KERNEL_OK")
</pallas_src>

<mosaic_0001>
module attributes {stable_mosaic.version = 11 : i64} {
  func.func @_res_tower_kernel(%arg0: i32, %arg1: memref<4x8x8x128xf32, #tpu.memory_space<vmem>>, %arg2: memref<1x2x1152x128xbf16, #tpu.memory_space<vmem>>, %arg3: memref<1x2x1x128xf32, #tpu.memory_space<vmem>>, %arg4: memref<1x2x1x128xf32, #tpu.memory_space<vmem>>, %arg5: memref<4x8x8x128xf32, #tpu.memory_space<vmem>>, %arg6: memref<4x10x10x128xbf16, #tpu.memory_space<vmem>>, %arg7: memref<256x128xf32, #tpu.memory_space<vmem>>) attributes {dimension_semantics = [#tpu.dimension_semantics<arbitrary>], iteration_bounds = array<i64: 1>, scalar_prefetch = 0 : i64, scratch_operands = 2 : i64, tpu.core_type = #tpu.core_type<tc>, window_params = [{pipeline_mode = #tpu.pipeline_mode<synchronous>, transform_indices = @transform_0, window_bounds = array<i64: 4, 8, 8, 128>}, {transform_indices = @transform_1, window_bounds = array<i64: 1, 2, 1152, 128>}, {transform_indices = @transform_2, window_bounds = array<i64: 1, 2, 1, 128>}, {transform_indices = @transform_3, window_bounds = array<i64: 1, 2, 1, 128>}, {pipeline_mode = #tpu.pipeline_mode<synchronous>, transform_indices = @transform_4, window_bounds = array<i64: 4, 8, 8, 128>}]} {
    %c0_i32 = arith.constant 0 : i32
    %0 = arith.cmpi eq, %arg0, %c0_i32 : i32
    %1 = arith.extui %0 : i1 to i32
    %c0_i32_0 = arith.constant 0 : i32
    %2 = arith.cmpi ne, %1, %c0_i32_0 : i32
    scf.if %2 {
      %cst_117 = arith.constant 0.000000e+00 : bf16
      %112 = vector.broadcast %cst_117 : bf16 to vector<4x1x10x128xbf16>
      %c0_118 = arith.constant 0 : index
      %c0_119 = arith.constant 0 : index
      %c0_120 = arith.constant 0 : index
      %c0_121 = arith.constant 0 : index
      %113 = vector.load %arg6[%c0_118, %c0_119, %c0_120, %c0_121] : memref<4x10x10x128xbf16, #tpu.memory_space<vmem>>, vector<4x1x10x128xbf16>
      tpu.vector_store %arg6[%c0_118, %c0_119, %c0_120, %c0_121], %112 {strides = array<i32>} : memref<4x10x10x128xbf16, #tpu.memory_space<vmem>>, vector<4x1x10x128xbf16>,
      %c0_122 = arith.constant 0 : index
      %c9 = arith.constant 9 : index
      %c0_123 = arith.constant 0 : index
      %c0_124 = arith.constant 0 : index
      %114 = vector.load %arg6[%c0_122, %c9, %c0_123, %c0_124] : memref<4x10x10x128xbf16, #tpu.memory_space<vmem>>, vector<4x1x10x128xbf16>
      tpu.vector_store %arg6[%c0_122, %c9, %c0_123, %c0_124], %112 {strides = array<i32>} : memref<4x10x10x128xbf16, #tpu.memory_space<vmem>>, vector<4x1x10x128xbf16>,
      %cst_125 = arith.constant 0.000000e+00 : bf16
      %115 = vector.broadcast %cst_125 : bf16 to vector<4x8x1x128xbf16>
      %c0_126 = arith.constant 0 : index
      %c1_127 = arith.constant 1 : index
      %c0_128 = arith.constant 0 : index
      %c0_129 = arith.constant 0 : index
      %116 = vector.load %arg6[%c0_126, %c1_127, %c0_128, %c0_129] : memref<4x10x10x128xbf16, #tpu.memory_space<vmem>>, vector<4x8x1x128xbf16>
      tpu.vector_store %arg6[%c0_126, %c1_127, %c0_128, %c0_129], %115 {strides = array<i32>} : memref<4x10x10x128xbf16, #tpu.memory_space<vmem>>, vector<4x8x1x128xbf16>,
      %c0_130 = arith.constant 0 : index
      %c1_131 = arith.constant 1 : index
      %c9_132 = arith.constant 9 : index
      %c0_133 = arith.constant 0 : index
      %117 = vector.load %arg6[%c0_130, %c1_131, %c9_132, %c0_133] : memref<4x10x10x128xbf16, #tpu.memory_space<vmem>>, vector<4x8x1x128xbf16>
      tpu.vector_store %arg6[%c0_130, %c1_131, %c9_132, %c0_133], %115 {strides = array<i32>} : memref<4x10x10x128xbf16, #tpu.memory_space<vmem>>, vector<4x8x1x128xbf16>,
      %c0_134 = arith.constant 0 : index
      %c0_135 = arith.constant 0 : index
      %c0_136 = arith.constant 0 : index
      %c0_137 = arith.constant 0 : index
      %118 = vector.load %arg1[%c0_134, %c0_135, %c0_136, %c0_137] : memref<4x8x8x128xf32, #tpu.memory_space<vmem>>, vector<4x8x8x128xf32>
      %119 = arith.truncf %118 : vector<4x8x8x128xf32> to vector<4x8x8x128xbf16>
      %c0_138 = arith.constant 0 : index
      %c1_139 = arith.constant 1 : index
      %c1_140 = arith.constant 1 : index
      %c0_141 = arith.constant 0 : index
      %120 = vector.load %arg6[%c0_138, %c1_139, %c1_140, %c0_141] : memref<4x10x10x128xbf16, #tpu.memory_space<vmem>>, vector<4x8x8x128xbf16>
      tpu.vector_store %arg6[%c0_138, %c1_139, %c1_140, %c0_141], %119 {strides = array<i32>} : memref<4x10x10x128xbf16, #tpu.memory_space<vmem>>, vector<4x8x8x128xbf16>,
      %121 = vector.shape_cast %118 : vector<4x8x8x128xf32> to vector<256x128xf32>
      %c0_142 = arith.constant 0 : index
      %c0_143 = arith.constant 0 : index
      %122 = vector.load %arg7[%c0_142, %c0_143] : memref<256x128xf32, #tpu.memory_space<vmem>>, vector<256x128xf32>
      tpu.vector_store %arg7[%c0_142, %c0_143], %121 {strides = array<i32>} : memref<256x128xf32, #tpu.memory_space<vmem>>, vector<256x128xf32>,
    } else {
    }
    %c0 = arith.constant 0 : index
    %c0_1 = arith.constant 0 : index
    %c0_2 = arith.constant 0 : index
    %c0_3 = arith.constant 0 : index
    %3 = vector.load %arg6[%c0, %c0_1, %c0_2, %c0_3] : memref<4x10x10x128xbf16, #tpu.memory_space<vmem>>, vector<4x8x8x128xbf16>
    %4 = vector.shape_cast %3 : vector<4x8x8x128xbf16> to vector<256x128xbf16>
    %c0_4 = arith.constant 0 : index
    %c0_5 = arith.constant 0 : index
    %c1 = arith.constant 1 : index
    %c0_6 = arith.constant 0 : index
    %5 = vector.load %arg6[%c0_4, %c0_5, %c1, %c0_6] : memref<4x10x10x128xbf16, #tpu.memory_space<vmem>>, vector<4x8x8x128xbf16>
    %6 = vector.shape_cast %5 : vector<4x8x8x128xbf16> to vector<256x128xbf16>
    %c0_7 = arith.constant 0 : index
    %c0_8 = arith.constant 0 : index
    %c2 = arith.constant 2 : index
    %c0_9 = arith.constant 0 : index
    %7 = vector.load %arg6[%c0_7, %c0_8, %c2, %c0_9] : memref<4x10x10x128xbf16, #tpu.memory_space<vmem>>, vector<4x8x8x128xbf16>
    %8 = vector.shape_cast %7 : vector<4x8x8x128xbf16> to vector<256x128xbf16>
    %c0_10 = arith.constant 0 : index
    %c1_11 = arith.constant 1 : index
    %c0_12 = arith.constant 0 : index
    %c0_13 = arith.constant 0 : index
    %9 = vector.load %arg6[%c0_10, %c1_11, %c0_12, %c0_13] : memref<4x10x10x128xbf16, #tpu.memory_space<vmem>>, vector<4x8x8x128xbf16>
    %10 = vector.shape_cast %9 : vector<4x8x8x128xbf16> to vector<256x128xbf16>
    %c0_14 = arith.constant 0 : index
    %c1_15 = arith.constant 1 : index
    %c1_16 = arith.constant 1 : index
    %c0_17 = arith.constant 0 : index
    %11 = vector.load %arg6[%c0_14, %c1_15, %c1_16, %c0_17] : memref<4x10x10x128xbf16, #tpu.memory_space<vmem>>, vector<4x8x8x128xbf16>
    %12 = vector.shape_cast %11 : vector<4x8x8x128xbf16> to vector<256x128xbf16>
    %c0_18 = arith.constant 0 : index
    %c1_19 = arith.constant 1 : index
    %c2_20 = arith.constant 2 : index
    %c0_21 = arith.constant 0 : index
    %13 = vector.load %arg6[%c0_18, %c1_19, %c2_20, %c0_21] : memref<4x10x10x128xbf16, #tpu.memory_space<vmem>>, vector<4x8x8x128xbf16>
    %14 = vector.shape_cast %13 : vector<4x8x8x128xbf16> to vector<256x128xbf16>
    %c0_22 = arith.constant 0 : index
    %c2_23 = arith.constant 2 : index
    %c0_24 = arith.constant 0 : index
    %c0_25 = arith.constant 0 : index
    %15 = vector.load %arg6[%c0_22, %c2_23, %c0_24, %c0_25] : memref<4x10x10x128xbf16, #tpu.memory_space<vmem>>, vector<4x8x8x128xbf16>
    %16 = vector.shape_cast %15 : vector<4x8x8x128xbf16> to vector<256x128xbf16>
    %c0_26 = arith.constant 0 : index
    %c2_27 = arith.constant 2 : index
    %c1_28 = arith.constant 1 : index
    %c0_29 = arith.constant 0 : index
    %17 = vector.load %arg6[%c0_26, %c2_27, %c1_28, %c0_29] : memref<4x10x10x128xbf16, #tpu.memory_space<vmem>>, vector<4x8x8x128xbf16>
    %18 = vector.shape_cast %17 : vector<4x8x8x128xbf16> to vector<256x128xbf16>
    %c0_30 = arith.constant 0 : index
    %c2_31 = arith.constant 2 : index
    %c2_32 = arith.constant 2 : index
    %c0_33 = arith.constant 0 : index
    %19 = vector.load %arg6[%c0_30, %c2_31, %c2_32, %c0_33] : memref<4x10x10x128xbf16, #tpu.memory_space<vmem>>, vector<4x8x8x128xbf16>
    %20 = vector.shape_cast %19 : vector<4x8x8x128xbf16> to vector<256x128xbf16>
    %21 = tpu.concatenate %4, %6, %8, %10, %12, %14, %16, %18, %20 in 1 : vector<256x128xbf16>, vector<256x128xbf16>, vector<256x128xbf16>, vector<256x128xbf16>, vector<256x128xbf16>, vector<256x128xbf16>, vector<256x128xbf16>, vector<256x128xbf16>, vector<256x128xbf16> -> vector<256x1152xbf16>
    %c0_34 = arith.constant 0 : index
    %c0_35 = arith.constant 0 : index
    %c0_36 = arith.constant 0 : index
    %c0_37 = arith.constant 0 : index
    %22 = vector.load %arg2[%c0_34, %c0_35, %c0_36, %c0_37] : memref<1x2x1152x128xbf16, #tpu.memory_space<vmem>>, vector<1x1x1152x128xbf16>
    %23 = vector.shape_cast %22 : vector<1x1x1152x128xbf16> to vector<1152x128xbf16>
    %cst = arith.constant dense<0.000000e+00> : vector<256x128xf32>
    %24 = tpu.matmul %21, %23, %cst {dimension_numbers = #tpu.dot_dimension_numbers<[1], [0], [0], [1], [0, 0, 1, 1], [], []>} : vector<256x1152xbf16>, vector<1152x128xbf16>, vector<256x128xf32> -> vector<256x128xf32>
    %cst_38 = arith.constant dense<0.000000e+00> : vector<128xf32>
    %25 = vector.multi_reduction <add>, %24, %cst_38 [0] : vector<256x128xf32> to vector<128xf32>
    %26 = vector.shape_cast %25 : vector<128xf32> to vector<1x128xf32>
    %cst_39 = arith.constant 2.560000e+02 : f32
    %27 = vector.broadcast %cst_39 : f32 to vector<1x128xf32>
    %28 = arith.divf %26, %27 : vector<1x128xf32>
    %29 = vector.broadcast %28 : vector<1x128xf32> to vector<256x128xf32>
    %30 = arith.subf %24, %29 : vector<256x128xf32>
    %31 = arith.mulf %30, %30 : vector<256x128xf32>
    %cst_40 = arith.constant dense<0.000000e+00> : vector<128xf32>
    %32 = vector.multi_reduction <add>, %31, %cst_40 [0] : vector<256x128xf32> to vector<128xf32>
    %33 = vector.shape_cast %32 : vector<128xf32> to vector<1x128xf32>
    %cst_41 = arith.constant 2.560000e+02 : f32
    %34 = vector.broadcast %cst_41 : f32 to vector<1x128xf32>
    %35 = arith.divf %33, %34 : vector<1x128xf32>
    %c0_42 = arith.constant 0 : index
    %c0_43 = arith.constant 0 : index
    %c0_44 = arith.constant 0 : index
    %c0_45 = arith.constant 0 : index
    %36 = vector.load %arg3[%c0_42, %c0_43, %c0_44, %c0_45] : memref<1x2x1x128xf32, #tpu.memory_space<vmem>>, vector<1x1x1x128xf32>
    %37 = vector.shape_cast %36 : vector<1x1x1x128xf32> to vector<1x128xf32>
    %cst_46 = arith.constant 9.99999974E-6 : f32
    %38 = vector.broadcast %cst_46 : f32 to vector<1x128xf32>
    %39 = arith.addf %35, %38 : vector<1x128xf32>
    %40 = math.rsqrt %39 : vector<1x128xf32>
    %41 = arith.mulf %37, %40 : vector<1x128xf32>
    %c0_47 = arith.constant 0 : index
    %c0_48 = arith.constant 0 : index
    %c0_49 = arith.constant 0 : index
    %c0_50 = arith.constant 0 : index
    %42 = vector.load %arg4[%c0_47, %c0_48, %c0_49, %c0_50] : memref<1x2x1x128xf32, #tpu.memory_space<vmem>>, vector<1x1x1x128xf32>
    %43 = vector.shape_cast %42 : vector<1x1x1x128xf32> to vector<1x128xf32>
    %44 = arith.mulf %28, %41 : vector<1x128xf32>
    %45 = arith.subf %43, %44 : vector<1x128xf32>
    %46 = vector.broadcast %41 : vector<1x128xf32> to vector<256x128xf32>
    %47 = arith.mulf %24, %46 : vector<256x128xf32>
    %48 = vector.broadcast %45 : vector<1x128xf32> to vector<256x128xf32>
    %49 = arith.addf %47, %48 : vector<256x128xf32>
    %cst_51 = arith.constant 0.000000e+00 : f32
    %50 = vector.broadcast %cst_51 : f32 to vector<256x128xf32>
    %51 = arith.maximumf %49, %50 : vector<256x128xf32>
    %52 = vector.shape_cast %51 : vector<256x128xf32> to vector<4x8x8x128xf32>
    %53 = arith.truncf %52 : vector<4x8x8x128xf32> to vector<4x8x8x128xbf16>
    %c0_52 = arith.constant 0 : index
    %c1_53 = arith.constant 1 : index
    %c1_54 = arith.constant 1 : index
    %c0_55 = arith.constant 0 : index
    %54 = vector.load %arg6[%c0_52, %c1_53, %c1_54, %c0_55] : memref<4x10x10x128xbf16, #tpu.memory_space<vmem>>, vector<4x8x8x128xbf16>
    tpu.vector_store %arg6[%c0_52, %c1_53, %c1_54, %c0_55], %53 {strides = array<i32>} : memref<4x10x10x128xbf16, #tpu.memory_space<vmem>>, vector<4x8x8x128xbf16>,
    %c0_56 = arith.constant 0 : index
    %c0_57 = arith.constant 0 : index
    %c0_58 = arith.constant 0 : index
    %c0_59 = arith.constant 0 : index
    %55 = vector.load %arg6[%c0_56, %c0_57, %c0_58, %c0_59] : memref<4x10x10x128xbf16, #tpu.memory_space<vmem>>, vector<4x8x8x128xbf16>
    %56 = vector.shape_cast %55 : vector<4x8x8x128xbf16> to vector<256x128xbf16>
    %c0_60 = arith.constant 0 : index
    %c0_61 = arith.constant 0 : index
    %c1_62 = arith.constant 1 : index
    %c0_63 = arith.constant 0 : index
    %57 = vector.load %arg6[%c0_60, %c0_61, %c1_62, %c0_63] : memref<4x10x10x128xbf16, #tpu.memory_space<vmem>>, vector<4x8x8x128xbf16>
    %58 = vector.shape_cast %57 : vector<4x8x8x128xbf16> to vector<256x128xbf16>
    %c0_64 = arith.constant 0 : index
    %c0_65 = arith.constant 0 : index
    %c2_66 = arith.constant 2 : index
    %c0_67 = arith.constant 0 : index
    %59 = vector.load %arg6[%c0_64, %c0_65, %c2_66, %c0_67] : memref<4x10x10x128xbf16, #tpu.memory_space<vmem>>, vector<4x8x8x128xbf16>
    %60 = vector.shape_cast %59 : vector<4x8x8x128xbf16> to vector<256x128xbf16>
    %c0_68 = arith.constant 0 : index
    %c1_69 = arith.constant 1 : index
    %c0_70 = arith.constant 0 : index
    %c0_71 = arith.constant 0 : index
    %61 = vector.load %arg6[%c0_68, %c1_69, %c0_70, %c0_71] : memref<4x10x10x128xbf16, #tpu.memory_space<vmem>>, vector<4x8x8x128xbf16>
    %62 = vector.shape_cast %61 : vector<4x8x8x128xbf16> to vector<256x128xbf16>
    %c0_72 = arith.constant 0 : index
    %c1_73 = arith.constant 1 : index
    %c1_74 = arith.constant 1 : index
    %c0_75 = arith.constant 0 : index
    %63 = vector.load %arg6[%c0_72, %c1_73, %c1_74, %c0_75] : memref<4x10x10x128xbf16, #tpu.memory_space<vmem>>, vector<4x8x8x128xbf16>
    %64 = vector.shape_cast %63 : vector<4x8x8x128xbf16> to vector<256x128xbf16>
    %c0_76 = arith.constant 0 : index
    %c1_77 = arith.constant 1 : index
    %c2_78 = arith.constant 2 : index
    %c0_79 = arith.constant 0 : index
    %65 = vector.load %arg6[%c0_76, %c1_77, %c2_78, %c0_79] : memref<4x10x10x128xbf16, #tpu.memory_space<vmem>>, vector<4x8x8x128xbf16>
    %66 = vector.shape_cast %65 : vector<4x8x8x128xbf16> to vector<256x128xbf16>
    %c0_80 = arith.constant 0 : index
    %c2_81 = arith.constant 2 : index
    %c0_82 = arith.constant 0 : index
    %c0_83 = arith.constant 0 : index
    %67 = vector.load %arg6[%c0_80, %c2_81, %c0_82, %c0_83] : memref<4x10x10x128xbf16, #tpu.memory_space<vmem>>, vector<4x8x8x128xbf16>
    %68 = vector.shape_cast %67 : vector<4x8x8x128xbf16> to vector<256x128xbf16>
    %c0_84 = arith.constant 0 : index
    %c2_85 = arith.constant 2 : index
    %c1_86 = arith.constant 1 : index
    %c0_87 = arith.constant 0 : index
    %69 = vector.load %arg6[%c0_84, %c2_85, %c1_86, %c0_87] : memref<4x10x10x128xbf16, #tpu.memory_space<vmem>>, vector<4x8x8x128xbf16>
    %70 = vector.shape_cast %69 : vector<4x8x8x128xbf16> to vector<256x128xbf16>
    %c0_88 = arith.constant 0 : index
    %c2_89 = arith.constant 2 : index
    %c2_90 = arith.constant 2 : index
    %c0_91 = arith.constant 0 : index
    %71 = vector.load %arg6[%c0_88, %c2_89, %c2_90, %c0_91] : memref<4x10x10x128xbf16, #tpu.memory_space<vmem>>, vector<4x8x8x128xbf16>
    %72 = vector.shape_cast %71 : vector<4x8x8x128xbf16> to vector<256x128xbf16>
    %73 = tpu.concatenate %56, %58, %60, %62, %64, %66, %68, %70, %72 in 1 : vector<256x128xbf16>, vector<256x128xbf16>, vector<256x128xbf16>, vector<256x128xbf16>, vector<256x128xbf16>, vector<256x128xbf16>, vector<256x128xbf16>, vector<256x128xbf16>, vector<256x128xbf16> -> vector<256x1152xbf16>
    %c0_92 = arith.constant 0 : index
    %c1_93 = arith.constant 1 : index
    %c0_94 = arith.constant 0 : index
    %c0_95 = arith.constant 0 : index
    %74 = vector.load %arg2[%c0_92, %c1_93, %c0_94, %c0_95] : memref<1x2x1152x128xbf16, #tpu.memory_space<vmem>>, vector<1x1x1152x128xbf16>
    %75 = vector.shape_cast %74 : vector<1x1x1152x128xbf16> to vector<1152x128xbf16>
    %cst_96 = arith.constant dense<0.000000e+00> : vector<256x128xf32>
    %76 = tpu.matmul %73, %75, %cst_96 {dimension_numbers = #tpu.dot_dimension_numbers<[1], [0], [0], [1], [0, 0, 1, 1], [], []>} : vector<256x1152xbf16>, vector<1152x128xbf16>, vector<256x128xf32> -> vector<256x128xf32>
    %cst_97 = arith.constant dense<0.000000e+00> : vector<128xf32>
    %77 = vector.multi_reduction <add>, %76, %cst_97 [0] : vector<256x128xf32> to vector<128xf32>
    %78 = vector.shape_cast %77 : vector<128xf32> to vector<1x128xf32>
    %cst_98 = arith.constant 2.560000e+02 : f32
    %79 = vector.broadcast %cst_98 : f32 to vector<1x128xf32>
    %80 = arith.divf %78, %79 : vector<1x128xf32>
    %81 = vector.broadcast %80 : vector<1x128xf32> to vector<256x128xf32>
    %82 = arith.subf %76, %81 : vector<256x128xf32>
    %83 = arith.mulf %82, %82 : vector<256x128xf32>
    %cst_99 = arith.constant dense<0.000000e+00> : vector<128xf32>
    %84 = vector.multi_reduction <add>, %83, %cst_99 [0] : vector<256x128xf32> to vector<128xf32>
    %85 = vector.shape_cast %84 : vector<128xf32> to vector<1x128xf32>
    %cst_100 = arith.constant 2.560000e+02 : f32
    %86 = vector.broadcast %cst_100 : f32 to vector<1x128xf32>
    %87 = arith.divf %85, %86 : vector<1x128xf32>
    %c0_101 = arith.constant 0 : index
    %c1_102 = arith.constant 1 : index
    %c0_103 = arith.constant 0 : index
    %c0_104 = arith.constant 0 : index
    %88 = vector.load %arg3[%c0_101, %c1_102, %c0_103, %c0_104] : memref<1x2x1x128xf32, #tpu.memory_space<vmem>>, vector<1x1x1x128xf32>
    %89 = vector.shape_cast %88 : vector<1x1x1x128xf32> to vector<1x128xf32>
    %cst_105 = arith.constant 9.99999974E-6 : f32
    %90 = vector.broadcast %cst_105 : f32 to vector<1x128xf32>
    %91 = arith.addf %87, %90 : vector<1x128xf32>
    %92 = math.rsqrt %91 : vector<1x128xf32>
    %93 = arith.mulf %89, %92 : vector<1x128xf32>
    %c0_106 = arith.constant 0 : index
    %c1_107 = arith.constant 1 : index
    %c0_108 = arith.constant 0 : index
    %c0_109 = arith.constant 0 : index
    %94 = vector.load %arg4[%c0_106, %c1_107, %c0_108, %c0_109] : memref<1x2x1x128xf32, #tpu.memory_space<vmem>>, vector<1x1x1x128xf32>
    %95 = vector.shape_cast %94 : vector<1x1x1x128xf32> to vector<1x128xf32>
    %96 = arith.mulf %80, %93 : vector<1x128xf32>
    %97 = arith.subf %95, %96 : vector<1x128xf32>
    %98 = vector.broadcast %93 : vector<1x128xf32> to vector<256x128xf32>
    %99 = arith.mulf %76, %98 : vector<256x128xf32>
    %100 = vector.broadcast %97 : vector<1x128xf32> to vector<256x128xf32>
    %101 = arith.addf %99, %100 : vector<256x128xf32>
    %c0_110 = arith.constant 0 : index
    %c0_111 = arith.constant 0 : index
    %102 = vector.load %arg7[%c0_110, %c0_111] : memref<256x128xf32, #tpu.memory_space<vmem>>, vector<256x128xf32>
    %103 = arith.addf %101, %102 : vector<256x128xf32>
    %cst_112 = arith.constant 0.000000e+00 : f32
    %104 = vector.broadcast %cst_112 : f32 to vector<256x128xf32>
    %105 = arith.maximumf %103, %104 : vector<256x128xf32>
    %c0_i32_113 = arith.constant 0 : i32
    %106 = arith.cmpi slt, %arg0, %c0_i32_113 : i32
    %107 = arith.extui %106 : i1 to i32
    %c0_i32_114 = arith.constant 0 : i32
    %108 = arith.cmpi ne, %107, %c0_i32_114 : i32
    scf.if %108 {
      %112 = vector.shape_cast %105 : vector<256x128xf32> to vector<4x8x8x128xf32>
      %113 = arith.truncf %112 : vector<4x8x8x128xf32> to vector<4x8x8x128xbf16>
      %c0_117 = arith.constant 0 : index
      %c1_118 = arith.constant 1 : index
      %c1_119 = arith.constant 1 : index
      %c0_120 = arith.constant 0 : index
      %114 = vector.load %arg6[%c0_117, %c1_118, %c1_119, %c0_120] : memref<4x10x10x128xbf16, #tpu.memory_space<vmem>>, vector<4x8x8x128xbf16>
      tpu.vector_store %arg6[%c0_117, %c1_118, %c1_119, %c0_120], %113 {strides = array<i32>} : memref<4x10x10x128xbf16, #tpu.memory_space<vmem>>, vector<4x8x8x128xbf16>,
      %c0_121 = arith.constant 0 : index
      %c0_122 = arith.constant 0 : index
      %115 = vector.load %arg7[%c0_121, %c0_122] : memref<256x128xf32, #tpu.memory_space<vmem>>, vector<256x128xf32>
      tpu.vector_store %arg7[%c0_121, %c0_122], %105 {strides = array<i32>} : memref<256x128xf32, #tpu.memory_space<vmem>>, vector<256x128xf32>,
    } else {
    }
    %c0_i32_115 = arith.constant 0 : i32
    %109 = arith.cmpi eq, %arg0, %c0_i32_115 : i32
    %110 = arith.extui %109 : i1 to i32
    %c0_i32_116 = arith.constant 0 : i32
    %111 = arith.cmpi ne, %110, %c0_i32_116 : i32
    scf.if %111 {
      %112 = vector.shape_cast %105 : vector<256x128xf32> to vector<4x8x8x128xf32>
      %c0_117 = arith.constant 0 : index
      %c0_118 = arith.constant 0 : index
      %c0_119 = arith.constant 0 : index
      %c0_120 = arith.constant 0 : index
      %113 = vector.load %arg5[%c0_117, %c0_118, %c0_119, %c0_120] : memref<4x8x8x128xf32, #tpu.memory_space<vmem>>, vector<4x8x8x128xf32>
      tpu.vector_store %arg5[%c0_117, %c0_118, %c0_119, %c0_120], %112 {strides = array<i32>} : memref<4x8x8x128xf32, #tpu.memory_space<vmem>>, vector<4x8x8x128xf32>,
    } else {
    }
    return
  }
  func.func @transform_0(%arg0: i32) -> (i32, i32, i32, i32) {
    %c0_i32 = arith.constant 0 : i32
    %c0_i32_0 = arith.constant 0 : i32
    %c0_i32_1 = arith.constant 0 : i32
    %c0_i32_2 = arith.constant 0 : i32
    %c0_i32_3 = arith.constant 0 : i32
    return %c0_i32, %c0_i32_0, %c0_i32_1, %c0_i32_2 : i32, i32, i32, i32
  }
  func.func @transform_1(%arg0: i32) -> (i32, i32, i32, i32) {
    %c0_i32 = arith.constant 0 : i32
    %c0_i32_0 = arith.constant 0 : i32
    %c0_i32_1 = arith.constant 0 : i32
    %c0_i32_2 = arith.constant 0 : i32
    return %arg0, %c0_i32, %c0_i32_0, %c0_i32_1 : i32, i32, i32, i32
  }
  func.func @transform_2(%arg0: i32) -> (i32, i32, i32, i32) {
    %c0_i32 = arith.constant 0 : i32
    %c0_i32_0 = arith.constant 0 : i32
    %c0_i32_1 = arith.constant 0 : i32
    %c0_i32_2 = arith.constant 0 : i32
    return %arg0, %c0_i32, %c0_i32_0, %c0_i32_1 : i32, i32, i32, i32
  }
  func.func @transform_3(%arg0: i32) -> (i32, i32, i32, i32) {
    %c0_i32 = arith.constant 0 : i32
    %c0_i32_0 = arith.constant 0 : i32
    %c0_i32_1 = arith.constant 0 : i32
    %c0_i32_2 = arith.constant 0 : i32
    return %arg0, %c0_i32, %c0_i32_0, %c0_i32_1 : i32, i32, i32, i32
  }
  func.func @transform_4(%arg0: i32) -> (i32, i32, i32, i32) {
    %c0_i32 = arith.constant 0 : i32
    %c0_i32_0 = arith.constant 0 : i32
    %c0_i32_1 = arith.constant 0 : i32
    %c0_i32_2 = arith.constant 0 : i32
    %c0_i32_3 = arith.constant 0 : i32
    return %c0_i32, %c0_i32_0, %c0_i32_1, %c0_i32_2 : i32, i32, i32, i32
  }
}

</mosaic_0001>

<bundles_post_ra>
// kernel: residual_layer.1
= control target key start
LH: loop header
LB: loop body
LE: loop exit
PB: predicated region body
PF: predicated region fallthrough
CT: control target
= control target key end

     0   :  { %v13775_v2 = vmov 0   ;;  %vm41_vm0 = vcmask 1040384   ;;  %vm42_vm1 = vsmask.f32 256  ;;  %v44_v33 = vld [vmem:[#allocation2 + $0x8] sm:$0x1]  ;;  %s19708_s0 = inlined_call_operand.vmem [shape: f32[4,8,8,128], index: 0, kind: input, shape index: {}]   ;;  %s19709_s1 = inlined_call_operand.vmem [shape: bf16[1,2,1152,128], index: 1, kind: input, shape index: {}]   ;;  %s19710_s2 = inlined_call_operand.vmem [shape: f32[1,2,1,128], index: 2, kind: input, shape index: {}]   ;;  %s19711_s3 = inlined_call_operand.vmem [shape: f32[1,2,1,128], index: 3, kind: input, shape index: {}]   ;;  %s19712_s4 = inlined_call_operand.hbm [shape: f32[4,8,8,128], index: 4, kind: output, shape index: {}]  }
   0x1   :  { %v13430_v0 = vld [vmem:[%s19709_s1 + $0x40] sm:$0xff]   ;;  %23 = vst [vmem:[#allocation2] sm:$0xf] %v13775_v2  ;;  %24 = vst [vmem:[#allocation2 + $0x4] sm:$0x1] %v13775_v2  ;;  %v13434_v5 = vld [vmem:[%s19709_s1 + $0x48] sm:$0xff]  }
   0x2   :  { %v13431_v1 = vld [vmem:[%s19709_s1 + $0xc0] sm:$0xff]   ;;  %25 = vst [vmem:[#allocation2 + $0x50] sm:$0xf] %v13775_v2  ;;  %26 = vst [vmem:[#allocation2 + $0x54] sm:$0x1] %v13775_v2  ;;  %12386 = vmatprep.subr.bf16.mxu0 %v13430_v0  ;;  %v13435_v6 = vld [vmem:[%s19709_s1 + $0xc8] sm:$0xff]  }
   0x3   :  { %27 = vst [vmem:[#allocation2 + $0xa0] sm:$0xf] %v13775_v2  ;;  %28 = vst [vmem:[#allocation2 + $0xa4] sm:$0x1] %v13775_v2  ;;  %v13432_v3 = vld [vmem:[%s19709_s1] sm:$0xff]   ;;  %12498 = vmatprep.subr.bf16.mxu1 %v13431_v1  ;;  %v13436_v7 = vld [vmem:[%s19709_s1 + $0x8] sm:$0xff]  }
   0x4   :  { %29 = vst [vmem:[#allocation2 + $0xf0] sm:$0xf] %v13775_v2  ;;  %30 = vst [vmem:[#allocation2 + $0xf4] sm:$0x1] %v13775_v2  ;;  %v13433_v4 = vld [vmem:[%s19709_s1 + $0x80] sm:$0xff]   ;;  %12387 = vmatpush3.bf16.msra.mxu0 %v13432_v3  ;;  %v13437_v8 = vld [vmem:[%s19709_s1 + $0x88] sm:$0xff]  }
   0x5   :  { %32 = vst [vmem:[#allocation2 + $0x48] sm:$0xf] %v13775_v2  ;;  %33 = vst [vmem:[#allocation2 + $0x4c] sm:$0x1] %v13775_v2  ;;  %12499 = vmatpush3.bf16.msra.mxu1 %v13433_v4  ;;  %12388 = vmatprep.subr.bf16.mxu0 %v13434_v5  ;;  %v13438_v9 = vld [vmem:[%s19709_s1 + $0x50] sm:$0xff]   ;;  %v13442_v13 = vld [vmem:[%s19709_s1 + $0x58] sm:$0xff]  }
   0x6   :  { %34 = vst [vmem:[#allocation2 + $0x98] sm:$0xf] %v13775_v2  ;;  %35 = vst [vmem:[#allocation2 + $0x9c] sm:$0x1] %v13775_v2  ;;  %12500 = vmatprep.subr.bf16.mxu1 %v13435_v6  ;;  %v13439_v10 = vld [vmem:[%s19709_s1 + $0xd0] sm:$0xff]   ;;  %v13443_v14 = vld [vmem:[%s19709_s1 + $0xd8] sm:$0xff]  }
   0x7   :  { %36 = vst [vmem:[#allocation2 + $0xe8] sm:$0xf] %v13775_v2  ;;  %37 = vst [vmem:[#allocation2 + $0xec] sm:$0x1] %v13775_v2  ;;  %v13440_v11 = vld [vmem:[%s19709_s1 + $0x10] sm:$0xff]   ;;  %v13444_v15 = vld [vmem:[%s19709_s1 + $0x18] sm:$0xff]  }
   0x8   :  { %38 = vst [vmem:[#allocation2 + $0x138] sm:$0xf] %v13775_v2  ;;  %39 = vst [vmem:[#allocation2 + $0x13c] sm:$0x1] %v13775_v2  ;;  %12389 = vmatpush3.bf16.msra.mxu0 %v13436_v7  ;;  %v13441_v12 = vld [vmem:[%s19709_s1 + $0x90] sm:$0xff]   ;;  %v13445_v16 = vld [vmem:[%s19709_s1 + $0x98] sm:$0xff]  }
   0x9   :  { %12501 = vmatpush3.bf16.msra.mxu1 %v13437_v8  ;;  %12390 = vmatprep.subr.bf16.mxu0 %v13438_v9  ;;  %v13446_v17 = vld [vmem:[%s19709_s1 + $0x60] sm:$0xff]   ;;  %v13450_v21 = vld [vmem:[%s19709_s1 + $0x68] sm:$0xff]   ;;  %v13454_v25 = vld [vmem:[%s19709_s1 + $0x70] sm:$0xff]   ;;  %vm140_vm2 = vsmask.f32 7938  ;;  %v19789_v34 = vmov 0 }
   0xa   :  { %12502 = vmatprep.subr.bf16.mxu1 %v13439_v10  ;;  %v13447_v18 = vld [vmem:[%s19709_s1 + $0xe0] sm:$0xff]   ;;  %v13451_v22 = vld [vmem:[%s19709_s1 + $0xe8] sm:$0xff]   ;;  %v13455_v26 = vld [vmem:[%s19709_s1 + $0xf0] sm:$0xff]   ;;  %vm718_vm4 = vcmask 1043456   ;;  %vm1555_vm6 = vcmask 1042432   ;;  %vm1556_vm7 = vcmask 1046532  }
   0xb   :  { %v13448_v19 = vld [vmem:[%s19709_s1 + $0x20] sm:$0xff]   ;;  %v13452_v23 = vld [vmem:[%s19709_s1 + $0x28] sm:$0xff]   ;;  %v13456_v27 = vld [vmem:[%s19709_s1 + $0x30] sm:$0xff]   ;;  %vm1008_vm8 = vsmask.f32 3328  ;;  %v19794_v59 = vmov 0 }
   0xc   :  { %12391 = vmatpush3.bf16.msra.mxu0 %v13440_v11  ;;  %v13449_v20 = vld [vmem:[%s19709_s1 + $0xa0] sm:$0xff]   ;;  %v13453_v24 = vld [vmem:[%s19709_s1 + $0xa8] sm:$0xff]   ;;  %v13457_v28 = vld [vmem:[%s19709_s1 + $0xb0] sm:$0xff]   ;;  %vm1009_vm9 = vsmask.f32 7440 }
   0xd   :  { %12503 = vmatpush3.bf16.msra.mxu1 %v13441_v12  ;;  %12392 = vmatprep.subr.bf16.mxu0 %v13442_v13  ;;  %v13458_v29 = vld [vmem:[%s19709_s1 + $0x78] sm:$0xff]   ;;  %vm13900_vm3 = vmand %vm41_vm0, %vm42_vm1  ;;  %v142_v35 = vld [vmem:[#allocation2 + $0xc] sm:$0x1] }
   0xe   :  { %12504 = vmatprep.subr.bf16.mxu1 %v13443_v14  ;;  %v13459_v30 = vld [vmem:[%s19709_s1 + $0xf8] sm:$0xff]   ;;  %v19790_v34 = vsel %vm13900_vm3, 4294967295, %v19789_v34  ;;  %v238_v36 = vld [vmem:[%s19708_s0] sm:$0xff]  ;;  %v45_v37 = vsel %vm13900_vm3, 0, %v44_v33  ;;  %vm13910_vm5 = vmand %vm41_vm0, %vm140_vm2 }
   0xf   :  { %v13460_v31 = vld [vmem:[%s19709_s1 + $0x38] sm:$0xff]   ;;  %19791 = vst [vmem:[#allocation7_spill] sm:$0xff] %v19790_v34  ;;  %v12290_v39 = vpack.c.bf16 %v238_v36, %v238_v36  ;;  %v13914_v40 = vld [vmem:[#allocation2] sm:$0xf]  ;;  %v13916_v41 = vld [vmem:[#allocation2 + $0x4] sm:$0x1] }
  0x10   :  { %12393 = vmatpush3.bf16.msra.mxu0 %v13444_v15  ;;  %v13461_v32 = vld [vmem:[%s19709_s1 + $0xb8] sm:$0xff]   ;;  %46 = vst [vmem:[#allocation2 + $0x8] sm:$0x1] %v45_v37  ;;  %v143_v42 = vsel %vm13910_vm5, 0, %v142_v35  ;;  %v1012_v43 = vshrl.u32 %v13914_v40, 16  ;;  %v1015_v44 = vshll.u32 %v13914_v40, 16  ;;  %vm13936_vm10 = vmand %vm718_vm4, %vm140_vm2 }
  0x11   :  { %12505 = vmatpush3.bf16.msra.mxu1 %v13445_v16  ;;  %12394 = vmatprep.subr.bf16.mxu0 %v13446_v17  ;;  %v239_v45 = vld [vmem:[%s19708_s0 + $0x8] sm:$0xff]  ;;  %144 = vst [vmem:[#allocation2 + $0xc] sm:$0x1] %v143_v42  ;;  %v399_v46 = vshrl.u32 %v12290_v39, 16  ;;  %v402_v47 = vshll.u32 %v12290_v39, 16  ;;  %v1021_v48 = vshll.u32 %v13916_v41, 16  ;;  %vm13972_vm11 = vmor %vm1555_vm6, %vm1556_vm7 }
  0x12   :  { %12506 = vmatprep.subr.bf16.mxu1 %v13447_v18  ;;  %v1560_v49 = vrot.slane %v13916_v41, 5  ;;  %v47_v50 = vld [vmem:[#allocation2 + $0x10] sm:$0x1]  ;;  %v1014_v51 = vrot.slane %v1012_v43, 4  ;;  %v1017_v52 = vrot.slane %v1015_v44, 5  ;;  %v12291_v54 = vpack.c.bf16 %v239_v45, %v239_v45  ;;  %v13464_v55 = vld [vmem:[%s19709_s1 + $0x140] sm:$0xff]   ;;  %vm13991_vm12 = vmor %vm1008_vm8, %vm1009_vm9 }
  0x13   :  { %v48_v53 = vsel %vm13900_vm3, 0, %v47_v50  ;;  %v401_v56 = vrot.slane %v399_v46, 7  ;;  %v13932_v57 = vrot.slane %v1021_v48, 5  ;;  %v1459_v58 = vld [vmem:[#allocation2] sm:$0xe]  ;;  %v19795_v59 = vsel %vm13936_vm10, 4294967295, %v19794_v59 }
  0x14   :  { %12395 = vmatpush3.bf16.msra.mxu0 %v13448_v19  ;;  %49 = vst [vmem:[#allocation2 + $0x10] sm:$0x1] %v48_v53  ;;  %19796 = vst [vmem:[#allocation8_spill] sm:$0xff] %v19795_v59  ;;  %v1018_v60 = vor.u32 %v1017_v52, %v1014_v51  ;;  %v407_v61 = vshrl.u32 %v12291_v54, 16  ;;  %v410_v62 = vshll.u32 %v12291_v54, 16  ;;  %v240_v2 = vld [vmem:[%s19708_s0 + $0x10] sm:$0xff] }
  0x15   :  { %12507 = vmatpush3.bf16.msra.mxu1 %v13449_v20  ;;  %12396 = vmatprep.subr.bf16.mxu0 %v13450_v21  ;;  %v404_v63 = vor.u32 %v402_v47, %v401_v56  ;;  %v405_v0 = vrot.slane %v401_v56, 4  ;;  %v50_v1 = vld [vmem:[#allocation2 + $0x18] sm:$0x1]  ;;  %v11456_v4 = vrot.slane %v1459_v58, 9  ;;  %v145_v6 = vld [vmem:[#allocation2 + $0x14] sm:$0x1]  ;;  %v12292_v7 = vpack.c.bf16 %v240_v2, %v240_v2 }
  0x16   :  { %12508 = vmatprep.subr.bf16.mxu1 %v13451_v22  ;;  %v13943_v3 = vrot.slane %v407_v61, 7  ;;  %v51_v5 = vsel %vm13900_vm3, 0, %v50_v1  ;;  %v241_v8 = vld [vmem:[%s19708_s0 + $0x18] sm:$0xff]  ;;  %v146_v10 = vsel %vm13910_vm5, 0, %v145_v6  ;;  %v242_v13 = vld [vmem:[%s19708_s0 + $0x20] sm:$0xff]  ;;  %v13959_v16 = vrot.slane %v1018_v60, 4 }
  0x17   :  { %v720_v9 = vld [vmem:[#allocation2 + $0x8] sm:$0xf]  ;;  %52 = vst [vmem:[#allocation2 + $0x18] sm:$0x1] %v51_v5  ;;  %v148_v11 = vld [vmem:[#allocation2 + $0x1c] sm:$0x1]  ;;  %v13952_v12 = vpack.c.bf16 %v241_v8, %v241_v8  ;;  %v13985_v36 = vpack.c.bf16 %v242_v13, %v242_v13  ;;  %v14006_v47 = vsel %vm13972_vm11, %v11456_v4, %v1560_v49 }
  0x18   :  { %12397 = vmatpush3.bf16.msra.mxu0 %v13452_v23  ;;  %v721_v14 = vsel %vm13936_vm10, %v404_v63, %v720_v9  ;;  %v723_v15 = vld [vmem:[#allocation2 + $0xc] sm:$0x1]  ;;  %v412_v17 = vor.u32 %v410_v62, %v13943_v3  ;;  %147 = vst [vmem:[#allocation2 + $0x14] sm:$0x1] %v146_v10  ;;  %v53_v18 = vld [vmem:[#allocation2 + $0x20] sm:$0x1]  ;;  %v1024_v58 = vsel %vm13991_vm12, %v13959_v16, %v13932_v57 }
  0x19   :  { %12509 = vmatpush3.bf16.msra.mxu1 %v13453_v24  ;;  %12398 = vmatprep.subr.bf16.mxu0 %v13454_v25  ;;  %v243_v19 = vld [vmem:[%s19708_s0 + $0x28] sm:$0xff]  ;;  %722 = vst [vmem:[#allocation2 + $0x8] sm:$0xf] %v721_v14  ;;  %v724_v20 = vsel %vm13900_vm3, %v405_v0, %v723_v15  ;;  %v149_v21 = vsel %vm13910_vm5, 0, %v148_v11  ;;  %v415_v22 = vshrl.u32 %v12292_v7, 16  ;;  %v418_v23 = vshll.u32 %v12292_v7, 16 }
  0x1a   :  { %12510 = vmatprep.subr.bf16.mxu1 %v13455_v26  ;;  %v56_v24 = vld [vmem:[#allocation2 + $0x28] sm:$0x1]  ;;  %725 = vst [vmem:[#allocation2 + $0xc] sm:$0x1] %v724_v20  ;;  %v413_v25 = vrot.slane %v13943_v3, 4  ;;  %v13987_v37 = vpack.c.bf16 %v243_v19, %v243_v19  ;;  %v19800_v39 = vmov 0 }
  0x1b   :  { %v726_v26 = vld [vmem:[#allocation2 + $0x10] sm:$0xf]  ;;  %150 = vst [vmem:[#allocation2 + $0x1c] sm:$0x1] %v149_v21  ;;  %v151_v33 = vld [vmem:[#allocation2 + $0x24] sm:$0x1] }
  0x1c   :  { %12399 = vmatpush3.bf16.msra.mxu0 %v13456_v27  ;;  %v19797_v27 = vmov 0  ;;  %v154_v35 = vld [vmem:[#allocation2 + $0x2c] sm:$0x1]  ;;  %v19801_v39 = vsel %vm13991_vm12, 4294967295, %v19800_v39  ;;  %v426_v43 = vshll.u32 %v13952_v12, 16  ;;  %v152_v44 = vsel %vm13910_vm5, 0, %v151_v33 }
  0x1d   :  { %12511 = vmatpush3.bf16.msra.mxu1 %v13457_v28  ;;  %12400 = vmatprep.subr.bf16.mxu0 %v13458_v29  ;;  %v19798_v27 = vsel %vm13972_vm11, 4294967295, %v19797_v27  ;;  %v54_v28 = vsel %vm13900_vm3, 0, %v53_v18  ;;  %v423_v29 = vshrl.u32 %v13952_v12, 16  ;;  %19802 = vst [vmem:[#allocation10_spill] sm:$0xff] %v19801_v39  ;;  %v155_v45 = vsel %vm13910_vm5, 0, %v154_v35  ;;  %v244_v52 = vld [vmem:[%s19708_s0 + $0x30] sm:$0xff] }
  0x1e   :  { %12512 = vmatprep.subr.bf16.mxu1 %v13459_v30  ;;  %19799 = vst [vmem:[#allocation9_spill] sm:$0xff] %v19798_v27  ;;  %v57_v30 = vsel %vm13900_vm3, 0, %v56_v24  ;;  %55 = vst [vmem:[#allocation2 + $0x20] sm:$0x1] %v54_v28  ;;  %v59_v46 = vld [vmem:[#allocation2 + $0x30] sm:$0x1]  ;;  %v14036_v5 = vpack.c.bf16 %v244_v52, %v244_v52 }
  0x1f   :  { %58 = vst [vmem:[#allocation2 + $0x28] sm:$0x1] %v57_v30  ;;  %v13995_v42 = vrot.slane %v423_v29, 7  ;;  %153 = vst [vmem:[#allocation2 + $0x24] sm:$0x1] %v152_v44  ;;  %v431_v51 = vshrl.u32 %v13985_v36, 16 }
  0x20   :  { %12401 = vmatpush3.bf16.msra.mxu0 %v13460_v31  ;;  %v727_v31 = vsel %vm13936_vm10, %v412_v17, %v726_v26  ;;  %156 = vst [vmem:[#allocation2 + $0x2c] sm:$0x1] %v155_v45  ;;  %v245_v41 = vld [vmem:[%s19708_s0 + $0x38] sm:$0xff]  ;;  %v434_v54 = vshll.u32 %v13985_v36, 16  ;;  %v439_v56 = vshrl.u32 %v13987_v37, 16  ;;  %v442_v63 = vshll.u32 %v13987_v37, 16 }
  0x21   :  { %12513 = vmatpush3.bf16.msra.mxu1 %v13461_v32  ;;  %12610 = vmatprep.subr.bf16.mxu0 %v13464_v55  ;;  %v13983_v32 = vrot.slane %v415_v22, 7  ;;  %728 = vst [vmem:[#allocation2 + $0x10] sm:$0xf] %v727_v31  ;;  %v732_v53 = vld [vmem:[#allocation2 + $0x18] sm:$0xf]  ;;  %v429_v49 = vrot.slane %v13995_v42, 4  ;;  %v428_v4 = vor.u32 %v426_v43, %v13995_v42  ;;  %v14038_v6 = vpack.c.bf16 %v245_v41, %v245_v41 }
  0x22   :  { %v60_v55 = vsel %vm13900_vm3, 0, %v59_v46  ;;  %v729_v60 = vld [vmem:[#allocation2 + $0x14] sm:$0x1]  ;;  %v14028_v62 = vrot.slane %v431_v51, 7  ;;  %v14031_v0 = vld [vmem:[#allocation2 + $0x8] sm:$0xf] }
  0x23   :  { %v420_v48 = vor.u32 %v418_v23, %v13983_v32  ;;  %v421_v50 = vrot.slane %v13983_v32, 4  ;;  %61 = vst [vmem:[#allocation2 + $0x30] sm:$0x1] %v60_v55  ;;  %v1687_v1 = vld [vmem:[#allocation2 + $0x8] sm:$0xf]  ;;  %v730_v3 = vsel %vm13900_vm3, %v413_v25, %v729_v60  ;;  %v1026_v8 = vshrl.u32 %v14031_v0, 16 }
  0x24   :  { %v1460_v2 = vld [vmem:[#allocation2 + $0x8] sm:$0xe]  ;;  %v977_v7 = vld [vmem:[#allocation2 + $0xc] sm:$0x1]  ;;  %v1029_v9 = vshll.u32 %v14031_v0, 16  ;;  %v1752_v10 = vshrl.u32 %v1687_v1, 16  ;;  %v11552_v13 = vcombine.low %v13914_v40, %v14031_v0 }
  0x25   :  { %v733_v61 = vsel %vm13936_vm10, %v420_v48, %v732_v53  ;;  %v1755_v11 = vshll.u32 %v1687_v1, 16  ;;  %731 = vst [vmem:[#allocation2 + $0x14] sm:$0x1] %v730_v3  ;;  %v1035_v12 = vshll.u32 %v977_v7, 16  ;;  %v11457_v14 = vrot.slane %v1460_v2, 9  ;;  %v13470_v57 = vld [vmem:[%s19709_s1 + $0x148] sm:$0xff]  }
  0x26   :  { %734 = vst [vmem:[#allocation2 + $0x18] sm:$0xf] %v733_v61  ;;  %v1564_v15 = vrot.slane %v977_v7, 5  ;;  %v735_v17 = vld [vmem:[#allocation2 + $0x1c] sm:$0x1]  ;;  %v1028_v18 = vrot.slane %v1026_v8, 4 }
  0x27   :  { %v1031_v19 = vrot.slane %v1029_v9, 5  ;;  %v1754_v21 = vrot.slane %v1752_v10, 4  ;;  %v1757_v22 = vrot.slane %v1755_v11, 5  ;;  %v1037_v23 = vrot.slane %v1035_v12, 5  ;;  %v738_v32 = vld [vmem:[#allocation2 + $0x20] sm:$0xf] }
  0x28   :  { %v1688_v20 = vld [vmem:[#allocation2 + $0x10] sm:$0xf]  ;;  %v1565_v31 = vsel %vm13972_vm11, %v11457_v14, %v1564_v15  ;;  %v736_v40 = vsel %vm13900_vm3, %v421_v50, %v735_v17  ;;  %v739_v52 = vsel %vm13936_vm10, %v428_v4, %v738_v32  ;;  %v741_v4 = vld [vmem:[#allocation2 + $0x24] sm:$0x1]  ;;  %v744_v14 = vld [vmem:[#allocation2 + $0x28] sm:$0xf] }
  0x29   :  { %v1766_v24 = vshrl.u32 %v1688_v20, 16  ;;  %v1769_v25 = vshll.u32 %v1688_v20, 16  ;;  %v11600_v26 = vcombine.low %v1687_v1, %v1688_v20  ;;  %v14044_v28 = vld [vmem:[#allocation2 + $0x10] sm:$0xf]  ;;  %v1032_v29 = vor.u32 %v1031_v19, %v1028_v18  ;;  %737 = vst [vmem:[#allocation2 + $0x1c] sm:$0x1] %v736_v40 }
  0x2a   :  { %v1758_v30 = vor.u32 %v1757_v22, %v1754_v21  ;;  %v11584_v43 = vcombine.low %v14006_v47, %v1565_v31  ;;  %v1040_v44 = vshrl.u32 %v14044_v28, 16  ;;  %v1043_v51 = vshll.u32 %v14044_v28, 16  ;;  %v1461_v50 = vld [vmem:[#allocation2 + $0x10] sm:$0xe]  ;;  %740 = vst [vmem:[#allocation2 + $0x20] sm:$0xf] %v739_v52 }
  0x2b   :  { %v1768_v33 = vrot.slane %v1766_v24, 4  ;;  %v1771_v35 = vrot.slane %v1769_v25, 5  ;;  %4601 = vmatprep.mubr.bf16.mxu1 %v11600_v26  ;;  %v1033_v45 = vrot.slane %v1032_v29, 4  ;;  %v13465_v9 = vld [vmem:[%s19709_s1 + $0x100] sm:$0xff]   ;;  %v747_v20 = vld [vmem:[#allocation2 + $0x2c] sm:$0x1]  ;;  %v436_v25 = vor.u32 %v434_v54, %v14028_v62 }
  0x2c   :  { %v14052_v46 = vrot.slane %v1758_v30, 4  ;;  %4602 = vmatmul.mubr.bf16.vlgmr.msra.gmra.mrb[0].mxu1 %v11584_v43  ;;  %v978_v53 = vld [vmem:[#allocation2 + $0x14] sm:$0x1]  ;;  %v1042_v55 = vrot.slane %v1040_v44, 4  ;;  %v1045_v0 = vrot.slane %v1043_v51, 5  ;;  %v437_v26 = vrot.slane %v14028_v62, 4 }
  0x2d   :  { %v14054_v48 = vld [vmem:[#allocation2 + $0x18] sm:$0xf]  ;;  %v1772_v41 = vor.u32 %v1771_v35, %v1768_v33  ;;  %v1038_v61 = vsel %vm13991_vm12, %v1033_v45, %v1037_v23  ;;  %v1049_v1 = vshll.u32 %v978_v53, 16  ;;  %v1568_v21 = vrot.slane %v978_v53, 5  ;;  %v750_v32 = vld [vmem:[#allocation2 + $0x30] sm:$0xf] }
  0x2e   :  { %v1054_v47 = vshrl.u32 %v14054_v48, 16  ;;  %v1057_v60 = vshll.u32 %v14054_v48, 16  ;;  %v11553_v2 = vcombine.low %v14044_v28, %v14054_v48  ;;  %v1462_v3 = vld [vmem:[#allocation2 + $0x18] sm:$0xe]  ;;  %v11568_v7 = vcombine.low %v1024_v58, %v1038_v61  ;;  %v13471_v36 = vld [vmem:[%s19709_s1 + $0x108] sm:$0xff]   ;;  %v13476_v44 = vld [vmem:[%s19709_s1 + $0x150] sm:$0xff]  }
  0x2f   :  { %v14070_v8 = vrot.slane %v1772_v41, 4  ;;  %v14075_v12 = vld [vmem:[#allocation2 + $0x18] sm:$0xf]  ;;  %v1046_v15 = vor.u32 %v1045_v0, %v1042_v55  ;;  %v1051_v17 = vrot.slane %v1049_v1, 5  ;;  %v11458_v58 = vrot.slane %v1461_v50, 9 }
  0x30   :  { %v1056_v10 = vrot.slane %v1054_v47, 4  ;;  %v1059_v11 = vrot.slane %v1057_v60, 5  ;;  %4440 = vmatprep.mubr.bf16.mxu0 %v11568_v7  ;;  %v11459_v22 = vrot.slane %v1462_v3, 9  ;;  %v979_v23 = vld [vmem:[#allocation2 + $0x1c] sm:$0x1]  ;;  %v742_v29 = vsel %vm13900_vm3, %v429_v49, %v741_v4 }
  0x31   :  { %4441 = vmatmul.mubr.bf16.vlgmr.msra.gmra.mrb[0].mxu0 %v11552_v13  ;;  %v1047_v24 = vrot.slane %v1046_v15, 4  ;;  %v1063_v31 = vshll.u32 %v979_v23, 16  ;;  %v1569_v40 = vsel %vm13972_vm11, %v11458_v58, %v1568_v21  ;;  %v1572_v13 = vrot.slane %v979_v23, 5  ;;  %743 = vst [vmem:[#allocation2 + $0x24] sm:$0x1] %v742_v29 }
  0x32   :  { %v1060_v16 = vor.u32 %v1059_v11, %v1056_v10  ;;  %12611 = vmatpush3.bf16.msra.mxu0 %v13465_v9  ;;  %v14097_v42 = vld [vmem:[#allocation2 + $0x20] sm:$0xf]  ;;  %v745_v49 = vsel %vm13936_vm10, %v436_v25, %v744_v14  ;;  %v748_v62 = vsel %vm13900_vm3, %v437_v26, %v747_v20  ;;  %v14107_v35 = vrot.slane %v439_v56, 7  ;;  %v62_v43 = vld [vmem:[#allocation2 + $0x38] sm:$0x1] }
  0x33   :  { %v1052_v54 = vsel %vm13991_vm12, %v1047_v24, %v1051_v17  ;;  %v14103_v33 = vld [vmem:[#allocation2 + $0x20] sm:$0xf]  ;;  %12612 = vmatprep.subr.bf16.mxu0 %v13470_v57  ;;  %v1065_v45 = vrot.slane %v1063_v31, 5  ;;  %v11601_v50 = vcombine.low %v14075_v12, %v14097_v42  ;;  %746 = vst [vmem:[#allocation2 + $0x28] sm:$0xf] %v745_v49  ;;  %v1573_v56 = vsel %vm13972_vm11, %v11459_v22, %v1572_v13  ;;  %v247_v31 = vld [vmem:[%s19708_s0 + $0x48] sm:$0xff] }
  0x34   :  { %v1061_v30 = vrot.slane %v1060_v16, 4  ;;  %749 = vst [vmem:[#allocation2 + $0x2c] sm:$0x1] %v748_v62  ;;  %v14116_v41 = vld [vmem:[#allocation2 + $0x20] sm:$0xe]  ;;  %v1068_v53 = vshrl.u32 %v14103_v33, 16  ;;  %v444_v47 = vor.u32 %v442_v63, %v14107_v35  ;;  %v11585_v1 = vcombine.low %v1569_v40, %v1573_v56 }
  0x35   :  { %v1071_v55 = vshll.u32 %v14103_v33, 16  ;;  %v157_v60 = vld [vmem:[#allocation2 + $0x34] sm:$0x1]  ;;  %v160_v61 = vld [vmem:[#allocation2 + $0x3c] sm:$0x1]  ;;  %4609 = vmatprep.mubr.bf16.mxu1 %v11601_v50  ;;  %v445_v3 = vrot.slane %v14107_v35, 4  ;;  %v14179_v50 = vpack.c.bf16 %v247_v31, %v247_v31 }
  0x36   :  { %v1066_v0 = vsel %vm13991_vm12, %v1061_v30, %v1065_v45  ;;  %v11460_v4 = vrot.slane %v14116_v41, 9  ;;  %12613 = vmatpush3.bf16.msra.mxu0 %v13471_v36  ;;  %v65_v7 = vld [vmem:[#allocation2 + $0x40] sm:$0x1]  ;;  %v1070_v10 = vrot.slane %v1068_v53, 4  ;;  %v751_v37 = vsel %vm13936_vm10, %v444_v47, %v750_v32  ;;  %v13477_v63 = vld [vmem:[%s19709_s1 + $0x110] sm:$0xff]   ;;  %4610 = vmatmul.mubr.bf16.gmra.mrb[4].mxu1 %v11585_v1  ;;  %v13482_v16 = vld [vmem:[%s19709_s1 + $0x158] sm:$0xff]  }
  0x37   :  { %v11569_v9 = vcombine.low %v1052_v54, %v1066_v0  ;;  %v1073_v11 = vrot.slane %v1071_v55, 5  ;;  %12614 = vmatprep.subr.bf16.mxu0 %v13476_v44  ;;  %752 = vst [vmem:[#allocation2 + $0x30] sm:$0xf] %v751_v37  ;;  %v63_v14 = vsel %vm13900_vm3, 0, %v62_v43  ;;  %v158_v15 = vsel %vm13910_vm5, 0, %v157_v60  ;;  %v246_v57 = vld [vmem:[%s19708_s0 + $0x40] sm:$0xff] }
  0x38   :  { %v161_v17 = vsel %vm13910_vm5, 0, %v160_v61  ;;  %v447_v20 = vshrl.u32 %v14036_v5, 16  ;;  %v980_v58 = vld [vmem:[#allocation2 + $0x24] sm:$0x1]  ;;  %64 = vst [vmem:[#allocation2 + $0x38] sm:$0x1] %v63_v14  ;;  %v14167_v48 = vpack.c.bf16 %v246_v57, %v246_v57 }
  0x39   :  { %4448 = vmatprep.mubr.bf16.mxu0 %v11569_v9  ;;  %v1074_v21 = vor.u32 %v1073_v11, %v1070_v10  ;;  %159 = vst [vmem:[#allocation2 + $0x34] sm:$0x1] %v158_v15  ;;  %162 = vst [vmem:[#allocation2 + $0x3c] sm:$0x1] %v161_v17  ;;  %v450_v22 = vshll.u32 %v14036_v5, 16  ;;  %v66_v23 = vsel %vm13900_vm3, 0, %v65_v7 }
  0x3a   :  { %v455_v24 = vshrl.u32 %v14038_v6, 16  ;;  %4449 = vmatmul.mubr.bf16.gmra.mrb[4].mxu0 %v11553_v2  ;;  %v1077_v25 = vshll.u32 %v980_v58, 16  ;;  %v1576_v26 = vrot.slane %v980_v58, 5  ;;  %v449_v29 = vrot.slane %v447_v20, 7  ;;  %67 = vst [vmem:[#allocation2 + $0x40] sm:$0x1] %v66_v23 }
  0x3b   :  { %v458_v30 = vshll.u32 %v14038_v6, 16  ;;  %v13483_v5 = vld [vmem:[%s19709_s1 + $0x118] sm:$0xff]   ;;  %v14161_v40 = vld [vmem:[#allocation2 + $0x28] sm:$0xf]  ;;  %v981_v13 = vld [vmem:[#allocation2 + $0x2c] sm:$0x1]  ;;  %12615 = vmatpush3.bf16.msra.mxu0 %v13477_v63 }
  0x3c   :  { %v14163_v32 = vrot.slane %v1074_v21, 4  ;;  %v14165_v28 = vrot.slane %v455_v24, 7  ;;  %v14169_v2 = vrot.slane %v1077_v25, 5  ;;  %v1082_v6 = vshrl.u32 %v14161_v40, 16  ;;  %v14173_v49 = vld [vmem:[#allocation2 + $0x28] sm:$0xf]  ;;  %12616 = vmatprep.subr.bf16.mxu0 %v13482_v16 }
  0x3d   :  { %v1085_v36 = vshll.u32 %v14161_v40, 16  ;;  %v1091_v54 = vshll.u32 %v981_v13, 16  ;;  %v11554_v44 = vcombine.low %v14103_v33, %v14161_v40  ;;  %v1464_v45 = vld [vmem:[#allocation2 + $0x28] sm:$0xe]  ;;  %v1577_v55 = vsel %vm13972_vm11, %v11460_v4, %v1576_v26  ;;  %v68_v47 = vld [vmem:[#allocation2 + $0x58] sm:$0x1] }
  0x3e   :  { %v1080_v41 = vsel %vm13991_vm12, %v14163_v32, %v14169_v2  ;;  %v1084_v56 = vrot.slane %v1082_v6, 4  ;;  %v14187_v60 = vld [vmem:[#allocation2 + $0x30] sm:$0xf]  ;;  %v11461_v61 = vrot.slane %v1464_v45, 9  ;;  %v1580_v0 = vrot.slane %v981_v13, 5  ;;  %v13488_v10 = vld [vmem:[%s19709_s1 + $0x160] sm:$0xff]  }
  0x3f   :  { %v1087_v53 = vrot.slane %v1085_v36, 5  ;;  %v452_v1 = vor.u32 %v450_v22, %v449_v29  ;;  %v453_v7 = vrot.slane %v449_v29, 4  ;;  %v166_v9 = vld [vmem:[#allocation2 + $0x5c] sm:$0x1]  ;;  %12617 = vmatpush3.bf16.msra.mxu0 %v13483_v5  ;;  %v1093_v37 = vrot.slane %v1091_v54, 5  ;;  %v13489_v2 = vld [vmem:[%s19709_s1 + $0x1c0] sm:$0xff]  }
  0x40   :  { %v11602_v4 = vcombine.low %v14173_v49, %v14187_v60  ;;  %v753_v14 = vld [vmem:[#allocation2 + $0x34] sm:$0x1]  ;;  %v756_v15 = vld [vmem:[#allocation2 + $0x38] sm:$0xf]  ;;  %v14195_v17 = vld [vmem:[#allocation2 + $0x50] sm:$0xf]  ;;  %v1581_v20 = vsel %vm13972_vm11, %v11461_v61, %v1580_v0  ;;  %v460_v22 = vor.u32 %v458_v30, %v14165_v28  ;;  %12618 = vmatprep.subr.bf16.mxu0 %v13488_v10  ;;  %12722 = vmatprep.subr.bf16.mxu1 %v13489_v2 }
  0x41   :  { %v1088_v11 = vor.u32 %v1087_v53, %v1084_v56  ;;  %v754_v57 = vsel %vm13900_vm3, %v445_v3, %v753_v14  ;;  %v757_v16 = vsel %vm13936_vm10, %v452_v1, %v756_v15  ;;  %v759_v58 = vld [vmem:[#allocation2 + $0x3c] sm:$0x1]  ;;  %v14205_v21 = vld [vmem:[#allocation2 + $0x30] sm:$0xf]  ;;  %v762_v23 = vld [vmem:[#allocation2 + $0x40] sm:$0xf]  ;;  %v11586_v29 = vcombine.low %v1577_v55, %v1581_v20 }
  0x42   :  { %v14208_v24 = vld [vmem:[#allocation2 + $0x54] sm:$0x1]  ;;  %v71_v25 = vld [vmem:[#allocation2 + $0x60] sm:$0x1]  ;;  %4617 = vmatprep.mubr.bf16.mxu1 %v11602_v4  ;;  %755 = vst [vmem:[#allocation2 + $0x34] sm:$0x1] %v754_v57  ;;  %v760_v35 = vsel %vm13900_vm3, %v453_v7, %v759_v58  ;;  %v763_v13 = vsel %vm13936_vm10, %v460_v22, %v762_v23 }
  0x43   :  { %v1089_v26 = vrot.slane %v1088_v11, 4  ;;  %758 = vst [vmem:[#allocation2 + $0x38] sm:$0xf] %v757_v16  ;;  %v1096_v3 = vshrl.u32 %v14205_v21, 16  ;;  %v14213_v31 = vld [vmem:[#allocation2 + $0x30] sm:$0xe]  ;;  %4618 = vmatmul.mubr.bf16.gmra.mrb[8].mxu1 %v11586_v29 }
  0x44   :  { %761 = vst [vmem:[#allocation2 + $0x3c] sm:$0x1] %v760_v35  ;;  %v1099_v30 = vshll.u32 %v14205_v21, 16  ;;  %v69_v32 = vsel %vm13900_vm3, 0, %v68_v47  ;;  %764 = vst [vmem:[#allocation2 + $0x40] sm:$0xf] %v763_v13 }
  0x45   :  { %v1094_v6 = vsel %vm13991_vm12, %v1089_v26, %v1093_v37  ;;  %v1098_v36 = vrot.slane %v1096_v3, 4  ;;  %70 = vst [vmem:[#allocation2 + $0x58] sm:$0x1] %v69_v32  ;;  %v167_v54 = vsel %vm13910_vm5, 0, %v166_v9  ;;  %v463_v45 = vshrl.u32 %v14167_v48, 16  ;;  %v13490_v56 = vld [vmem:[%s19709_s1 + $0x120] sm:$0xff]  }
  0x46   :  { %v11570_v53 = vcombine.low %v1080_v41, %v1094_v6  ;;  %v1101_v55 = vrot.slane %v1099_v30, 5  ;;  %168 = vst [vmem:[#allocation2 + $0x5c] sm:$0x1] %v167_v54  ;;  %v466_v47 = vshll.u32 %v14167_v48, 16  ;;  %v1124_v61 = vshrl.u32 %v14195_v17, 16  ;;  %v13491_v0 = vld [vmem:[%s19709_s1 + $0x180] sm:$0xff]   ;;  %12619 = vmatpush3.bf16.msra.mxu0 %v13490_v56 }
  0x47   :  { %v465_v1 = vrot.slane %v463_v45, 7  ;;  %v1127_v7 = vshll.u32 %v14195_v17, 16  ;;  %v1133_v9 = vshll.u32 %v14208_v24, 16  ;;  %v72_v10 = vsel %vm13900_vm3, 0, %v71_v25  ;;  %v248_v41 = vld [vmem:[%s19708_s0 + $0x50] sm:$0xff]  ;;  %v249_v14 = vld [vmem:[%s19708_s0 + $0x58] sm:$0xff]  ;;  %12723 = vmatpush3.bf16.msra.mxu1 %v13491_v0 }
  0x48   :  { %4456 = vmatprep.mubr.bf16.mxu0 %v11570_v53  ;;  %v1102_v48 = vor.u32 %v1101_v55, %v1098_v36  ;;  %v11462_v11 = vrot.slane %v14213_v31, 9  ;;  %v1126_v37 = vrot.slane %v1124_v61, 4  ;;  %73 = vst [vmem:[#allocation2 + $0x60] sm:$0x1] %v72_v10  ;;  %v471_v4 = vshrl.u32 %v14179_v50, 16  ;;  %v250_v58 = vld [vmem:[%s19708_s0 + $0x60] sm:$0xff] }
  0x49   :  { %4457 = vmatmul.mubr.bf16.gmra.mrb[8].mxu0 %v11554_v44  ;;  %v469_v15 = vrot.slane %v465_v1, 4  ;;  %v1129_v20 = vrot.slane %v1127_v7, 5  ;;  %v14252_v57 = vrot.slane %v1133_v9, 5  ;;  %v474_v16 = vshll.u32 %v14179_v50, 16  ;;  %v982_v23 = vld [vmem:[#allocation2 + $0x34] sm:$0x1] }
  0x4a   :  { %v14258_v22 = vld [vmem:[#allocation2 + $0x38] sm:$0xf]  ;;  %v14260_v25 = vrot.slane %v1102_v48, 4  ;;  %v468_v26 = vor.u32 %v466_v47, %v465_v1  ;;  %v14262_v29 = vrot.slane %v471_v4, 7  ;;  %v14264_v33 = vpack.c.bf16 %v248_v41, %v248_v41  ;;  %v14277_v55 = vld [vmem:[#allocation2 + $0x50] sm:$0xe] }
  0x4b   :  { %v983_v40 = vld [vmem:[#allocation2 + $0x3c] sm:$0x1]  ;;  %v1105_v44 = vshll.u32 %v982_v23, 16  ;;  %v1110_v35 = vshrl.u32 %v14258_v22, 16  ;;  %v1113_v50 = vshll.u32 %v14258_v22, 16  ;;  %v14268_v3 = vpack.c.bf16 %v249_v14, %v249_v14 }
  0x4c   :  { %v1119_v31 = vshll.u32 %v983_v40, 16  ;;  %v14270_v30 = vld [vmem:[#allocation2 + $0x38] sm:$0xf]  ;;  %v14272_v13 = vld [vmem:[#allocation2 + $0x40] sm:$0xf]  ;;  %v1584_v32 = vrot.slane %v982_v23, 5  ;;  %v1130_v2 = vor.u32 %v1129_v20, %v1126_v37  ;;  %v14274_v6 = vpack.c.bf16 %v250_v58, %v250_v58 }
  0x4d   :  { %v1107_v36 = vrot.slane %v1105_v44, 5  ;;  %v1112_v54 = vrot.slane %v1110_v35, 4  ;;  %v1115_v45 = vrot.slane %v1113_v50, 5  ;;  %v1466_v56 = vld [vmem:[#allocation2 + $0x38] sm:$0xe]  ;;  %v476_v53 = vor.u32 %v474_v16, %v14262_v29 }
  0x4e   :  { %v74_v47 = vld [vmem:[#allocation2 + $0x68] sm:$0x1]  ;;  %v1121_v61 = vrot.slane %v1119_v31, 5  ;;  %v768_v9 = vld [vmem:[#allocation2 + $0x58] sm:$0xf]  ;;  %v11603_v37 = vcombine.low %v14270_v30, %v14272_v13  ;;  %v1585_v4 = vsel %vm13972_vm11, %v11462_v11, %v1584_v32  ;;  %v11463_v16 = vrot.slane %v1466_v56, 9 }
  0x4f   :  { %v169_v10 = vld [vmem:[#allocation2 + $0x64] sm:$0x1]  ;;  %v1116_v41 = vor.u32 %v1115_v45, %v1112_v54  ;;  %v771_v14 = vld [vmem:[#allocation2 + $0x5c] sm:$0x1]  ;;  %v774_v20 = vld [vmem:[#allocation2 + $0x60] sm:$0xf]  ;;  %v769_v23 = vsel %vm13936_vm10, %v468_v26, %v768_v9  ;;  %v1108_v31 = vsel %vm13991_vm12, %v14260_v25, %v1107_v36 }
  0x50   :  { %v1588_v58 = vrot.slane %v983_v40, 5  ;;  %v772_v44 = vsel %vm13900_vm3, %v469_v15, %v771_v14  ;;  %v172_v35 = vld [vmem:[#allocation2 + $0x6c] sm:$0x1]  ;;  %v77_v50 = vld [vmem:[#allocation2 + $0x70] sm:$0x1]  ;;  %4625 = vmatprep.mubr.bf16.mxu1 %v11603_v37  ;;  %v14294_v11 = vrot.slane %v1130_v2, 4  ;;  %v775_v40 = vsel %vm13936_vm10, %v476_v53, %v774_v20 }
  0x51   :  { %v1117_v54 = vrot.slane %v1116_v41, 4  ;;  %770 = vst [vmem:[#allocation2 + $0x58] sm:$0xf] %v769_v23  ;;  %773 = vst [vmem:[#allocation2 + $0x5c] sm:$0x1] %v772_v44  ;;  %v477_v56 = vrot.slane %v14262_v29, 4  ;;  %v11555_v41 = vcombine.low %v14205_v21, %v14258_v22 }
  0x52   :  { %v80_v32 = vld [vmem:[#allocation2 + $0x78] sm:$0x1]  ;;  %v175_v26 = vld [vmem:[#allocation2 + $0x74] sm:$0x1]  ;;  %v178_v45 = vld [vmem:[#allocation2 + $0x7c] sm:$0x1]  ;;  %v1589_v15 = vsel %vm13972_vm11, %v11463_v16, %v1588_v58 }
  0x53   :  { %776 = vst [vmem:[#allocation2 + $0x60] sm:$0xf] %v775_v40  ;;  %v11464_v25 = vrot.slane %v14277_v55, 9  ;;  %v75_v36 = vsel %vm13900_vm3, 0, %v74_v47  ;;  %v83_v9 = vld [vmem:[#allocation2 + $0x80] sm:$0x1]  ;;  %v1122_v53 = vsel %vm13991_vm12, %v1117_v54, %v1121_v61  ;;  %v11587_v37 = vcombine.low %v1585_v4, %v1589_v15 }
  0x54   :  { %v13496_v2 = vld [vmem:[%s19709_s1 + $0x168] sm:$0xff]   ;;  %76 = vst [vmem:[#allocation2 + $0x68] sm:$0x1] %v75_v36  ;;  %v170_v14 = vsel %vm13910_vm5, 0, %v169_v10  ;;  %v11571_v47 = vcombine.low %v1108_v31, %v1122_v53  ;;  %v1592_v20 = vrot.slane %v14208_v24, 5  ;;  %v173_v16 = vsel %vm13910_vm5, 0, %v172_v35 }
  0x55   :  { %v13497_v55 = vld [vmem:[%s19709_s1 + $0x1c8] sm:$0xff]   ;;  %171 = vst [vmem:[#allocation2 + $0x64] sm:$0x1] %v170_v14  ;;  %v479_v61 = vshrl.u32 %v14264_v33, 16  ;;  %12620 = vmatprep.subr.bf16.mxu0 %v13496_v2  ;;  %4626 = vmatmul.mubr.bf16.gmra.mrb[12].mxu1 %v11587_v37  ;;  %174 = vst [vmem:[#allocation2 + $0x6c] sm:$0x1] %v173_v16 }
  0x56   :  { %v482_v21 = vshll.u32 %v14264_v33, 16  ;;  %v78_v22 = vsel %vm13900_vm3, 0, %v77_v50  ;;  %v487_v10 = vshrl.u32 %v14268_v3, 16  ;;  %v490_v4 = vshll.u32 %v14268_v3, 16  ;;  %v251_v24 = vld [vmem:[%s19708_s0 + $0x68] sm:$0xff]  ;;  %12724 = vmatprep.subr.bf16.mxu1 %v13497_v55  ;;  %4464 = vmatprep.mubr.bf16.mxu0 %v11571_v47  ;;  %v252_v54 = vld [vmem:[%s19708_s0 + $0x70] sm:$0xff] }
  0x57   :  { %v481_v58 = vrot.slane %v479_v61, 7  ;;  %79 = vst [vmem:[#allocation2 + $0x70] sm:$0x1] %v78_v22  ;;  %v81_v23 = vsel %vm13900_vm3, 0, %v80_v32  ;;  %v176_v33 = vsel %vm13910_vm5, 0, %v175_v26  ;;  %v179_v44 = vsel %vm13910_vm5, 0, %v178_v45  ;;  %4465 = vmatmul.mubr.bf16.gmra.mrb[12].mxu0 %v11555_v41 }
  0x58   :  { %v14334_v35 = vrot.slane %v487_v10, 7  ;;  %82 = vst [vmem:[#allocation2 + $0x78] sm:$0x1] %v81_v23  ;;  %177 = vst [vmem:[#allocation2 + $0x74] sm:$0x1] %v176_v33  ;;  %v495_v3 = vshrl.u32 %v14274_v6, 16  ;;  %v1136_v26 = vsel %vm13991_vm12, %v14294_v11, %v14252_v57  ;;  %v1593_v15 = vsel %vm13972_vm11, %v11464_v25, %v1592_v20 }
  0x59   :  { %180 = vst [vmem:[#allocation2 + $0x7c] sm:$0x1] %v179_v44  ;;  %v498_v50 = vshll.u32 %v14274_v6, 16  ;;  %v84_v31 = vsel %vm13900_vm3, 0, %v83_v9  ;;  %v14343_v40 = vld [vmem:[#allocation2 + $0x58] sm:$0xf]  ;;  %v484_v36 = vor.u32 %v482_v21, %v481_v58  ;;  %v14353_v9 = vpack.c.bf16 %v251_v24, %v251_v24 }
  0x5a   :  { %v985_v32 = vld [vmem:[#allocation2 + $0x5c] sm:$0x1]  ;;  %v14349_v45 = vld [vmem:[#allocation2 + $0x58] sm:$0xf]  ;;  %85 = vst [vmem:[#allocation2 + $0x80] sm:$0x1] %v84_v31  ;;  %v14368_v23 = vpack.c.bf16 %v252_v54, %v252_v54 }
  0x5b   :  { %v1138_v2 = vshrl.u32 %v14343_v40, 16  ;;  %v1141_v53 = vshll.u32 %v14343_v40, 16  ;;  %v1147_v41 = vshll.u32 %v985_v32, 16  ;;  %v14357_v37 = vld [vmem:[#allocation2 + $0x60] sm:$0xf]  ;;  %v13498_v61 = vld [vmem:[%s19709_s1 + $0x128] sm:$0xff]  }
  0x5c   :  { %v11604_v25 = vcombine.low %v14349_v45, %v14357_v37  ;;  %v1468_v20 = vld [vmem:[#allocation2 + $0x58] sm:$0xe]  ;;  %v777_v24 = vld [vmem:[#allocation2 + $0x64] sm:$0x1]  ;;  %v13499_v33 = vld [vmem:[%s19709_s1 + $0x188] sm:$0xff]   ;;  %v1596_v31 = vrot.slane %v985_v32, 5  ;;  %12621 = vmatpush3.bf16.msra.mxu0 %v13498_v61 }
  0x5d   :  { %v1140_v21 = vrot.slane %v1138_v2, 4  ;;  %v1143_v22 = vrot.slane %v1141_v53, 5  ;;  %v1149_v10 = vrot.slane %v1147_v41, 5  ;;  %v11465_v44 = vrot.slane %v1468_v20, 9  ;;  %v780_v55 = vld [vmem:[#allocation2 + $0x68] sm:$0xf]  ;;  %12725 = vmatpush3.bf16.msra.mxu1 %v13499_v33 }
  0x5e   :  { %4633 = vmatprep.mubr.bf16.mxu1 %v11604_v25  ;;  %v485_v16 = vrot.slane %v481_v58, 4  ;;  %v778_v47 = vsel %vm13900_vm3, %v477_v56, %v777_v24  ;;  %v86_v2 = vld [vmem:[#allocation2 + $0x88] sm:$0x1]  ;;  %v781_v54 = vsel %vm13936_vm10, %v484_v36, %v780_v55  ;;  %v783_v41 = vld [vmem:[#allocation2 + $0x6c] sm:$0x1]  ;;  %v492_v25 = vor.u32 %v490_v4, %v14334_v35 }
  0x5f   :  { %v1144_v53 = vor.u32 %v1143_v22, %v1140_v21  ;;  %779 = vst [vmem:[#allocation2 + $0x64] sm:$0x1] %v778_v47  ;;  %v14379_v14 = vld [vmem:[#allocation2 + $0x60] sm:$0xf]  ;;  %v493_v58 = vrot.slane %v14334_v35, 4  ;;  %v1597_v29 = vsel %vm13972_vm11, %v11465_v44, %v1596_v31 }
  0x60   :  { %782 = vst [vmem:[#allocation2 + $0x68] sm:$0xf] %v781_v54  ;;  %v784_v56 = vsel %vm13900_vm3, %v485_v16, %v783_v41  ;;  %v1152_v32 = vshrl.u32 %v14379_v14, 16  ;;  %v1155_v47 = vshll.u32 %v14379_v14, 16  ;;  %v786_v36 = vld [vmem:[#allocation2 + $0x70] sm:$0xf]  ;;  %v11588_v61 = vcombine.low %v1593_v15, %v1597_v29 }
  0x61   :  { %v14389_v55 = vld [vmem:[#allocation2 + $0x60] sm:$0xe]  ;;  %v1145_v20 = vrot.slane %v1144_v53, 4  ;;  %785 = vst [vmem:[#allocation2 + $0x6c] sm:$0x1] %v784_v56  ;;  %v787_v4 = vsel %vm13936_vm10, %v492_v25, %v786_v36  ;;  %v497_v16 = vrot.slane %v495_v3, 7  ;;  %v11556_v15 = vcombine.low %v14195_v17, %v14343_v40 }
  0x62   :  { %v11466_v35 = vrot.slane %v14389_v55, 9  ;;  %v789_v21 = vld [vmem:[#allocation2 + $0x74] sm:$0x1]  ;;  %v181_v22 = vld [vmem:[#allocation2 + $0x84] sm:$0x1]  ;;  %v1154_v24 = vrot.slane %v1152_v32, 4  ;;  %4634 = vmatmul.mubr.bf16.gmra.mrb[16].mxu1 %v11588_v61 }
  0x63   :  { %v1157_v33 = vrot.slane %v1155_v47, 5  ;;  %788 = vst [vmem:[#allocation2 + $0x70] sm:$0xf] %v787_v4  ;;  %v790_v44 = vsel %vm13900_vm3, %v493_v58, %v789_v21  ;;  %v184_v31 = vld [vmem:[#allocation2 + $0x8c] sm:$0x1]  ;;  %v1150_v53 = vsel %vm13991_vm12, %v1145_v20, %v1149_v10  ;;  %v503_v25 = vshrl.u32 %v14353_v9, 16 }
  0x64   :  { %791 = vst [vmem:[#allocation2 + $0x74] sm:$0x1] %v790_v44  ;;  %v792_v54 = vld [vmem:[#allocation2 + $0x78] sm:$0xf]  ;;  %v795_v41 = vld [vmem:[#allocation2 + $0x7c] sm:$0x1]  ;;  %v11572_v3 = vcombine.low %v1136_v26, %v1150_v53  ;;  %v500_v10 = vor.u32 %v498_v50, %v497_v16 }
  0x65   :  { %v87_v29 = vsel %vm13900_vm3, 0, %v86_v2  ;;  %v1158_v58 = vor.u32 %v1157_v33, %v1154_v24  ;;  %v501_v17 = vrot.slane %v497_v16, 4  ;;  %v253_v40 = vld [vmem:[%s19708_s0 + $0x78] sm:$0xff]  ;;  %v13504_v2 = vld [vmem:[%s19709_s1 + $0x170] sm:$0xff]   ;;  %v14416_v56 = vrot.slane %v503_v25, 7  ;;  %v254_v36 = vld [vmem:[%s19708_s0 + $0x80] sm:$0xff] }
  0x66   :  { %88 = vst [vmem:[#allocation2 + $0x88] sm:$0x1] %v87_v29  ;;  %v506_v32 = vshll.u32 %v14353_v9, 16  ;;  %v182_v57 = vsel %vm13910_vm5, 0, %v181_v22  ;;  %v185_v6 = vsel %vm13910_vm5, 0, %v184_v31  ;;  %4472 = vmatprep.mubr.bf16.mxu0 %v11572_v3  ;;  %v793_v26 = vsel %vm13936_vm10, %v500_v10, %v792_v54  ;;  %12622 = vmatprep.subr.bf16.mxu0 %v13504_v2 }
  0x67   :  { %v986_v11 = vld [vmem:[#allocation2 + $0x64] sm:$0x1]  ;;  %v14423_v50 = vrot.slane %v1158_v58, 4  ;;  %v796_v47 = vsel %vm13900_vm3, %v501_v17, %v795_v41  ;;  %183 = vst [vmem:[#allocation2 + $0x84] sm:$0x1] %v182_v57  ;;  %v511_v9 = vshrl.u32 %v14368_v23, 16  ;;  %4473 = vmatmul.mubr.bf16.gmra.mrb[16].mxu0 %v11556_v15  ;;  %v14437_v22 = vpack.c.bf16 %v253_v40, %v253_v40 }
  0x68   :  { %186 = vst [vmem:[#allocation2 + $0x8c] sm:$0x1] %v185_v6  ;;  %v14433_v20 = vld [vmem:[#allocation2 + $0x68] sm:$0xf]  ;;  %v1161_v61 = vshll.u32 %v986_v11, 16  ;;  %v1600_v21 = vrot.slane %v986_v11, 5  ;;  %v508_v29 = vor.u32 %v506_v32, %v14416_v56  ;;  %v14447_v3 = vpack.c.bf16 %v254_v36, %v254_v36 }
  0x69   :  { %v14435_v4 = vld [vmem:[#allocation2 + $0x68] sm:$0xf]  ;;  %794 = vst [vmem:[#allocation2 + $0x78] sm:$0xf] %v793_v26  ;;  %797 = vst [vmem:[#allocation2 + $0x7c] sm:$0x1] %v796_v47  ;;  %v11557_v40 = vcombine.low %v14379_v14, %v14433_v20 }
  0x6a   :  { %v987_v24 = vld [vmem:[#allocation2 + $0x6c] sm:$0x1]  ;;  %v1166_v33 = vshrl.u32 %v14433_v20, 16  ;;  %v1169_v16 = vshll.u32 %v14433_v20, 16  ;;  %v798_v31 = vld [vmem:[#allocation2 + $0x80] sm:$0xf]  ;;  %v1601_v11 = vsel %vm13972_vm11, %v11466_v35, %v1600_v21 }
  0x6b   :  { %v514_v53 = vshll.u32 %v14368_v23, 16  ;;  %v1175_v15 = vshll.u32 %v987_v24, 16  ;;  %v14443_v54 = vld [vmem:[#allocation2 + $0x70] sm:$0xf]  ;;  %v1470_v25 = vld [vmem:[#allocation2 + $0x68] sm:$0xe]  ;;  %v799_v35 = vsel %vm13936_vm10, %v508_v29, %v798_v31 }
  0x6c   :  { %v1163_v58 = vrot.slane %v1161_v61, 5  ;;  %v1168_v10 = vrot.slane %v1166_v33, 4  ;;  %v1171_v17 = vrot.slane %v1169_v16, 5  ;;  %v14451_v2 = vld [vmem:[#allocation2 + $0x70] sm:$0xf]  ;;  %v11605_v6 = vcombine.low %v14435_v4, %v14443_v54 }
  0x6d   :  { %v1177_v57 = vrot.slane %v1175_v15, 5  ;;  %v11467_v32 = vrot.slane %v1470_v25, 9  ;;  %v988_v26 = vld [vmem:[#allocation2 + $0x74] sm:$0x1]  ;;  %v1604_v36 = vrot.slane %v987_v24, 5  ;;  %v1180_v61 = vshrl.u32 %v14451_v2, 16 }
  0x6e   :  { %v1172_v47 = vor.u32 %v1171_v17, %v1168_v10  ;;  %v1183_v33 = vshll.u32 %v14451_v2, 16  ;;  %v13505_v14 = vld [vmem:[%s19709_s1 + $0x1d0] sm:$0xff]   ;;  %4641 = vmatprep.mubr.bf16.mxu1 %v11605_v6  ;;  %v1189_v55 = vshll.u32 %v988_v26, 16  ;;  %v1164_v15 = vsel %vm13991_vm12, %v14423_v50, %v1163_v58  ;;  %800 = vst [vmem:[#allocation2 + $0x80] sm:$0xf] %v799_v35 }
  0x6f   :  { %v1471_v21 = vld [vmem:[#allocation2 + $0x70] sm:$0xe]  ;;  %v1605_v10 = vsel %vm13972_vm11, %v11467_v32, %v1604_v36  ;;  %v1182_v16 = vrot.slane %v1180_v61, 4  ;;  %12726 = vmatprep.subr.bf16.mxu1 %v13505_v14  ;;  %v509_v41 = vrot.slane %v14416_v56, 4  ;;  %v89_v44 = vld [vmem:[#allocation2 + $0x90] sm:$0x1] }
  0x70   :  { %v13506_v24 = vld [vmem:[%s19709_s1 + $0x130] sm:$0xff]   ;;  %v1173_v25 = vrot.slane %v1172_v47, 4  ;;  %v14476_v17 = vld [vmem:[#allocation2 + $0x78] sm:$0xf]  ;;  %v989_v6 = vld [vmem:[#allocation2 + $0x7c] sm:$0x1]  ;;  %v11589_v31 = vcombine.low %v1601_v11, %v1605_v10 }
  0x71   :  { %v1185_v29 = vrot.slane %v1183_v33, 5  ;;  %v1194_v20 = vshrl.u32 %v14476_v17, 16  ;;  %12623 = vmatpush3.bf16.msra.mxu0 %v13506_v24  ;;  %v13507_v50 = vld [vmem:[%s19709_s1 + $0x190] sm:$0xff]   ;;  %v1197_v32 = vshll.u32 %v14476_v17, 16  ;;  %v1203_v47 = vshll.u32 %v989_v6, 16 }
  0x72   :  { %v1178_v58 = vsel %vm13991_vm12, %v1173_v25, %v1177_v57  ;;  %v1472_v36 = vld [vmem:[#allocation2 + $0x78] sm:$0xe]  ;;  %v11468_v61 = vrot.slane %v1471_v21, 9  ;;  %4642 = vmatmul.mubr.bf16.gmra.mrb[20].mxu1 %v11589_v31  ;;  %v1191_v14 = vrot.slane %v1189_v55, 5  ;;  %v801_v24 = vld [vmem:[#allocation2 + $0x84] sm:$0x1] }
  0x73   :  { %v11573_v11 = vcombine.low %v1164_v15, %v1178_v58  ;;  %v1186_v33 = vor.u32 %v1185_v29, %v1182_v16  ;;  %v1196_v35 = vrot.slane %v1194_v20, 4  ;;  %v14486_v56 = vld [vmem:[#allocation2 + $0x78] sm:$0xf]  ;;  %v1199_v10 = vrot.slane %v1197_v32, 5  ;;  %v804_v0 = vld [vmem:[#allocation2 + $0x88] sm:$0xf]  ;;  %12727 = vmatpush3.bf16.msra.mxu1 %v13507_v50 }
  0x74   :  { %v1205_v48 = vrot.slane %v1203_v47, 5  ;;  %v1608_v1 = vrot.slane %v988_v26, 5  ;;  %v807_v57 = vld [vmem:[#allocation2 + $0x8c] sm:$0x1]  ;;  %v11469_v5 = vrot.slane %v1472_v36, 9  ;;  %v1612_v21 = vrot.slane %v989_v6, 5 }
  0x75   :  { %4480 = vmatprep.mubr.bf16.mxu0 %v11573_v11  ;;  %v1187_v25 = vrot.slane %v1186_v33, 4  ;;  %v513_v16 = vrot.slane %v511_v9, 7  ;;  %v1200_v20 = vor.u32 %v1199_v10, %v1196_v35  ;;  %v802_v15 = vsel %vm13900_vm3, %v509_v41, %v801_v24  ;;  %v92_v31 = vld [vmem:[#allocation2 + $0xa8] sm:$0x1]  ;;  %v13510_v29 = vld [vmem:[%s19709_s1 + $0x1d8] sm:$0xff]  }
  0x76   :  { %4481 = vmatmul.mubr.bf16.gmra.mrb[20].mxu0 %v11557_v40  ;;  %v1609_v55 = vsel %vm13972_vm11, %v11468_v61, %v1608_v1  ;;  %v90_v26 = vsel %vm13900_vm3, 0, %v89_v44  ;;  %v14500_v6 = vld [vmem:[#allocation2 + $0x80] sm:$0xf]  ;;  %v1613_v40 = vsel %vm13972_vm11, %v11469_v5, %v1612_v21  ;;  %803 = vst [vmem:[#allocation2 + $0x84] sm:$0x1] %v802_v15  ;;  %v11558_v36 = vcombine.low %v14451_v2, %v14476_v17  ;;  %v13512_v2 = vld [vmem:[%s19709_s1 + $0x198] sm:$0xff]  }
  0x77   :  { %v516_v1 = vor.u32 %v514_v53, %v513_v16  ;;  %v517_v50 = vrot.slane %v513_v16, 4  ;;  %v14507_v41 = vld [vmem:[#allocation2 + $0x80] sm:$0xf]  ;;  %91 = vst [vmem:[#allocation2 + $0x90] sm:$0x1] %v90_v26  ;;  %v1192_v58 = vsel %vm13991_vm12, %v1187_v25, %v1191_v14  ;;  %v1201_v32 = vrot.slane %v1200_v20, 4  ;;  %12728 = vmatprep.subr.bf16.mxu1 %v13510_v29 }
  0x78   :  { %v190_v44 = vld [vmem:[#allocation2 + $0xac] sm:$0x1]  ;;  %v11606_v47 = vcombine.low %v14486_v56, %v14500_v6  ;;  %v14515_v5 = vld [vmem:[#allocation2 + $0x80] sm:$0xe]  ;;  %v14519_v53 = vld [vmem:[#allocation2 + $0xa4] sm:$0x1]  ;;  %v11590_v61 = vcombine.low %v1609_v55, %v1613_v40  ;;  %12729 = vmatpush3.bf16.msra.mxu1 %v13512_v2 }
  0x79   :  { %v14517_v23 = vld [vmem:[#allocation2 + $0xa0] sm:$0xf]  ;;  %v805_v11 = vsel %vm13936_vm10, %v516_v1, %v804_v0  ;;  %v808_v33 = vsel %vm13900_vm3, %v517_v50, %v807_v57  ;;  %v1208_v14 = vshrl.u32 %v14507_v41, 16  ;;  %v95_v35 = vld [vmem:[#allocation2 + $0xb0] sm:$0x1]  ;;  %v1206_v17 = vsel %vm13991_vm12, %v1201_v32, %v1205_v48  ;;  %v13514_v57 = vld [vmem:[%s19709_s1 + $0x178] sm:$0xff]  }
  0x7a   :  { %4649 = vmatprep.mubr.bf16.mxu1 %v11606_v47  ;;  %806 = vst [vmem:[#allocation2 + $0x88] sm:$0xf] %v805_v11  ;;  %809 = vst [vmem:[#allocation2 + $0x8c] sm:$0x1] %v808_v33  ;;  %v1211_v24 = vshll.u32 %v14507_v41, 16  ;;  %v519_v0 = vshrl.u32 %v14437_v22, 16  ;;  %v11574_v25 = vcombine.low %v1192_v58, %v1206_v17  ;;  %12624 = vmatprep.subr.bf16.mxu0 %v13514_v57 }
  0x7b   :  { %v522_v10 = vshll.u32 %v14437_v22, 16  ;;  %4650 = vmatmul.mubr.bf16.gmra.mrb[24].mxu1 %v11590_v61  ;;  %v1210_v21 = vrot.slane %v1208_v14, 4  ;;  %v11470_v16 = vrot.slane %v14515_v5, 9  ;;  %v93_v48 = vsel %vm13900_vm3, 0, %v92_v31  ;;  %v13515_v20 = vld [vmem:[%s19709_s1 + $0x138] sm:$0xff]   ;;  %v255_v50 = vld [vmem:[%s19708_s0 + $0x88] sm:$0xff] }
  0x7c   :  { %v1213_v55 = vrot.slane %v1211_v24, 5  ;;  %v14543_v15 = vrot.slane %v519_v0, 7  ;;  %94 = vst [vmem:[#allocation2 + $0xa8] sm:$0x1] %v93_v48  ;;  %v191_v22 = vsel %vm13910_vm5, 0, %v190_v44  ;;  %v527_v26 = vshrl.u32 %v14447_v3, 16  ;;  %4488 = vmatprep.mubr.bf16.mxu0 %v11574_v25  ;;  %12625 = vmatpush3.bf16.msra.mxu0 %v13515_v20 }
  0x7d   :  { %192 = vst [vmem:[#allocation2 + $0xac] sm:$0x1] %v191_v22  ;;  %v530_v29 = vshll.u32 %v14447_v3, 16  ;;  %v1236_v31 = vshrl.u32 %v14517_v23, 16  ;;  %v1239_v40 = vshll.u32 %v14517_v23, 16  ;;  %v1245_v1 = vshll.u32 %v14519_v53, 16 }
  0x7e   :  { %4489 = vmatmul.mubr.bf16.gmra.mrb[24].mxu0 %v11558_v36  ;;  %v990_v44 = vld [vmem:[#allocation2 + $0x84] sm:$0x1]  ;;  %v1214_v58 = vor.u32 %v1213_v55, %v1210_v21  ;;  %v524_v32 = vor.u32 %v522_v10, %v14543_v15  ;;  %v810_v47 = vld [vmem:[#allocation2 + $0x90] sm:$0xf]  ;;  %v529_v5 = vrot.slane %v527_v26, 7  ;;  %v96_v3 = vsel %vm13900_vm3, 0, %v95_v35 }
  0x7f   :  { %v1217_v61 = vshll.u32 %v990_v44, 16  ;;  %v1616_v11 = vrot.slane %v990_v44, 5  ;;  %v1238_v33 = vrot.slane %v1236_v31, 4  ;;  %v1241_v14 = vrot.slane %v1239_v40, 5  ;;  %97 = vst [vmem:[#allocation2 + $0xb0] sm:$0x1] %v96_v3 }
  0x80   :  { %v14560_v24 = vrot.slane %v1214_v58, 4  ;;  %v811_v36 = vsel %vm13936_vm10, %v524_v32, %v810_v47  ;;  %v532_v35 = vor.u32 %v530_v29, %v529_v5  ;;  %v533_v25 = vrot.slane %v529_v5, 4  ;;  %v14572_v26 = vld [vmem:[#allocation2 + $0xa0] sm:$0xe]  ;;  %v98_v32 = vld [vmem:[#allocation2 + $0xb8] sm:$0x1] }
  0x81   :  { %v14564_v0 = vld [vmem:[#allocation2 + $0x88] sm:$0xf]  ;;  %v991_v10 = vld [vmem:[#allocation2 + $0x8c] sm:$0x1]  ;;  %v14566_v57 = vrot.slane %v1217_v61, 5  ;;  %v12307_v21 = vpack.c.bf16 %v255_v50, %v255_v50  ;;  %v14570_v22 = vrot.slane %v1245_v1, 5  ;;  %v1617_v44 = vsel %vm13972_vm11, %v11470_v16, %v1616_v11 }
  0x82   :  { %812 = vst [vmem:[#allocation2 + $0x90] sm:$0xf] %v811_v36  ;;  %v1222_v48 = vshrl.u32 %v14564_v0, 16  ;;  %v1225_v20 = vshll.u32 %v14564_v0, 16  ;;  %v1231_v55 = vshll.u32 %v991_v10, 16  ;;  %v13516_v31 = vld [vmem:[%s19709_s1 + $0x1e0] sm:$0xff]   ;;  %v1242_v1 = vor.u32 %v1241_v14, %v1238_v33 }
  0x83   :  { %v1220_v29 = vsel %vm13991_vm12, %v14560_v24, %v14566_v57  ;;  %v14581_v40 = vld [vmem:[#allocation2 + $0x88] sm:$0xf]  ;;  %v1620_v58 = vrot.slane %v991_v10, 5  ;;  %v193_v47 = vld [vmem:[#allocation2 + $0xb4] sm:$0x1]  ;;  %v13517_v3 = vld [vmem:[%s19709_s1 + $0x1a0] sm:$0xff]   ;;  %12730 = vmatprep.subr.bf16.mxu1 %v13516_v31 }
  0x84   :  { %v1474_v50 = vld [vmem:[#allocation2 + $0x88] sm:$0xe]  ;;  %v196_v5 = vld [vmem:[#allocation2 + $0xbc] sm:$0x1]  ;;  %v1224_v61 = vrot.slane %v1222_v48, 4  ;;  %v1227_v36 = vrot.slane %v1225_v20, 5  ;;  %12731 = vmatpush3.bf16.msra.mxu1 %v13517_v3 }
  0x85   :  { %v11471_v24 = vrot.slane %v1474_v50, 9  ;;  %v816_v57 = vld [vmem:[#allocation2 + $0xa8] sm:$0xf]  ;;  %v819_v11 = vld [vmem:[#allocation2 + $0xac] sm:$0x1]  ;;  %v535_v33 = vshrl.u32 %v12307_v21, 16 }
  0x86   :  { %v817_v16 = vsel %vm13936_vm10, %v532_v35, %v816_v57  ;;  %v538_v14 = vshll.u32 %v12307_v21, 16  ;;  %v13518_v10 = vld [vmem:[%s19709_s1 + $0x1e8] sm:$0xff]   ;;  %v1228_v48 = vor.u32 %v1227_v36, %v1224_v61  ;;  %v1233_v20 = vrot.slane %v1231_v55, 5  ;;  %v256_v35 = vld [vmem:[%s19708_s0 + $0x90] sm:$0xff]  ;;  %v101_v57 = vld [vmem:[#allocation2 + $0xc0] sm:$0x1] }
  0x87   :  { %v1621_v50 = vsel %vm13972_vm11, %v11471_v24, %v1620_v58  ;;  %818 = vst [vmem:[#allocation2 + $0xa8] sm:$0xf] %v817_v16  ;;  %v820_v31 = vsel %vm13900_vm3, %v533_v25, %v819_v11  ;;  %v14602_v3 = vrot.slane %v1242_v1, 4  ;;  %v14604_v2 = vrot.slane %v535_v33, 7  ;;  %v822_v61 = vld [vmem:[#allocation2 + $0xb0] sm:$0xf]  ;;  %12732 = vmatprep.subr.bf16.mxu1 %v13518_v10 }
  0x88   :  { %v11591_v21 = vcombine.low %v1617_v44, %v1621_v50  ;;  %821 = vst [vmem:[#allocation2 + $0xac] sm:$0x1] %v820_v31  ;;  %v11472_v55 = vrot.slane %v14572_v26, 9  ;;  %v257_v58 = vld [vmem:[%s19708_s0 + $0x98] sm:$0xff]  ;;  %v1229_v25 = vrot.slane %v1228_v48, 4  ;;  %v99_v24 = vsel %vm13900_vm3, 0, %v98_v32 }
  0x89   :  { %v14610_v36 = vld [vmem:[#allocation2 + $0x90] sm:$0xf]  ;;  %v194_v44 = vsel %vm13910_vm5, 0, %v193_v47  ;;  %v197_v1 = vsel %vm13910_vm5, 0, %v196_v5  ;;  %v11559_v16 = vcombine.low %v14507_v41, %v14564_v0  ;;  %v540_v11 = vor.u32 %v538_v14, %v14604_v2  ;;  %100 = vst [vmem:[#allocation2 + $0xb8] sm:$0x1] %v99_v24 }
  0x8a   :  { %v11607_v26 = vcombine.low %v14581_v40, %v14610_v36  ;;  %195 = vst [vmem:[#allocation2 + $0xb4] sm:$0x1] %v194_v44  ;;  %198 = vst [vmem:[#allocation2 + $0xbc] sm:$0x1] %v197_v1  ;;  %v104_v33 = vld [vmem:[#allocation2 + $0xc8] sm:$0x1]  ;;  %v1234_v32 = vsel %vm13991_vm12, %v1229_v25, %v1233_v20  ;;  %v12308_v48 = vpack.c.bf16 %v256_v35, %v256_v35 }
  0x8b   :  { %v199_v10 = vld [vmem:[#allocation2 + $0xc4] sm:$0x1]  ;;  %v1624_v5 = vrot.slane %v14519_v53, 5  ;;  %v11575_v41 = vcombine.low %v1220_v29, %v1234_v32  ;;  %v823_v0 = vsel %vm13936_vm10, %v540_v11, %v822_v61  ;;  %v102_v14 = vsel %vm13900_vm3, 0, %v101_v57  ;;  %v13520_v20 = vld [vmem:[%s19709_s1 + $0x1a8] sm:$0xff]   ;;  %v260_v32 = vld [vmem:[%s19708_s0 + $0xb0] sm:$0xff] }
  0x8c   :  { %v258_v50 = vld [vmem:[%s19708_s0 + $0xa0] sm:$0xff]  ;;  %4657 = vmatprep.mubr.bf16.mxu1 %v11607_v26  ;;  %824 = vst [vmem:[#allocation2 + $0xb0] sm:$0xf] %v823_v0  ;;  %v543_v53 = vshrl.u32 %v12308_v48, 16  ;;  %103 = vst [vmem:[#allocation2 + $0xc0] sm:$0x1] %v102_v14  ;;  %v14637_v31 = vpack.c.bf16 %v257_v58, %v257_v58  ;;  %12733 = vmatpush3.bf16.msra.mxu1 %v13520_v20 }
  0x8d   :  { %4658 = vmatmul.mubr.bf16.gmra.mrb[28].mxu1 %v11591_v21  ;;  %v105_v29 = vsel %vm13900_vm3, 0, %v104_v33  ;;  %v200_v35 = vsel %vm13910_vm5, 0, %v199_v10  ;;  %v259_v57 = vld [vmem:[%s19708_s0 + $0xa8] sm:$0xff]  ;;  %4496 = vmatprep.mubr.bf16.mxu0 %v11575_v41  ;;  %v1248_v21 = vsel %vm13991_vm12, %v14602_v3, %v14570_v22  ;;  %v541_v58 = vrot.slane %v14604_v2, 4  ;;  %v208_v3 = vld [vmem:[#allocation2 + $0xdc] sm:$0x1] }
  0x8e   :  { %v14647_v25 = vld [vmem:[#allocation2 + $0xa8] sm:$0xf]  ;;  %106 = vst [vmem:[#allocation2 + $0xc8] sm:$0x1] %v105_v29  ;;  %201 = vst [vmem:[#allocation2 + $0xc4] sm:$0x1] %v200_v35  ;;  %4497 = vmatmul.mubr.bf16.gmra.mrb[28].mxu0 %v11559_v16  ;;  %v1625_v11 = vsel %vm13972_vm11, %v11472_v55, %v1624_v5  ;;  %v14663_v14 = vpack.c.bf16 %v258_v50, %v258_v50  ;;  %v14673_v17 = vpack.c.bf16 %v259_v57, %v259_v57 }
  0x8f   :  { %v1476_v24 = vld [vmem:[#allocation2 + $0xa8] sm:$0xe]  ;;  %v993_v44 = vld [vmem:[#allocation2 + $0xac] sm:$0x1]  ;;  %v1250_v1 = vshrl.u32 %v14647_v25, 16  ;;  %v1253_v26 = vshll.u32 %v14647_v25, 16 }
  0x90   :  { %v546_v33 = vshll.u32 %v12308_v48, 16  ;;  %v202_v10 = vld [vmem:[#allocation2 + $0xcc] sm:$0x1]  ;;  %v1259_v2 = vshll.u32 %v993_v44, 16  ;;  %v14661_v41 = vld [vmem:[#allocation2 + $0xa8] sm:$0xf] }
  0x91   :  { %v11473_v0 = vrot.slane %v1476_v24, 9  ;;  %v1628_v16 = vrot.slane %v993_v44, 5  ;;  %v13522_v29 = vld [vmem:[%s19709_s1 + $0x1f0] sm:$0xff]   ;;  %v1252_v35 = vrot.slane %v1250_v1, 4  ;;  %v1255_v55 = vrot.slane %v1253_v26, 5  ;;  %v261_v1 = vld [vmem:[%s19708_s0 + $0xb8] sm:$0xff] }
  0x92   :  { %v545_v5 = vrot.slane %v543_v53, 7  ;;  %v825_v48 = vld [vmem:[#allocation2 + $0xb4] sm:$0x1]  ;;  %v551_v61 = vshrl.u32 %v14637_v31, 16  ;;  %v1261_v47 = vrot.slane %v1259_v2, 5  ;;  %12734 = vmatprep.subr.bf16.mxu1 %v13522_v29  ;;  %v554_v2 = vshll.u32 %v14637_v31, 16 }
  0x93   :  { %v1629_v20 = vsel %vm13972_vm11, %v11473_v0, %v1628_v16  ;;  %v826_v24 = vsel %vm13900_vm3, %v541_v58, %v825_v48  ;;  %v828_v44 = vld [vmem:[#allocation2 + $0xb8] sm:$0xf]  ;;  %v831_v50 = vld [vmem:[#allocation2 + $0xbc] sm:$0x1]  ;;  %v1256_v53 = vor.u32 %v1255_v55, %v1252_v35  ;;  %v13523_v0 = vld [vmem:[%s19709_s1 + $0x1b0] sm:$0xff]   ;;  %v203_v7 = vsel %vm13910_vm5, 0, %v202_v10 }
  0x94   :  { %v548_v26 = vor.u32 %v546_v33, %v545_v5  ;;  %v549_v9 = vrot.slane %v545_v5, 4  ;;  %827 = vst [vmem:[#allocation2 + $0xb4] sm:$0x1] %v826_v24  ;;  %v14682_v58 = vld [vmem:[#allocation2 + $0xb0] sm:$0xf]  ;;  %v11592_v16 = vcombine.low %v1625_v11, %v1629_v20  ;;  %v553_v48 = vrot.slane %v551_v61, 7  ;;  %12735 = vmatpush3.bf16.msra.mxu1 %v13523_v0 }
  0x95   :  { %v14684_v57 = vld [vmem:[#allocation2 + $0xb0] sm:$0xf]  ;;  %v14688_v29 = vpack.c.bf16 %v260_v32, %v260_v32  ;;  %v1257_v33 = vrot.slane %v1256_v53, 4  ;;  %v11608_v31 = vcombine.low %v14661_v41, %v14682_v58  ;;  %204 = vst [vmem:[#allocation2 + $0xcc] sm:$0x1] %v203_v7  ;;  %v14693_v5 = vpack.c.bf16 %v261_v1, %v261_v1  ;;  %v13524_v61 = vld [vmem:[%s19709_s1 + $0x1f8] sm:$0xff]  }
  0x96   :  { %v107_v55 = vld [vmem:[#allocation2 + $0xd0] sm:$0x1]  ;;  %v829_v11 = vsel %vm13936_vm10, %v548_v26, %v828_v44  ;;  %v832_v10 = vsel %vm13900_vm3, %v549_v9, %v831_v50  ;;  %v1264_v32 = vshrl.u32 %v14684_v57, 16  ;;  %v1267_v20 = vshll.u32 %v14684_v57, 16  ;;  %v834_v24 = vld [vmem:[#allocation2 + $0xc0] sm:$0xf]  ;;  %12736 = vmatprep.subr.bf16.mxu1 %v13524_v61 }
  0x97   :  { %v837_v7 = vld [vmem:[#allocation2 + $0xc4] sm:$0x1]  ;;  %v1262_v1 = vsel %vm13991_vm12, %v1257_v33, %v1261_v47  ;;  %4665 = vmatprep.mubr.bf16.mxu1 %v11608_v31  ;;  %v11560_v53 = vcombine.low %v14517_v23, %v14647_v25  ;;  %830 = vst [vmem:[#allocation2 + $0xb8] sm:$0xf] %v829_v11  ;;  %833 = vst [vmem:[#allocation2 + $0xbc] sm:$0x1] %v832_v10  ;;  %v556_v0 = vor.u32 %v554_v2, %v553_v48 }
  0x98   :  { %v557_v44 = vrot.slane %v553_v48, 4  ;;  %v14708_v26 = vld [vmem:[#allocation2 + $0xb0] sm:$0xe]  ;;  %v110_v9 = vld [vmem:[#allocation2 + $0xd8] sm:$0x1]  ;;  %v11576_v50 = vcombine.low %v1248_v21, %v1262_v1  ;;  %4666 = vmatmul.mubr.bf16.gmra.mrb[32].mxu1 %v11592_v16  ;;  %v1266_v47 = vrot.slane %v1264_v32, 4 }
  0x99   :  { %v1269_v33 = vrot.slane %v1267_v20, 5  ;;  %v559_v31 = vshrl.u32 %v14663_v14, 16  ;;  %v205_v23 = vld [vmem:[#allocation2 + $0xd4] sm:$0x1]  ;;  %v13525_v25 = vld [vmem:[%s19709_s1 + $0x1b8] sm:$0xff]   ;;  %v835_v2 = vsel %vm13936_vm10, %v556_v0, %v834_v24  ;;  %v562_v48 = vshll.u32 %v14663_v14, 16 }
  0x9a   :  { %v838_v61 = vsel %vm13900_vm3, %v557_v44, %v837_v7  ;;  %v108_v22 = vsel %vm13900_vm3, 0, %v107_v55  ;;  %v262_v21 = vld [vmem:[%s19708_s0 + $0xc0] sm:$0xff]  ;;  %v263_v16 = vld [vmem:[%s19708_s0 + $0xc8] sm:$0xff]  ;;  %4504 = vmatprep.mubr.bf16.mxu0 %v11576_v50  ;;  %836 = vst [vmem:[#allocation2 + $0xc0] sm:$0xf] %v835_v2  ;;  %v11474_v14 = vrot.slane %v14708_v26, 9  ;;  %12737 = vmatpush3.bf16.msra.mxu1 %v13525_v25 }
  0x9b   :  { %v994_v11 = vld [vmem:[#allocation2 + $0xb4] sm:$0x1]  ;;  %v1270_v10 = vor.u32 %v1269_v33, %v1266_v47  ;;  %v561_v32 = vrot.slane %v559_v31, 7  ;;  %839 = vst [vmem:[#allocation2 + $0xc4] sm:$0x1] %v838_v61  ;;  %v567_v55 = vshrl.u32 %v14673_v17, 16  ;;  %4505 = vmatmul.mubr.bf16.gmra.mrb[32].mxu0 %v11560_v53 }
  0x9c   :  { %109 = vst [vmem:[#allocation2 + $0xd0] sm:$0x1] %v108_v22  ;;  %v13526_v20 = vld [vmem:[%s19709_s1 + $0x200] sm:$0xff]   ;;  %v1273_v24 = vshll.u32 %v994_v11, 16  ;;  %v840_v7 = vld [vmem:[#allocation2 + $0xc8] sm:$0xf] }
  0x9d   :  { %v570_v1 = vshll.u32 %v14673_v17, 16  ;;  %v111_v0 = vsel %vm13900_vm3, 0, %v110_v9  ;;  %v206_v44 = vsel %vm13910_vm5, 0, %v205_v23  ;;  %v1632_v26 = vrot.slane %v994_v11, 5  ;;  %v843_v33 = vld [vmem:[#allocation2 + $0xcc] sm:$0x1]  ;;  %13330 = vmatprep.subr.bf16.mxu0 %v13526_v20 }
  0x9e   :  { %v564_v50 = vor.u32 %v562_v48, %v561_v32  ;;  %v565_v47 = vrot.slane %v561_v32, 4  ;;  %v14742_v31 = vrot.slane %v567_v55, 7  ;;  %112 = vst [vmem:[#allocation2 + $0xd8] sm:$0x1] %v111_v0  ;;  %207 = vst [vmem:[#allocation2 + $0xd4] sm:$0x1] %v206_v44  ;;  %v14759_v11 = vpack.c.bf16 %v262_v21, %v262_v21 }
  0x9f   :  { %v14745_v25 = vrot.slane %v1270_v10, 4  ;;  %v14747_v17 = vrot.slane %v1273_v24, 5  ;;  %v209_v9 = vsel %vm13910_vm5, 0, %v208_v3  ;;  %v14751_v2 = vld [vmem:[#allocation2 + $0xb8] sm:$0xf]  ;;  %v14761_v10 = vpack.c.bf16 %v263_v16, %v263_v16 }
  0xa0   :  { %v995_v23 = vld [vmem:[#allocation2 + $0xbc] sm:$0x1]  ;;  %v14753_v48 = vld [vmem:[#allocation2 + $0xb8] sm:$0xf]  ;;  %v841_v61 = vsel %vm13936_vm10, %v564_v50, %v840_v7  ;;  %v844_v22 = vsel %vm13900_vm3, %v565_v47, %v843_v33  ;;  %210 = vst [vmem:[#allocation2 + $0xdc] sm:$0x1] %v209_v9  ;;  %v1633_v0 = vsel %vm13972_vm11, %v11474_v14, %v1632_v26  ;;  %v572_v21 = vor.u32 %v570_v1, %v14742_v31 }
  0xa1   :  { %v1278_v3 = vshrl.u32 %v14751_v2, 16  ;;  %v1281_v55 = vshll.u32 %v14751_v2, 16  ;;  %v1287_v20 = vshll.u32 %v995_v23, 16  ;;  %v1478_v24 = vld [vmem:[#allocation2 + $0xb8] sm:$0xe]  ;;  %v1636_v33 = vrot.slane %v995_v23, 5 }
  0xa2   :  { %842 = vst [vmem:[#allocation2 + $0xc8] sm:$0xf] %v841_v61  ;;  %845 = vst [vmem:[#allocation2 + $0xcc] sm:$0x1] %v844_v22  ;;  %v11475_v44 = vrot.slane %v1478_v24, 9  ;;  %v575_v9 = vshrl.u32 %v14688_v29, 16  ;;  %v1276_v61 = vsel %vm13991_vm12, %v14745_v25, %v14747_v17 }
  0xa3   :  { %v1280_v16 = vrot.slane %v1278_v3, 4  ;;  %v1283_v50 = vrot.slane %v1281_v55, 5  ;;  %v14770_v47 = vld [vmem:[#allocation2 + $0xc0] sm:$0xf]  ;;  %v1289_v22 = vrot.slane %v1287_v20, 5  ;;  %v573_v20 = vrot.slane %v14742_v31, 4 }
  0xa4   :  { %v11609_v14 = vcombine.low %v14753_v48, %v14770_v47  ;;  %v14780_v26 = vld [vmem:[#allocation2 + $0xc0] sm:$0xf]  ;;  %v996_v1 = vld [vmem:[#allocation2 + $0xc4] sm:$0x1]  ;;  %v1637_v23 = vsel %vm13972_vm11, %v11475_v44, %v1636_v33  ;;  %v846_v32 = vld [vmem:[#allocation2 + $0xd0] sm:$0xf]  ;;  %v11561_v33 = vcombine.low %v14684_v57, %v14751_v2 }
  0xa5   :  { %v1284_v3 = vor.u32 %v1283_v50, %v1280_v16  ;;  %v1292_v55 = vshrl.u32 %v14780_v26, 16  ;;  %v1295_v24 = vshll.u32 %v14780_v26, 16  ;;  %v1479_v53 = vld [vmem:[#allocation2 + $0xc0] sm:$0xe]  ;;  %v11593_v17 = vcombine.low %v1633_v0, %v1637_v23  ;;  %v849_v35 = vld [vmem:[#allocation2 + $0xd4] sm:$0x1] }
  0xa6   :  { %4673 = vmatprep.mubr.bf16.mxu1 %v11609_v14  ;;  %v847_v7 = vsel %vm13936_vm10, %v572_v21, %v846_v32  ;;  %v1301_v44 = vshll.u32 %v996_v1, 16  ;;  %v11476_v14 = vrot.slane %v1479_v53, 9  ;;  %v1640_v0 = vrot.slane %v996_v1, 5  ;;  %v113_v1 = vld [vmem:[#allocation2 + $0xe0] sm:$0x1] }
  0xa7   :  { %v1285_v16 = vrot.slane %v1284_v3, 4  ;;  %v1294_v50 = vrot.slane %v1292_v55, 4  ;;  %v1297_v63 = vrot.slane %v1295_v24, 5  ;;  %848 = vst [vmem:[#allocation2 + $0xd0] sm:$0xf] %v847_v7  ;;  %4674 = vmatmul.mubr.bf16.gmra.mrb[36].mxu1 %v11593_v17  ;;  %v850_v31 = vsel %vm13900_vm3, %v573_v20, %v849_v35  ;;  %v264_v35 = vld [vmem:[%s19708_s0 + $0xd0] sm:$0xff] }
  0xa8   :  { %851 = vst [vmem:[#allocation2 + $0xd4] sm:$0x1] %v850_v31  ;;  %v1641_v55 = vsel %vm13972_vm11, %v11476_v14, %v1640_v0  ;;  %v577_v2 = vrot.slane %v575_v9, 7  ;;  %v578_v62 = vshll.u32 %v14688_v29, 16  ;;  %v2202_v59 = vld [vmem:[#allocation2 + $0x20] sm:$0xe] }
  0xa9   :  { %v14792_v43 = vld [vmem:[#allocation2 + $0xc8] sm:$0xf]  ;;  %v997_v25 = vld [vmem:[#allocation2 + $0xcc] sm:$0x1]  ;;  %v1290_v32 = vsel %vm13991_vm12, %v1285_v16, %v1289_v22  ;;  %v1298_v21 = vor.u32 %v1297_v63, %v1294_v50  ;;  %v1303_v22 = vrot.slane %v1301_v44, 5 }
  0xaa   :  { %v1306_v3 = vshrl.u32 %v14792_v43, 16  ;;  %v1309_v7 = vshll.u32 %v14792_v43, 16  ;;  %v1480_v23 = vld [vmem:[#allocation2 + $0xc8] sm:$0xe]  ;;  %v11577_v57 = vcombine.low %v1276_v61, %v1290_v32  ;;  %v1315_v53 = vshll.u32 %v997_v25, 16 }
  0xab   :  { %v1299_v24 = vrot.slane %v1298_v21, 4  ;;  %v14805_v20 = vld [vmem:[#allocation2 + $0xc8] sm:$0xf]  ;;  %v11477_v50 = vrot.slane %v1480_v23, 9  ;;  %v1644_v31 = vrot.slane %v997_v25, 5  ;;  %v114_v23 = vsel %vm13900_vm3, 0, %v113_v1 }
  0xac   :  { %v1308_v63 = vrot.slane %v1306_v3, 4  ;;  %v1311_v17 = vrot.slane %v1309_v7, 5  ;;  %19803 = vst [vmem:[#allocation11_spill] sm:$0xff] %v14805_v20  ;;  %4512 = vmatprep.mubr.bf16.mxu0 %v11577_v57  ;;  %v1317_v16 = vrot.slane %v1315_v53, 5  ;;  %v852_v21 = vld [vmem:[#allocation2 + $0xd8] sm:$0xf]  ;;  %v11562_v0 = vcombine.low %v14780_v26, %v14792_v43 }
  0xad   :  { %4513 = vmatmul.mubr.bf16.gmra.mrb[36].mxu0 %v11561_v33  ;;  %v1645_v3 = vsel %vm13972_vm11, %v11477_v50, %v1644_v31  ;;  %v583_v25 = vshrl.u32 %v14693_v5, 16  ;;  %v14820_v33 = vpack.c.bf16 %v264_v35, %v264_v35  ;;  %v1304_v9 = vsel %vm13991_vm12, %v1299_v24, %v1303_v22  ;;  %v855_v57 = vld [vmem:[#allocation2 + $0xdc] sm:$0x1]  ;;  %115 = vst [vmem:[#allocation2 + $0xe0] sm:$0x1] %v114_v23 }
  0xae   :  { %v1312_v32 = vor.u32 %v1311_v17, %v1308_v63  ;;  %v14811_v44 = vld [vmem:[#allocation2 + $0xd0] sm:$0xf]  ;;  %v116_v63 = vld [vmem:[#allocation2 + $0xf8] sm:$0x1]  ;;  %v214_v1 = vld [vmem:[#allocation2 + $0xfc] sm:$0x1]  ;;  %v11594_v17 = vcombine.low %v1641_v55, %v1645_v3  ;;  %v580_v50 = vor.u32 %v578_v62, %v577_v2 }
  0xaf   :  { %19804 = vst [vmem:[#allocation12_spill] sm:$0xff] %v14811_v44  ;;  %v14815_v7 = vld [vmem:[#allocation2 + $0xd0] sm:$0xf]  ;;  %v11610_v29 = vcombine.low %v14805_v20, %v14811_v44  ;;  %v581_v35 = vrot.slane %v577_v2, 4  ;;  %v998_v31 = vld [vmem:[#allocation2 + $0xd4] sm:$0x1] }
  0xb0   :  { %v1313_v14 = vrot.slane %v1312_v32, 4  ;;  %v14828_v53 = vld [vmem:[#allocation2 + $0xd0] sm:$0xe]  ;;  %v1320_v61 = vshrl.u32 %v14815_v7, 16  ;;  %v1323_v43 = vshll.u32 %v14815_v7, 16  ;;  %v1329_v26 = vshll.u32 %v998_v31, 16 }
  0xb1   :  { %v14831_v24 = vld [vmem:[#allocation2 + $0xf0] sm:$0xf]  ;;  %4681 = vmatprep.mubr.bf16.mxu1 %v11610_v29  ;;  %v14836_v32 = vrot.slane %v583_v25, 7  ;;  %v14838_v23 = vld [vmem:[#allocation2 + $0xf4] sm:$0x1]  ;;  %v853_v62 = vsel %vm13936_vm10, %v580_v50, %v852_v21  ;;  %v856_v2 = vsel %vm13900_vm3, %v581_v35, %v855_v57  ;;  %v586_v25 = vshll.u32 %v14693_v5, 16 }
  0xb2   :  { %v1318_v22 = vsel %vm13991_vm12, %v1313_v14, %v1317_v16  ;;  %4682 = vmatmul.mubr.bf16.gmra.mrb[40].mxu1 %v11594_v17  ;;  %v1322_v55 = vrot.slane %v1320_v61, 4  ;;  %854 = vst [vmem:[#allocation2 + $0xd8] sm:$0xf] %v853_v62  ;;  %857 = vst [vmem:[#allocation2 + $0xdc] sm:$0x1] %v856_v2  ;;  %v1325_v16 = vrot.slane %v1323_v43, 5 }
  0xb3   :  { %19805 = vst [vmem:[#allocation13_spill] sm:$0xff] %v14836_v32  ;;  %v11578_v52 = vcombine.low %v1304_v9, %v1318_v22  ;;  %v14845_v14 = vrot.slane %v1329_v26, 5  ;;  %v11478_v9 = vrot.slane %v14828_v53, 9  ;;  %v117_v29 = vsel %vm13900_vm3, 0, %v116_v63  ;;  %v119_v57 = vld [vmem:[#allocation2 + $0x100] sm:$0x1] }
  0xb4   :  { %v215_v21 = vsel %vm13910_vm5, 0, %v214_v1  ;;  %v591_v61 = vshrl.u32 %v14759_v11, 16  ;;  %v1326_v17 = vor.u32 %v1325_v16, %v1322_v55  ;;  %v588_v50 = vor.u32 %v586_v25, %v14836_v32  ;;  %118 = vst [vmem:[#allocation2 + $0xf8] sm:$0x1] %v117_v29  ;;  %v265_v53 = vld [vmem:[%s19708_s0 + $0xd8] sm:$0xff] }
  0xb5   :  { %4520 = vmatprep.mubr.bf16.mxu0 %v11578_v52  ;;  %216 = vst [vmem:[#allocation2 + $0xfc] sm:$0x1] %v215_v21  ;;  %v594_v5 = vshll.u32 %v14759_v11, 16  ;;  %v1348_v52 = vshrl.u32 %v14831_v24, 16  ;;  %v858_v63 = vld [vmem:[#allocation2 + $0xe0] sm:$0xf] }
  0xb6   :  { %4521 = vmatmul.mubr.bf16.gmra.mrb[40].mxu0 %v11562_v0  ;;  %v1648_v35 = vrot.slane %v998_v31, 5  ;;  %v593_v1 = vrot.slane %v591_v61, 7  ;;  %v1351_v22 = vshll.u32 %v14831_v24, 16  ;;  %v1357_v0 = vshll.u32 %v14838_v23, 16  ;;  %v14868_v2 = vld [vmem:[#allocation2 + $0xf0] sm:$0xe] }
  0xb7   :  { %v14862_v43 = vrot.slane %v1326_v17, 4  ;;  %v859_v26 = vsel %vm13936_vm10, %v588_v50, %v858_v63  ;;  %v1350_v62 = vrot.slane %v1348_v52, 4  ;;  %v120_v11 = vsel %vm13900_vm3, 0, %v119_v57  ;;  %v266_v31 = vld [vmem:[%s19708_s0 + $0xe0] sm:$0xff] }
  0xb8   :  { %860 = vst [vmem:[#allocation2 + $0xe0] sm:$0xf] %v859_v26  ;;  %v596_v25 = vor.u32 %v594_v5, %v593_v1  ;;  %v1353_v29 = vrot.slane %v1351_v22, 5  ;;  %121 = vst [vmem:[#allocation2 + $0x100] sm:$0x1] %v120_v11  ;;  %v597_v21 = vrot.slane %v593_v1, 4  ;;  %v1649_v5 = vsel %vm13972_vm11, %v11478_v9, %v1648_v35 }
  0xb9   :  { %v14875_v61 = vrot.slane %v1357_v0, 5  ;;  %v599_v17 = vshrl.u32 %v14761_v10, 16  ;;  %v602_v57 = vshll.u32 %v14761_v10, 16  ;;  %v14879_v50 = vld [vmem:[#allocation2 + $0xd8] sm:$0xf]  ;;  %v1332_v63 = vsel %vm13991_vm12, %v14862_v43, %v14845_v14 }
  0xba   :  { %v999_v52 = vld [vmem:[#allocation2 + $0xdc] sm:$0x1]  ;;  %v14885_v16 = vld [vmem:[#allocation2 + $0xd8] sm:$0xf]  ;;  %v122_v1 = vld [vmem:[#allocation2 + $0x108] sm:$0x1]  ;;  %v14889_v22 = vpack.c.bf16 %v265_v53, %v265_v53  ;;  %v14891_v0 = vpack.c.bf16 %v266_v31, %v266_v31  ;;  %v1354_v3 = vor.u32 %v1353_v29, %v1350_v62 }
  0xbb   :  { %19806 = vst [vmem:[#allocation14_spill] sm:$0xff] %v14885_v16  ;;  %v1334_v10 = vshrl.u32 %v14879_v50, 16  ;;  %v1337_v26 = vshll.u32 %v14879_v50, 16  ;;  %v1343_v11 = vshll.u32 %v999_v52, 16  ;;  %v1482_v55 = vld [vmem:[#allocation2 + $0xd8] sm:$0xe] }
  0xbc   :  { %v11479_v14 = vrot.slane %v1482_v55, 9  ;;  %v1652_v43 = vrot.slane %v999_v52, 5  ;;  %v864_v19 = vld [vmem:[#allocation2 + $0xf8] sm:$0xf]  ;;  %v11480_v18 = vrot.slane %v14868_v2, 9  ;;  %v14904_v29 = vrot.slane %v599_v17, 7 }
  0xbd   :  { %v1336_v9 = vrot.slane %v1334_v10, 4  ;;  %v1339_v35 = vrot.slane %v1337_v26, 5  ;;  %v865_v31 = vsel %vm13936_vm10, %v596_v25, %v864_v19  ;;  %v867_v32 = vld [vmem:[#allocation2 + $0xfc] sm:$0x1]  ;;  %v217_v44 = vld [vmem:[#allocation2 + $0x104] sm:$0x1] }
  0xbe   :  { %v1345_v20 = vrot.slane %v1343_v11, 5  ;;  %v1653_v62 = vsel %vm13972_vm11, %v11479_v14, %v1652_v43  ;;  %866 = vst [vmem:[#allocation2 + $0xf8] sm:$0xf] %v865_v31  ;;  %v868_v55 = vsel %vm13900_vm3, %v597_v21, %v867_v32  ;;  %v220_v2 = vld [vmem:[#allocation2 + $0x10c] sm:$0x1]  ;;  %v14908_v19 = vrot.slane %v1354_v3, 4 }
  0xbf   :  { %v125_v52 = vld [vmem:[#allocation2 + $0x110] sm:$0x1]  ;;  %v1340_v10 = vor.u32 %v1339_v35, %v1336_v9  ;;  %v14906_v26 = vld [vmem:[#allocation2 + $0xe0] sm:$0xf]  ;;  %v11595_v53 = vcombine.low %v1649_v5, %v1653_v62  ;;  %869 = vst [vmem:[#allocation2 + $0xfc] sm:$0x1] %v868_v55  ;;  %v11563_v9 = vcombine.low %v14815_v7, %v14879_v50  ;;  %v604_v35 = vor.u32 %v602_v57, %v14904_v29 }
  0xc0   :  { %19807 = vst [vmem:[#allocation15_spill] sm:$0xff] %v14906_v26  ;;  %v123_v25 = vsel %vm13900_vm3, 0, %v122_v1  ;;  %v128_v11 = vld [vmem:[#allocation2 + $0x118] sm:$0x1]  ;;  %v11611_v32 = vcombine.low %v14885_v16, %v14906_v26  ;;  %v870_v21 = vld [vmem:[#allocation2 + $0x100] sm:$0xf] }
  0xc1   :  { %v1656_v17 = vrot.slane %v14838_v23, 5  ;;  %124 = vst [vmem:[#allocation2 + $0x108] sm:$0x1] %v123_v25  ;;  %v267_v3 = vld [vmem:[%s19708_s0 + $0xe8] sm:$0xff]  ;;  %v268_v5 = vld [vmem:[%s19708_s0 + $0xf0] sm:$0xff]  ;;  %v1341_v1 = vrot.slane %v1340_v10, 4  ;;  %v871_v7 = vsel %vm13936_vm10, %v604_v35, %v870_v21 }
  0xc2   :  { %v605_v31 = vrot.slane %v14904_v29, 4  ;;  %4689 = vmatprep.mubr.bf16.mxu1 %v11611_v32  ;;  %v218_v23 = vsel %vm13910_vm5, 0, %v217_v44  ;;  %v221_v62 = vsel %vm13910_vm5, 0, %v220_v2  ;;  %v607_v55 = vshrl.u32 %v14820_v33, 16  ;;  %872 = vst [vmem:[#allocation2 + $0x100] sm:$0xf] %v871_v7 }
  0xc3   :  { %v610_v25 = vshll.u32 %v14820_v33, 16  ;;  %v1346_v10 = vsel %vm13991_vm12, %v1341_v1, %v1345_v20  ;;  %4690 = vmatmul.mubr.bf16.gmra.mrb[44].mxu1 %v11595_v53  ;;  %219 = vst [vmem:[#allocation2 + $0x104] sm:$0x1] %v218_v23  ;;  %222 = vst [vmem:[#allocation2 + $0x10c] sm:$0x1] %v221_v62  ;;  %v126_v57 = vsel %vm13900_vm3, 0, %v125_v52  ;;  %v14955_v35 = vpack.c.bf16 %v268_v5, %v268_v5 }
  0xc4   :  { %v615_v44 = vshrl.u32 %v14889_v22, 16  ;;  %v11579_v50 = vcombine.low %v1332_v63, %v1346_v10  ;;  %v609_v29 = vrot.slane %v607_v55, 7  ;;  %127 = vst [vmem:[#allocation2 + $0x110] sm:$0x1] %v126_v57  ;;  %v618_v33 = vshll.u32 %v14889_v22, 16 }
  0xc5   :  { %v129_v20 = vsel %vm13900_vm3, 0, %v128_v11  ;;  %v223_v53 = vld [vmem:[#allocation2 + $0x114] sm:$0x1]  ;;  %v14943_v2 = vld [vmem:[#allocation2 + $0xf8] sm:$0xf]  ;;  %v1657_v63 = vsel %vm13972_vm11, %v11480_v18, %v1656_v17  ;;  %v14953_v22 = vpack.c.bf16 %v267_v3, %v267_v3 }
  0xc6   :  { %v14949_v52 = vld [vmem:[#allocation2 + $0xf8] sm:$0xf]  ;;  %130 = vst [vmem:[#allocation2 + $0x118] sm:$0x1] %v129_v20  ;;  %v226_v1 = vld [vmem:[#allocation2 + $0x11c] sm:$0x1]  ;;  %4528 = vmatprep.mubr.bf16.mxu0 %v11579_v50  ;;  %v11564_v18 = vcombine.low %v14831_v24, %v14943_v2  ;;  %v612_v50 = vor.u32 %v610_v25, %v609_v29 }
  0xc7   :  { %19808 = vst [vmem:[#allocation16_spill] sm:$0xff] %v14949_v52  ;;  %v1484_v21 = vld [vmem:[#allocation2 + $0xf8] sm:$0xe]  ;;  %v1001_v11 = vld [vmem:[#allocation2 + $0xfc] sm:$0x1]  ;;  %v1362_v23 = vshrl.u32 %v14943_v2, 16  ;;  %4529 = vmatmul.mubr.bf16.gmra.mrb[44].mxu0 %v11563_v9 }
  0xc8   :  { %v1365_v62 = vshll.u32 %v14943_v2, 16  ;;  %v1371_v7 = vshll.u32 %v1001_v11, 16  ;;  %v11481_v17 = vrot.slane %v1484_v21, 9  ;;  %v1660_v3 = vrot.slane %v1001_v11, 5  ;;  %v876_v57 = vld [vmem:[#allocation2 + $0x108] sm:$0xf] }
  0xc9   :  { %v1364_v5 = vrot.slane %v1362_v23, 4  ;;  %v613_v43 = vrot.slane %v609_v29, 4  ;;  %v617_v32 = vrot.slane %v615_v44, 7  ;;  %v224_v10 = vsel %vm13910_vm5, 0, %v223_v53  ;;  %v131_v9 = vld [vmem:[#allocation2 + $0x120] sm:$0x1] }
  0xca   :  { %v1367_v20 = vrot.slane %v1365_v62, 5  ;;  %v1373_v14 = vrot.slane %v1371_v7, 5  ;;  %v1661_v51 = vsel %vm13972_vm11, %v11481_v17, %v1660_v3  ;;  %v873_v16 = vld [vmem:[#allocation2 + $0x104] sm:$0x1]  ;;  %v877_v24 = vsel %vm13936_vm10, %v612_v50, %v876_v57  ;;  %v879_v2 = vld [vmem:[#allocation2 + $0x10c] sm:$0x1] }
  0xcb   :  { %v11596_v26 = vcombine.low %v1657_v63, %v1661_v51  ;;  %225 = vst [vmem:[#allocation2 + $0x114] sm:$0x1] %v224_v10  ;;  %v227_v25 = vsel %vm13910_vm5, 0, %v226_v1  ;;  %v14971_v29 = vld [vmem:[#allocation2 + $0x100] sm:$0xf]  ;;  %v874_v44 = vsel %vm13900_vm3, %v605_v31, %v873_v16  ;;  %v880_v53 = vsel %vm13900_vm3, %v613_v43, %v879_v2 }
  0xcc   :  { %v1368_v55 = vor.u32 %v1367_v20, %v1364_v5  ;;  %19809 = vst [vmem:[#allocation17_spill] sm:$0xff] %v14971_v29  ;;  %878 = vst [vmem:[#allocation2 + $0x108] sm:$0xf] %v877_v24  ;;  %v14977_v21 = vld [vmem:[#allocation2 + $0x100] sm:$0xf]  ;;  %v620_v51 = vor.u32 %v618_v33, %v617_v32  ;;  %v621_v63 = vrot.slane %v617_v32, 4  ;;  %v11612_v1 = vcombine.low %v14949_v52, %v14971_v29 }
  0xcd   :  { %228 = vst [vmem:[#allocation2 + $0x11c] sm:$0x1] %v227_v25  ;;  %875 = vst [vmem:[#allocation2 + $0x104] sm:$0x1] %v874_v44  ;;  %v882_v16 = vld [vmem:[#allocation2 + $0x110] sm:$0xf]  ;;  %v19810_v5 = vsel %vm13991_vm12, %v14908_v19, %v14875_v61 }
  0xce   :  { %v1369_v11 = vrot.slane %v1368_v55, 4  ;;  %881 = vst [vmem:[#allocation2 + $0x10c] sm:$0x1] %v880_v53  ;;  %v1376_v31 = vshrl.u32 %v14977_v21, 16  ;;  %v1379_v43 = vshll.u32 %v14977_v21, 16  ;;  %v883_v33 = vsel %vm13936_vm10, %v620_v51, %v882_v16  ;;  %4697 = vmatprep.mubr.bf16.mxu1 %v11612_v1 }
  0xcf   :  { %v1485_v32 = vld [vmem:[#allocation2 + $0x100] sm:$0xe]  ;;  %v623_v55 = vshrl.u32 %v14891_v0, 16  ;;  %884 = vst [vmem:[#allocation2 + $0x110] sm:$0xf] %v883_v33  ;;  %v626_v17 = vshll.u32 %v14891_v0, 16  ;;  %4698 = vmatmul.mubr.bf16.gmra.mrb[48].mxu1 %v11596_v26 }
  0xd0   :  { %v1374_v10 = vsel %vm13991_vm12, %v1369_v11, %v1373_v14  ;;  %v11482_v7 = vrot.slane %v1485_v32, 9  ;;  %v888_v3 = vld [vmem:[#allocation2 + $0x118] sm:$0xf]  ;;  %v132_v57 = vsel %vm13900_vm3, 0, %v131_v9  ;;  %v1378_v50 = vrot.slane %v1376_v31, 4 }
  0xd1   :  { %v11580_v20 = vcombine.low %v19810_v5, %v1374_v10  ;;  %v1381_v24 = vrot.slane %v1379_v43, 5  ;;  %v625_v2 = vrot.slane %v623_v55, 7  ;;  %133 = vst [vmem:[#allocation2 + $0x120] sm:$0x1] %v132_v57  ;;  %v269_v14 = vld [vmem:[%s19708_s0 + $0xf8] sm:$0xff]  ;;  %v631_v0 = vshrl.u32 %v14953_v22, 16 }
  0xd2   :  { %v634_v25 = vshll.u32 %v14953_v22, 16  ;;  %v885_v51 = vld [vmem:[#allocation2 + $0x114] sm:$0x1]  ;;  %v15013_v32 = vpack.c.bf16 %v269_v14, %v269_v14  ;;  %v137_v23 = vld [vmem:[#allocation2 + $0x130] sm:$0x1] }
  0xd3   :  { %4536 = vmatprep.mubr.bf16.mxu0 %v11580_v20  ;;  %v1382_v9 = vor.u32 %v1381_v24, %v1378_v50  ;;  %v628_v44 = vor.u32 %v626_v17, %v625_v2  ;;  %v629_v53 = vrot.slane %v625_v2, 4  ;;  %v15004_v26 = vld [vmem:[#allocation2 + $0x108] sm:$0xf]  ;;  %v886_v1 = vsel %vm13900_vm3, %v621_v63, %v885_v51 }
  0xd4   :  { %4537 = vmatmul.mubr.bf16.gmra.mrb[48].mxu0 %v11564_v18  ;;  %v15006_v19 = vld [vmem:[#allocation2 + $0x108] sm:$0xf]  ;;  %v1002_v16 = vld [vmem:[#allocation2 + $0x104] sm:$0x1]  ;;  %v1390_v22 = vshrl.u32 %v15004_v26, 16  ;;  %v1393_v55 = vshll.u32 %v15004_v26, 16 }
  0xd5   :  { %19811 = vst [vmem:[#allocation18_spill] sm:$0xff] %v15006_v19  ;;  %v1486_v11 = vld [vmem:[#allocation2 + $0x108] sm:$0xe]  ;;  %v1003_v31 = vld [vmem:[#allocation2 + $0x10c] sm:$0x1]  ;;  %v1383_v43 = vrot.slane %v1382_v9, 4  ;;  %v889_v33 = vsel %vm13936_vm10, %v628_v44, %v888_v3 }
  0xd6   :  { %887 = vst [vmem:[#allocation2 + $0x114] sm:$0x1] %v886_v1  ;;  %v1385_v18 = vshll.u32 %v1002_v16, 16  ;;  %v1399_v10 = vshll.u32 %v1003_v31, 16  ;;  %890 = vst [vmem:[#allocation2 + $0x118] sm:$0xf] %v889_v33 }
  0xd7   :  { %v891_v57 = vld [vmem:[#allocation2 + $0x11c] sm:$0x1]  ;;  %v1392_v63 = vrot.slane %v1390_v22, 4  ;;  %v15017_v5 = vld [vmem:[#allocation2 + $0x110] sm:$0xf]  ;;  %v1664_v50 = vrot.slane %v1002_v16, 5 }
  0xd8   :  { %19812 = vst [vmem:[#allocation19_spill] sm:$0xff] %v15017_v5  ;;  %v11483_v24 = vrot.slane %v1486_v11, 9  ;;  %v1387_v2 = vrot.slane %v1385_v18, 5  ;;  %v1395_v9 = vrot.slane %v1393_v55, 5  ;;  %v1401_v3 = vrot.slane %v1399_v10, 5 }
  0xd9   :  { %v15021_v44 = vld [vmem:[#allocation2 + $0x110] sm:$0xf]  ;;  %v11613_v1 = vcombine.low %v15006_v19, %v15017_v5  ;;  %v1665_v22 = vsel %vm13972_vm11, %v11482_v7, %v1664_v50  ;;  %v1668_v33 = vrot.slane %v1003_v31, 5  ;;  %v892_v18 = vsel %vm13900_vm3, %v629_v53, %v891_v57  ;;  %v134_v10 = vld [vmem:[#allocation2 + $0x128] sm:$0x1] }
  0xda   :  { %v1487_v17 = vld [vmem:[#allocation2 + $0x110] sm:$0xe]  ;;  %v1388_v11 = vsel %vm13991_vm12, %v1383_v43, %v1387_v2  ;;  %v1396_v16 = vor.u32 %v1395_v9, %v1392_v63  ;;  %v1404_v55 = vshrl.u32 %v15021_v44, 16  ;;  %893 = vst [vmem:[#allocation2 + $0x11c] sm:$0x1] %v892_v18  ;;  %v1407_v14 = vshll.u32 %v15021_v44, 16 }
  0xdb   :  { %4705 = vmatprep.mubr.bf16.mxu1 %v11613_v1  ;;  %v1669_v51 = vsel %vm13972_vm11, %v11483_v24, %v1668_v33  ;;  %v15036_v7 = vrot.slane %v631_v0, 7  ;;  %v894_v31 = vld [vmem:[#allocation2 + $0x120] sm:$0xf]  ;;  %v11484_v50 = vrot.slane %v1487_v17, 9  ;;  %v135_v53 = vsel %vm13900_vm3, 0, %v134_v10 }
  0xdc   :  { %v1397_v20 = vrot.slane %v1396_v16, 4  ;;  %v11597_v43 = vcombine.low %v1665_v22, %v1669_v51  ;;  %v1406_v2 = vrot.slane %v1404_v55, 4  ;;  %v229_v57 = vld [vmem:[#allocation2 + $0x124] sm:$0x1]  ;;  %v1409_v1 = vrot.slane %v1407_v14, 5 }
  0xdd   :  { %v1004_v63 = vld [vmem:[#allocation2 + $0x114] sm:$0x1]  ;;  %v15040_v9 = vld [vmem:[#allocation2 + $0x118] sm:$0xf]  ;;  %v636_v24 = vor.u32 %v634_v25, %v15036_v7  ;;  %136 = vst [vmem:[#allocation2 + $0x128] sm:$0x1] %v135_v53  ;;  %v11565_v51 = vcombine.low %v14977_v21, %v15004_v26 }
  0xde   :  { %v1413_v62 = vshll.u32 %v1004_v63, 16  ;;  %v232_v0 = vld [vmem:[#allocation2 + $0x12c] sm:$0x1]  ;;  %v1402_v17 = vsel %vm13991_vm12, %v1397_v20, %v1401_v3  ;;  %4706 = vmatmul.mubr.bf16.gmra.mrb[52].mxu1 %v11597_v43  ;;  %v1418_v22 = vshrl.u32 %v15040_v9, 16  ;;  %v1421_v16 = vshll.u32 %v15040_v9, 16 }
  0xdf   :  { %v15050_v18 = vld [vmem:[#allocation2 + $0x118] sm:$0xf]  ;;  %v11581_v55 = vcombine.low %v1388_v11, %v1402_v17  ;;  %v1410_v25 = vor.u32 %v1409_v1, %v1406_v2  ;;  %v895_v53 = vsel %vm13936_vm10, %v636_v24, %v894_v31  ;;  %v1672_v43 = vrot.slane %v1004_v63, 5 }
  0xe0   :  { %19813 = vst [vmem:[#allocation20_spill] sm:$0xff] %v15050_v18  ;;  %v1488_v14 = vld [vmem:[#allocation2 + $0x118] sm:$0xe]  ;;  %v1415_v10 = vrot.slane %v1413_v62, 5  ;;  %v1420_v33 = vrot.slane %v1418_v22, 4  ;;  %v1423_v20 = vrot.slane %v1421_v16, 5 }
  0xe1   :  { %896 = vst [vmem:[#allocation2 + $0x120] sm:$0xf] %v895_v53  ;;  %4544 = vmatprep.mubr.bf16.mxu0 %v11581_v55  ;;  %v1411_v3 = vrot.slane %v1410_v25, 4  ;;  %v11485_v61 = vrot.slane %v1488_v14, 9  ;;  %v230_v11 = vsel %vm13910_vm5, 0, %v229_v57  ;;  %v233_v31 = vsel %vm13910_vm5, 0, %v232_v0 }
  0xe2   :  { %4545 = vmatmul.mubr.bf16.gmra.mrb[52].mxu0 %v11565_v51  ;;  %v1005_v62 = vld [vmem:[#allocation2 + $0x11c] sm:$0x1]  ;;  %v1424_v2 = vor.u32 %v1423_v20, %v1420_v33  ;;  %231 = vst [vmem:[#allocation2 + $0x124] sm:$0x1] %v230_v11  ;;  %v19814_v1 = vshrl.u32 %v14955_v35, 16  ;;  %v642_v17 = vshll.u32 %v14955_v35, 16  ;;  %v1673_v16 = vsel %vm13972_vm11, %v11484_v50, %v1672_v43 }
  0xe3   :  { %v1416_v22 = vsel %vm13991_vm12, %v1411_v3, %v1415_v10  ;;  %v1427_v63 = vshll.u32 %v1005_v62, 16  ;;  %v1676_v57 = vrot.slane %v1005_v62, 5  ;;  %234 = vst [vmem:[#allocation2 + $0x12c] sm:$0x1] %v233_v31  ;;  %v138_v0 = vsel %vm13900_vm3, 0, %v137_v23 }
  0xe4   :  { %v641_v24 = vrot.slane %v19814_v1, 7  ;;  %v1425_v51 = vrot.slane %v1424_v2, 4  ;;  %v900_v55 = vld [vmem:[#allocation2 + $0x128] sm:$0xf]  ;;  %139 = vst [vmem:[#allocation2 + $0x130] sm:$0x1] %v138_v0  ;;  %v11566_v50 = vcombine.low %v15021_v44, %v15040_v9 }
  0xe5   :  { %v1429_v25 = vrot.slane %v1427_v63, 5  ;;  %v1677_v35 = vsel %vm13972_vm11, %v11485_v61, %v1676_v57  ;;  %v647_v10 = vshrl.u32 %v15013_v32, 16  ;;  %v650_v53 = vshll.u32 %v15013_v32, 16  ;;  %v1719_v3 = vld [vmem:[#allocation2 + $0xc] sm:$0x1] }
  0xe6   :  { %v644_v33 = vor.u32 %v642_v17, %v641_v24  ;;  %v645_v14 = vrot.slane %v641_v24, 4  ;;  %v11598_v11 = vcombine.low %v1673_v16, %v1677_v35  ;;  %v1761_v2 = vshll.u32 %v1719_v3, 16  ;;  %v1720_v24 = vld [vmem:[#allocation2 + $0x14] sm:$0x1]  ;;  %v2199_v35 = vld [vmem:[#allocation2 + $0x8] sm:$0xe] }
  0xe7   :  { %v1430_v43 = vsel %vm13991_vm12, %v1425_v51, %v1429_v25  ;;  %v15083_v62 = vrot.slane %v647_v10, 7  ;;  %v1775_v25 = vshll.u32 %v1720_v24, 16  ;;  %v2297_v44 = vrot.slane %v1719_v3, 5 }
  0xe8   :  { %v901_v20 = vsel %vm13936_vm10, %v644_v33, %v900_v55  ;;  %v15079_v23 = vld [vmem:[#allocation2 + $0x120] sm:$0xf]  ;;  %v11582_v32 = vcombine.low %v1416_v22, %v1430_v43  ;;  %v19817_v22 = vrot.slane %v15036_v7, 4  ;;  %v1763_v0 = vrot.slane %v1761_v2, 5  ;;  %v2200_v43 = vld [vmem:[#allocation2 + $0x10] sm:$0xe] }
  0xe9   :  { %19815 = vst [vmem:[#allocation21_spill] sm:$0xff] %v15079_v23  ;;  %902 = vst [vmem:[#allocation2 + $0x128] sm:$0xf] %v901_v20  ;;  %v15081_v61 = vld [vmem:[#allocation2 + $0x120] sm:$0xf]  ;;  %v11614_v9 = vcombine.low %v15050_v18, %v15079_v23  ;;  %v652_v57 = vor.u32 %v650_v53, %v15083_v62  ;;  %v1777_v7 = vrot.slane %v1775_v25, 5 }
  0xea   :  { %19816 = vst [vmem:[#allocation22_spill] sm:$0xff] %v15083_v62  ;;  %v15089_v1 = vld [vmem:[#allocation2 + $0x120] sm:$0xe]  ;;  %v897_v17 = vld [vmem:[#allocation2 + $0x124] sm:$0x1]  ;;  %v1432_v63 = vshrl.u32 %v15081_v61, 16  ;;  %4552 = vmatprep.mubr.bf16.mxu0 %v11582_v32  ;;  %v1764_v3 = vsel %vm13991_vm12, %v14052_v46, %v1763_v0 }
  0xeb   :  { %v1435_v16 = vshll.u32 %v15081_v61, 16  ;;  %v11486_v51 = vrot.slane %v15089_v1, 9  ;;  %4713 = vmatprep.mubr.bf16.mxu1 %v11614_v9  ;;  %v898_v33 = vsel %vm13900_vm3, %v19817_v22, %v897_v17  ;;  %v903_v55 = vld [vmem:[#allocation2 + $0x12c] sm:$0x1]  ;;  %4553 = vmatmul.mubr.bf16.gmra.mrb[56].mxu0 %v11566_v50  ;;  %v11488_v32 = vrot.slane %v2199_v35, 9 }
  0xec   :  { %4714 = vmatmul.mubr.bf16.gmra.mrb[56].mxu1 %v11598_v11  ;;  %899 = vst [vmem:[#allocation2 + $0x124] sm:$0x1] %v898_v33  ;;  %v904_v10 = vsel %vm13900_vm3, %v645_v14, %v903_v55  ;;  %v1434_v53 = vrot.slane %v1432_v63, 4  ;;  %v906_v9 = vld [vmem:[#allocation2 + $0x130] sm:$0xf]  ;;  %v11489_v31 = vrot.slane %v2200_v43, 9 }
  0xed   :  { %v1437_v20 = vrot.slane %v1435_v16, 5  ;;  %905 = vst [vmem:[#allocation2 + $0x12c] sm:$0x1] %v904_v10  ;;  %v2301_v17 = vrot.slane %v1720_v24, 5  ;;  %v907_v2 = vsel %vm13936_vm10, %v652_v57, %v906_v9  ;;  %v15109_v63 = vsel %vm13972_vm11, %v11488_v32, %v2297_v44  ;;  %v15127_v10 = vld [vmem:[#allocation2 + $0x10] sm:$0xf] }
  0xee   :  { %908 = vst [vmem:[#allocation2 + $0x130] sm:$0xf] %v907_v2  ;;  %v1778_v24 = vsel %vm13991_vm12, %v14070_v8, %v1777_v7  ;;  %v15129_v46 = vld [vmem:[#allocation2 + $0x18] sm:$0xf]  ;;  %v2456_v43 = vld [vmem:[#allocation2 + $0x14] sm:$0x1] }
  0xef   :  { %v1438_v22 = vor.u32 %v1437_v20, %v1434_v53  ;;  %v15113_v16 = vsel %vm13972_vm11, %v11489_v31, %v2301_v17  ;;  %v15133_v20 = vcombine.low %v1764_v3, %v1778_v24  ;;  %v2489_v9 = vshrl.u32 %v15127_v10, 16 }
  0xf0   :  { %v15103_v50 = vld [vmem:[#allocation2 + $0x128] sm:$0xf]  ;;  %v11632_v8 = vcombine.low %v15109_v63, %v15113_v16  ;;  %v2492_v7 = vshll.u32 %v15127_v10, 16  ;;  %v2498_v17 = vshll.u32 %v2456_v43, 16  ;;  %v2457_v63 = vld [vmem:[#allocation2 + $0x1c] sm:$0x1] }
  0xf1   :  { %v15105_v11 = vld [vmem:[#allocation2 + $0x128] sm:$0xf]  ;;  %v1439_v57 = vrot.slane %v1438_v22, 4  ;;  %v1446_v33 = vshrl.u32 %v15103_v50, 16  ;;  %v1449_v55 = vshll.u32 %v15103_v50, 16  ;;  %v11567_v31 = vcombine.low %v15081_v61, %v15103_v50 }
  0xf2   :  { %19818 = vst [vmem:[#allocation23_spill] sm:$0xff] %v15105_v11  ;;  %v1490_v14 = vld [vmem:[#allocation2 + $0x128] sm:$0xe]  ;;  %v2503_v61 = vshrl.u32 %v15129_v46, 16  ;;  %v2491_v16 = vrot.slane %v2489_v9, 4  ;;  %v2494_v3 = vrot.slane %v2492_v7, 5 }
  0xf3   :  { %v11487_v35 = vrot.slane %v1490_v14, 9  ;;  %v1448_v0 = vrot.slane %v1446_v33, 4  ;;  %v1451_v53 = vrot.slane %v1449_v55, 5  ;;  %v1006_v32 = vld [vmem:[#allocation2 + $0x124] sm:$0x1]  ;;  %v2506_v33 = vshll.u32 %v15129_v46, 16 }
  0xf4   :  { %v1007_v22 = vld [vmem:[#allocation2 + $0x12c] sm:$0x1]  ;;  %v1441_v2 = vshll.u32 %v1006_v32, 16  ;;  %v1680_v14 = vrot.slane %v1006_v32, 5  ;;  %v2500_v7 = vrot.slane %v2498_v17, 5  ;;  %v2512_v62 = vshll.u32 %v2457_v63, 16 }
  0xf5   :  { %v1452_v50 = vor.u32 %v1451_v53, %v1448_v0  ;;  %v1455_v55 = vshll.u32 %v1007_v22, 16  ;;  %v1684_v25 = vrot.slane %v1007_v22, 5  ;;  %v15139_v26 = vld [vmem:[#allocation2 + $0x130] sm:$0xf]  ;;  %v1721_v53 = vld [vmem:[#allocation2 + $0x1c] sm:$0x1] }
  0xf6   :  { %v1443_v24 = vrot.slane %v1441_v2, 5  ;;  %19819 = vst [vmem:[#allocation24_spill] sm:$0xff] %v15139_v26  ;;  %v1681_v43 = vsel %vm13972_vm11, %v11486_v51, %v1680_v14  ;;  %v11615_v9 = vcombine.low %v15105_v11, %v15139_v26  ;;  %v1722_v22 = vld [vmem:[#allocation2 + $0x24] sm:$0x1]  ;;  %v2505_v51 = vrot.slane %v2503_v61, 4 }
  0xf7   :  { %v1453_v44 = vrot.slane %v1452_v50, 4  ;;  %v1457_v32 = vrot.slane %v1455_v55, 5  ;;  %v1685_v1 = vsel %vm13972_vm11, %v11487_v35, %v1684_v25  ;;  %v2495_v50 = vor.u32 %v2494_v3, %v2491_v16  ;;  %v2201_v14 = vld [vmem:[#allocation2 + $0x18] sm:$0xe]  ;;  %v15164_v3 = vld [vmem:[#allocation2 + $0x20] sm:$0xf] }
  0xf8   :  { %v1444_v2 = vsel %vm13991_vm12, %v1439_v57, %v1443_v24  ;;  %4721 = vmatprep.mubr.bf16.mxu1 %v11615_v9  ;;  %v11599_v21 = vcombine.low %v1681_v43, %v1685_v1  ;;  %v2508_v0 = vrot.slane %v2506_v33, 5  ;;  %v11490_v23 = vrot.slane %v2201_v14, 9 }
  0xf9   :  { %v1458_v55 = vsel %vm13991_vm12, %v1453_v44, %v1457_v32  ;;  %v2496_v17 = vrot.slane %v2495_v50, 4  ;;  %v2305_v18 = vrot.slane %v1721_v53, 5  ;;  %v2514_v24 = vrot.slane %v2512_v62, 5 }
  0xfa   :  { %v11583_v11 = vcombine.low %v1444_v2, %v1458_v55  ;;  %4722 = vmatmul.mubr.bf16.gmra.mrb[60].mxu1 %v11599_v21  ;;  %v2509_v57 = vor.u32 %v2508_v0, %v2505_v51  ;;  %v11491_v5 = vrot.slane %v2202_v59, 9  ;;  %v2309_v25 = vrot.slane %v1722_v22, 5  ;;  %v15166_v21 = vld [vmem:[#allocation2 + $0x28] sm:$0xf]  ;;  %v2459_v2 = vld [vmem:[#allocation2 + $0x2c] sm:$0x1] }
  0xfb   :  { %v2501_v35 = vsel %vm13991_vm12, %v2496_v17, %v2500_v7  ;;  %v2306_v44 = vsel %vm13972_vm11, %v11490_v23, %v2305_v18  ;;  %v19820_v61 = vshrl.u32 %v14075_v12, 16  ;;  %v19821_v63 = vshll.u32 %v14075_v12, 16  ;;  %v2458_v18 = vld [vmem:[#allocation2 + $0x24] sm:$0x1] }
  0xfc   :  { %4560 = vmatprep.mubr.bf16.mxu0 %v11583_v11  ;;  %v2510_v59 = vrot.slane %v2509_v57, 4  ;;  %v2310_v62 = vsel %vm13972_vm11, %v11491_v5, %v2309_v25  ;;  %v1789_v11 = vshll.u32 %v1721_v53, 16  ;;  %v19822_v43 = vshrl.u32 %v14097_v42, 16  ;;  %v1723_v25 = vld [vmem:[#allocation2 + $0x2c] sm:$0x1] }
  0xfd   :  { %v1782_v33 = vrot.slane %v19820_v61, 4  ;;  %v1785_v16 = vrot.slane %v19821_v63, 5  ;;  %4561 = vmatmul.mubr.bf16.gmra.mrb[60].mxu0 %v11567_v31  ;;  %v11633_v23 = vcombine.low %v2306_v44, %v2310_v62  ;;  %v19823_v12 = vshll.u32 %v14097_v42, 16 }
  0xfe   :  { %v1796_v0 = vrot.slane %v19822_v43, 4  ;;  %4762 = vmatprep.mubr.bf16.mxu0 %v11632_v8  ;;  %v1803_v7 = vshll.u32 %v1722_v22, 16  ;;  %v2515_v31 = vsel %vm13991_vm12, %v2510_v59, %v2514_v24  ;;  %v1791_v1 = vrot.slane %v1789_v11, 5  ;;  %v1724_v11 = vld [vmem:[#allocation2 + $0x34] sm:$0x1] }
  0xff   :  { %v1786_v32 = vor.u32 %v1785_v16, %v1782_v33  ;;  %v1799_v9 = vrot.slane %v19823_v12, 5  ;;  %v2517_v50 = vshrl.u32 %v15164_v3, 16  ;;  %v2520_v5 = vshll.u32 %v15164_v3, 16  ;;  %v2203_v33 = vld [vmem:[#allocation2 + $0x28] sm:$0xe] }
 0x100   :  { %v11664_v53 = vcombine.low %v2501_v35, %v2515_v31  ;;  %v1805_v55 = vrot.slane %v1803_v7, 5  ;;  %v2526_v57 = vshll.u32 %v2458_v18, 16  ;;  %v2531_v42 = vshrl.u32 %v15166_v21, 16  ;;  %v13529_v35 = vld [vmem:[%s19709_s1 + $0x208] sm:$0xff]   ;;  %v2204_v43 = vld [vmem:[#allocation2 + $0x30] sm:$0xe] }
 0x101   :  { %v1787_v51 = vrot.slane %v1786_v32, 4  ;;  %v1800_v14 = vor.u32 %v1799_v9, %v1796_v0  ;;  %v2519_v8 = vrot.slane %v2517_v50, 4  ;;  %v2522_v17 = vrot.slane %v2520_v5, 5  ;;  %v2208_v0 = vld [vmem:[#allocation2 + $0x60] sm:$0xe] }
 0x102   :  { %4923 = vmatprep.mubr.bf16.mxu1 %v11664_v53  ;;  %v2534_v44 = vshll.u32 %v15166_v21, 16  ;;  %v2540_v61 = vshll.u32 %v2459_v2, 16  ;;  %v19824_v63 = vcombine.low %v15127_v10, %v15129_v46  ;;  %v2528_v59 = vrot.slane %v2526_v57, 5  ;;  %v13674_v2 = vld [vmem:[%s19709_s1 + $0x200] sm:$0xff]  }
 0x103   :  { %v1792_v22 = vsel %vm13991_vm12, %v1787_v51, %v1791_v1  ;;  %v1801_v24 = vrot.slane %v1800_v14, 4  ;;  %v2523_v16 = vor.u32 %v2522_v17, %v2519_v8  ;;  %v2533_v62 = vrot.slane %v2531_v42, 4 }
 0x104   :  { %4924 = vmatmul.mubr.bf16.vlgmr.msra.gmra.mrb[64].mxu1 %v19824_v63  ;;  %v2536_v32 = vrot.slane %v2534_v44, 5  ;;  %v2542_v12 = vrot.slane %v2540_v61, 5  ;;  %v11649_v10 = vcombine.low %v15164_v3, %v15166_v21  ;;  %v11492_v46 = vrot.slane %v2203_v33, 9  ;;  %v15216_v63 = vld [vmem:[#allocation2 + $0x38] sm:$0xf] }
 0x105   :  { %v1806_v18 = vsel %vm13991_vm12, %v1801_v24, %v1805_v55  ;;  %4763 = vmatmul.mubr.bf16.vlgmr.msra.gmra.mrb[64].mxu0 %v15133_v20  ;;  %v2524_v7 = vrot.slane %v2523_v16, 4  ;;  %v2313_v1 = vrot.slane %v1723_v25, 5  ;;  %v11493_v50 = vrot.slane %v2204_v43, 9  ;;  %v15203_v55 = vld [vmem:[#allocation2 + $0x30] sm:$0xf] }
 0x106   :  { %v11617_v9 = vcombine.low %v1792_v22, %v1806_v18  ;;  %13331 = vmatpush3.bf16.msra.mxu0 %v13674_v2  ;;  %4770 = vmatprep.mubr.bf16.mxu0 %v11633_v23  ;;  %v2537_v31 = vor.u32 %v2536_v32, %v2533_v62  ;;  %v2317_v5 = vrot.slane %v1724_v11, 5  ;;  %v19825_v20 = vshrl.u32 %v14173_v49, 16  ;;  %v13532_v23 = vld [vmem:[%s19709_s1 + $0x210] sm:$0xff]   ;;  %v2461_v62 = vld [vmem:[#allocation2 + $0x3c] sm:$0x1] }
 0x107   :  { %v2529_v53 = vsel %vm13991_vm12, %v2524_v7, %v2528_v59  ;;  %v19826_v14 = vshll.u32 %v14173_v49, 16  ;;  %v1817_v21 = vshll.u32 %v1723_v25, 16  ;;  %13332 = vmatprep.subr.bf16.mxu0 %v13529_v35  ;;  %v2314_v17 = vsel %vm13972_vm11, %v11492_v46, %v2313_v1  ;;  %v2460_v49 = vld [vmem:[#allocation2 + $0x34] sm:$0x1]  ;;  %v13535_v32 = vld [vmem:[%s19709_s1 + $0x218] sm:$0xff]   ;;  %v15225_v7 = vpop.f32.mrb[0].mxu1 }
 0x108   :  { %v1810_v51 = vrot.slane %v19825_v20, 4  ;;  %v2538_v8 = vrot.slane %v2537_v31, 4  ;;  %v2318_v57 = vsel %vm13972_vm11, %v11493_v50, %v2317_v5  ;;  %v19827_v42 = vshrl.u32 %v14187_v60, 16  ;;  %v163_v5 = vld [vmem:[#allocation2 + $0x44] sm:$0x1] }
 0x109   :  { %v1813_v3 = vrot.slane %v19826_v14, 5  ;;  %v11634_v24 = vcombine.low %v2314_v17, %v2318_v57  ;;  %v1819_v44 = vrot.slane %v1817_v21, 5  ;;  %v19828_v61 = vshll.u32 %v14187_v60, 16 }
 0x10a   :  { %v1824_v22 = vrot.slane %v19827_v42, 4  ;;  %v2543_v16 = vsel %vm13991_vm12, %v2538_v8, %v2542_v12  ;;  %v1831_v59 = vshll.u32 %v1724_v11, 16  ;;  %v2545_v43 = vshrl.u32 %v15203_v55, 16  ;;  %13333 = vmatpush3.bf16.msra.mxu0 %v13529_v35  ;;  %v15235_v42 = vld [vmem:[#allocation2 + $0x40] sm:$0xe] }
 0x10b   :  { %v1814_v25 = vor.u32 %v1813_v3, %v1810_v51  ;;  %v1827_v33 = vrot.slane %v19828_v61, 5  ;;  %v2548_v18 = vshll.u32 %v15203_v55, 16  ;;  %v11665_v60 = vcombine.low %v2529_v53, %v2543_v16  ;;  %13334 = vmatprep.subr.bf16.mxu0 %v13532_v23  ;;  %v2205_v53 = vld [vmem:[#allocation2 + $0x38] sm:$0xe]  ;;  %v15231_v3 = vpop.f32.mrb[1].mxu1 }
 0x10c   :  { %v2554_v31 = vshll.u32 %v2460_v49, 16  ;;  %v1833_v1 = vrot.slane %v1831_v59, 5  ;;  %v2547_v12 = vrot.slane %v2545_v43, 4  ;;  %v2559_v50 = vshrl.u32 %v15216_v63, 16 }
 0x10d   :  { %v1815_v46 = vrot.slane %v1814_v25, 4  ;;  %v1828_v2 = vor.u32 %v1827_v33, %v1824_v22  ;;  %v2550_v11 = vrot.slane %v2548_v18, 5  ;;  %4771 = vmatmul.mubr.bf16.gmra.mrb[68].mxu0 %v11617_v9  ;;  %4931 = vmatprep.mubr.bf16.mxu1 %v11665_v60  ;;  %v2562_v14 = vshll.u32 %v15216_v63, 16  ;;  %v1725_v9 = vld [vmem:[#allocation2 + $0x3c] sm:$0x1] }
 0x10e   :  { %v2556_v51 = vrot.slane %v2554_v31, 5  ;;  %4932 = vmatmul.mubr.bf16.gmra.mrb[68].mxu1 %v11649_v10  ;;  %4778 = vmatprep.mubr.bf16.mxu0 %v11634_v24  ;;  %v2561_v8 = vrot.slane %v2559_v50, 4  ;;  %v2568_v17 = vshll.u32 %v2461_v62, 16  ;;  %v164_v25 = vsel %vm13910_vm5, 0, %v163_v5  ;;  %v13538_v10 = vld [vmem:[%s19709_s1 + $0x220] sm:$0xff]   ;;  %v15245_v24 = vpop.f32.mrb[0].mxu0 }
 0x10f   :  { %v1820_v35 = vsel %vm13991_vm12, %v1815_v46, %v1819_v44  ;;  %v1829_v20 = vrot.slane %v1828_v2, 4  ;;  %v2551_v21 = vor.u32 %v2550_v11, %v2547_v12  ;;  %v2564_v49 = vrot.slane %v2562_v14, 5  ;;  %13335 = vmatpush3.bf16.msra.mxu0 %v13532_v23  ;;  %165 = vst [vmem:[#allocation2 + $0x44] sm:$0x1] %v164_v25  ;;  %v15247_v62 = vld [vmem:[#allocation2 + $0x40] sm:$0xf] }
 0x110   :  { %v461_v44 = vrot.slane %v14165_v28, 4  ;;  %v2570_v16 = vrot.slane %v2568_v17, 5  ;;  %v11494_v59 = vrot.slane %v2205_v53, 9  ;;  %13336 = vmatprep.subr.bf16.mxu0 %v13535_v32  ;;  %v15249_v43 = vpop.f32.mrb[1].mxu0  ;;  %v2321_v60 = vrot.slane %v1725_v9, 5  ;;  %v15267_v14 = vpop.f32.mrb[2].mxu1 }
 0x111   :  { %v1834_v22 = vsel %vm13991_vm12, %v1829_v20, %v1833_v1  ;;  %v2552_v33 = vrot.slane %v2551_v21, 4  ;;  %v2565_v18 = vor.u32 %v2564_v49, %v2561_v8  ;;  %v19829_v23 = vshrl.u32 %v14270_v30, 16  ;;  %v15254_v2 = vld [vmem:[#allocation2 + $0x48] sm:$0xf]  ;;  %v15256_v31 = vpop.f32.mrb[2].mxu0 }
 0x112   :  { %v11618_v61 = vcombine.low %v1820_v35, %v1834_v22  ;;  %v19830_v12 = vshll.u32 %v14270_v30, 16  ;;  %v1845_v50 = vshll.u32 %v1725_v9, 16  ;;  %v19831_v5 = vshrl.u32 %v14272_v13, 16  ;;  %v13541_v20 = vld [vmem:[%s19709_s1 + $0x228] sm:$0xff]   ;;  %v15276_v9 = vpop.f32.mrb[3].mxu0 }
 0x113   :  { %v1838_v46 = vrot.slane %v19829_v23, 4  ;;  %v2557_v1 = vsel %vm13991_vm12, %v2552_v33, %v2556_v51  ;;  %v2566_v53 = vrot.slane %v2565_v18, 4  ;;  %v15271_v21 = vsel %vm13972_vm11, %v11494_v59, %v2321_v60  ;;  %v2463_v30 = vld [vmem:[#allocation2 + $0x4c] sm:$0x1]  ;;  %13337 = vmatpush3.bf16.msra.mxu0 %v13535_v32  ;;  %v1727_v18 = vld [vmem:[#allocation2 + $0x5c] sm:$0x1] }
 0x114   :  { %v1841_v11 = vrot.slane %v19830_v12, 5  ;;  %v1852_v35 = vrot.slane %v19831_v5, 4  ;;  %v19832_v51 = vshll.u32 %v14272_v13, 16  ;;  %v2573_v17 = vshrl.u32 %v15247_v62, 16  ;;  %13338 = vmatprep.subr.bf16.mxu0 %v13538_v10  ;;  %v15282_v59 = vpop.f32.mrb[3].mxu1 }
 0x115   :  { %v15278_v49 = vrot.slane %v1845_v50, 5  ;;  %v2576_v25 = vshll.u32 %v15247_v62, 16  ;;  %v2587_v33 = vshrl.u32 %v15254_v2, 16  ;;  %4779 = vmatmul.mubr.bf16.gmra.mrb[72].mxu0 %v11618_v61  ;;  %v2571_v13 = vsel %vm13991_vm12, %v2566_v53, %v2570_v16  ;;  %v1728_v12 = vld [vmem:[#allocation2 + $0x64] sm:$0x1]  ;;  %v15289_v28 = vpop.f32.mrb[4].mxu1 }
 0x116   :  { %v1855_v8 = vrot.slane %v19832_v51, 5  ;;  %v1842_v22 = vor.u32 %v1841_v11, %v1838_v46  ;;  %v2575_v23 = vrot.slane %v2573_v17, 4  ;;  %v2590_v32 = vshll.u32 %v15254_v2, 16  ;;  %v2207_v46 = vld [vmem:[#allocation2 + $0x58] sm:$0xe]  ;;  %19833 = vst [vmem:[#allocation25_spill] sm:$0xff] %v15289_v28 }
 0x117   :  { %v11666_v11 = vcombine.low %v2557_v1, %v2571_v13  ;;  %v2578_v5 = vrot.slane %v2576_v25, 5  ;;  %v2589_v51 = vrot.slane %v2587_v33, 4  ;;  %v765_v57 = vld [vmem:[#allocation2 + $0x44] sm:$0x1]  ;;  %v2596_v19 = vshll.u32 %v2463_v30, 16  ;;  %13339 = vmatpush3.bf16.msra.mxu0 %v13538_v10  ;;  %v13544_v10 = vld [vmem:[%s19709_s1 + $0x230] sm:$0xff]  }
 0x118   :  { %v1856_v60 = vor.u32 %v1855_v8, %v1852_v35  ;;  %v15287_v50 = vrot.slane %v1842_v22, 4  ;;  %v2592_v61 = vrot.slane %v2590_v32, 5  ;;  %v15295_v35 = vpop.f32.mrb[5].mxu1  ;;  %v766_v1 = vsel %vm13900_vm3, %v461_v44, %v765_v57  ;;  %13340 = vmatprep.subr.bf16.mxu0 %v13541_v20  ;;  %v15303_v22 = vpop.f32.mrb[4].mxu0  ;;  %v15313_v13 = vld [vmem:[#allocation2 + $0x60] sm:$0xf] }
 0x119   :  { %19834 = vst [vmem:[#allocation26_spill] sm:$0xff] %v15295_v35  ;;  %4939 = vmatprep.mubr.bf16.mxu1 %v11666_v11  ;;  %v2579_v8 = vor.u32 %v2578_v5, %v2575_v23  ;;  %v11496_v17 = vrot.slane %v2207_v46, 9  ;;  %v19835_v30 = vcombine.low %v15203_v55, %v15216_v63  ;;  %767 = vst [vmem:[#allocation2 + $0x44] sm:$0x1] %v766_v1  ;;  %v15311_v44 = vrot.slane %v2596_v19, 5 }
 0x11a   :  { %v15291_v26 = vrot.slane %v1856_v60, 4  ;;  %v2593_v57 = vor.u32 %v2592_v61, %v2589_v51  ;;  %v2329_v25 = vrot.slane %v1727_v18, 5  ;;  %v11497_v33 = vrot.slane %v2208_v0, 9  ;;  %v15315_v60 = vpop.f32.mrb[5].mxu0  ;;  %v2209_v35 = vld [vmem:[#allocation2 + $0x68] sm:$0xe] }
 0x11b   :  { %4940 = vmatmul.mubr.bf16.gmra.mrb[72].mxu1 %v19835_v30  ;;  %v15317_v23 = vrot.slane %v2579_v8, 4  ;;  %v2333_v32 = vrot.slane %v1728_v12, 5  ;;  %v19836_v46 = vshrl.u32 %v14349_v45, 16  ;;  %v19837_v5 = vshll.u32 %v14349_v45, 16  ;;  %13341 = vmatpush3.bf16.msra.mxu0 %v13541_v20  ;;  %v15329_v1 = vpop.f32.mrb[6].mxu0 }
 0x11c   :  { %v2594_v63 = vrot.slane %v2593_v57, 4  ;;  %v15325_v19 = vsel %vm13972_vm11, %v11496_v17, %v2329_v25  ;;  %v1873_v51 = vshll.u32 %v1727_v18, 16  ;;  %v19838_v0 = vshrl.u32 %v14357_v37, 16  ;;  %19839 = vst [vmem:[#allocation27_spill] sm:$0xff] %v15329_v1  ;;  %v2464_v17 = vld [vmem:[#allocation2 + $0x64] sm:$0x1]  ;;  %13342 = vmatprep.subr.bf16.mxu0 %v13544_v10 }
 0x11d   :  { %v1866_v11 = vrot.slane %v19836_v46, 4  ;;  %v1869_v55 = vrot.slane %v19837_v5, 5  ;;  %v15333_v8 = vsel %vm13972_vm11, %v11497_v33, %v2333_v32  ;;  %v19840_v45 = vshll.u32 %v14357_v37, 16  ;;  %v15337_v5 = vld [vmem:[#allocation2 + $0x68] sm:$0xf] }
 0x11e   :  { %v1880_v61 = vrot.slane %v19838_v0, 4  ;;  %v1887_v57 = vshll.u32 %v1728_v12, 16  ;;  %v2599_v18 = vsel %vm13991_vm12, %v2594_v63, %v15311_v44  ;;  %v11636_v20 = vcombine.low %v15325_v19, %v15333_v8  ;;  %v15346_v12 = vpop.f32.mrb[6].mxu1  ;;  %v1729_v1 = vld [vmem:[#allocation2 + $0x6c] sm:$0x1] }
 0x11f   :  { %v1870_v30 = vor.u32 %v1869_v55, %v1866_v11  ;;  %v1883_v46 = vrot.slane %v19840_v45, 5  ;;  %v1875_v25 = vrot.slane %v1873_v51, 5  ;;  %v2601_v33 = vshrl.u32 %v15313_v13, 16  ;;  %19841 = vst [vmem:[#allocation28_spill] sm:$0xff] %v15346_v12  ;;  %13343 = vmatpush3.bf16.msra.mxu0 %v13544_v10 }
 0x120   :  { %v1889_v55 = vrot.slane %v1887_v57, 5  ;;  %v2604_v37 = vshll.u32 %v15313_v13, 16  ;;  %v2610_v45 = vshll.u32 %v2464_v17, 16  ;;  %v2615_v16 = vshrl.u32 %v15337_v5, 16  ;;  %v1726_v44 = vld [vmem:[#allocation2 + $0x44] sm:$0x1] }
 0x121   :  { %v1871_v32 = vrot.slane %v1870_v30, 4  ;;  %v1884_v11 = vor.u32 %v1883_v46, %v1880_v61  ;;  %v2603_v0 = vrot.slane %v2601_v33, 4  ;;  %v2618_v53 = vshll.u32 %v15337_v5, 16  ;;  %v2462_v63 = vld [vmem:[#allocation2 + $0x44] sm:$0x1] }
 0x122   :  { %v2606_v8 = vrot.slane %v2604_v37, 5  ;;  %v2325_v30 = vrot.slane %v1726_v44, 5  ;;  %v1859_v46 = vshll.u32 %v1726_v44, 16  ;;  %v2582_v57 = vshll.u32 %v2462_v63, 16  ;;  %v2465_v33 = vld [vmem:[#allocation2 + $0x6c] sm:$0x1] }
 0x123   :  { %v1876_v19 = vsel %vm13991_vm12, %v1871_v32, %v1875_v25  ;;  %v1885_v51 = vrot.slane %v1884_v11, 4  ;;  %v2612_v17 = vrot.slane %v2610_v45, 5  ;;  %v2617_v10 = vrot.slane %v2615_v16, 4 }
 0x124   :  { %v2607_v52 = vor.u32 %v2606_v8, %v2603_v0  ;;  %v2620_v12 = vrot.slane %v2618_v53, 5  ;;  %v19842_v25 = vrot.slane %v15235_v42, 9  ;;  %v1861_v11 = vrot.slane %v1859_v46, 5  ;;  %v2210_v0 = vld [vmem:[#allocation2 + $0x70] sm:$0xe]  ;;  %v15376_v8 = vpop.f32.mrb[7].mxu0 }
 0x125   :  { %v1890_v29 = vsel %vm13991_vm12, %v1885_v51, %v1889_v55  ;;  %v2584_v37 = vrot.slane %v2582_v57, 5  ;;  %v2624_v28 = vshll.u32 %v2465_v33, 16  ;;  %v1730_v55 = vld [vmem:[#allocation2 + $0x74] sm:$0x1]  ;;  %v11498_v53 = vrot.slane %v2209_v35, 9  ;;  %v15380_v46 = vpop.f32.mrb[7].mxu1 }
 0x126   :  { %v2326_v32 = vsel %vm13972_vm11, %v19842_v25, %v2325_v30  ;;  %v15360_v61 = vcombine.low %v1876_v19, %v1890_v29  ;;  %v2608_v45 = vrot.slane %v2607_v52, 4  ;;  %v2621_v63 = vor.u32 %v2620_v12, %v2617_v10 }
 0x127   :  { %v11635_v44 = vcombine.low %v15271_v21, %v2326_v32  ;;  %v1862_v16 = vsel %vm13991_vm12, %v15291_v26, %v1861_v11  ;;  %v2585_v42 = vsel %vm13991_vm12, %v15317_v23, %v2584_v37  ;;  %v2337_v51 = vrot.slane %v1729_v1, 5 }
 0x128   :  { %v19843_v52 = vsel %vm13991_vm12, %v15287_v50, %v15278_v49  ;;  %v11667_v21 = vcombine.low %v2585_v42, %v2599_v18  ;;  %v2613_v12 = vsel %vm13991_vm12, %v2608_v45, %v2612_v17  ;;  %v2622_v19 = vrot.slane %v2621_v63, 4  ;;  %v2466_v45 = vld [vmem:[#allocation2 + $0x74] sm:$0x1] }
 0x129   :  { %4786 = vmatprep.mubr.bf16.mxu0 %v11635_v44  ;;  %v11619_v29 = vcombine.low %v19843_v52, %v1862_v16  ;;  %v2626_v26 = vrot.slane %v2624_v28, 5  ;;  %v2338_v23 = vsel %vm13972_vm11, %v11498_v53, %v2337_v51  ;;  %v11499_v35 = vrot.slane %v2210_v0, 9  ;;  %v15388_v28 = vld [vmem:[#allocation2 + $0x70] sm:$0xf]  ;;  %v15399_v44 = vld [vmem:[#allocation2 + $0x78] sm:$0xf] }
 0x12a   :  { %v2341_v30 = vrot.slane %v1730_v55, 5  ;;  %4947 = vmatprep.mubr.bf16.mxu1 %v11667_v21  ;;  %v19844_v49 = vshrl.u32 %v14435_v4, 16  ;;  %v19845_v18 = vshll.u32 %v14435_v4, 16  ;;  %v1901_v33 = vshll.u32 %v1729_v1, 16 }
 0x12b   :  { %4787 = vmatmul.mubr.bf16.gmra.mrb[76].mxu0 %v11619_v29  ;;  %v19846_v17 = vshrl.u32 %v14443_v54, 16  ;;  %v19847_v25 = vcombine.low %v15247_v62, %v15254_v2  ;;  %v2627_v32 = vsel %vm13991_vm12, %v2622_v19, %v2626_v26  ;;  %v19848_v4 = vshll.u32 %v14443_v54, 16  ;;  %v2467_v62 = vld [vmem:[#allocation2 + $0x7c] sm:$0x1]  ;;  %v15401_v2 = vpop.f32.mrb[8].mxu0  ;;  %v15405_v54 = vpop.f32.mrb[8].mxu1 }
 0x12c   :  { %v1894_v50 = vrot.slane %v19844_v49, 4  ;;  %v1897_v57 = vrot.slane %v19845_v18, 5  ;;  %4794 = vmatprep.mubr.bf16.mxu0 %v11636_v20  ;;  %v2342_v11 = vsel %vm13972_vm11, %v11499_v35, %v2341_v30  ;;  %v1915_v1 = vshll.u32 %v1730_v55, 16  ;;  %v1731_v29 = vld [vmem:[#allocation2 + $0x7c] sm:$0x1] }
 0x12d   :  { %v1908_v10 = vrot.slane %v19846_v17, 4  ;;  %4948 = vmatmul.mubr.bf16.gmra.mrb[76].mxu1 %v19847_v25  ;;  %v1911_v37 = vrot.slane %v19848_v4, 5  ;;  %v11668_v63 = vcombine.low %v2613_v12, %v2627_v32  ;;  %v11637_v0 = vcombine.low %v2338_v23, %v2342_v11  ;;  %v1732_v26 = vld [vmem:[#allocation2 + $0x84] sm:$0x1]  ;;  %v15411_v25 = vpop.f32.mrb[9].mxu0 }
 0x12e   :  { %v1898_v16 = vor.u32 %v1897_v57, %v1894_v50  ;;  %v1903_v42 = vrot.slane %v1901_v33, 5  ;;  %v1917_v53 = vrot.slane %v1915_v1, 5  ;;  %v2629_v51 = vshrl.u32 %v15388_v28, 16  ;;  %v2211_v50 = vld [vmem:[#allocation2 + $0x78] sm:$0xe]  ;;  %v15417_v1 = vpop.f32.mrb[9].mxu1 }
 0x12f   :  { %v1912_v20 = vor.u32 %v1911_v37, %v1908_v10  ;;  %v2632_v52 = vshll.u32 %v15388_v28, 16  ;;  %4955 = vmatprep.mubr.bf16.mxu1 %v11668_v63  ;;  %v2638_v21 = vshll.u32 %v2466_v45, 16  ;;  %v2643_v12 = vshrl.u32 %v15399_v44, 16  ;;  %v2212_v10 = vld [vmem:[#allocation2 + $0x80] sm:$0xe] }
 0x130   :  { %v1899_v55 = vrot.slane %v1898_v16, 4  ;;  %v2646_v19 = vshll.u32 %v15399_v44, 16  ;;  %v2631_v35 = vrot.slane %v2629_v51, 4  ;;  %v2652_v49 = vshll.u32 %v2467_v62, 16  ;;  %v15420_v62 = vld [vmem:[#allocation2 + $0x80] sm:$0xf] }
 0x131   :  { %v1913_v23 = vrot.slane %v1912_v20, 4  ;;  %v2634_v30 = vrot.slane %v2632_v52, 5  ;;  %v2640_v57 = vrot.slane %v2638_v21, 5  ;;  %v2645_v33 = vrot.slane %v2643_v12, 4 }
 0x132   :  { %v1904_v18 = vsel %vm13991_vm12, %v1899_v55, %v1903_v42  ;;  %v2648_v17 = vrot.slane %v2646_v19, 5  ;;  %v2654_v4 = vrot.slane %v2652_v49, 5  ;;  %v11653_v37 = vcombine.low %v15388_v28, %v15399_v44  ;;  %v15427_v55 = vld [vmem:[#allocation2 + $0x88] sm:$0xf] }
 0x133   :  { %v1918_v32 = vsel %vm13991_vm12, %v1913_v23, %v1917_v53  ;;  %v2635_v11 = vor.u32 %v2634_v30, %v2631_v35  ;;  %4795 = vmatmul.mubr.bf16.gmra.mrb[80].mxu0 %v15360_v61  ;;  %v11500_v16 = vrot.slane %v2211_v50, 9  ;;  %v2345_v42 = vrot.slane %v1731_v29, 5  ;;  %v2468_v35 = vld [vmem:[#allocation2 + $0x84] sm:$0x1] }
 0x134   :  { %v11621_v45 = vcombine.low %v1904_v18, %v1918_v32  ;;  %v2649_v63 = vor.u32 %v2648_v17, %v2645_v33  ;;  %v19849_v20 = vcombine.low %v15313_v13, %v15337_v5  ;;  %4802 = vmatprep.mubr.bf16.mxu0 %v11637_v0  ;;  %v11501_v51 = vrot.slane %v2212_v10, 9  ;;  %v15433_v13 = vpop.f32.mrb[10].mxu0  ;;  %v15445_v10 = vpop.f32.mrb[10].mxu1 }
 0x135   :  { %v2636_v53 = vrot.slane %v2635_v11, 4  ;;  %v2349_v52 = vrot.slane %v1732_v26, 5  ;;  %v19850_v28 = vshrl.u32 %v14486_v56, 16  ;;  %v2346_v21 = vsel %vm13972_vm11, %v11500_v16, %v2345_v42 }
 0x136   :  { %4956 = vmatmul.mubr.bf16.gmra.mrb[80].mxu1 %v19849_v20  ;;  %v2650_v61 = vrot.slane %v2649_v63, 4  ;;  %v19851_v12 = vshll.u32 %v14486_v56, 16  ;;  %v1929_v23 = vshll.u32 %v1731_v29, 16  ;;  %v19852_v30 = vshrl.u32 %v14500_v6, 16  ;;  %v2469_v63 = vld [vmem:[#allocation2 + $0x8c] sm:$0x1] }
 0x137   :  { %v1922_v44 = vrot.slane %v19850_v28, 4  ;;  %v2641_v5 = vsel %vm13991_vm12, %v2636_v53, %v2640_v57  ;;  %v2350_v0 = vsel %vm13972_vm11, %v11501_v51, %v2349_v52  ;;  %v19853_v50 = vshll.u32 %v14500_v6, 16  ;;  %v187_v51 = vld [vmem:[#allocation2 + $0x94] sm:$0x1] }
 0x138   :  { %v1925_v19 = vrot.slane %v19851_v12, 5  ;;  %v1936_v49 = vrot.slane %v19852_v30, 4  ;;  %v2655_v56 = vsel %vm13991_vm12, %v2650_v61, %v2654_v4  ;;  %v11638_v33 = vcombine.low %v2346_v21, %v2350_v0  ;;  %v1733_v61 = vld [vmem:[#allocation2 + $0x8c] sm:$0x1] }
 0x139   :  { %v1939_v18 = vrot.slane %v19853_v50, 5  ;;  %v1931_v17 = vrot.slane %v1929_v23, 5  ;;  %v11669_v32 = vcombine.low %v2641_v5, %v2655_v56  ;;  %v1943_v57 = vshll.u32 %v1732_v26, 16  ;;  %v2213_v23 = vld [vmem:[#allocation2 + $0x88] sm:$0xe]  ;;  %v15453_v5 = vpop.f32.mrb[11].mxu0 }
 0x13a   :  { %v1926_v29 = vor.u32 %v1925_v19, %v1922_v44  ;;  %v2657_v16 = vshrl.u32 %v15420_v62, 16  ;;  %v2660_v20 = vshll.u32 %v15420_v62, 16  ;;  %v2666_v53 = vshll.u32 %v2468_v35, 16 }
 0x13b   :  { %v1940_v11 = vor.u32 %v1939_v18, %v1936_v49  ;;  %v2671_v6 = vshrl.u32 %v15427_v55, 16  ;;  %4963 = vmatprep.mubr.bf16.mxu1 %v11669_v32  ;;  %v1945_v52 = vrot.slane %v1943_v57, 5  ;;  %v2674_v44 = vshll.u32 %v15427_v55, 16  ;;  %4803 = vmatmul.mubr.bf16.gmra.mrb[84].mxu0 %v11621_v45  ;;  %v15459_v45 = vld [vmem:[#allocation2 + $0x90] sm:$0xe]  ;;  %v15466_v57 = vpop.f32.mrb[11].mxu1 }
 0x13c   :  { %v1927_v42 = vrot.slane %v1926_v29, 4  ;;  %v2659_v28 = vrot.slane %v2657_v16, 4  ;;  %v2662_v21 = vrot.slane %v2660_v20, 5  ;;  %v2668_v12 = vrot.slane %v2666_v53, 5  ;;  %4810 = vmatprep.mubr.bf16.mxu0 %v11638_v33  ;;  %19854 = vst [vmem:[#allocation29_spill] sm:$0xff] %v15466_v57 }
 0x13d   :  { %v1941_v4 = vrot.slane %v1940_v11, 4  ;;  %v2673_v19 = vrot.slane %v2671_v6, 4  ;;  %v2676_v0 = vrot.slane %v2674_v44, 5  ;;  %v2680_v30 = vshll.u32 %v2469_v63, 16  ;;  %v15464_v11 = vld [vmem:[#allocation2 + $0x90] sm:$0xf] }
 0x13e   :  { %v1932_v26 = vsel %vm13991_vm12, %v1927_v42, %v1931_v17  ;;  %4964 = vmatmul.mubr.bf16.gmra.mrb[84].mxu1 %v11653_v37  ;;  %v11654_v49 = vcombine.low %v15420_v62, %v15427_v55  ;;  %v2663_v18 = vor.u32 %v2662_v21, %v2659_v28  ;;  %v188_v56 = vsel %vm13910_vm5, 0, %v187_v51  ;;  %v15473_v53 = vld [vmem:[#allocation2 + $0x98] sm:$0xf]  ;;  %v2471_v28 = vld [vmem:[#allocation2 + $0x9c] sm:$0x1]  ;;  %v15481_v44 = vpop.f32.mrb[12].mxu0 }
 0x13f   :  { %v1946_v35 = vsel %vm13991_vm12, %v1941_v4, %v1945_v52  ;;  %v525_v29 = vrot.slane %v14543_v15, 4  ;;  %v2677_v17 = vor.u32 %v2676_v0, %v2673_v19  ;;  %v2682_v37 = vrot.slane %v2680_v30, 5  ;;  %189 = vst [vmem:[#allocation2 + $0x94] sm:$0x1] %v188_v56  ;;  %19858 = vst [vmem:[#allocation30_spill] sm:$0xff] %v15481_v44  ;;  %v15494_v56 = vpop.f32.mrb[12].mxu1 }
 0x140   :  { %v11622_v50 = vcombine.low %v1932_v26, %v1946_v35  ;;  %v11502_v33 = vrot.slane %v2213_v23, 9  ;;  %v2353_v32 = vrot.slane %v1733_v61, 5  ;;  %v2664_v63 = vrot.slane %v2663_v18, 4  ;;  %v2215_v35 = vld [vmem:[#allocation2 + $0xa8] sm:$0xe]  ;;  %19860 = vst [vmem:[#allocation31_spill] sm:$0xff] %v15494_v56 }
 0x141   :  { %v19855_v55 = vshrl.u32 %v14581_v40, 16  ;;  %v19856_v42 = vshll.u32 %v14581_v40, 16  ;;  %v2678_v15 = vrot.slane %v2677_v17, 4  ;;  %v1957_v51 = vshll.u32 %v1733_v61, 16 }
 0x142   :  { %v15477_v6 = vsel %vm13972_vm11, %v11502_v33, %v2353_v32  ;;  %v19857_v4 = vshrl.u32 %v14610_v36, 16  ;;  %v2669_v26 = vsel %vm13991_vm12, %v2664_v63, %v2668_v12  ;;  %v19859_v40 = vshll.u32 %v14610_v36, 16  ;;  %v1735_v32 = vld [vmem:[#allocation2 + $0xac] sm:$0x1]  ;;  %v1736_v63 = vld [vmem:[#allocation2 + $0xb4] sm:$0x1] }
 0x143   :  { %v1950_v16 = vrot.slane %v19855_v55, 4  ;;  %v1953_v20 = vrot.slane %v19856_v42, 5  ;;  %v2685_v23 = vshrl.u32 %v15464_v11, 16  ;;  %v2683_v0 = vsel %vm13991_vm12, %v2678_v15, %v2682_v37  ;;  %4811 = vmatmul.mubr.bf16.gmra.mrb[88].mxu0 %v11622_v50  ;;  %v15517_v50 = vld [vmem:[#allocation2 + $0xb0] sm:$0xf] }
 0x144   :  { %v1964_v52 = vrot.slane %v19857_v4, 4  ;;  %v1967_v19 = vrot.slane %v19859_v40, 5  ;;  %v15490_v61 = vrot.slane %v1957_v51, 5  ;;  %v2688_v30 = vshll.u32 %v15464_v11, 16 }
 0x145   :  { %v1954_v21 = vor.u32 %v1953_v20, %v1950_v16  ;;  %v2699_v18 = vshrl.u32 %v15473_v53, 16  ;;  %v11670_v12 = vcombine.low %v2669_v26, %v2683_v0  ;;  %v2687_v33 = vrot.slane %v2685_v23, 4  ;;  %v2216_v20 = vld [vmem:[#allocation2 + $0xb0] sm:$0xe] }
 0x146   :  { %v1968_v36 = vor.u32 %v1967_v19, %v1964_v52  ;;  %v2690_v55 = vrot.slane %v2688_v30, 5  ;;  %v2702_v37 = vshll.u32 %v15473_v53, 16  ;;  %v2708_v42 = vshll.u32 %v2471_v28, 16  ;;  %v813_v15 = vld [vmem:[#allocation2 + $0x94] sm:$0x1] }
 0x147   :  { %v15496_v17 = vrot.slane %v1954_v21, 4  ;;  %v2701_v16 = vrot.slane %v2699_v18, 4  ;;  %4971 = vmatprep.mubr.bf16.mxu1 %v11670_v12  ;;  %v11504_v52 = vrot.slane %v2215_v35, 9  ;;  %v814_v26 = vsel %vm13900_vm3, %v525_v29, %v813_v15  ;;  %v15519_v29 = vpop.f32.mrb[13].mxu0 }
 0x148   :  { %v15503_v51 = vrot.slane %v1968_v36, 4  ;;  %4972 = vmatmul.mubr.bf16.gmra.mrb[88].mxu1 %v11654_v49  ;;  %v2691_v21 = vor.u32 %v2690_v55, %v2687_v33  ;;  %v2704_v28 = vrot.slane %v2702_v37, 5  ;;  %v15509_v40 = vrot.slane %v2708_v42, 5  ;;  %815 = vst [vmem:[#allocation2 + $0x94] sm:$0x1] %v814_v26  ;;  %19863 = vst [vmem:[#allocation32_spill] sm:$0xff] %v15519_v29 }
 0x149   :  { %v2361_v19 = vrot.slane %v1735_v32, 5  ;;  %v11505_v23 = vrot.slane %v2216_v20, 9  ;;  %v2365_v0 = vrot.slane %v1736_v63, 5  ;;  %v19861_v30 = vshrl.u32 %v14661_v41, 16  ;;  %v15533_v20 = vld [vmem:[#allocation2 + $0xb8] sm:$0xf] }
 0x14a   :  { %v15513_v12 = vrot.slane %v2691_v21, 4  ;;  %v2705_v36 = vor.u32 %v2704_v28, %v2701_v16  ;;  %v19862_v35 = vshll.u32 %v14661_v41, 16  ;;  %v1985_v4 = vshll.u32 %v1735_v32, 16  ;;  %v2472_v32 = vld [vmem:[#allocation2 + $0xb4] sm:$0x1] }
 0x14b   :  { %v1978_v18 = vrot.slane %v19861_v30, 4  ;;  %v15523_v33 = vsel %vm13972_vm11, %v11504_v52, %v2361_v19  ;;  %v15527_v55 = vsel %vm13972_vm11, %v11505_v23, %v2365_v0  ;;  %v19864_v37 = vshrl.u32 %v14682_v58, 16  ;;  %v2473_v30 = vld [vmem:[#allocation2 + $0xbc] sm:$0x1] }
 0x14c   :  { %v1981_v49 = vrot.slane %v19862_v35, 5  ;;  %v19865_v16 = vshll.u32 %v14682_v58, 16  ;;  %v2706_v15 = vrot.slane %v2705_v36, 4  ;;  %v1987_v52 = vrot.slane %v1985_v4, 5  ;;  %v15539_v35 = vpop.f32.mrb[13].mxu1  ;;  %v15541_v58 = vpop.f32.mrb[14].mxu0 }
 0x14d   :  { %v1992_v42 = vrot.slane %v19864_v37, 4  ;;  %v1999_v19 = vshll.u32 %v1736_v63, 16  ;;  %v2713_v23 = vshrl.u32 %v15517_v50, 16  ;;  %v2716_v0 = vshll.u32 %v15517_v50, 16  ;;  %19866 = vst [vmem:[#allocation33_spill] sm:$0xff] %v15539_v35  ;;  %19867 = vst [vmem:[#allocation34_spill] sm:$0xff] %v15541_v58 }
 0x14e   :  { %v1995_v41 = vrot.slane %v19865_v16, 5  ;;  %v1982_v21 = vor.u32 %v1981_v49, %v1978_v18  ;;  %v13547_v36 = vld [vmem:[%s19709_s1 + $0x238] sm:$0xff]   ;;  %v2711_v18 = vsel %vm13991_vm12, %v2706_v15, %v15509_v40  ;;  %v2722_v49 = vshll.u32 %v2472_v32, 16  ;;  %v15552_v16 = vpop.f32.mrb[15].mxu0 }
 0x14f   :  { %v2727_v63 = vshrl.u32 %v15533_v20, 16  ;;  %v2217_v37 = vld [vmem:[#allocation2 + $0xb8] sm:$0xe]  ;;  %19869 = vst [vmem:[#allocation36_spill] sm:$0xff] %v15552_v16  ;;  %v2001_v26 = vrot.slane %v1999_v19, 5  ;;  %v2715_v62 = vrot.slane %v2713_v23, 4  ;;  %13344 = vmatprep.subr.bf16.mxu0 %v13547_v36 }
 0x150   :  { %v1996_v28 = vor.u32 %v1995_v41, %v1992_v42  ;;  %v1983_v4 = vrot.slane %v1982_v21, 4  ;;  %v15550_v42 = vpop.f32.mrb[14].mxu1  ;;  %v2718_v58 = vrot.slane %v2716_v0, 5  ;;  %v15556_v56 = vpop.f32.mrb[16].mxu0  ;;  %v1734_v29 = vld [vmem:[#allocation2 + $0x94] sm:$0x1]  ;;  %13345 = vmatpush3.bf16.msra.mxu0 %v13547_v36 }
 0x151   :  { %19868 = vst [vmem:[#allocation35_spill] sm:$0xff] %v15550_v42  ;;  %v15554_v35 = vpop.f32.mrb[15].mxu1  ;;  %19871 = vst [vmem:[#allocation38_spill] sm:$0xff] %v15556_v56  ;;  %v2470_v40 = vld [vmem:[#allocation2 + $0x94] sm:$0x1]  ;;  %v15560_v15 = vrot.slane %v2722_v49, 5 }
 0x152   :  { %v1997_v41 = vrot.slane %v1996_v28, 4  ;;  %19870 = vst [vmem:[#allocation37_spill] sm:$0xff] %v15554_v35  ;;  %v1988_v32 = vsel %vm13991_vm12, %v1983_v4, %v1987_v52  ;;  %v2729_v21 = vrot.slane %v2727_v63, 4  ;;  %v2357_v28 = vrot.slane %v1734_v29, 5  ;;  %v15566_v35 = vpop.f32.mrb[16].mxu1 }
 0x153   :  { %v1971_v19 = vshll.u32 %v1734_v29, 16  ;;  %v2694_v23 = vshll.u32 %v2470_v40, 16  ;;  %v2719_v16 = vor.u32 %v2718_v58, %v2715_v62  ;;  %v2730_v52 = vshll.u32 %v15533_v20, 16  ;;  %v1737_v49 = vld [vmem:[#allocation2 + $0xbc] sm:$0x1] }
 0x154   :  { %v2002_v0 = vsel %vm13991_vm12, %v1997_v41, %v2001_v26  ;;  %v2736_v4 = vshll.u32 %v2473_v30, 16  ;;  %v2218_v63 = vld [vmem:[#allocation2 + $0xc0] sm:$0xe]  ;;  %v19872_v44 = vrot.slane %v15459_v45, 9  ;;  %v1738_v42 = vld [vmem:[#allocation2 + $0xc4] sm:$0x1] }
 0x155   :  { %v15568_v56 = vcombine.low %v1988_v32, %v2002_v0  ;;  %v1973_v29 = vrot.slane %v1971_v19, 5  ;;  %v2696_v40 = vrot.slane %v2694_v23, 5  ;;  %v11506_v57 = vrot.slane %v2217_v37, 9  ;;  %v15575_v26 = vpop.f32.mrb[17].mxu0  ;;  %v15578_v0 = vpop.f32.mrb[17].mxu1 }
 0x156   :  { %v2358_v36 = vsel %vm13972_vm11, %v19872_v44, %v2357_v28  ;;  %v2720_v32 = vrot.slane %v2719_v16, 4  ;;  %v2732_v62 = vrot.slane %v2730_v52, 5  ;;  %v2738_v58 = vrot.slane %v2736_v4, 5 }
 0x157   :  { %v11639_v41 = vcombine.low %v15477_v6, %v2358_v36  ;;  %v1974_v45 = vsel %vm13991_vm12, %v15503_v51, %v1973_v29  ;;  %v2697_v44 = vsel %vm13991_vm12, %v15513_v12, %v2696_v40  ;;  %v2369_v30 = vrot.slane %v1737_v49, 5  ;;  %v15594_v51 = vld [vmem:[#allocation2 + $0xc0] sm:$0xf] }
 0x158   :  { %v11507_v28 = vrot.slane %v2218_v63, 9  ;;  %v19873_v6 = vsel %vm13991_vm12, %v15496_v17, %v15490_v61  ;;  %v11671_v16 = vcombine.low %v2697_v44, %v2711_v18  ;;  %v2725_v19 = vsel %vm13991_vm12, %v2720_v32, %v15560_v15  ;;  %v15604_v17 = vpop.f32.mrb[18].mxu0  ;;  %v15606_v18 = vpop.f32.mrb[18].mxu1 }
 0x159   :  { %4818 = vmatprep.mubr.bf16.mxu0 %v11639_v41  ;;  %v11623_v37 = vcombine.low %v19873_v6, %v1974_v45  ;;  %v2733_v23 = vor.u32 %v2732_v62, %v2729_v21  ;;  %v15598_v12 = vsel %vm13972_vm11, %v11506_v57, %v2369_v30  ;;  %v2373_v52 = vrot.slane %v1738_v42, 5  ;;  %v15612_v32 = vpop.f32.mrb[19].mxu0  ;;  %v15614_v62 = vpop.f32.mrb[19].mxu1  ;;  %v15624_v6 = vld [vmem:[#allocation2 + $0xc8] sm:$0xf] }
 0x15a   :  { %v19874_v4 = vshrl.u32 %v14753_v48, 16  ;;  %v19875_v36 = vshll.u32 %v14753_v48, 16  ;;  %4979 = vmatprep.mubr.bf16.mxu1 %v11671_v16  ;;  %v2013_v21 = vshll.u32 %v1737_v49, 16  ;;  %v19876_v29 = vshrl.u32 %v14770_v47, 16 }
 0x15b   :  { %4819 = vmatmul.mubr.bf16.gmra.mrb[92].mxu0 %v11623_v37  ;;  %v2734_v15 = vrot.slane %v2733_v23, 4  ;;  %v19877_v57 = vshll.u32 %v14770_v47, 16  ;;  %v19878_v48 = vcombine.low %v15464_v11, %v15473_v53  ;;  %v19879_v45 = vcombine.low %v15523_v33, %v15527_v55  ;;  %v2474_v47 = vld [vmem:[#allocation2 + $0xc4] sm:$0x1]  ;;  %v15630_v33 = vpop.f32.mrb[20].mxu0 }
 0x15c   :  { %v2006_v63 = vrot.slane %v19874_v4, 4  ;;  %v2009_v61 = vrot.slane %v19875_v36, 5  ;;  %v2020_v40 = vrot.slane %v19876_v29, 4  ;;  %v2374_v49 = vsel %vm13972_vm11, %v11507_v28, %v2373_v52  ;;  %v2475_v4 = vld [vmem:[#allocation2 + $0xcc] sm:$0x1] }
 0x15d   :  { %v2023_v41 = vrot.slane %v19877_v57, 5  ;;  %4980 = vmatmul.mubr.bf16.gmra.mrb[92].mxu1 %v19878_v48  ;;  %4826 = vmatprep.mubr.bf16.mxu0 %v19879_v45  ;;  %v2027_v30 = vshll.u32 %v1738_v42, 16  ;;  %v2741_v37 = vshrl.u32 %v15594_v51, 16  ;;  %v2739_v16 = vsel %vm13991_vm12, %v2734_v15, %v2738_v58  ;;  %v1739_v42 = vld [vmem:[#allocation2 + $0xcc] sm:$0x1]  ;;  %v15643_v45 = vpop.f32.mrb[21].mxu0 }
 0x15e   :  { %v2010_v44 = vor.u32 %v2009_v61, %v2006_v63  ;;  %v11641_v11 = vcombine.low %v15598_v12, %v2374_v49  ;;  %v2015_v53 = vrot.slane %v2013_v21, 5  ;;  %v11672_v55 = vcombine.low %v2725_v19, %v2739_v16  ;;  %v15632_v63 = vld [vmem:[#allocation2 + $0xd4] sm:$0x1]  ;;  %v15634_v61 = vpop.f32.mrb[20].mxu1  ;;  %v2219_v15 = vld [vmem:[#allocation2 + $0xc8] sm:$0xe] }
 0x15f   :  { %v2024_v23 = vor.u32 %v2023_v41, %v2020_v40  ;;  %v2029_v28 = vrot.slane %v2027_v30, 5  ;;  %v2743_v52 = vrot.slane %v2741_v37, 4  ;;  %19880 = vst [vmem:[#allocation39_spill] sm:$0xff] %v15634_v61  ;;  %v2744_v57 = vshll.u32 %v15594_v51, 16  ;;  %v2220_v48 = vld [vmem:[#allocation2 + $0xd0] sm:$0xe] }
 0x160   :  { %v2011_v36 = vrot.slane %v2010_v44, 4  ;;  %v2750_v58 = vshll.u32 %v2474_v47, 16  ;;  %v2755_v12 = vshrl.u32 %v15624_v6, 16  ;;  %4987 = vmatprep.mubr.bf16.mxu1 %v11672_v55  ;;  %v2758_v19 = vshll.u32 %v15624_v6, 16  ;;  %19881 = vst [vmem:[#allocation40_spill] sm:$0xff] %v15643_v45  ;;  %v15645_v49 = vpop.f32.mrb[21].mxu1 }
 0x161   :  { %v2025_v29 = vrot.slane %v2024_v23, 4  ;;  %v2764_v40 = vshll.u32 %v2475_v4, 16  ;;  %19882 = vst [vmem:[#allocation41_spill] sm:$0xff] %v15645_v49  ;;  %v2746_v30 = vrot.slane %v2744_v57, 5  ;;  %v15649_v16 = vpop.f32.mrb[22].mxu0  ;;  %v2377_v45 = vrot.slane %v1739_v42, 5 }
 0x162   :  { %v2016_v21 = vsel %vm13991_vm12, %v2011_v36, %v2015_v53  ;;  %v2752_v47 = vrot.slane %v2750_v58, 5  ;;  %v2757_v37 = vrot.slane %v2755_v12, 4  ;;  %v15651_v53 = vpop.f32.mrb[22].mxu1  ;;  %v2760_v4 = vrot.slane %v2758_v19, 5  ;;  %v15653_v41 = vpop.f32.mrb[23].mxu0 }
 0x163   :  { %v2030_v44 = vsel %vm13991_vm12, %v2025_v29, %v2029_v28  ;;  %19883 = vst [vmem:[#allocation42_spill] sm:$0xff] %v15651_v53  ;;  %v2766_v55 = vrot.slane %v2764_v40, 5  ;;  %v11508_v36 = vrot.slane %v2219_v15, 9  ;;  %v15655_v61 = vpop.f32.mrb[23].mxu1  ;;  %4827 = vmatmul.mubr.bf16.gmra.mrb[96].mxu0 %v15568_v56  ;;  %v2747_v49 = vor.u32 %v2746_v30, %v2743_v52  ;;  %v15659_v57 = vpop.f32.mrb[24].mxu0  ;;  %v19887_v15 = vld [vmem:[#allocation11_spill] sm:$0xff] }
 0x164   :  { %v11625_v23 = vcombine.low %v2016_v21, %v2030_v44  ;;  %19884 = vst [vmem:[#allocation43_spill] sm:$0xff] %v15655_v61  ;;  %v11509_v28 = vrot.slane %v2220_v48, 9  ;;  %v2381_v29 = vrot.slane %v15632_v63, 5  ;;  %19885 = vst [vmem:[#allocation44_spill] sm:$0xff] %v15659_v57  ;;  %v19886_v58 = vcombine.low %v15517_v50, %v15533_v20  ;;  %4834 = vmatprep.mubr.bf16.mxu0 %v11641_v11  ;;  %v15668_v52 = vld [vmem:[#allocation2 + $0xd0] sm:$0xf] }
 0x165   :  { %v2761_v12 = vor.u32 %v2760_v4, %v2757_v37  ;;  %v19888_v21 = vshrl.u32 %v19887_v15, 16  ;;  %v19889_v40 = vshll.u32 %v19887_v15, 16  ;;  %v2041_v56 = vshll.u32 %v1739_v42, 16  ;;  %v15670_v48 = vpop.f32.mrb[24].mxu1  ;;  %v19891_v20 = vld [vmem:[#allocation12_spill] sm:$0xff]  ;;  %v15680_v53 = vpop.f32.mrb[25].mxu0 }
 0x166   :  { %4988 = vmatmul.mubr.bf16.gmra.mrb[96].mxu1 %v19886_v58  ;;  %19890 = vst [vmem:[#allocation11_spill] sm:$0xff] %v15670_v48  ;;  %v2748_v30 = vrot.slane %v2747_v49, 4  ;;  %v2378_v57 = vsel %vm13972_vm11, %v11508_v36, %v2377_v45  ;;  %v2382_v50 = vsel %vm13972_vm11, %v11509_v28, %v2381_v29  ;;  %v19892_v11 = vshrl.u32 %v19891_v20, 16  ;;  %v15678_v4 = vld [vmem:[#allocation2 + $0xd8] sm:$0xf]  ;;  %19893 = vst [vmem:[#allocation12_spill] sm:$0xff] %v15680_v53 }
 0x167   :  { %v2034_v19 = vrot.slane %v19888_v21, 4  ;;  %v2037_v44 = vrot.slane %v19889_v40, 5  ;;  %v2476_v58 = vld [vmem:[#allocation2 + $0xd4] sm:$0x1]  ;;  %v2762_v15 = vrot.slane %v2761_v12, 4  ;;  %v11642_v21 = vcombine.low %v2378_v57, %v2382_v50  ;;  %v15682_v49 = vpop.f32.mrb[25].mxu1 }
 0x168   :  { %v2048_v37 = vrot.slane %v19892_v11, 4  ;;  %v2043_v40 = vrot.slane %v2041_v56, 5  ;;  %v2477_v61 = vld [vmem:[#allocation2 + $0xdc] sm:$0x1]  ;;  %19894 = vst [vmem:[#allocation45_spill] sm:$0xff] %v15682_v49  ;;  %v2753_v45 = vsel %vm13991_vm12, %v2748_v30, %v2752_v47  ;;  %v19895_v36 = vshll.u32 %v19891_v20, 16 }
 0x169   :  { %v2038_v42 = vor.u32 %v2037_v44, %v2034_v19  ;;  %v2055_v29 = vshll.u32 %v15632_v63, 16  ;;  %v2769_v11 = vshrl.u32 %v15668_v52, 16  ;;  %v15690_v48 = vpop.f32.mrb[26].mxu0  ;;  %v15692_v57 = vpop.f32.mrb[26].mxu1  ;;  %v2767_v12 = vsel %vm13991_vm12, %v2762_v15, %v2766_v55  ;;  %v211_v55 = vld [vmem:[#allocation2 + $0xe4] sm:$0x1] }
 0x16a   :  { %v2051_v28 = vrot.slane %v19895_v36, 5  ;;  %19896 = vst [vmem:[#allocation46_spill] sm:$0xff] %v15690_v48  ;;  %19897 = vst [vmem:[#allocation47_spill] sm:$0xff] %v15692_v57  ;;  %v2772_v44 = vshll.u32 %v15668_v52, 16  ;;  %v2778_v56 = vshll.u32 %v2476_v58, 16  ;;  %v15697_v50 = vpop.f32.mrb[27].mxu0  ;;  %v11673_v30 = vcombine.low %v2753_v45, %v2767_v12 }
 0x16b   :  { %v2039_v19 = vrot.slane %v2038_v42, 4  ;;  %v15699_v47 = vpop.f32.mrb[27].mxu1  ;;  %v2057_v63 = vrot.slane %v2055_v29, 5  ;;  %v2771_v36 = vrot.slane %v2769_v11, 4  ;;  %v2783_v53 = vshrl.u32 %v15678_v4, 16  ;;  %4835 = vmatmul.mubr.bf16.gmra.mrb[100].mxu0 %v11625_v23 }
 0x16c   :  { %v2052_v20 = vor.u32 %v2051_v28, %v2048_v37  ;;  %v2774_v49 = vrot.slane %v2772_v44, 5  ;;  %v2780_v57 = vrot.slane %v2778_v56, 5  ;;  %4995 = vmatprep.mubr.bf16.mxu1 %v11673_v30  ;;  %v2786_v58 = vshll.u32 %v15678_v4, 16  ;;  %v1741_v37 = vld [vmem:[#allocation2 + $0xdc] sm:$0x1]  ;;  %4842 = vmatprep.mubr.bf16.mxu0 %v11642_v21 }
 0x16d   :  { %v2044_v48 = vsel %vm13991_vm12, %v2039_v19, %v2043_v40  ;;  %v2792_v42 = vshll.u32 %v2477_v61, 16  ;;  %v19898_v28 = vcombine.low %v15594_v51, %v15624_v6  ;;  %v2785_v29 = vrot.slane %v2783_v53, 4  ;;  %v2221_v61 = vld [vmem:[#allocation2 + $0xd8] sm:$0xe]  ;;  %v15718_v12 = vld [vmem:[#allocation2 + $0xe0] sm:$0xe] }
 0x16e   :  { %v2053_v15 = vrot.slane %v2052_v20, 4  ;;  %v2775_v40 = vor.u32 %v2774_v49, %v2771_v36  ;;  %v15712_v11 = vadd.f32 %v15249_v43, %v15245_v24  ;;  %v15716_v23 = vadd.f32 %v15231_v3, %v15225_v7  ;;  %v15726_v53 = vld [vmem:[#allocation2 + $0xe0] sm:$0xf]  ;;  %v15728_v24 = vpop.f32.mrb[28].mxu1  ;;  %v15736_v49 = vld [vmem:[#allocation2 + $0xe8] sm:$0xf] }
 0x16f   :  { %4996 = vmatmul.mubr.bf16.gmra.mrb[100].mxu1 %v19898_v28  ;;  %v2788_v44 = vrot.slane %v2786_v58, 5  ;;  %v2794_v51 = vrot.slane %v2792_v42, 5  ;;  %v15724_v6 = vadd.f32 %v15276_v9, %v15256_v31  ;;  %v15732_v7 = vadd.f32 %v15282_v59, %v15267_v14  ;;  %v15738_v56 = vpop.f32.mrb[29].mxu1  ;;  %v19903_v31 = vld [vmem:[#allocation13_spill] sm:$0xff]  ;;  %v15741_v36 = vpop.f32.mrb[28].mxu0 }
 0x170   :  { %19899 = vst [vmem:[#allocation48_spill] sm:$0xff] %v15712_v11  ;;  %19900 = vst [vmem:[#allocation49_spill] sm:$0xff] %v15716_v23  ;;  %v2058_v19 = vsel %vm13991_vm12, %v2053_v15, %v2057_v63  ;;  %v2776_v21 = vrot.slane %v2775_v40, 4  ;;  %v212_v3 = vsel %vm13910_vm5, 0, %v211_v55  ;;  %v589_v9 = vrot.slane %v19903_v31, 4  ;;  %v19905_v55 = vld [vmem:[#allocation14_spill] sm:$0xff] }
 0x171   :  { %19901 = vst [vmem:[#allocation50_spill] sm:$0xff] %v15724_v6  ;;  %v11626_v43 = vcombine.low %v2044_v48, %v2058_v19  ;;  %19902 = vst [vmem:[#allocation51_spill] sm:$0xff] %v15732_v7  ;;  %v2789_v30 = vor.u32 %v2788_v44, %v2785_v29  ;;  %v11510_v20 = vrot.slane %v2221_v61, 9  ;;  %v2385_v63 = vrot.slane %v1741_v37, 5  ;;  %v15743_v48 = vpop.f32.mrb[30].mxu1  ;;  %v15752_v40 = vpop.f32.mrb[29].mxu0 }
 0x172   :  { %213 = vst [vmem:[#allocation2 + $0xe4] sm:$0x1] %v212_v3  ;;  %19904 = vst [vmem:[#allocation13_spill] sm:$0xff] %v15743_v48  ;;  %v2781_v14 = vsel %vm13991_vm12, %v2776_v21, %v2780_v57  ;;  %v19906_v15 = vshrl.u32 %v19905_v55, 16  ;;  %v19907_v42 = vshll.u32 %v19905_v55, 16  ;;  %v15754_v29 = vpop.f32.mrb[31].mxu1 }
 0x173   :  { %19908 = vst [vmem:[#allocation14_spill] sm:$0xff] %v15754_v29  ;;  %v2790_v61 = vrot.slane %v2789_v30, 4  ;;  %v15758_v19 = vsel %vm13972_vm11, %v11510_v20, %v2385_v63  ;;  %v2069_v44 = vshll.u32 %v1741_v37, 16  ;;  %v19909_v3 = vld [vmem:[#allocation15_spill] sm:$0xff]  ;;  %v15762_v31 = vpop.f32.mrb[30].mxu0  ;;  %v2797_v45 = vshrl.u32 %v15726_v53, 16  ;;  %4843 = vmatmul.mubr.bf16.gmra.mrb[104].mxu0 %v11626_v43 }
 0x174   :  { %v2062_v58 = vrot.slane %v19906_v15, 4  ;;  %v2065_v28 = vrot.slane %v19907_v42, 5  ;;  %v19910_v57 = vshrl.u32 %v19909_v3, 16  ;;  %v19911_v15 = vshll.u32 %v19909_v3, 16  ;;  %v2479_v42 = vld [vmem:[#allocation2 + $0xec] sm:$0x1] }
 0x175   :  { %v2800_v7 = vshll.u32 %v15726_v53, 16  ;;  %v15768_v30 = vpop.f32.mrb[31].mxu0  ;;  %v2795_v37 = vsel %vm13991_vm12, %v2790_v61, %v2794_v51  ;;  %v15772_v20 = vrot.slane %v2069_v44, 5  ;;  %v2811_v63 = vshrl.u32 %v15736_v49, 16  ;;  %v1743_v6 = vld [vmem:[#allocation2 + $0xfc] sm:$0x1] }
 0x176   :  { %v2076_v21 = vrot.slane %v19910_v57, 4  ;;  %v2066_v59 = vor.u32 %v2065_v28, %v2062_v58  ;;  %v2079_v55 = vrot.slane %v19911_v15, 5  ;;  %19912 = vst [vmem:[#allocation15_spill] sm:$0xff] %v15768_v30  ;;  %v2814_v58 = vshll.u32 %v15736_v49, 16  ;;  %v2223_v43 = vld [vmem:[#allocation2 + $0xf8] sm:$0xe] }
 0x177   :  { %v11674_v28 = vcombine.low %v2781_v14, %v2795_v37  ;;  %v2799_v15 = vrot.slane %v2797_v45, 4  ;;  %v2802_v23 = vrot.slane %v2800_v7, 5  ;;  %v2813_v11 = vrot.slane %v2811_v63, 4  ;;  %v2224_v7 = vld [vmem:[#allocation2 + $0x100] sm:$0xe]  ;;  %v19915_v63 = vld [vmem:[#allocation25_spill] sm:$0xff] }
 0x178   :  { %v15776_v3 = vrot.slane %v2066_v59, 4  ;;  %v2080_v57 = vor.u32 %v2079_v55, %v2076_v21  ;;  %v2816_v29 = vrot.slane %v2814_v58, 5  ;;  %v2820_v48 = vshll.u32 %v2479_v42, 16  ;;  %v1744_v37 = vld [vmem:[#allocation2 + $0x104] sm:$0x1]  ;;  %v19916_v58 = vld [vmem:[#allocation26_spill] sm:$0xff] }
 0x179   :  { %5003 = vmatprep.mubr.bf16.mxu1 %v11674_v28  ;;  %v861_v30 = vld [vmem:[#allocation2 + $0xe4] sm:$0x1]  ;;  %v15788_v45 = vadd.f32 %v15315_v60, %v15303_v22  ;;  %v19914_v59 = vcombine.low %v15668_v52, %v15678_v4  ;;  %v2803_v21 = vor.u32 %v2802_v23, %v2799_v15  ;;  %v15799_v28 = vadd.f32 %v19916_v58, %v19915_v63  ;;  %v15817_v15 = vld [vmem:[#allocation2 + $0x108] sm:$0xf] }
 0x17a   :  { %v15782_v61 = vrot.slane %v2080_v57, 4  ;;  %v862_v44 = vsel %vm13900_vm3, %v589_v9, %v861_v30  ;;  %v2817_v55 = vor.u32 %v2816_v29, %v2813_v11  ;;  %v15795_v42 = vrot.slane %v2820_v48, 5  ;;  %v19918_v22 = vld [vmem:[#allocation27_spill] sm:$0xff]  ;;  %v19920_v57 = vld [vmem:[#allocation28_spill] sm:$0xff]  ;;  %v15811_v11 = vpop.f32.mrb[32].mxu1 }
 0x17b   :  { %19913 = vst [vmem:[#allocation52_spill] sm:$0xff] %v15788_v45  ;;  %5004 = vmatmul.mubr.bf16.gmra.mrb[104].mxu1 %v19914_v59  ;;  %863 = vst [vmem:[#allocation2 + $0xe4] sm:$0x1] %v862_v44  ;;  %v15803_v60 = vadd.f32 %v15376_v8, %v19918_v22  ;;  %v15807_v52 = vadd.f32 %v15380_v46, %v19920_v57  ;;  %v11512_v4 = vrot.slane %v2223_v43, 9  ;;  %v15809_v9 = vld [vmem:[#allocation2 + $0x100] sm:$0xf] }
 0x17c   :  { %19917 = vst [vmem:[#allocation25_spill] sm:$0xff] %v15799_v28  ;;  %19922 = vst [vmem:[#allocation28_spill] sm:$0xff] %v15811_v11  ;;  %v15813_v23 = vrot.slane %v2803_v21, 4  ;;  %v15815_v48 = vrot.slane %v2817_v55, 4  ;;  %v2393_v29 = vrot.slane %v1743_v6, 5  ;;  %v11513_v30 = vrot.slane %v2224_v7, 9 }
 0x17d   :  { %19919 = vst [vmem:[#allocation26_spill] sm:$0xff] %v15803_v60  ;;  %19921 = vst [vmem:[#allocation27_spill] sm:$0xff] %v15807_v52  ;;  %v15819_v59 = vpop.f32.mrb[33].mxu1  ;;  %v2397_v8 = vrot.slane %v1744_v37, 5  ;;  %v19924_v44 = vld [vmem:[#allocation16_spill] sm:$0xff]  ;;  %v2097_v22 = vshll.u32 %v1743_v6, 16 }
 0x17e   :  { %19923 = vst [vmem:[#allocation53_spill] sm:$0xff] %v15819_v59  ;;  %v19925_v63 = vshrl.u32 %v19924_v44, 16  ;;  %v19926_v43 = vshll.u32 %v19924_v44, 16  ;;  %v15825_v57 = vpop.f32.mrb[34].mxu1  ;;  %v2823_v21 = vsel %vm13991_vm12, %v15815_v48, %v15795_v42  ;;  %v15833_v7 = vsel %vm13972_vm11, %v11512_v4, %v2393_v29  ;;  %v19928_v55 = vld [vmem:[#allocation17_spill] sm:$0xff] }
 0x17f   :  { %19927 = vst [vmem:[#allocation16_spill] sm:$0xff] %v15825_v57  ;;  %v19929_v14 = vshrl.u32 %v19928_v55, 16  ;;  %v2480_v44 = vld [vmem:[#allocation2 + $0x104] sm:$0x1]  ;;  %v15841_v6 = vpop.f32.mrb[35].mxu1  ;;  %v15845_v60 = vsel %vm13972_vm11, %v11513_v30, %v2397_v8  ;;  %v2099_v48 = vrot.slane %v2097_v22, 5 }
 0x180   :  { %v2090_v46 = vrot.slane %v19925_v63, 4  ;;  %v2093_v58 = vrot.slane %v19926_v43, 5  ;;  %v19930_v63 = vshll.u32 %v19928_v55, 16  ;;  %v15839_v43 = vpop.f32.mrb[32].mxu0  ;;  %19931 = vst [vmem:[#allocation17_spill] sm:$0xff] %v15841_v6  ;;  %v2111_v28 = vshll.u32 %v1744_v37, 16 }
 0x181   :  { %v2104_v51 = vrot.slane %v19929_v14, 4  ;;  %v15847_v4 = vpop.f32.mrb[33].mxu0  ;;  %v11644_v14 = vcombine.low %v15833_v7, %v15845_v60  ;;  %v2825_v55 = vshrl.u32 %v15809_v9, 16  ;;  %v2834_v59 = vshll.u32 %v2480_v44, 16  ;;  %v1745_v11 = vld [vmem:[#allocation2 + $0x10c] sm:$0x1] }
 0x182   :  { %v2107_v52 = vrot.slane %v19930_v63, 5  ;;  %v2094_v42 = vor.u32 %v2093_v58, %v2090_v46  ;;  %19932 = vst [vmem:[#allocation54_spill] sm:$0xff] %v15847_v4  ;;  %v2828_v63 = vshll.u32 %v15809_v9, 16  ;;  %v15853_v45 = vpop.f32.mrb[34].mxu0  ;;  %v2113_v57 = vrot.slane %v2111_v28, 5 }
 0x183   :  { %19933 = vst [vmem:[#allocation55_spill] sm:$0xff] %v15853_v45  ;;  %v2839_v30 = vshrl.u32 %v15817_v15, 16  ;;  %v15856_v8 = vpop.f32.mrb[35].mxu0  ;;  %v1742_v37 = vld [vmem:[#allocation2 + $0xe4] sm:$0x1]  ;;  %v2827_v22 = vrot.slane %v2825_v55, 4  ;;  %v15864_v60 = vadd.f32 %v15411_v25, %v15401_v2 }
 0x184   :  { %v2108_v29 = vor.u32 %v2107_v52, %v2104_v51  ;;  %v2095_v6 = vrot.slane %v2094_v42, 4  ;;  %19934 = vst [vmem:[#allocation56_spill] sm:$0xff] %v15856_v8  ;;  %v15858_v46 = vld [vmem:[#allocation2 + $0xe4] sm:$0x1]  ;;  %v2389_v52 = vrot.slane %v1742_v37, 5  ;;  %v2083_v7 = vshll.u32 %v1742_v37, 16 }
 0x185   :  { %19935 = vst [vmem:[#allocation57_spill] sm:$0xff] %v15858_v46  ;;  %19936 = vst [vmem:[#allocation58_spill] sm:$0xff] %v15864_v60  ;;  %v2806_v28 = vshll.u32 %v15858_v46, 16  ;;  %v2481_v42 = vld [vmem:[#allocation2 + $0x10c] sm:$0x1]  ;;  %v2836_v55 = vrot.slane %v2834_v59, 5 }
 0x186   :  { %v2109_v58 = vrot.slane %v2108_v29, 4  ;;  %v2100_v44 = vsel %vm13991_vm12, %v2095_v6, %v2099_v48  ;;  %v2830_v29 = vrot.slane %v2828_v63, 5  ;;  %v2841_v45 = vrot.slane %v2839_v30, 4  ;;  %v1746_v46 = vld [vmem:[#allocation2 + $0x114] sm:$0x1] }
 0x187   :  { %v19937_v51 = vrot.slane %v15718_v12, 9  ;;  %v2085_v25 = vrot.slane %v2083_v7, 5  ;;  %v2808_v37 = vrot.slane %v2806_v28, 5  ;;  %v2225_v4 = vld [vmem:[#allocation2 + $0x108] sm:$0xe]  ;;  %v2848_v63 = vshll.u32 %v2481_v42, 16 }
 0x188   :  { %v2114_v8 = vsel %vm13991_vm12, %v2109_v58, %v2113_v57  ;;  %v2831_v48 = vor.u32 %v2830_v29, %v2827_v22  ;;  %v2842_v57 = vshll.u32 %v15817_v15, 16  ;;  %v2226_v59 = vld [vmem:[#allocation2 + $0x110] sm:$0xe]  ;;  %v19940_v58 = vsel %vm13991_vm12, %v15776_v3, %v15772_v20  ;;  %v2482_v42 = vld [vmem:[#allocation2 + $0x114] sm:$0x1] }
 0x189   :  { %v2390_v2 = vsel %vm13972_vm11, %v19937_v51, %v2389_v52  ;;  %v15875_v60 = vcombine.low %v2100_v44, %v2114_v8  ;;  %v2086_v12 = vsel %vm13991_vm12, %v15782_v61, %v2085_v25  ;;  %v2809_v30 = vsel %vm13991_vm12, %v15813_v23, %v2808_v37  ;;  %v19941_v23 = vld [vmem:[#allocation29_spill] sm:$0xff] }
 0x18a   :  { %v11643_v6 = vcombine.low %v15758_v19, %v2390_v2  ;;  %v15887_v8 = vadd.f32 %v15417_v1, %v15405_v54  ;;  %v15891_v19 = vadd.f32 %v15453_v5, %v15433_v13  ;;  %v11627_v22 = vcombine.low %v19940_v58, %v2086_v12  ;;  %v15902_v44 = vld [vmem:[#allocation2 + $0x110] sm:$0xf]  ;;  %v15904_v13 = vpop.f32.mrb[36].mxu1  ;;  %v19944_v2 = vld [vmem:[#allocation18_spill] sm:$0xff] }
 0x18b   :  { %v11675_v61 = vcombine.low %v2809_v30, %v2823_v21  ;;  %v2832_v51 = vrot.slane %v2831_v48, 4  ;;  %v2844_v52 = vrot.slane %v2842_v57, 5  ;;  %v2850_v7 = vrot.slane %v2848_v63, 5  ;;  %v15908_v29 = vpop.f32.mrb[37].mxu1  ;;  %v15919_v48 = vld [vmem:[#allocation2 + $0x118] sm:$0xf] }
 0x18c   :  { %19938 = vst [vmem:[#allocation59_spill] sm:$0xff] %v15887_v8  ;;  %19939 = vst [vmem:[#allocation60_spill] sm:$0xff] %v15891_v19  ;;  %4850 = vmatprep.mubr.bf16.mxu0 %v11643_v6  ;;  %v15900_v28 = vadd.f32 %v19941_v23, %v15445_v10  ;;  %v11514_v54 = vrot.slane %v2225_v4, 9  ;;  %v2401_v1 = vrot.slane %v1745_v11, 5  ;;  %v11515_v3 = vrot.slane %v2226_v59, 9  ;;  %v15921_v57 = vpop.f32.mrb[38].mxu1 }
 0x18d   :  { %4851 = vmatmul.mubr.bf16.gmra.mrb[108].mxu0 %v11627_v22  ;;  %5011 = vmatprep.mubr.bf16.mxu1 %v11675_v61  ;;  %v2837_v5 = vsel %vm13991_vm12, %v2832_v51, %v2836_v55  ;;  %v2845_v20 = vor.u32 %v2844_v52, %v2841_v45  ;;  %v2405_v21 = vrot.slane %v1746_v46, 5  ;;  %v19943_v10 = vcombine.low %v15726_v53, %v15736_v49  ;;  %v19947_v49 = vld [vmem:[#allocation19_spill] sm:$0xff]  ;;  %v2483_v58 = vld [vmem:[#allocation2 + $0x11c] sm:$0x1]  ;;  %v15929_v22 = vpop.f32.mrb[39].mxu1 }
 0x18e   :  { %19942 = vst [vmem:[#allocation29_spill] sm:$0xff] %v15900_v28  ;;  %4858 = vmatprep.mubr.bf16.mxu0 %v11644_v14  ;;  %v2402_v4 = vsel %vm13972_vm11, %v11514_v54, %v2401_v1  ;;  %v19945_v25 = vshrl.u32 %v19944_v2, 16  ;;  %v19946_v6 = vshll.u32 %v19944_v2, 16  ;;  %v2125_v45 = vshll.u32 %v1745_v11, 16 }
 0x18f   :  { %5012 = vmatmul.mubr.bf16.gmra.mrb[108].mxu1 %v19943_v10  ;;  %v2846_v63 = vrot.slane %v2845_v20, 4  ;;  %v2406_v53 = vsel %vm13972_vm11, %v11515_v3, %v2405_v21  ;;  %v19948_v14 = vshrl.u32 %v19947_v49, 16  ;;  %v19949_v12 = vshll.u32 %v19947_v49, 16  ;;  %v15935_v3 = vpop.f32.mrb[36].mxu0 }
 0x190   :  { %v2118_v37 = vrot.slane %v19945_v25, 4  ;;  %v2121_v55 = vrot.slane %v19946_v6, 5  ;;  %v11645_v61 = vcombine.low %v2402_v4, %v2406_v53  ;;  %v2127_v11 = vrot.slane %v2125_v45, 5  ;;  %v15937_v6 = vpop.f32.mrb[37].mxu0  ;;  %v1747_v45 = vld [vmem:[#allocation2 + $0x11c] sm:$0x1] }
 0x191   :  { %v2132_v59 = vrot.slane %v19948_v14, 4  ;;  %v2135_v30 = vrot.slane %v19949_v12, 5  ;;  %v2139_v52 = vshll.u32 %v1746_v46, 16  ;;  %v2851_v23 = vsel %vm13991_vm12, %v2846_v63, %v2850_v7  ;;  %v2227_v7 = vld [vmem:[#allocation2 + $0x118] sm:$0xe]  ;;  %v15940_v53 = vpop.f32.mrb[38].mxu0 }
 0x192   :  { %v2122_v51 = vor.u32 %v2121_v55, %v2118_v37  ;;  %v2853_v1 = vshrl.u32 %v15902_v44, 16  ;;  %v2856_v20 = vshll.u32 %v15902_v44, 16  ;;  %v11676_v21 = vcombine.low %v2837_v5, %v2851_v23  ;;  %v2228_v63 = vld [vmem:[#allocation2 + $0x120] sm:$0xe]  ;;  %v15945_v12 = vpop.f32.mrb[39].mxu0 }
 0x193   :  { %v2136_v54 = vor.u32 %v2135_v30, %v2132_v59  ;;  %v2141_v2 = vrot.slane %v2139_v52, 5  ;;  %v2862_v25 = vshll.u32 %v2482_v42, 16  ;;  %v2867_v46 = vshrl.u32 %v15919_v48, 16  ;;  %v1748_v59 = vld [vmem:[#allocation2 + $0x124] sm:$0x1] }
 0x194   :  { %v2123_v10 = vrot.slane %v2122_v51, 4  ;;  %v2855_v37 = vrot.slane %v2853_v1, 4  ;;  %v2858_v55 = vrot.slane %v2856_v20, 5  ;;  %5019 = vmatprep.mubr.bf16.mxu1 %v11676_v21  ;;  %v2870_v14 = vshll.u32 %v15919_v48, 16  ;;  %v19951_v20 = vld [vmem:[#allocation30_spill] sm:$0xff]  ;;  %v19952_v21 = vld [vmem:[#allocation32_spill] sm:$0xff] }
 0x195   :  { %v2137_v4 = vrot.slane %v2136_v54, 4  ;;  %v2864_v5 = vrot.slane %v2862_v25, 5  ;;  %v2876_v42 = vshll.u32 %v2483_v58, 16  ;;  %4859 = vmatmul.mubr.bf16.gmra.mrb[112].mxu0 %v15875_v60  ;;  %v2869_v52 = vrot.slane %v2867_v46, 4  ;;  %v15959_v60 = vpop.f32.mrb[40].mxu1  ;;  %v19954_v25 = vld [vmem:[#allocation31_spill] sm:$0xff] }
 0x196   :  { %v2128_v49 = vsel %vm13991_vm12, %v2123_v10, %v2127_v11  ;;  %v2859_v51 = vor.u32 %v2858_v55, %v2855_v37  ;;  %v11661_v23 = vcombine.low %v15902_v44, %v15919_v48  ;;  %v19950_v11 = vcombine.low %v15809_v9, %v15817_v15  ;;  %4866 = vmatprep.mubr.bf16.mxu0 %v11645_v61  ;;  %v19957_v44 = vld [vmem:[#allocation34_spill] sm:$0xff]  ;;  %v19958_v48 = vld [vmem:[#allocation36_spill] sm:$0xff]  ;;  %v19960_v9 = vld [vmem:[#allocation35_spill] sm:$0xff] }
 0x197   :  { %v2142_v30 = vsel %vm13991_vm12, %v2137_v4, %v2141_v2  ;;  %v2872_v58 = vrot.slane %v2870_v14, 5  ;;  %v2878_v1 = vrot.slane %v2876_v42, 5  ;;  %v15957_v10 = vadd.f32 %v19952_v21, %v19951_v20  ;;  %v19955_v4 = vld [vmem:[#allocation33_spill] sm:$0xff]  ;;  %v15973_v46 = vld [vmem:[#allocation2 + $0x120] sm:$0xf] }
 0x198   :  { %5020 = vmatmul.mubr.bf16.gmra.mrb[112].mxu1 %v19950_v11  ;;  %v11629_v54 = vcombine.low %v2128_v49, %v2142_v30  ;;  %v2860_v2 = vrot.slane %v2859_v51, 4  ;;  %v15963_v37 = vadd.f32 %v19955_v4, %v19954_v25  ;;  %v15967_v55 = vadd.f32 %v19958_v48, %v19957_v44  ;;  %v19961_v15 = vld [vmem:[#allocation37_spill] sm:$0xff]  ;;  %v15975_v49 = vpop.f32.mrb[41].mxu1  ;;  %v19965_v25 = vld [vmem:[#allocation20_spill] sm:$0xff] }
 0x199   :  { %19953 = vst [vmem:[#allocation18_spill] sm:$0xff] %v15957_v10  ;;  %v15971_v61 = vadd.f32 %v19961_v15, %v19960_v9  ;;  %19963 = vst [vmem:[#allocation31_spill] sm:$0xff] %v15975_v49  ;;  %v2873_v14 = vor.u32 %v2872_v58, %v2869_v52  ;;  %v11516_v42 = vrot.slane %v2227_v7, 9  ;;  %v2409_v30 = vrot.slane %v1747_v45, 5  ;;  %v15977_v11 = vpop.f32.mrb[42].mxu1  ;;  %v15989_v52 = vpop.f32.mrb[40].mxu0 }
 0x19a   :  { %19956 = vst [vmem:[#allocation19_spill] sm:$0xff] %v15963_v37  ;;  %19959 = vst [vmem:[#allocation30_spill] sm:$0xff] %v15967_v55  ;;  %v11517_v51 = vrot.slane %v2228_v63, 9  ;;  %v2865_v20 = vsel %vm13991_vm12, %v2860_v2, %v2864_v5  ;;  %v2413_v21 = vrot.slane %v1748_v59, 5  ;;  %v19966_v4 = vshrl.u32 %v19965_v25, 16  ;;  %v15991_v7 = vpop.f32.mrb[43].mxu1 }
 0x19b   :  { %19962 = vst [vmem:[#allocation32_spill] sm:$0xff] %v15971_v61  ;;  %19964 = vst [vmem:[#allocation33_spill] sm:$0xff] %v15977_v11  ;;  %v19967_v48 = vshll.u32 %v19965_v25, 16  ;;  %v15985_v15 = vld [vmem:[#allocation2 + $0x128] sm:$0xf]  ;;  %v2874_v63 = vrot.slane %v2873_v14, 4  ;;  %v2410_v58 = vsel %vm13972_vm11, %v11516_v42, %v2409_v30 }
 0x19c   :  { %v2146_v44 = vrot.slane %v19966_v4, 4  ;;  %v15987_v61 = vld [vmem:[#allocation2 + $0x124] sm:$0x1]  ;;  %19969 = vst [vmem:[#allocation36_spill] sm:$0xff] %v15991_v7  ;;  %v2153_v5 = vshll.u32 %v1747_v45, 16  ;;  %v19970_v2 = vld [vmem:[#allocation21_spill] sm:$0xff] }
 0x19d   :  { %v2149_v9 = vrot.slane %v19967_v48, 5  ;;  %19968 = vst [vmem:[#allocation34_spill] sm:$0xff] %v15987_v61  ;;  %v19971_v55 = vshrl.u32 %v19970_v2, 16  ;;  %v15997_v4 = vld [vmem:[#allocation2 + $0x12c] sm:$0x1]  ;;  %v15999_v25 = vpop.f32.mrb[41].mxu0  ;;  %v2414_v48 = vsel %vm13972_vm11, %v11517_v51, %v2413_v21  ;;  %v2879_v45 = vsel %vm13991_vm12, %v2874_v63, %v2878_v1  ;;  %4867 = vmatmul.mubr.bf16.gmra.mrb[116].mxu0 %v11629_v54 }
 0x19e   :  { %19972 = vst [vmem:[#allocation35_spill] sm:$0xff] %v15997_v4  ;;  %v19973_v28 = vshll.u32 %v19970_v2, 16  ;;  %v2167_v8 = vshll.u32 %v1748_v59, 16  ;;  %v16005_v14 = vpop.f32.mrb[42].mxu0  ;;  %v11646_v42 = vcombine.low %v2410_v58, %v2414_v48  ;;  %v2155_v30 = vrot.slane %v2153_v5, 5  ;;  %v19974_v2 = vld [vmem:[#allocation38_spill] sm:$0xff] }
 0x19f   :  { %v2160_v37 = vrot.slane %v19971_v55, 4  ;;  %v2150_v10 = vor.u32 %v2149_v9, %v2146_v44  ;;  %v2881_v55 = vshrl.u32 %v15973_v46, 16  ;;  %v16010_v7 = vpop.f32.mrb[43].mxu0  ;;  %v11677_v11 = vcombine.low %v2865_v20, %v2879_v45 }
 0x1a0   :  { %v2163_v19 = vrot.slane %v19973_v28, 5  ;;  %v2169_v21 = vrot.slane %v2167_v8, 5  ;;  %4874 = vmatprep.mubr.bf16.mxu0 %v11646_v42  ;;  %v2884_v28 = vshll.u32 %v15973_v46, 16  ;;  %v2890_v59 = vshll.u32 %v15987_v61, 16 }
 0x1a1   :  { %v2151_v49 = vrot.slane %v2150_v10, 4  ;;  %v2883_v44 = vrot.slane %v2881_v55, 4  ;;  %v2895_v9 = vshrl.u32 %v15985_v15, 16  ;;  %5027 = vmatprep.mubr.bf16.mxu1 %v11677_v11  ;;  %v2898_v58 = vshll.u32 %v15985_v15, 16  ;;  %v235_v10 = vld [vmem:[#allocation2 + $0x134] sm:$0x1] }
 0x1a2   :  { %v2164_v51 = vor.u32 %v2163_v19, %v2160_v37  ;;  %v2904_v54 = vshll.u32 %v15997_v4, 16  ;;  %5028 = vmatmul.mubr.bf16.gmra.mrb[116].mxu1 %v11661_v23  ;;  %v2886_v19 = vrot.slane %v2884_v28, 5  ;;  %v2892_v20 = vrot.slane %v2890_v59, 5  ;;  %v16047_v28 = vld [vmem:[#allocation2 + $0x138] sm:$0xf] }
 0x1a3   :  { %v2156_v1 = vsel %vm13991_vm12, %v2151_v49, %v2155_v30  ;;  %v2897_v8 = vrot.slane %v2895_v9, 4  ;;  %v2900_v5 = vrot.slane %v2898_v58, 5  ;;  %v16023_v11 = vadd.f32 %v15575_v26, %v19974_v2  ;;  %v16056_v58 = vld [vmem:[#allocation2 + $0x130] sm:$0xe]  ;;  %v2937_v4 = vld [vmem:[#allocation2 + $0x18] sm:$0xe] }
 0x1a4   :  { %v2165_v63 = vrot.slane %v2164_v51, 4  ;;  %v2887_v49 = vor.u32 %v2886_v19, %v2883_v44  ;;  %v16027_v45 = vadd.f32 %v15578_v0, %v15566_v35  ;;  %v16031_v23 = vadd.f32 %v15612_v32, %v15604_v17  ;;  %v16039_v51 = vld [vmem:[#allocation2 + $0x24] sm:$0x1]  ;;  %v16042_v35 = vld [vmem:[#allocation2 + $0x130] sm:$0xf]  ;;  %v16059_v19 = vpop.f32.mrb[44].mxu1 }
 0x1a5   :  { %19975 = vst [vmem:[#allocation37_spill] sm:$0xff] %v16023_v11  ;;  %v2901_v42 = vor.u32 %v2900_v5, %v2897_v8  ;;  %v2906_v30 = vrot.slane %v2904_v54, 5  ;;  %v16035_v55 = vadd.f32 %v15614_v62, %v15606_v18  ;;  %v236_v26 = vsel %vm13910_vm5, 0, %v235_v10  ;;  %v16044_v0 = vld [vmem:[#allocation2 + $0x2c] sm:$0x1]  ;;  %v19980_v10 = vld [vmem:[#allocation23_spill] sm:$0xff] }
 0x1a6   :  { %v2170_v37 = vsel %vm13991_vm12, %v2165_v63, %v2169_v21  ;;  %19976 = vst [vmem:[#allocation20_spill] sm:$0xff] %v16027_v45  ;;  %19977 = vst [vmem:[#allocation21_spill] sm:$0xff] %v16031_v23  ;;  %v2888_v44 = vrot.slane %v2887_v49, 4  ;;  %v1749_v18 = vld [vmem:[#allocation2 + $0x12c] sm:$0x1]  ;;  %v11662_v9 = vcombine.low %v15973_v46, %v15985_v15  ;;  %v2909_v54 = vshrl.u32 %v16042_v35, 16 }
 0x1a7   :  { %v11630_v48 = vcombine.low %v2156_v1, %v2170_v37  ;;  %19978 = vst [vmem:[#allocation38_spill] sm:$0xff] %v16035_v55  ;;  %237 = vst [vmem:[#allocation2 + $0x134] sm:$0x1] %v236_v26  ;;  %v2902_v32 = vrot.slane %v2901_v42, 4  ;;  %v2229_v62 = vld [vmem:[#allocation2 + $0x128] sm:$0xe] }
 0x1a8   :  { %v2893_v38 = vsel %vm13991_vm12, %v2888_v44, %v2892_v20  ;;  %v19979_v1 = vld [vmem:[#allocation22_spill] sm:$0xff]  ;;  %v19981_v37 = vshrl.u32 %v19980_v10, 16  ;;  %v2912_v5 = vshll.u32 %v16042_v35, 16  ;;  %v2923_v2 = vshrl.u32 %v16047_v28, 16  ;;  %v19983_v49 = vld [vmem:[#allocation24_spill] sm:$0xff]  ;;  %v16084_v23 = vpop.f32.mrb[44].mxu0 }
 0x1a9   :  { %4875 = vmatmul.mubr.bf16.gmra.mrb[120].mxu0 %v11630_v48  ;;  %v2907_v59 = vsel %vm13991_vm12, %v2902_v32, %v2906_v30  ;;  %v653_v63 = vrot.slane %v19979_v1, 4  ;;  %v16065_v48 = vpop.f32.mrb[45].mxu1  ;;  %v19982_v46 = vshll.u32 %v19980_v10, 16  ;;  %v19984_v42 = vshrl.u32 %v19983_v49, 16  ;;  %v16073_v32 = vld [vmem:[#allocation2 + $0x13c] sm:$0x1] }
 0x1aa   :  { %v11678_v8 = vcombine.low %v2893_v38, %v2907_v59  ;;  %v2174_v20 = vrot.slane %v19981_v37, 4  ;;  %v19985_v26 = vshll.u32 %v19983_v49, 16  ;;  %19986 = vst [vmem:[#allocation22_spill] sm:$0xff] %v16073_v32  ;;  %v2926_v38 = vshll.u32 %v16047_v28, 16  ;;  %v2936_v59 = vld [vmem:[#allocation2 + $0x10] sm:$0xe] }
 0x1ab   :  { %v2177_v15 = vrot.slane %v19982_v46, 5  ;;  %v2188_v30 = vrot.slane %v19984_v42, 4  ;;  %v16076_v1 = vpop.f32.mrb[46].mxu1  ;;  %v11518_v37 = vrot.slane %v2229_v62, 9  ;;  %v2911_v17 = vrot.slane %v2909_v54, 4  ;;  %v19990_v54 = vld [vmem:[#allocation39_spill] sm:$0xff] }
 0x1ac   :  { %v2191_v44 = vrot.slane %v19985_v26, 5  ;;  %5035 = vmatprep.mubr.bf16.mxu1 %v11678_v8  ;;  %v2914_v21 = vrot.slane %v2912_v5, 5  ;;  %v16078_v10 = vpop.f32.mrb[47].mxu1  ;;  %v2417_v42 = vrot.slane %v1749_v18, 5  ;;  %v2925_v61 = vrot.slane %v2923_v2, 4  ;;  %v19988_v26 = vld [vmem:[#allocation40_spill] sm:$0xff] }
 0x1ad   :  { %19987 = vst [vmem:[#allocation23_spill] sm:$0xff] %v16078_v10  ;;  %5036 = vmatmul.mubr.bf16.gmra.mrb[120].mxu1 %v11662_v9  ;;  %v2928_v49 = vrot.slane %v2926_v38, 5  ;;  %v16082_v55 = vadd.f32 %v19988_v26, %v15630_v33  ;;  %v11519_v62 = vrot.slane %v16056_v58, 9  ;;  %v19991_v5 = vld [vmem:[#allocation41_spill] sm:$0xff]  ;;  %v16095_v9 = vadd.f32 %v15653_v41, %v15649_v16  ;;  %v16097_v2 = vpop.f32.mrb[45].mxu0  ;;  %v19995_v11 = vld [vmem:[#allocation43_spill] sm:$0xff] }
 0x1ae   :  { %v909_v46 = vld [vmem:[#allocation2 + $0x134] sm:$0x1]  ;;  %v16091_v45 = vadd.f32 %v19991_v5, %v19990_v54  ;;  %v2178_v33 = vor.u32 %v2177_v15, %v2174_v20  ;;  %v2181_v38 = vshll.u32 %v1749_v18, 16  ;;  %v2192_v26 = vor.u32 %v2191_v44, %v2188_v30  ;;  %v2938_v41 = vld [vmem:[#allocation2 + $0x20] sm:$0xe]  ;;  %v19997_v30 = vld [vmem:[#allocation44_spill] sm:$0xff] }
 0x1af   :  { %19989 = vst [vmem:[#allocation24_spill] sm:$0xff] %v16082_v55  ;;  %v910_v8 = vsel %vm13900_vm3, %v653_v63, %v909_v46  ;;  %19993 = vst [vmem:[#allocation39_spill] sm:$0xff] %v16095_v9  ;;  %v19994_v55 = vld [vmem:[#allocation42_spill] sm:$0xff]  ;;  %v16103_v63 = vpop.f32.mrb[46].mxu0  ;;  %v2915_v58 = vor.u32 %v2914_v21, %v2911_v17  ;;  %v2932_v46 = vshll.u32 %v16073_v32, 16  ;;  %v11520_v54 = vrot.slane %v2936_v59, 9 }
 0x1b0   :  { %19992 = vst [vmem:[#allocation40_spill] sm:$0xff] %v16091_v45  ;;  %911 = vst [vmem:[#allocation2 + $0x134] sm:$0x1] %v910_v8  ;;  %v16101_v34 = vadd.f32 %v19995_v11, %v19994_v55  ;;  %v13677_v5 = vld [vmem:[#allocation2 + $0x14] sm:$0x1]  ;;  %v16106_v16 = vpop.f32.mrb[47].mxu0  ;;  %v2929_v9 = vor.u32 %v2928_v49, %v2925_v61  ;;  %v2418_v61 = vsel %vm13972_vm11, %v11518_v37, %v2417_v42 }
 0x1b1   :  { %v3034_v45 = vrot.slane %v13677_v5, 5  ;;  %v11521_v8 = vrot.slane %v2937_v4, 9  ;;  %v13678_v20 = vld [vmem:[#allocation2 + $0x1c] sm:$0x1]  ;;  %v2939_v15 = vld [vmem:[#allocation2 + $0x28] sm:$0xe]  ;;  %v16134_v37 = vadd.f32 %v15752_v40, %v15741_v36  ;;  %v16138_v42 = vadd.f32 %v15738_v56, %v15728_v24 }
 0x1b2   :  { %19996 = vst [vmem:[#allocation41_spill] sm:$0xff] %v16101_v34  ;;  %v3038_v18 = vrot.slane %v13678_v20, 5  ;;  %v19998_v44 = vld [vmem:[#allocation12_spill] sm:$0xff]  ;;  %v20000_v55 = vld [vmem:[#allocation11_spill] sm:$0xff]  ;;  %v20001_v34 = vld [vmem:[#allocation45_spill] sm:$0xff]  ;;  %v2179_v4 = vrot.slane %v2178_v33, 4  ;;  %v11663_v40 = vcombine.low %v16042_v35, %v16047_v28 }
 0x1b3   :  { %v16110_v11 = vadd.f32 %v19998_v44, %v19997_v30  ;;  %v16114_v21 = vadd.f32 %v20001_v34, %v20000_v55  ;;  %v20003_v17 = vld [vmem:[#allocation46_spill] sm:$0xff]  ;;  %v20004_v5 = vld [vmem:[#allocation47_spill] sm:$0xff]  ;;  %v2183_v49 = vrot.slane %v2181_v38, 5  ;;  %v11522_v20 = vrot.slane %v2938_v41, 9  ;;  %v16126_v34 = vpop.f32.mrb[48].mxu1 }
 0x1b4   :  { %v16118_v59 = vadd.f32 %v15697_v50, %v20003_v17  ;;  %v16122_v32 = vadd.f32 %v15699_v47, %v20004_v5  ;;  %v2193_v30 = vrot.slane %v2192_v26, 4  ;;  %v2916_v44 = vrot.slane %v2915_v58, 4  ;;  %v2940_v17 = vld [vmem:[#allocation2 + $0x30] sm:$0xe] }
 0x1b5   :  { %19999 = vst [vmem:[#allocation42_spill] sm:$0xff] %v16110_v11  ;;  %20002 = vst [vmem:[#allocation43_spill] sm:$0xff] %v16114_v21  ;;  %v2930_v11 = vrot.slane %v2929_v9, 4  ;;  %v2934_v10 = vrot.slane %v2932_v46, 5  ;;  %v3035_v50 = vsel %vm13972_vm11, %v11520_v54, %v3034_v45  ;;  %v11523_v47 = vrot.slane %v2939_v15, 9  ;;  %v16140_v9 = vpop.f32.mrb[49].mxu1 }
 0x1b6   :  { %v3039_v58 = vsel %vm13972_vm11, %v11521_v8, %v3038_v18  ;;  %v2941_v45 = vld [vmem:[#allocation2 + $0x38] sm:$0xe]  ;;  %v16145_v46 = vpop.f32.mrb[50].mxu1  ;;  %v2184_v36 = vsel %vm13991_vm12, %v2179_v4, %v2183_v49  ;;  %v20006_v24 = vrot.slane %v16039_v51, 5  ;;  %v20007_v54 = vld [vmem:[#allocation15_spill] sm:$0xff]  ;;  %v16161_v8 = vpop.f32.mrb[48].mxu0 }
 0x1b7   :  { %v1750_v55 = vld [vmem:[#allocation2 + $0x134] sm:$0x1]  ;;  %v16159_v41 = vadd.f32 %v20007_v54, %v15762_v31  ;;  %v16163_v18 = vpop.f32.mrb[51].mxu1  ;;  %v2935_v51 = vsel %vm13991_vm12, %v2930_v11, %v2934_v10  ;;  %v16169_v35 = vpop.f32.mrb[49].mxu0  ;;  %v11680_v49 = vcombine.low %v3035_v50, %v3039_v58  ;;  %v20010_v54 = vld [vmem:[#allocation14_spill] sm:$0xff]  ;;  %v11524_v11 = vrot.slane %v2940_v17, 9 }
 0x1b8   :  { %v16128_v21 = vld [vmem:[#allocation2 + $0x134] sm:$0x1]  ;;  %v2421_v33 = vrot.slane %v1750_v55, 5  ;;  %v2195_v38 = vshll.u32 %v1750_v55, 16  ;;  %v16155_v56 = vsel %vm13972_vm11, %v11522_v20, %v20006_v24  ;;  %v20008_v20 = vrot.slane %v16044_v0, 5 }
 0x1b9   :  { %20005 = vst [vmem:[#allocation44_spill] sm:$0xff] %v16128_v21  ;;  %v2918_v26 = vshll.u32 %v16128_v21, 16  ;;  %v2942_v55 = vld [vmem:[#allocation2 + $0x40] sm:$0xe]  ;;  %v20009_v24 = vld [vmem:[#allocation13_spill] sm:$0xff] }
 0x1ba   :  { %v2422_v15 = vsel %vm13972_vm11, %v11519_v62, %v2421_v33  ;;  %v2197_v5 = vrot.slane %v2195_v38, 5  ;;  %v3047_v31 = vsel %vm13972_vm11, %v11523_v47, %v20008_v20  ;;  %v16177_v21 = vadd.f32 %v20010_v54, %v20009_v24  ;;  %v16179_v62 = vpop.f32.mrb[50].mxu0  ;;  %v13680_v58 = vld [vmem:[#allocation2 + $0x3c] sm:$0x1]  ;;  %v2943_v20 = vld [vmem:[#allocation2 + $0x48] sm:$0xe] }
 0x1bb   :  { %v2920_v4 = vrot.slane %v2918_v26, 5  ;;  %v11647_v28 = vcombine.low %v2418_v61, %v2422_v15  ;;  %v13679_v61 = vld [vmem:[#allocation2 + $0x34] sm:$0x1]  ;;  %v16185_v0 = vpop.f32.mrb[51].mxu0  ;;  %v11525_v26 = vrot.slane %v2941_v45, 9  ;;  %v3054_v15 = vrot.slane %v13680_v58, 5 }
 0x1bc   :  { %v2198_v33 = vsel %vm13991_vm12, %v2193_v30, %v2197_v5  ;;  %v3050_v50 = vrot.slane %v13679_v61, 5  ;;  %v2944_v24 = vld [vmem:[#allocation2 + $0x60] sm:$0xe]  ;;  %v2945_v54 = vld [vmem:[#allocation2 + $0x68] sm:$0xe]  ;;  %v20011_v30 = vld [vmem:[#allocation54_spill] sm:$0xff] }
 0x1bd   :  { %v2921_v10 = vsel %vm13991_vm12, %v2916_v44, %v2920_v4  ;;  %4882 = vmatprep.mubr.bf16.mxu0 %v11647_v28  ;;  %v11631_v47 = vcombine.low %v2184_v36, %v2198_v33  ;;  %v12452_v5 = vadd.f32 %v20011_v30, %v15839_v43  ;;  %v20012_v44 = vld [vmem:[#allocation28_spill] sm:$0xff]  ;;  %v20013_v17 = vld [vmem:[#allocation53_spill] sm:$0xff]  ;;  %v11681_v28 = vcombine.low %v16155_v56, %v3047_v31  ;;  %v13681_v30 = vld [vmem:[#allocation2 + $0x44] sm:$0x1] }
 0x1be   :  { %v11679_v38 = vcombine.low %v2921_v10, %v2935_v51  ;;  %v12564_v4 = vadd.f32 %v20013_v17, %v20012_v44  ;;  %v11526_v36 = vrot.slane %v2942_v55, 9  ;;  %v20014_v51 = vld [vmem:[#allocation55_spill] sm:$0xff]  ;;  %v20015_v45 = vld [vmem:[#allocation56_spill] sm:$0xff]  ;;  %v3051_v10 = vsel %vm13972_vm11, %v11524_v11, %v3050_v50  ;;  %v16206_v50 = vpop.f32.mrb[52].mxu1 }
 0x1bf   :  { %4883 = vmatmul.mubr.bf16.gmra.mrb[124].mxu0 %v11631_v47  ;;  %v12455_v33 = vadd.f32 %v20015_v45, %v20014_v51  ;;  %v3055_v61 = vsel %vm13972_vm11, %v11525_v26, %v3054_v15  ;;  %v20016_v43 = vld [vmem:[#allocation16_spill] sm:$0xff]  ;;  %v11528_v31 = vrot.slane %v2944_v24, 9  ;;  %v13683_v55 = vld [vmem:[#allocation2 + $0x64] sm:$0x1]  ;;  %v11529_v51 = vrot.slane %v2945_v54, 9 }
 0x1c0   :  { %5043 = vmatprep.mubr.bf16.mxu1 %v11679_v38  ;;  %13346 = vmatprep.mubr.bf16.mxu0 %v11680_v49  ;;  %v16198_v47 = vadd.f32 %v12564_v4, %v12452_v5  ;;  %v20017_v38 = vld [vmem:[#allocation17_spill] sm:$0xff]  ;;  %v11527_v49 = vrot.slane %v2943_v20, 9  ;;  %v13682_v44 = vld [vmem:[#allocation2 + $0x4c] sm:$0x1]  ;;  %v3066_v17 = vrot.slane %v13683_v55, 5  ;;  %v12458_v11 = vadd.f32 %v15937_v6, %v15935_v3 }
 0x1c1   :  { %5044 = vmatmul.mubr.bf16.gmra.mrb[124].mxu1 %v11663_v40  ;;  %v12567_v58 = vadd.f32 %v20017_v38, %v20016_v43  ;;  %v3058_v40 = vrot.slane %v13681_v30, 5  ;;  %v3062_v56 = vrot.slane %v13682_v44, 5  ;;  %v2946_v45 = vld [vmem:[#allocation2 + $0x70] sm:$0xe]  ;;  %v11682_v26 = vcombine.low %v3051_v10, %v3055_v61  ;;  %v13684_v15 = vld [vmem:[#allocation2 + $0x6c] sm:$0x1] }
 0x1c2   :  { %v3070_v5 = vrot.slane %v13684_v15, 5  ;;  %v2947_v4 = vld [vmem:[#allocation2 + $0x78] sm:$0xe]  ;;  %v12570_v20 = vadd.f32 %v15908_v29, %v15904_v13  ;;  %v12461_v24 = vadd.f32 %v15945_v12, %v15940_v53  ;;  %v16212_v43 = vpop.f32.mrb[53].mxu1  ;;  %v12573_v54 = vadd.f32 %v15929_v22, %v15921_v57  ;;  %v2948_v3 = vld [vmem:[#allocation2 + $0x80] sm:$0xe] }
 0x1c3   :  { %v16202_v39 = vadd.f32 %v12567_v58, %v12455_v33  ;;  %v16216_v33 = vpop.f32.mrb[54].mxu1  ;;  %v3059_v61 = vsel %vm13972_vm11, %v11526_v36, %v3058_v40  ;;  %v3063_v13 = vsel %vm13972_vm11, %v11527_v49, %v3062_v56  ;;  %v3067_v29 = vsel %vm13972_vm11, %v11528_v31, %v3066_v17  ;;  %v2949_v53 = vld [vmem:[#allocation2 + $0x88] sm:$0xe]  ;;  %v16228_v12 = vld [vmem:[#allocation2 + $0x90] sm:$0xe]  ;;  %v16232_v22 = vpop.f32.mrb[52].mxu0 }
 0x1c4   :  { %v16218_v6 = vadd.f32 %v12570_v20, %v12458_v11  ;;  %v16220_v10 = vpop.f32.mrb[55].mxu1  ;;  %v16230_v57 = vadd.f32 %v12573_v54, %v12461_v24  ;;  %v11530_v38 = vrot.slane %v2946_v45, 9  ;;  %v13685_v58 = vld [vmem:[#allocation2 + $0x74] sm:$0x1]  ;;  %v16236_v30 = vld [vmem:[#allocation2 + $0x98] sm:$0xe]  ;;  %v12464_v40 = vadd.f32 %v15999_v25, %v15989_v52 }
 0x1c5   :  { %v3074_v36 = vrot.slane %v13685_v58, 5  ;;  %v16240_v49 = vpop.f32.mrb[53].mxu0  ;;  %v11531_v44 = vrot.slane %v2947_v4, 9  ;;  %v20018_v56 = vld [vmem:[#allocation31_spill] sm:$0xff]  ;;  %v12467_v55 = vadd.f32 %v16010_v7, %v16005_v14  ;;  %v13686_v45 = vld [vmem:[#allocation2 + $0x7c] sm:$0x1] }
 0x1c6   :  { %v12576_v31 = vadd.f32 %v20018_v56, %v15959_v60  ;;  %v16246_v17 = vpop.f32.mrb[54].mxu0  ;;  %v3078_v11 = vrot.slane %v13686_v45, 5  ;;  %v20019_v15 = vld [vmem:[#allocation33_spill] sm:$0xff]  ;;  %v11532_v4 = vrot.slane %v2948_v3, 9  ;;  %v13687_v24 = vld [vmem:[#allocation2 + $0x84] sm:$0x1] }
 0x1c7   :  { %13347 = vmatmul.mubr.bf16.vlgmr.msra.gmra.mrb[128].mxu0 %v11681_v28  ;;  %v3071_v28 = vsel %vm13972_vm11, %v11529_v51, %v3070_v5  ;;  %v11683_v51 = vcombine.low %v3059_v61, %v3063_v13  ;;  %v20020_v5 = vld [vmem:[#allocation36_spill] sm:$0xff]  ;;  %v16252_v52 = vpop.f32.mrb[55].mxu0  ;;  %v3082_v54 = vrot.slane %v13687_v24, 5  ;;  %v16254_v60 = vld [vmem:[#allocation2 + $0xb8] sm:$0xe]  ;;  %v11533_v7 = vrot.slane %v2949_v53, 9 }
 0x1c8   :  { %13350 = vmatprep.mubr.bf16.mxu0 %v11682_v26  ;;  %v16248_v26 = vld [vmem:[#allocation2 + $0xb0] sm:$0xe]  ;;  %v12579_v20 = vadd.f32 %v20020_v5, %v20019_v15  ;;  %v11684_v25 = vcombine.low %v3067_v29, %v3071_v28  ;;  %v16256_v58 = vadd.f32 %v12576_v31, %v12464_v40  ;;  %v13688_v14 = vld [vmem:[#allocation2 + $0x8c] sm:$0x1]  ;;  %v11534_v13 = vrot.slane %v16228_v12, 9 }
 0x1c9   :  { %v3086_v61 = vrot.slane %v13688_v14, 5  ;;  %v16259_v56 = vld [vmem:[#allocation2 + $0xc0] sm:$0xe]  ;;  %v13689_v15 = vld [vmem:[#allocation2 + $0x94] sm:$0x1]  ;;  %v11535_v29 = vrot.slane %v16236_v30, 9  ;;  %v12470_v28 = vadd.f32 %v16097_v2, %v16084_v23  ;;  %v3075_v53 = vsel %vm13972_vm11, %v11530_v38, %v3074_v36 }
 0x1ca   :  { %v16261_v45 = vadd.f32 %v12579_v20, %v12467_v55  ;;  %v3090_v5 = vrot.slane %v13689_v15, 5  ;;  %v16264_v3 = vld [vmem:[#allocation2 + $0xc8] sm:$0xe]  ;;  %v3079_v40 = vsel %vm13972_vm11, %v11531_v44, %v3078_v11  ;;  %v12582_v12 = vadd.f32 %v16065_v48, %v16059_v19  ;;  %v13690_v55 = vld [vmem:[#allocation2 + $0x9c] sm:$0x1]  ;;  %v20021_v38 = vld [vmem:[#allocation23_spill] sm:$0xff] }
 0x1cb   :  { %v12473_v31 = vadd.f32 %v16106_v16, %v16103_v63  ;;  %v3083_v30 = vsel %vm13972_vm11, %v11532_v4, %v3082_v54  ;;  %v3094_v20 = vrot.slane %v13690_v55, 5  ;;  %v11536_v23 = vrot.slane %v16248_v26, 9  ;;  %v16279_v2 = vld [vmem:[#allocation2 + $0xd0] sm:$0xe]  ;;  %v13691_v48 = vld [vmem:[#allocation2 + $0xb4] sm:$0x1] }
 0x1cc   :  { %v12585_v36 = vadd.f32 %v20021_v38, %v16076_v1  ;;  %v3087_v19 = vsel %vm13972_vm11, %v11533_v7, %v3086_v61  ;;  %v3098_v44 = vrot.slane %v13691_v48, 5  ;;  %v11537_v63 = vrot.slane %v16254_v60, 9  ;;  %v16286_v16 = vld [vmem:[#allocation2 + $0xd8] sm:$0xe]  ;;  %v12486_v11 = vpop.f32.mrb[56].mxu0  ;;  %v12598_v4 = vpop.f32.mrb[56].mxu1 }
 0x1cd   :  { %v13692_v26 = vld [vmem:[#allocation2 + $0xbc] sm:$0x1]  ;;  %v16291_v14 = vld [vmem:[#allocation2 + $0xc4] sm:$0x1]  ;;  %v16296_v7 = vld [vmem:[#allocation2 + $0xe8] sm:$0xe]  ;;  %v3095_v38 = vsel %vm13972_vm11, %v11535_v29, %v3094_v20 }
 0x1ce   :  { %v3102_v24 = vrot.slane %v13692_v26, 5  ;;  %v16298_v61 = vadd.f32 %v12585_v36, %v12473_v31  ;;  %v12487_v60 = vpop.f32.mrb[57].mxu0  ;;  %v12599_v15 = vpop.f32.mrb[57].mxu1  ;;  %v16301_v55 = vld [vmem:[#allocation2 + $0xcc] sm:$0x1]  ;;  %v12476_v26 = vadd.f32 %v16169_v35, %v16161_v8  ;;  %v3091_v31 = vsel %vm13972_vm11, %v11534_v13, %v3090_v5 }
 0x1cf   :  { %13351 = vmatmul.mubr.bf16.gmra.mrb[132].mxu0 %v11683_v51  ;;  %v16288_v51 = vadd.f32 %v12582_v12, %v12470_v28  ;;  %v11685_v28 = vcombine.low %v3075_v53, %v3079_v40  ;;  %v16304_v48 = vld [vmem:[#allocation2 + $0x100] sm:$0xe]  ;;  %v12489_v54 = vpop.f32.mrb[58].mxu0  ;;  %v12601_v1 = vpop.f32.mrb[58].mxu1  ;;  %v12588_v53 = vadd.f32 %v16140_v9, %v16126_v34  ;;  %v12479_v40 = vadd.f32 %v16185_v0, %v16179_v62  ;;  %v13695_v8 = vld [vmem:[#allocation2 + $0xd4] sm:$0x1] }
 0x1d0   :  { %13354 = vmatprep.mubr.bf16.mxu0 %v11684_v25  ;;  %v16294_v25 = vld [vmem:[#allocation2 + $0xe0] sm:$0xe]  ;;  %20023 = vst [vmem:[#allocation11_spill] sm:$0xff] %v16298_v61  ;;  %v12490_v36 = vpop.f32.mrb[59].mxu0  ;;  %v12602_v12 = vpop.f32.mrb[59].mxu1  ;;  %v11540_v61 = vrot.slane %v16279_v2, 9  ;;  %v3099_v13 = vsel %vm13972_vm11, %v11536_v23, %v3098_v44 }
 0x1d1   :  { %20022 = vst [vmem:[#allocation12_spill] sm:$0xff] %v16288_v51  ;;  %v11686_v51 = vcombine.low %v3083_v30, %v3087_v19  ;;  %v3114_v35 = vrot.slane %v13695_v8, 5  ;;  %v12591_v30 = vadd.f32 %v16163_v18, %v16145_v46  ;;  %v11541_v34 = vrot.slane %v16286_v16, 9  ;;  %v13696_v9 = vld [vmem:[#allocation2 + $0xdc] sm:$0x1]  ;;  %v20024_v19 = vld [vmem:[#allocation57_spill] sm:$0xff] }
 0x1d2   :  { %v3118_v5 = vrot.slane %v13696_v9, 5  ;;  %v16322_v62 = vadd.f32 %v12588_v53, %v12476_v26  ;;  %v11542_v0 = vrot.slane %v16294_v25, 9  ;;  %v3122_v29 = vrot.slane %v20024_v19, 5  ;;  %v16331_v18 = vld [vmem:[#allocation2 + $0xec] sm:$0x1] }
 0x1d3   :  { %v16327_v2 = vadd.f32 %v12591_v30, %v12479_v40  ;;  %v3103_v46 = vsel %vm13972_vm11, %v11537_v63, %v3102_v24  ;;  %v12482_v16 = vadd.f32 %v16240_v49, %v16232_v22  ;;  %v12594_v26 = vadd.f32 %v16212_v43, %v16206_v50  ;;  %v20025_v49 = vld [vmem:[#allocation48_spill] sm:$0xff]  ;;  %v20027_v50 = vld [vmem:[#allocation50_spill] sm:$0xff]  ;;  %v20028_v43 = vld [vmem:[#allocation51_spill] sm:$0xff] }
 0x1d4   :  { %v12485_v53 = vadd.f32 %v16252_v52, %v16246_v17  ;;  %v12597_v63 = vadd.f32 %v16220_v10, %v16216_v33  ;;  %v12488_v24 = vadd.f32 %v12487_v60, %v12486_v11  ;;  %v11688_v40 = vcombine.low %v3099_v13, %v3103_v46  ;;  %v20029_v33 = vld [vmem:[#allocation52_spill] sm:$0xff]  ;;  %v20030_v10 = vld [vmem:[#allocation25_spill] sm:$0xff]  ;;  %v20031_v60 = vld [vmem:[#allocation26_spill] sm:$0xff] }
 0x1d5   :  { %v16343_v8 = vadd.f32 %v12594_v26, %v12482_v16  ;;  %v12600_v30 = vadd.f32 %v12599_v15, %v12598_v4  ;;  %v12491_v9 = vadd.f32 %v12490_v36, %v12489_v54  ;;  %v12603_v22 = vadd.f32 %v12602_v12, %v12601_v1  ;;  %v20032_v4 = vld [vmem:[#allocation27_spill] sm:$0xff]  ;;  %v20033_v15 = vld [vmem:[#allocation58_spill] sm:$0xff]  ;;  %v20036_v36 = vld [vmem:[#allocation29_spill] sm:$0xff] }
 0x1d6   :  { %v16345_v44 = vadd.f32 %v12597_v63, %v12485_v53  ;;  %v16353_v17 = vadd.f32 %v20028_v43, %v20027_v50  ;;  %v16359_v11 = vadd.f32 %v20030_v10, %v20029_v33  ;;  %v16363_v54 = vadd.f32 %v20032_v4, %v20031_v60  ;;  %v20034_v1 = vld [vmem:[#allocation59_spill] sm:$0xff]  ;;  %v20037_v46 = vld [vmem:[#allocation18_spill] sm:$0xff]  ;;  %v20040_v63 = vld [vmem:[#allocation32_spill] sm:$0xff] }
 0x1d7   :  { %13355 = vmatmul.mubr.bf16.gmra.mrb[136].mxu0 %v11685_v28  ;;  %v11687_v28 = vcombine.low %v3091_v31, %v3095_v38  ;;  %v16355_v52 = vadd.f32 %v12600_v30, %v12488_v24  ;;  %v16367_v12 = vadd.f32 %v20034_v1, %v20033_v15  ;;  %v16369_v38 = vadd.f32 %v12603_v22, %v12491_v9  ;;  %v20035_v31 = vld [vmem:[#allocation60_spill] sm:$0xff]  ;;  %v20038_v16 = vld [vmem:[#allocation19_spill] sm:$0xff]  ;;  %v20039_v53 = vld [vmem:[#allocation30_spill] sm:$0xff] }
 0x1d8   :  { %13358 = vmatprep.mubr.bf16.mxu0 %v11686_v51  ;;  %v20026_v51 = vld [vmem:[#allocation49_spill] sm:$0xff]  ;;  %v16373_v13 = vadd.f32 %v20036_v36, %v20035_v31  ;;  %v16377_v26 = vadd.f32 %v20038_v16, %v20037_v46  ;;  %v16381_v24 = vadd.f32 %v20040_v63, %v20039_v53  ;;  %v2961_v30 = vld [vmem:[#allocation2 + $0x108] sm:$0xe]  ;;  %v20044_v9 = vld [vmem:[#allocation38_spill] sm:$0xff]  ;;  %v12604_v31 = vpop.f32.mrb[60].mxu1  ;;  %v16405_v53 = vadd.f32 %v16122_v32, %v16118_v59 }
 0x1d9   :  { %v16349_v20 = vadd.f32 %v20026_v51, %v20025_v49  ;;  %v20041_v49 = vld [vmem:[#allocation37_spill] sm:$0xff]  ;;  %v20042_v51 = vld [vmem:[#allocation20_spill] sm:$0xff]  ;;  %v20047_v4 = vld [vmem:[#allocation39_spill] sm:$0xff]  ;;  %v16409_v63 = vadd.f32 %v16138_v42, %v16134_v37  ;;  %v20054_v32 = vrot.slane %v16264_v3, 9 }
 0x1da   :  { %v16385_v50 = vadd.f32 %v20042_v51, %v20041_v49  ;;  %v20043_v43 = vld [vmem:[#allocation21_spill] sm:$0xff]  ;;  %v20045_v33 = vld [vmem:[#allocation24_spill] sm:$0xff]  ;;  %v20049_v36 = vld [vmem:[#allocation42_spill] sm:$0xff]  ;;  %v16413_v49 = vadd.f32 %v16177_v21, %v16159_v41  ;;  %v20052_v51 = vrot.slane %v16259_v56, 9  ;;  %v3115_v21 = vsel %vm13972_vm11, %v11540_v61, %v3114_v35  ;;  %v12492_v56 = vpop.f32.mrb[60].mxu0 }
 0x1db   :  { %v16389_v22 = vadd.f32 %v20044_v9, %v20043_v43  ;;  %v20046_v10 = vld [vmem:[#allocation40_spill] sm:$0xff]  ;;  %v20048_v15 = vld [vmem:[#allocation41_spill] sm:$0xff]  ;;  %v20050_v46 = vld [vmem:[#allocation43_spill] sm:$0xff]  ;;  %v20053_v9 = vrot.slane %v16301_v55, 5  ;;  %v3119_v41 = vsel %vm13972_vm11, %v11541_v34, %v3118_v5  ;;  %v3123_v35 = vsel %vm13972_vm11, %v11542_v0, %v3122_v29 }
 0x1dc   :  { %v16393_v60 = vadd.f32 %v20046_v10, %v20045_v33  ;;  %v16397_v1 = vadd.f32 %v20048_v15, %v20047_v4  ;;  %v16401_v16 = vadd.f32 %v20050_v46, %v20049_v36  ;;  %v13698_v37 = vld [vmem:[#allocation2 + $0x104] sm:$0x1]  ;;  %v12605_v33 = vpop.f32.mrb[61].mxu1  ;;  %v12493_v10 = vpop.f32.mrb[61].mxu0  ;;  %v11545_v15 = vrot.slane %v2961_v30, 9 }
 0x1dd   :  { %v3111_v59 = vsel %vm13972_vm11, %v20054_v32, %v20053_v9  ;;  %v3130_v42 = vrot.slane %v13698_v37, 5  ;;  %v12494_v3 = vadd.f32 %v12493_v10, %v12492_v56  ;;  %v12495_v36 = vpop.f32.mrb[62].mxu0  ;;  %v2962_v37 = vld [vmem:[#allocation2 + $0x110] sm:$0xe]  ;;  %v20055_v34 = vrot.slane %v16331_v18, 5 }
 0x1de   :  { %v12496_v32 = vpop.f32.mrb[63].mxu0  ;;  %v20056_v5 = vrot.slane %v16296_v7, 9 }
 0x1df   :  { %13359 = vmatmul.mubr.bf16.gmra.mrb[140].mxu0 %v11687_v28  ;;  %v20051_v28 = vrot.slane %v16291_v14, 5  ;;  %v12606_v14 = vadd.f32 %v12605_v33, %v12604_v31  ;;  %v12497_v61 = vadd.f32 %v12496_v32, %v12495_v36 }
 0x1e0   :  { %13362 = vmatprep.mubr.bf16.mxu0 %v11688_v40  ;;  %v12607_v40 = vpop.f32.mrb[62].mxu1  ;;  %v3127_v30 = vsel %vm13972_vm11, %v20056_v5, %v20055_v34 }
 0x1e1   :  { %v3107_v43 = vsel %vm13972_vm11, %v20052_v51, %v20051_v28  ;;  %v12608_v4 = vpop.f32.mrb[63].mxu1  ;;  %v11690_v28 = vcombine.low %v3115_v21, %v3119_v41  ;;  %v13699_v51 = vld [vmem:[#allocation2 + $0x10c] sm:$0x1]  ;;  %v16431_v23 = vadd.f32 %v12606_v14, %v12494_v3 }
 0x1e2   :  { %v11689_v55 = vcombine.low %v3107_v43, %v3111_v59  ;;  %v12609_v46 = vadd.f32 %v12608_v4, %v12607_v40  ;;  %v3134_v9 = vrot.slane %v13699_v51, 5  ;;  %v12738_v43 = vpop.f32.mrb[64].mxu1 }
 0x1e4   :  { %v16445_v31 = vadd.f32 %v12609_v46, %v12497_v61 }
 0x1e7   :  { %13363 = vmatmul.mubr.bf16.gmra.mrb[144].mxu0 %v11689_v55 }
 0x1e8   :  { %9 = vsyncpa [#allocation5], 0  ;;  %13366 = vmatprep.mubr.bf16.mxu0 %v11690_v28  ;;  %v2963_v59 = vld [vmem:[#allocation2 + $0x118] sm:$0xe]  ;;  %v12739_v33 = vpop.f32.mrb[65].mxu1  ;;  %v20057_v19 = vrot.slane %v16304_v48, 9  ;;  %v3135_v0 = vsel %vm13972_vm11, %v11545_v15, %v3134_v9  ;;  %v11691_v41 = vcombine.low %v3123_v35, %v3127_v30 }
 0x1e9   :  { %v2964_v29 = vld [vmem:[#allocation2 + $0x120] sm:$0xe]  ;;  %v12626_v7 = vpop.f32.mrb[64].mxu0  ;;  %v12740_v18 = vadd.f32 %v12739_v33, %v12738_v43  ;;  %v12741_v21 = vpop.f32.mrb[66].mxu1  ;;  %v11546_v56 = vrot.slane %v2962_v37, 9  ;;  %v11547_v3 = vrot.slane %v2963_v59, 9 }
 0x1ea   :  { %v3131_v25 = vsel %vm13972_vm11, %v20057_v19, %v3130_v42  ;;  %v2965_v14 = vld [vmem:[#allocation2 + $0x128] sm:$0xe]  ;;  %v12627_v40 = vpop.f32.mrb[65].mxu0  ;;  %v12742_v10 = vpop.f32.mrb[67].mxu1  ;;  %v13700_v4 = vld [vmem:[#allocation2 + $0x114] sm:$0x1] }
 0x1eb   :  { %v3138_v55 = vrot.slane %v13700_v4, 5  ;;  %v12628_v36 = vadd.f32 %v12627_v40, %v12626_v7  ;;  %v12629_v48 = vpop.f32.mrb[66].mxu0  ;;  %v12743_v46 = vadd.f32 %v12742_v10, %v12741_v21  ;;  %v11692_v28 = vcombine.low %v3131_v25, %v3135_v0  ;;  %v13701_v42 = vld [vmem:[#allocation2 + $0x11c] sm:$0x1]  ;;  %v20059_v5 = vld [vmem:[#allocation35_spill] sm:$0xff]  ;;  %v20060_v40 = vld [vmem:[#allocation44_spill] sm:$0xff] }
 0x1ec   :  { %v3142_v51 = vrot.slane %v13701_v42, 5  ;;  %v11548_v32 = vrot.slane %v2964_v29, 9  ;;  %v20058_v15 = vld [vmem:[#allocation34_spill] sm:$0xff]  ;;  %v12630_v61 = vpop.f32.mrb[67].mxu0  ;;  %v11549_v34 = vrot.slane %v2965_v14, 9  ;;  %v3150_v35 = vrot.slane %v20059_v5, 5 }
 0x1ed   :  { %v3146_v9 = vrot.slane %v20058_v15, 5  ;;  %v4765_v37 = vadd.f32 %v12628_v36, %v16349_v20  ;;  %v12631_v30 = vadd.f32 %v12630_v61, %v12629_v48  ;;  %v3139_v33 = vsel %vm13972_vm11, %v11546_v56, %v3138_v55  ;;  %v2966_v25 = vld [vmem:[#allocation2 + $0x130] sm:$0xe]  ;;  %v2967_v29 = vld [vmem:[#allocation2 + $0x138] sm:$0xe]  ;;  %v12632_v7 = vpop.f32.mrb[68].mxu0 }
 0x1ee   :  { %v3143_v19 = vsel %vm13972_vm11, %v11547_v3, %v3142_v51  ;;  %v3151_v20 = vsel %vm13972_vm11, %v11549_v34, %v3150_v35  ;;  %v11550_v14 = vrot.slane %v2966_v25, 9  ;;  %v3154_v56 = vrot.slane %v20060_v40, 5  ;;  %v20061_v48 = vld [vmem:[#allocation22_spill] sm:$0xff] }
 0x1ef   :  { %13367 = vmatmul.mubr.bf16.gmra.mrb[148].mxu0 %v11691_v41  ;;  %v4768_v43 = vadd.f32 %v12631_v30, %v16353_v17  ;;  %v16457_v59 = vadd.f32 %v12740_v18, %v4765_v37  ;;  %v3147_v0 = vsel %vm13972_vm11, %v11548_v32, %v3146_v9  ;;  %v12633_v17 = vpop.f32.mrb[69].mxu0  ;;  %v12744_v18 = vpop.f32.mrb[68].mxu1  ;;  %v11693_v41 = vcombine.low %v3139_v33, %v3143_v19 }
 0x1f0   :  { %13370 = vmatprep.mubr.bf16.mxu0 %v11692_v28  ;;  %v12634_v10 = vadd.f32 %v12633_v17, %v12632_v7  ;;  %v12635_v4 = vpop.f32.mrb[70].mxu0  ;;  %v12745_v55 = vpop.f32.mrb[69].mxu1  ;;  %v11694_v3 = vcombine.low %v3147_v0, %v3151_v20  ;;  %v11551_v36 = vrot.slane %v2967_v29, 9  ;;  %v3158_v28 = vrot.slane %v20061_v48, 5 }
 0x1f1   :  { %v16467_v21 = vadd.f32 %v12743_v46, %v4768_v43  ;;  %v12636_v42 = vpop.f32.mrb[71].mxu0  ;;  %v12746_v51 = vadd.f32 %v12745_v55, %v12744_v18  ;;  %v12747_v32 = vpop.f32.mrb[70].mxu1  ;;  %v3155_v35 = vsel %vm13972_vm11, %v11550_v14, %v3154_v56 }
 0x1f2   :  { %v4773_v15 = vadd.f32 %v12634_v10, %v16359_v11  ;;  %v12637_v46 = vadd.f32 %v12636_v42, %v12635_v4  ;;  %v12748_v9 = vpop.f32.mrb[71].mxu1  ;;  %v3159_v37 = vsel %vm13972_vm11, %v11551_v36, %v3158_v28  ;;  %v12638_v30 = vpop.f32.mrb[72].mxu0 }
 0x1f3   :  { %v12749_v61 = vadd.f32 %v12748_v9, %v12747_v32  ;;  %v12639_v33 = vpop.f32.mrb[73].mxu0  ;;  %v11695_v11 = vcombine.low %v3155_v35, %v3159_v37 }
 0x1f4   :  { %v4776_v34 = vadd.f32 %v12637_v46, %v16363_v54  ;;  %v16473_v5 = vadd.f32 %v12746_v51, %v4773_v15  ;;  %v12640_v19 = vadd.f32 %v12639_v33, %v12638_v30  ;;  %v12641_v25 = vpop.f32.mrb[74].mxu0  ;;  %v12750_v54 = vpop.f32.mrb[72].mxu1 }
 0x1f5   :  { %v12642_v0 = vpop.f32.mrb[75].mxu0  ;;  %v12751_v7 = vpop.f32.mrb[73].mxu1 }
 0x1f6   :  { %v16479_v43 = vadd.f32 %v12749_v61, %v4776_v34  ;;  %v4781_v20 = vadd.f32 %v12640_v19, %v16367_v12  ;;  %v12643_v29 = vadd.f32 %v12642_v0, %v12641_v25  ;;  %v12752_v18 = vadd.f32 %v12751_v7, %v12750_v54 }
 0x1f7   :  { %13371 = vmatmul.mubr.bf16.gmra.mrb[152].mxu0 %v11693_v41  ;;  %v12753_v41 = vpop.f32.mrb[74].mxu1 }
 0x1f8   :  { %13374 = vmatprep.mubr.bf16.mxu0 %v11694_v3  ;;  %v4784_v17 = vadd.f32 %v12643_v29, %v16373_v13  ;;  %v12754_v14 = vpop.f32.mrb[75].mxu1  ;;  %v16483_v56 = vadd.f32 %v12752_v18, %v4781_v20 }
 0x1f9   :  { %v12755_v40 = vadd.f32 %v12754_v14, %v12753_v41 }
 0x1fb   :  { %v16485_v10 = vadd.f32 %v12755_v40, %v4784_v17 }
 0x1fe   :  { %v12644_v4 = vpop.f32.mrb[76].mxu0 }
 0x1ff   :  { %13375 = vmatmul.mubr.bf16.gmra.mrb[156].mxu0 %v11695_v11  ;;  %v12645_v55 = vpop.f32.mrb[77].mxu0 }
 0x200   :  { %v12756_v3 = vpop.f32.mrb[76].mxu1  ;;  %v12646_v36 = vadd.f32 %v12645_v55, %v12644_v4  ;;  %v12647_v48 = vpop.f32.mrb[78].mxu0 }
 0x201   :  { %v12757_v12 = vpop.f32.mrb[77].mxu1  ;;  %v12648_v28 = vpop.f32.mrb[79].mxu0 }
 0x202   :  { %v12758_v42 = vadd.f32 %v12757_v12, %v12756_v3  ;;  %v12759_v51 = vpop.f32.mrb[78].mxu1  ;;  %v4789_v32 = vadd.f32 %v12646_v36, %v16377_v26  ;;  %v12649_v13 = vadd.f32 %v12648_v28, %v12647_v48 }
 0x203   :  { %v12760_v15 = vpop.f32.mrb[79].mxu1 }
 0x204   :  { %v12761_v46 = vadd.f32 %v12760_v15, %v12759_v51  ;;  %v4792_v9 = vadd.f32 %v12649_v13, %v16381_v24  ;;  %v16489_v61 = vadd.f32 %v12758_v42, %v4789_v32 }
 0x206   :  { %v12650_v34 = vpop.f32.mrb[80].mxu0  ;;  %v16491_v35 = vadd.f32 %v12761_v46, %v4792_v9 }
 0x207   :  { %v12651_v37 = vpop.f32.mrb[81].mxu0 }
 0x208   :  { %v12652_v33 = vadd.f32 %v12651_v37, %v12650_v34  ;;  %v12653_v11 = vpop.f32.mrb[82].mxu0 }
 0x209   :  { %v12762_v30 = vpop.f32.mrb[80].mxu1  ;;  %v12654_v25 = vpop.f32.mrb[83].mxu0 }
 0x20a   :  { %v12763_v19 = vpop.f32.mrb[81].mxu1  ;;  %v4797_v26 = vadd.f32 %v12652_v33, %v16385_v50  ;;  %v12655_v54 = vadd.f32 %v12654_v25, %v12653_v11 }
 0x20b   :  { %v12764_v0 = vadd.f32 %v12763_v19, %v12762_v30  ;;  %v12765_v20 = vpop.f32.mrb[82].mxu1 }
 0x20c   :  { %v12766_v29 = vpop.f32.mrb[83].mxu1  ;;  %v4800_v24 = vadd.f32 %v12655_v54, %v16389_v22 }
 0x20d   :  { %v12767_v7 = vadd.f32 %v12766_v29, %v12765_v20  ;;  %v16495_v17 = vadd.f32 %v12764_v0, %v4797_v26 }
 0x20e   :  { %v12656_v18 = vpop.f32.mrb[84].mxu0 }
 0x20f   :  { %v16497_v41 = vadd.f32 %v12767_v7, %v4800_v24  ;;  %v12657_v14 = vpop.f32.mrb[85].mxu0 }
 0x210   :  { %v12658_v4 = vadd.f32 %v12657_v14, %v12656_v18  ;;  %v12659_v55 = vpop.f32.mrb[86].mxu0 }
 0x211   :  { %v12768_v40 = vpop.f32.mrb[84].mxu1  ;;  %v12660_v36 = vpop.f32.mrb[87].mxu0 }
 0x212   :  { %v12769_v3 = vpop.f32.mrb[85].mxu1  ;;  %v4805_v50 = vadd.f32 %v12658_v4, %v16393_v60  ;;  %v12661_v28 = vadd.f32 %v12660_v36, %v12659_v55 }
 0x213   :  { %v12770_v48 = vadd.f32 %v12769_v3, %v12768_v40  ;;  %v12771_v12 = vpop.f32.mrb[86].mxu1 }
 0x214   :  { %v12772_v42 = vpop.f32.mrb[87].mxu1  ;;  %v4808_v22 = vadd.f32 %v12661_v28, %v16397_v1 }
 0x215   :  { %v12773_v51 = vadd.f32 %v12772_v42, %v12771_v12  ;;  %v16501_v32 = vadd.f32 %v12770_v48, %v4805_v50 }
 0x216   :  { %v12662_v13 = vpop.f32.mrb[88].mxu0 }
 0x217   :  { %v16503_v15 = vadd.f32 %v12773_v51, %v4808_v22  ;;  %v12663_v46 = vpop.f32.mrb[89].mxu0 }
 0x218   :  { %v12664_v9 = vadd.f32 %v12663_v46, %v12662_v13  ;;  %v12665_v34 = vpop.f32.mrb[90].mxu0 }
 0x219   :  { %v12666_v30 = vpop.f32.mrb[91].mxu0 }
 0x21a   :  { %v4813_v33 = vadd.f32 %v12664_v9, %v16401_v16  ;;  %v12667_v11 = vadd.f32 %v12666_v30, %v12665_v34 }
 0x21b   :  { %v12774_v37 = vpop.f32.mrb[88].mxu1 }
 0x21c   :  { %v12775_v19 = vpop.f32.mrb[89].mxu1  ;;  %v4816_v0 = vadd.f32 %v12667_v11, %v16405_v53 }
 0x21d   :  { %v12776_v60 = vadd.f32 %v12775_v19, %v12774_v37  ;;  %v12777_v25 = vpop.f32.mrb[90].mxu1 }
 0x21e   :  { %v12778_v20 = vpop.f32.mrb[91].mxu1 }
 0x21f   :  { %v12779_v1 = vadd.f32 %v12778_v20, %v12777_v25  ;;  %v16507_v26 = vadd.f32 %v12776_v60, %v4813_v33 }
 0x221   :  { %v16509_v54 = vadd.f32 %v12779_v1, %v4816_v0 }
 0x22e   :  { %v12668_v29 = vpop.f32.mrb[92].mxu0 }
 0x22f   :  { %v12669_v7 = vpop.f32.mrb[93].mxu0 }
 0x230   :  { %v12780_v24 = vpop.f32.mrb[92].mxu1  ;;  %v12670_v18 = vadd.f32 %v12669_v7, %v12668_v29  ;;  %v12671_v14 = vpop.f32.mrb[94].mxu0 }
 0x231   :  { %v12781_v40 = vpop.f32.mrb[93].mxu1  ;;  %v12672_v4 = vpop.f32.mrb[95].mxu0 }
 0x232   :  { %v12782_v16 = vadd.f32 %v12781_v40, %v12780_v24  ;;  %v12783_v55 = vpop.f32.mrb[94].mxu1  ;;  %v4821_v3 = vadd.f32 %v12670_v18, %v16409_v63  ;;  %v12673_v36 = vadd.f32 %v12672_v4, %v12671_v14 }
 0x233   :  { %v12784_v48 = vpop.f32.mrb[95].mxu1 }
 0x234   :  { %v12785_v53 = vadd.f32 %v12784_v48, %v12783_v55  ;;  %v4824_v12 = vadd.f32 %v12673_v36, %v16413_v49  ;;  %v16513_v50 = vadd.f32 %v12782_v16, %v4821_v3 }
 0x236   :  { %v12674_v28 = vpop.f32.mrb[96].mxu0  ;;  %v16515_v42 = vadd.f32 %v12785_v53, %v4824_v12 }
 0x237   :  { %v12675_v51 = vpop.f32.mrb[97].mxu0 }
 0x238   :  { %v12676_v13 = vadd.f32 %v12675_v51, %v12674_v28  ;;  %v12677_v46 = vpop.f32.mrb[98].mxu0 }
 0x239   :  { %v12786_v22 = vpop.f32.mrb[96].mxu1  ;;  %v12678_v34 = vpop.f32.mrb[99].mxu0 }
 0x23a   :  { %v12787_v9 = vpop.f32.mrb[97].mxu1  ;;  %v4829_v63 = vadd.f32 %v12676_v13, %v16198_v47  ;;  %v12679_v33 = vadd.f32 %v12678_v34, %v12677_v46 }
 0x23b   :  { %v12788_v37 = vadd.f32 %v12787_v9, %v12786_v22  ;;  %v12789_v30 = vpop.f32.mrb[98].mxu1 }
 0x23c   :  { %v12790_v11 = vpop.f32.mrb[99].mxu1  ;;  %v4832_v49 = vadd.f32 %v12679_v33, %v16202_v39 }
 0x23d   :  { %v12791_v19 = vadd.f32 %v12790_v11, %v12789_v30  ;;  %v16519_v60 = vadd.f32 %v12788_v37, %v4829_v63 }
 0x23e   :  { %v12680_v25 = vpop.f32.mrb[100].mxu0 }
 0x23f   :  { %v16521_v0 = vadd.f32 %v12791_v19, %v4832_v49  ;;  %v12681_v20 = vpop.f32.mrb[101].mxu0 }
 0x240   :  { %v12682_v29 = vadd.f32 %v12681_v20, %v12680_v25  ;;  %v12683_v7 = vpop.f32.mrb[102].mxu0 }
 0x241   :  { %v12684_v18 = vpop.f32.mrb[103].mxu0 }
 0x242   :  { %v12792_v1 = vpop.f32.mrb[100].mxu1  ;;  %v4837_v47 = vadd.f32 %v12682_v29, %v16218_v6  ;;  %v12685_v4 = vadd.f32 %v12684_v18, %v12683_v7 }
 0x243   :  { %v12793_v24 = vpop.f32.mrb[101].mxu1 }
 0x244   :  { %v12794_v14 = vadd.f32 %v12793_v24, %v12792_v1  ;;  %v12795_v40 = vpop.f32.mrb[102].mxu1  ;;  %v4840_v39 = vadd.f32 %v12685_v4, %v16230_v57  ;;  %v20062_v24 = vld [vmem:[#allocation12_spill] sm:$0xff] }
 0x245   :  { %v12796_v16 = vpop.f32.mrb[103].mxu1 }
 0x246   :  { %v12797_v55 = vadd.f32 %v12796_v16, %v12795_v40  ;;  %v16525_v3 = vadd.f32 %v12794_v14, %v4837_v47  ;;  %v12686_v36 = vpop.f32.mrb[104].mxu0  ;;  %v20063_v47 = vld [vmem:[#allocation11_spill] sm:$0xff] }
 0x247   :  { %v12687_v53 = vpop.f32.mrb[105].mxu0 }
 0x248   :  { %v16527_v48 = vadd.f32 %v12797_v55, %v4840_v39  ;;  %v12688_v12 = vadd.f32 %v12687_v53, %v12686_v36  ;;  %v12689_v28 = vpop.f32.mrb[106].mxu0 }
 0x249   :  { %v12690_v51 = vpop.f32.mrb[107].mxu0 }
 0x24a   :  { %v4845_v22 = vadd.f32 %v12688_v12, %v16256_v58  ;;  %v12691_v46 = vadd.f32 %v12690_v51, %v12689_v28 }
 0x24c   :  { %v4848_v6 = vadd.f32 %v12691_v46, %v16261_v45 }
 0x24e   :  { %v12798_v13 = vpop.f32.mrb[104].mxu1 }
 0x24f   :  { %v12799_v9 = vpop.f32.mrb[105].mxu1 }
 0x250   :  { %v12800_v34 = vadd.f32 %v12799_v9, %v12798_v13  ;;  %v12801_v37 = vpop.f32.mrb[106].mxu1 }
 0x251   :  { %v12802_v30 = vpop.f32.mrb[107].mxu1 }
 0x252   :  { %v12803_v57 = vadd.f32 %v12802_v30, %v12801_v37  ;;  %v16531_v63 = vadd.f32 %v12800_v34, %v4845_v22 }
 0x254   :  { %v16533_v33 = vadd.f32 %v12803_v57, %v4848_v6 }
 0x260   :  { %v12692_v11 = vpop.f32.mrb[108].mxu0 }
 0x261   :  { %v12693_v19 = vpop.f32.mrb[109].mxu0 }
 0x262   :  { %v12804_v49 = vpop.f32.mrb[108].mxu1  ;;  %v12694_v25 = vadd.f32 %v12693_v19, %v12692_v11  ;;  %v12695_v20 = vpop.f32.mrb[110].mxu0 }
 0x263   :  { %v12805_v1 = vpop.f32.mrb[109].mxu1  ;;  %v12696_v58 = vpop.f32.mrb[111].mxu0 }
 0x264   :  { %v12806_v29 = vadd.f32 %v12805_v1, %v12804_v49  ;;  %v12807_v7 = vpop.f32.mrb[110].mxu1  ;;  %v4853_v18 = vadd.f32 %v12694_v25, %v20062_v24  ;;  %v12697_v45 = vadd.f32 %v12696_v58, %v12695_v20 }
 0x265   :  { %v12808_v14 = vpop.f32.mrb[111].mxu1 }
 0x266   :  { %v12809_v40 = vadd.f32 %v12808_v14, %v12807_v7  ;;  %v4856_v4 = vadd.f32 %v12697_v45, %v20063_v47  ;;  %v16537_v16 = vadd.f32 %v12806_v29, %v4853_v18 }
 0x268   :  { %v12698_v55 = vpop.f32.mrb[112].mxu0  ;;  %v16539_v39 = vadd.f32 %v12809_v40, %v4856_v4 }
 0x269   :  { %v12699_v36 = vpop.f32.mrb[113].mxu0 }
 0x26a   :  { %v12700_v12 = vadd.f32 %v12699_v36, %v12698_v55  ;;  %v12701_v28 = vpop.f32.mrb[114].mxu0 }
 0x26b   :  { %v12810_v53 = vpop.f32.mrb[112].mxu1  ;;  %v12702_v22 = vpop.f32.mrb[115].mxu0 }
 0x26c   :  { %v12811_v51 = vpop.f32.mrb[113].mxu1  ;;  %v4861_v9 = vadd.f32 %v12700_v12, %v16322_v62  ;;  %v12703_v6 = vadd.f32 %v12702_v22, %v12701_v28 }
 0x26d   :  { %v12812_v13 = vadd.f32 %v12811_v51, %v12810_v53  ;;  %v12813_v46 = vpop.f32.mrb[114].mxu1 }
 0x26e   :  { %v12814_v34 = vpop.f32.mrb[115].mxu1  ;;  %v4864_v30 = vadd.f32 %v12703_v6, %v16327_v2 }
 0x26f   :  { %v12815_v37 = vadd.f32 %v12814_v34, %v12813_v46  ;;  %v16543_v57 = vadd.f32 %v12812_v13, %v4861_v9 }
 0x270   :  { %v12704_v11 = vpop.f32.mrb[116].mxu0 }
 0x271   :  { %v16545_v19 = vadd.f32 %v12815_v37, %v4864_v30  ;;  %v12705_v49 = vpop.f32.mrb[117].mxu0 }
 0x272   :  { %v12706_v25 = vadd.f32 %v12705_v49, %v12704_v11  ;;  %v12707_v20 = vpop.f32.mrb[118].mxu0 }
 0x273   :  { %v12708_v58 = vpop.f32.mrb[119].mxu0 }
 0x274   :  { %v4869_v29 = vadd.f32 %v12706_v25, %v16343_v8  ;;  %v12709_v7 = vadd.f32 %v12708_v58, %v12707_v20 }
 0x275   :  { %v12816_v1 = vpop.f32.mrb[116].mxu1 }
 0x276   :  { %v12817_v24 = vpop.f32.mrb[117].mxu1  ;;  %v4872_v45 = vadd.f32 %v12709_v7, %v16345_v44 }
 0x277   :  { %v12818_v62 = vadd.f32 %v12817_v24, %v12816_v1  ;;  %v12819_v18 = vpop.f32.mrb[118].mxu1 }
 0x278   :  { %v12820_v14 = vpop.f32.mrb[119].mxu1 }
 0x279   :  { %v12821_v2 = vadd.f32 %v12820_v14, %v12819_v18  ;;  %v16549_v40 = vadd.f32 %v12818_v62, %v4869_v29 }
 0x27b   :  { %v16551_v55 = vadd.f32 %v12821_v2, %v4872_v45 }
 0x27c   :  { %v12710_v47 = vpop.f32.mrb[120].mxu0 }
 0x27d   :  { %v12711_v4 = vpop.f32.mrb[121].mxu0 }
 0x27e   :  { %v12712_v36 = vadd.f32 %v12711_v4, %v12710_v47  ;;  %v12713_v53 = vpop.f32.mrb[122].mxu0 }
 0x27f   :  { %v12714_v12 = vpop.f32.mrb[123].mxu0 }
 0x280   :  { %v4877_v28 = vadd.f32 %v12712_v36, %v16355_v52  ;;  %v12715_v8 = vadd.f32 %v12714_v12, %v12713_v53  ;;  %v12822_v51 = vpop.f32.mrb[120].mxu1 }
 0x281   :  { %v12823_v13 = vpop.f32.mrb[121].mxu1 }
 0x282   :  { %v4880_v22 = vadd.f32 %v12715_v8, %v16369_v38  ;;  %v12824_v46 = vadd.f32 %v12823_v13, %v12822_v51  ;;  %v12825_v44 = vpop.f32.mrb[122].mxu1 }
 0x283   :  { %v12826_v9 = vpop.f32.mrb[123].mxu1 }
 0x284   :  { %v12827_v6 = vadd.f32 %v12826_v9, %v12825_v44  ;;  %v16555_v34 = vadd.f32 %v12824_v46, %v4877_v28 }
 0x286   :  { %v16557_v37 = vadd.f32 %v12827_v6, %v4880_v22 }
 0x292   :  { %v12716_v30 = vpop.f32.mrb[124].mxu0 }
 0x293   :  { %v12717_v11 = vpop.f32.mrb[125].mxu0 }
 0x294   :  { %v12828_v49 = vpop.f32.mrb[124].mxu1  ;;  %v12718_v25 = vadd.f32 %v12717_v11, %v12716_v30  ;;  %v12719_v20 = vpop.f32.mrb[126].mxu0 }
 0x295   :  { %v12829_v1 = vpop.f32.mrb[125].mxu1  ;;  %v12720_v52 = vpop.f32.mrb[127].mxu0 }
 0x296   :  { %v12830_v58 = vadd.f32 %v12829_v1, %v12828_v49  ;;  %v12831_v29 = vpop.f32.mrb[126].mxu1  ;;  %v4885_v38 = vadd.f32 %v12718_v25, %v16431_v23  ;;  %v12721_v7 = vadd.f32 %v12720_v52, %v12719_v20 }
 0x297   :  { %v12832_v24 = vpop.f32.mrb[127].mxu1 }
 0x298   :  { %v12833_v62 = vadd.f32 %v12832_v24, %v12831_v29  ;;  %v4888_v18 = vadd.f32 %v12721_v7, %v16445_v31  ;;  %v16561_v45 = vadd.f32 %v12830_v58, %v4885_v38 }
 0x29a   :  { %v13348_v14 = vpop.f32.mrb[128].mxu0  ;;  %v16563_v2 = vadd.f32 %v12833_v62, %v4888_v18 }
 0x29b   :  { %v16566_v47 = vadd.f32 %v13348_v14, %v16473_v5  ;;  %v5086_v4 = vpop.f32.mrb[129].mxu0 }
 0x29c   :  { %v16569_v36 = vadd.f32 %v5086_v4, %v16457_v59  ;;  %v13349_v53 = vpop.f32.mrb[130].mxu0 }
 0x29d   :  { %v16572_v23 = vadd.f32 %v13349_v53, %v16479_v43  ;;  %v5089_v12 = vpop.f32.mrb[131].mxu0 }
 0x29e   :  { %v16575_v28 = vadd.f32 %v5089_v12, %v16467_v21 }
 0x2a0   :  { %v5213_v31 = vadd.f32 %v16575_v28, %v16569_v36 }
 0x2a2   :  { %v5214_v8 = vadd.f32 %v5213_v31, %v16566_v47  ;;  %v13352_v51 = vpop.f32.mrb[132].mxu0 }
 0x2a3   :  { %v16581_v5 = vadd.f32 %v13352_v51, %v16489_v61  ;;  %v5102_v22 = vpop.f32.mrb[133].mxu0 }
 0x2a4   :  { %v16584_v59 = vadd.f32 %v5102_v22, %v16483_v56  ;;  %v5215_v43 = vadd.f32 %v5214_v8, %v16572_v23  ;;  %v13353_v13 = vpop.f32.mrb[134].mxu0 }
 0x2a5   :  { %v16588_v46 = vadd.f32 %v13353_v13, %v16491_v35  ;;  %v5105_v21 = vpop.f32.mrb[135].mxu0 }
 0x2a6   :  { %v5216_v44 = vadd.f32 %v5215_v43, %v16584_v59  ;;  %v16592_v9 = vadd.f32 %v5105_v21, %v16485_v10 }
 0x2a8   :  { %v5217_v6 = vadd.f32 %v5216_v44, %v16592_v9 }
 0x2aa   :  { %v5218_v61 = vadd.f32 %v5217_v6, %v16581_v5  ;;  %v13356_v30 = vpop.f32.mrb[136].mxu0 }
 0x2ab   :  { %v16597_v56 = vadd.f32 %v13356_v30, %v16501_v32  ;;  %v5118_v11 = vpop.f32.mrb[137].mxu0 }
 0x2ac   :  { %v16600_v49 = vadd.f32 %v5118_v11, %v16495_v17  ;;  %v5219_v35 = vadd.f32 %v5218_v61, %v16588_v46  ;;  %v13357_v25 = vpop.f32.mrb[138].mxu0 }
 0x2ad   :  { %v16604_v20 = vadd.f32 %v13357_v25, %v16503_v15  ;;  %v5121_v10 = vpop.f32.mrb[139].mxu0 }
 0x2ae   :  { %v5220_v1 = vadd.f32 %v5219_v35, %v16600_v49  ;;  %v16608_v52 = vadd.f32 %v5121_v10, %v16497_v41 }
 0x2b0   :  { %v5221_v58 = vadd.f32 %v5220_v1, %v16608_v52 }
 0x2b2   :  { %v5222_v32 = vadd.f32 %v5221_v58, %v16597_v56  ;;  %v13360_v29 = vpop.f32.mrb[140].mxu0 }
 0x2b3   :  { %v16613_v17 = vadd.f32 %v13360_v29, %v16513_v50  ;;  %v5134_v38 = vpop.f32.mrb[141].mxu0 }
 0x2b4   :  { %v16616_v7 = vadd.f32 %v5134_v38, %v16507_v26  ;;  %v5223_v15 = vadd.f32 %v5222_v32, %v16604_v20  ;;  %v13361_v24 = vpop.f32.mrb[142].mxu0 }
 0x2b5   :  { %v16620_v62 = vadd.f32 %v13361_v24, %v16515_v42  ;;  %v5137_v41 = vpop.f32.mrb[143].mxu0 }
 0x2b6   :  { %v5224_v18 = vadd.f32 %v5223_v15, %v16616_v7  ;;  %v16624_v14 = vadd.f32 %v5137_v41, %v16509_v54 }
 0x2b8   :  { %v5225_v4 = vadd.f32 %v5224_v18, %v16624_v14 }
 0x2ba   :  { %v5226_v50 = vadd.f32 %v5225_v4, %v16613_v17  ;;  %v13364_v53 = vpop.f32.mrb[144].mxu0 }
 0x2bb   :  { %v16629_v26 = vadd.f32 %v13364_v53, %v16525_v3  ;;  %v5150_v12 = vpop.f32.mrb[145].mxu0 }
 0x2bc   :  { %v16632_v31 = vadd.f32 %v5150_v12, %v16519_v60  ;;  %v5227_v42 = vadd.f32 %v5226_v50, %v16620_v62  ;;  %v13365_v8 = vpop.f32.mrb[146].mxu0 }
 0x2bd   :  { %v16636_v51 = vadd.f32 %v13365_v8, %v16527_v48  ;;  %v5153_v54 = vpop.f32.mrb[147].mxu0 }
 0x2be   :  { %v5228_v22 = vadd.f32 %v5227_v42, %v16632_v31  ;;  %v16640_v43 = vadd.f32 %v5153_v54, %v16521_v0 }
 0x2c0   :  { %v5229_v13 = vadd.f32 %v5228_v22, %v16640_v43 }
 0x2c2   :  { %v5230_v3 = vadd.f32 %v5229_v13, %v16629_v26  ;;  %v13368_v21 = vpop.f32.mrb[148].mxu0 }
 0x2c3   :  { %v16645_v60 = vadd.f32 %v13368_v21, %v16537_v16  ;;  %v5166_v44 = vpop.f32.mrb[149].mxu0 }
 0x2c4   :  { %v16648_v6 = vadd.f32 %v5166_v44, %v16531_v63  ;;  %v5231_v48 = vadd.f32 %v5230_v3, %v16636_v51  ;;  %v13369_v61 = vpop.f32.mrb[150].mxu0 }
 0x2c5   :  { %v16652_v30 = vadd.f32 %v13369_v61, %v16539_v39  ;;  %v5169_v0 = vpop.f32.mrb[151].mxu0 }
 0x2c6   :  { %v5232_v11 = vadd.f32 %v5231_v48, %v16648_v6  ;;  %v16656_v35 = vadd.f32 %v5169_v0, %v16533_v33 }
 0x2c8   :  { %v5233_v25 = vadd.f32 %v5232_v11, %v16656_v35 }
 0x2ca   :  { %v5234_v16 = vadd.f32 %v5233_v25, %v16645_v60  ;;  %v13372_v10 = vpop.f32.mrb[152].mxu0 }
 0x2cb   :  { %v16661_v63 = vadd.f32 %v13372_v10, %v16549_v40  ;;  %v5182_v1 = vpop.f32.mrb[153].mxu0 }
 0x2cc   :  { %v16664_v58 = vadd.f32 %v5182_v1, %v16543_v57  ;;  %v5235_v39 = vadd.f32 %v5234_v16, %v16652_v30  ;;  %v13373_v32 = vpop.f32.mrb[154].mxu0 }
 0x2cd   :  { %v16668_v29 = vadd.f32 %v13373_v32, %v16551_v55  ;;  %v5185_v33 = vpop.f32.mrb[155].mxu0 }
 0x2ce   :  { %v5236_v38 = vadd.f32 %v5235_v39, %v16664_v58  ;;  %v16672_v15 = vadd.f32 %v5185_v33, %v16545_v19 }
 0x2d0   :  { %v5237_v24 = vadd.f32 %v5236_v38, %v16672_v15 }
 0x2d2   :  { %v5238_v40 = vadd.f32 %v5237_v24, %v16661_v63  ;;  %v13376_v41 = vpop.f32.mrb[156].mxu0 }
 0x2d3   :  { %v16677_v57 = vadd.f32 %v13376_v41, %v16561_v45  ;;  %v5198_v18 = vpop.f32.mrb[157].mxu0 }
 0x2d4   :  { %v16680_v4 = vadd.f32 %v5198_v18, %v16555_v34  ;;  %v5239_v55 = vadd.f32 %v5238_v40, %v16668_v29  ;;  %v13377_v50 = vpop.f32.mrb[158].mxu0 }
 0x2d5   :  { %v16684_v53 = vadd.f32 %v13377_v50, %v16563_v2  ;;  %v5201_v19 = vpop.f32.mrb[159].mxu0 }
 0x2d6   :  { %v5240_v12 = vadd.f32 %v5239_v55, %v16680_v4  ;;  %v16688_v42 = vadd.f32 %v5201_v19, %v16557_v37 }
 0x2d8   :  { %v5241_v8 = vadd.f32 %v5240_v12, %v16688_v42 }
 0x2da   :  { %v5242_v45 = vadd.f32 %v5241_v8, %v16677_v57 }
 0x2dc   :  { %v5243_v54 = vadd.f32 %v5242_v45, %v16684_v53 }
 0x2de   :  { %v5244_v34 = vrot.slane %v5243_v54, 4 }
 0x2e0   :  { %v5245_v22 = vadd.f32 %v5244_v34, %v5243_v54 }
 0x2e2   :  { %v5246_v13 = vrot.slane %v5245_v22, 2 }
 0x2e4   :  { %v5247_v3 = vadd.f32 %v5246_v13, %v5245_v22 }
 0x2e6   :  { %v5248_v21 = vrot.slane %v5247_v3, 1 }
 0x2e8   :  { %v5249_v44 = vadd.f32 %v5248_v21, %v5247_v3 }
 0x2ea   :  { %v16693_v2 = vmul.f32 0.00390625, %v5249_v44 }
 0x2ec   :  { %v5252_v48 = vsub.f32 %v16569_v36, %v16693_v2  ;;  %v5253_v37 = vsub.f32 %v16575_v28, %v16693_v2  ;;  %v5254_v61 = vsub.f32 %v16566_v47, %v16693_v2  ;;  %v5255_v25 = vsub.f32 %v16572_v23, %v16693_v2 }
 0x2ed   :  { %v5256_v16 = vsub.f32 %v16584_v59, %v16693_v2  ;;  %v5257_v39 = vsub.f32 %v16592_v9, %v16693_v2  ;;  %v5258_v38 = vsub.f32 %v16581_v5, %v16693_v2  ;;  %v5259_v41 = vsub.f32 %v16588_v46, %v16693_v2 }
 0x2ee   :  { %v5284_v0 = vmul.f32 %v5252_v48, %v5252_v48  ;;  %v5285_v11 = vmul.f32 %v5253_v37, %v5253_v37  ;;  %v5286_v10 = vmul.f32 %v5254_v61, %v5254_v61  ;;  %v5287_v32 = vmul.f32 %v5255_v25, %v5255_v25 }
 0x2ef   :  { %v5288_v24 = vmul.f32 %v5256_v16, %v5256_v16  ;;  %v5289_v18 = vmul.f32 %v5257_v39, %v5257_v39  ;;  %v5260_v50 = vsub.f32 %v16600_v49, %v16693_v2  ;;  %v5290_v19 = vmul.f32 %v5258_v38, %v5258_v38 }
 0x2f0   :  { %v5316_v1 = vadd.f32 %v5285_v11, %v5284_v0  ;;  %v5261_v8 = vsub.f32 %v16608_v52, %v16693_v2  ;;  %v5291_v45 = vmul.f32 %v5259_v41, %v5259_v41  ;;  %v5262_v34 = vsub.f32 %v16597_v56, %v16693_v2 }
 0x2f1   :  { %v5292_v22 = vmul.f32 %v5260_v50, %v5260_v50  ;;  %v5263_v3 = vsub.f32 %v16604_v20, %v16693_v2  ;;  %v5264_v48 = vsub.f32 %v16616_v7, %v16693_v2  ;;  %v5265_v0 = vsub.f32 %v16624_v14, %v16693_v2 }
 0x2f2   :  { %v5317_v33 = vadd.f32 %v5316_v1, %v5286_v10  ;;  %v5293_v21 = vmul.f32 %v5261_v8, %v5261_v8  ;;  %v5294_v37 = vmul.f32 %v5262_v34, %v5262_v34  ;;  %v5266_v16 = vsub.f32 %v16613_v17, %v16693_v2 }
 0x2f3   :  { %v5295_v11 = vmul.f32 %v5263_v3, %v5263_v3  ;;  %v5296_v10 = vmul.f32 %v5264_v48, %v5264_v48  ;;  %v5267_v39 = vsub.f32 %v16620_v62, %v16693_v2  ;;  %v5268_v38 = vsub.f32 %v16632_v31, %v16693_v2  ;;  %v13562_v3 = vld [vmem:[%s19709_s1 + $0x300] sm:$0xff]  }
 0x2f4   :  { %v5318_v40 = vadd.f32 %v5317_v33, %v5287_v32  ;;  %v5297_v32 = vmul.f32 %v5265_v0, %v5265_v0  ;;  %v5269_v41 = vsub.f32 %v16640_v43, %v16693_v2  ;;  %v5270_v50 = vsub.f32 %v16629_v26, %v16693_v2  ;;  %12970 = vmatprep.subr.bf16.mxu0 %v13562_v3 }
 0x2f5   :  { %v5271_v8 = vsub.f32 %v16636_v51, %v16693_v2  ;;  %v5272_v34 = vsub.f32 %v16648_v6, %v16693_v2 }
 0x2f6   :  { %v5319_v55 = vadd.f32 %v5318_v40, %v5288_v24  ;;  %v5298_v24 = vmul.f32 %v5266_v16, %v5266_v16  ;;  %v5275_v16 = vsub.f32 %v16652_v30, %v16693_v2 }
 0x2f7   :  { %v5304_v0 = vmul.f32 %v5272_v34, %v5272_v34  ;;  %v13553_v34 = vld [vmem:[%s19709_s1 + $0x248] sm:$0xff]  }
 0x2f8   :  { %v5320_v12 = vadd.f32 %v5319_v55, %v5289_v18  ;;  %v5299_v18 = vmul.f32 %v5267_v39, %v5267_v39  ;;  %v13565_v39 = vld [vmem:[%s19709_s1 + $0x2c8] sm:$0xff]  }
 0x2fa   :  { %v5321_v54 = vadd.f32 %v5320_v12, %v5290_v19  ;;  %v5300_v19 = vmul.f32 %v5268_v38, %v5268_v38 }
 0x2fc   :  { %v5322_v13 = vadd.f32 %v5321_v54, %v5291_v45  ;;  %v5301_v45 = vmul.f32 %v5269_v41, %v5269_v41  ;;  %v13568_v41 = vld [vmem:[%s19709_s1 + $0x310] sm:$0xff]  }
 0x2fe   :  { %v5323_v44 = vadd.f32 %v5322_v13, %v5292_v22  ;;  %v5302_v22 = vmul.f32 %v5270_v50, %v5270_v50 }
 0x300   :  { %v5324_v61 = vadd.f32 %v5323_v44, %v5293_v21  ;;  %v5273_v21 = vsub.f32 %v16656_v35, %v16693_v2  ;;  %v5303_v44 = vmul.f32 %v5271_v8, %v5271_v8 }
 0x302   :  { %v5325_v25 = vadd.f32 %v5324_v61, %v5294_v37  ;;  %v13563_v37 = vld [vmem:[%s19709_s1 + $0x2c0] sm:$0xff]   ;;  %v5274_v61 = vsub.f32 %v16645_v60, %v16693_v2 }
 0x303   :  { %12971 = vmatpush3.bf16.msra.mxu0 %v13563_v37 }
 0x304   :  { %v5326_v1 = vadd.f32 %v5325_v25, %v5295_v11  ;;  %v13564_v25 = vld [vmem:[%s19709_s1 + $0x308] sm:$0xff]  }
 0x305   :  { %12972 = vmatprep.subr.bf16.mxu0 %v13564_v25  ;;  %v13572_v25 = vld [vmem:[%s19709_s1 + $0x320] sm:$0xff]  }
 0x306   :  { %v5327_v33 = vadd.f32 %v5326_v1, %v5296_v10  ;;  %v5305_v10 = vmul.f32 %v5273_v21, %v5273_v21 }
 0x307   :  { %12973 = vmatpush3.bf16.msra.mxu0 %v13565_v39  ;;  %v13573_v39 = vld [vmem:[%s19709_s1 + $0x2e0] sm:$0xff]  }
 0x308   :  { %v5328_v40 = vadd.f32 %v5327_v33, %v5297_v32  ;;  %v5276_v32 = vsub.f32 %v16664_v58, %v16693_v2  ;;  %v5306_v33 = vmul.f32 %v5274_v61, %v5274_v61  ;;  %12974 = vmatprep.subr.bf16.mxu0 %v13568_v41  ;;  %v13574_v41 = vld [vmem:[%s19709_s1 + $0x328] sm:$0xff]  }
 0x30a   :  { %v5329_v55 = vadd.f32 %v5328_v40, %v5298_v24  ;;  %v13550_v24 = vld [vmem:[%s19709_s1 + $0x280] sm:$0xff]   ;;  %v5308_v8 = vmul.f32 %v5276_v32, %v5276_v32  ;;  %v5282_v32 = vsub.f32 %v16677_v57, %v16693_v2 }
 0x30b   :  { %v13551_v40 = vld [vmem:[%s19709_s1 + $0x240] sm:$0xff]   ;;  %12858 = vmatprep.subr.bf16.mxu1 %v13550_v24  ;;  %v13556_v24 = vld [vmem:[%s19709_s1 + $0x298] sm:$0xff]  }
 0x30c   :  { %v5330_v12 = vadd.f32 %v5329_v55, %v5299_v18  ;;  %v5277_v18 = vsub.f32 %v16672_v15, %v16693_v2  ;;  %v5307_v55 = vmul.f32 %v5275_v16, %v5275_v16  ;;  %12859 = vmatpush3.bf16.msra.mxu1 %v13551_v40  ;;  %v5281_v16 = vsub.f32 %v16688_v42, %v16693_v2  ;;  %v13557_v40 = vld [vmem:[%s19709_s1 + $0x258] sm:$0xff]  }
 0x30e   :  { %v5331_v54 = vadd.f32 %v5330_v12, %v5300_v19  ;;  %v13569_v19 = vld [vmem:[%s19709_s1 + $0x2d0] sm:$0xff]   ;;  %v5278_v12 = vsub.f32 %v16661_v63, %v16693_v2  ;;  %v5309_v3 = vmul.f32 %v5277_v18, %v5277_v18  ;;  %v5283_v18 = vsub.f32 %v16684_v53, %v16693_v2 }
 0x30f   :  { %12975 = vmatpush3.bf16.msra.mxu0 %v13569_v19  ;;  %v13558_v19 = vld [vmem:[%s19709_s1 + $0x2a0] sm:$0xff]  }
 0x310   :  { %v5332_v13 = vadd.f32 %v5331_v54, %v5301_v45  ;;  %v13552_v54 = vld [vmem:[%s19709_s1 + $0x288] sm:$0xff]   ;;  %v5310_v37 = vmul.f32 %v5278_v12, %v5278_v12  ;;  %v13559_v12 = vld [vmem:[%s19709_s1 + $0x260] sm:$0xff]  }
 0x311   :  { %12860 = vmatprep.subr.bf16.mxu1 %v13552_v54  ;;  %v13560_v54 = vld [vmem:[%s19709_s1 + $0x2a8] sm:$0xff]  }
 0x312   :  { %v5333_v48 = vadd.f32 %v5332_v13, %v5302_v22  ;;  %v13570_v22 = vld [vmem:[%s19709_s1 + $0x318] sm:$0xff]   ;;  %v5279_v13 = vsub.f32 %v16668_v29, %v16693_v2  ;;  %12861 = vmatpush3.bf16.msra.mxu1 %v13553_v34  ;;  %v13575_v34 = vld [vmem:[%s19709_s1 + $0x2e8] sm:$0xff]  }
 0x313   :  { %12976 = vmatprep.subr.bf16.mxu0 %v13570_v22  ;;  %v13578_v22 = vld [vmem:[%s19709_s1 + $0x330] sm:$0xff]  }
 0x314   :  { %v5334_v11 = vadd.f32 %v5333_v48, %v5303_v44  ;;  %v13571_v44 = vld [vmem:[%s19709_s1 + $0x2d8] sm:$0xff]   ;;  %v5280_v48 = vsub.f32 %v16680_v4, %v16693_v2 }
 0x315   :  { %12977 = vmatpush3.bf16.msra.mxu0 %v13571_v44  ;;  %v13561_v44 = vld [vmem:[%s19709_s1 + $0x268] sm:$0xff]  }
 0x316   :  { %v5335_v1 = vadd.f32 %v5334_v11, %v5304_v0  ;;  %v13554_v0 = vld [vmem:[%s19709_s1 + $0x290] sm:$0xff]   ;;  %12978 = vmatprep.subr.bf16.mxu0 %v13572_v25 }
 0x317   :  { %v13555_v11 = vld [vmem:[%s19709_s1 + $0x250] sm:$0xff]   ;;  %12862 = vmatprep.subr.bf16.mxu1 %v13554_v0 }
 0x318   :  { %v5336_v38 = vadd.f32 %v5335_v1, %v5305_v10  ;;  %v5311_v10 = vmul.f32 %v5279_v13, %v5279_v13  ;;  %12863 = vmatpush3.bf16.msra.mxu1 %v13555_v11  ;;  %v5315_v13 = vmul.f32 %v5283_v18, %v5283_v18  ;;  %v13581_v11 = vld [vmem:[%s19709_s1 + $0x2f8] sm:$0xff]   ;;  %v13567_v25 = vld [vmem:[%s19709_s1 + $0x270] sm:$0xff]  }
 0x319   :  { %12979 = vmatpush3.bf16.msra.mxu0 %v13573_v39  ;;  %12864 = vmatprep.subr.bf16.mxu1 %v13556_v24  ;;  %v13577_v39 = vld [vmem:[%s19709_s1 + $0x278] sm:$0xff]   ;;  %v13585_v24 = vld [vmem:[%s19709_s1 + $0x380] sm:$0xff]  }
 0x31a   :  { %v5337_v50 = vadd.f32 %v5336_v38, %v5306_v33  ;;  %v5312_v33 = vmul.f32 %v5280_v48, %v5280_v48  ;;  %12980 = vmatprep.subr.bf16.mxu0 %v13574_v41  ;;  %v13580_v48 = vld [vmem:[%s19709_s1 + $0x338] sm:$0xff]  }
 0x31c   :  { %v5338_v45 = vadd.f32 %v5337_v50, %v5307_v55  ;;  %v5313_v55 = vmul.f32 %v5281_v16, %v5281_v16  ;;  %12865 = vmatpush3.bf16.msra.mxu1 %v13557_v40  ;;  %v6114_v40 = vld [vmem:[#allocation2] sm:$0xf] }
 0x31d   :  { %12866 = vmatprep.subr.bf16.mxu1 %v13558_v19  ;;  %12981 = vmatpush3.bf16.msra.mxu0 %v13575_v34  ;;  %v5362_v19 = vlaneseq  ;;  %v6626_v34 = vld [vmem:[#allocation2] sm:$0xe] }
 0x31e   :  { %v5339_v21 = vadd.f32 %v5338_v45, %v5308_v8  ;;  %v5314_v8 = vmul.f32 %v5282_v32, %v5282_v32  ;;  %12982 = vmatprep.subr.bf16.mxu0 %v13578_v22 }
 0x320   :  { %v5340_v61 = vadd.f32 %v5339_v21, %v5309_v3  ;;  %v13579_v21 = vld [vmem:[%s19709_s1 + $0x2f0] sm:$0xff]   ;;  %12867 = vmatpush3.bf16.msra.mxu1 %v13559_v12 }
 0x321   :  { %12868 = vmatprep.subr.bf16.mxu1 %v13560_v54  ;;  %12983 = vmatpush3.bf16.msra.mxu0 %v13579_v21  ;;  %v6146_v54 = vld [vmem:[#allocation2 + $0x4] sm:$0x1] }
 0x322   :  { %v5341_v1 = vadd.f32 %v5340_v61, %v5310_v37  ;;  %v13566_v61 = vld [vmem:[%s19709_s1 + $0x2b0] sm:$0xff]   ;;  %12984 = vmatprep.subr.bf16.mxu0 %v13580_v48  ;;  %v6724_v48 = vrot.slane %v6146_v54, 5 }
 0x324   :  { %v5342_v38 = vadd.f32 %v5341_v1, %v5311_v10  ;;  %12869 = vmatpush3.bf16.msra.mxu1 %v13561_v44  ;;  %v13576_v10 = vld [vmem:[%s19709_s1 + $0x2b8] sm:$0xff]   ;;  %v11800_v44 = vrot.slane %v6626_v34, 9 }
 0x325   :  { %12870 = vmatprep.subr.bf16.mxu1 %v13566_v61  ;;  %12985 = vmatpush3.bf16.msra.mxu0 %v13581_v11  ;;  %v6122_v11 = vld [vmem:[#allocation2 + $0x50] sm:$0xf] }
 0x326   :  { %v5343_v50 = vadd.f32 %v5342_v38, %v5312_v33 }
 0x328   :  { %v5344_v45 = vadd.f32 %v5343_v50, %v5313_v55  ;;  %12871 = vmatpush3.bf16.msra.mxu1 %v13567_v25  ;;  %v6179_v55 = vshrl.u32 %v6114_v40, 16  ;;  %v6182_v50 = vshll.u32 %v6114_v40, 16  ;;  %v6154_v25 = vld [vmem:[#allocation2 + $0x54] sm:$0x1] }
 0x329   :  { %12872 = vmatprep.subr.bf16.mxu1 %v13576_v10  ;;  %v6291_v10 = vshrl.u32 %v6122_v11, 16 }
 0x32a   :  { %v5345_v3 = vadd.f32 %v5344_v45, %v5314_v8  ;;  %v6181_v12 = vrot.slane %v6179_v55, 4  ;;  %v6184_v8 = vrot.slane %v6182_v50, 5  ;;  %v5363_v45 = vshrl.u32 %v5362_v19, 7 }
 0x32b   :  { %v16880_v50 = vrot.slane %v6291_v10, 4 }
 0x32c   :  { %v5346_v37 = vadd.f32 %v5345_v3, %v5315_v13  ;;  %12873 = vmatpush3.bf16.msra.mxu1 %v13577_v39  ;;  %v6185_v22 = vor.u32 %v6184_v8, %v6181_v12  ;;  %v6188_v13 = vshll.u32 %v6146_v54, 16  ;;  %v5354_v3 = vld [vmem:[%s19710_s2] sm:$0x1]  ;;  %v16861_v21 = vsub.s32 0, %v5363_v45  ;;  %v6634_v39 = vld [vmem:[#allocation2 + $0x50] sm:$0xe] }
 0x32d   :  { %13082 = vmatprep.subr.bf16.mxu1 %v13585_v24  ;;  %20069 = vst [vmem:[#allocation13_spill] sm:$0xff] %v16880_v50 }
 0x32e   :  { %v5347_v0 = vrot.slane %v5346_v37, 4  ;;  %20064 = vst [vmem:[#allocation45_spill] sm:$0xff] %v16861_v21  ;;  %v16863_v61 = vrot.slane %v6185_v22, 4 }
 0x330   :  { %v5348_v16 = vadd.f32 %v5347_v0, %v5346_v37  ;;  %20065 = vst [vmem:[#allocation46_spill] sm:$0xff] %v16863_v61  ;;  %v16865_v0 = vrot.slane %v6188_v13, 5 }
 0x332   :  { %v5349_v1 = vrot.slane %v5348_v16, 2  ;;  %20066 = vst [vmem:[#allocation47_spill] sm:$0xff] %v16865_v0 }
 0x334   :  { %v5350_v32 = vadd.f32 %v5349_v1, %v5348_v16  ;;  %v6294_v1 = vshll.u32 %v6122_v11, 16 }
 0x336   :  { %v5351_v33 = vrot.slane %v5350_v32, 1  ;;  %v16882_v19 = vrot.slane %v6294_v1, 5 }
 0x338   :  { %v5352_v38 = vadd.f32 %v5351_v33, %v5350_v32  ;;  %v5358_v32 = vld [vmem:[%s19711_s3] sm:$0x1]  ;;  %v11808_v33 = vrot.slane %v6634_v39, 9  ;;  %20070 = vst [vmem:[#allocation14_spill] sm:$0xff] %v16882_v19 }
 0x33a   :  { %v5353_v41 = vmul.f32 0.00390625, %v5352_v38  ;;  %v6756_v38 = vrot.slane %v6154_v25, 5 }
 0x33c   :  { %v5355_v18 = vadd.f32 1e-05, %v5353_v41  ;;  %v16874_v41 = vsel %vm13972_vm11, %v11800_v44, %v6724_v48  ;;  %v16886_v12 = vsel %vm13972_vm11, %v11808_v33, %v6756_v38 }
 0x33d   :  { %20067 = vst [vmem:[#allocation15_spill] sm:$0xff] %v16874_v41  ;;  %20071 = vst [vmem:[#allocation54_spill] sm:$0xff] %v16886_v12 }
 0x33e   :  { %13670 = vrsqrt.f32 %v5355_v18 }
 0x348   :  { %v13671_v37 = vpop.eup %13670 }
 0x349   :  { %v5357_v16 = vmul.f32 %v13671_v37, %v5354_v3 }
 0x34b   :  { %v5359_v24 = vmul.f32 %v5357_v16, %v16693_v2  ;;  %v5365_v40 = vrot.slane %v5357_v16, %v16861_v21 }
 0x34d   :  { %v5360_v2 = vsub.f32 %v5358_v32, %v5359_v24  ;;  %v5396_v8 = vmul.f32 %v5365_v40, %v16688_v42  ;;  %v5367_v45 = vmul.f32 %v5365_v40, %v16569_v36  ;;  %v5368_v54 = vmul.f32 %v5365_v40, %v16575_v28  ;;  %v6096_v24 = vld [vmem:[#allocation2 + $0x120] sm:$0xf] }
 0x34e   :  { %v5369_v34 = vmul.f32 %v5365_v40, %v16566_v47  ;;  %v5370_v22 = vmul.f32 %v5365_v40, %v16572_v23  ;;  %v5371_v13 = vmul.f32 %v5365_v40, %v16584_v59  ;;  %v5372_v3 = vmul.f32 %v5365_v40, %v16592_v9 }
 0x34f   :  { %v16896_v44 = vrot.slane %v5360_v2, %v16861_v21  ;;  %v5373_v48 = vmul.f32 %v5365_v40, %v16581_v5  ;;  %v5374_v37 = vmul.f32 %v5365_v40, %v16588_v46  ;;  %v5375_v42 = vmul.f32 %v5365_v40, %v16600_v49 }
 0x350   :  { %v5376_v36 = vmul.f32 %v5365_v40, %v16608_v52  ;;  %v5377_v28 = vmul.f32 %v5365_v40, %v16597_v56  ;;  %v5378_v47 = vmul.f32 %v5365_v40, %v16604_v20  ;;  %v5379_v23 = vmul.f32 %v5365_v40, %v16616_v7 }
 0x351   :  { %v5434_v59 = vadd.f32 %v16896_v44, %v5396_v8  ;;  %v5380_v9 = vmul.f32 %v5365_v40, %v16624_v14  ;;  %v5381_v11 = vmul.f32 %v5365_v40, %v16613_v17  ;;  %v5382_v5 = vmul.f32 %v5365_v40, %v16620_v62 }
 0x352   :  { %v5383_v46 = vmul.f32 %v5365_v40, %v16632_v31  ;;  %v5384_v49 = vmul.f32 %v5365_v40, %v16640_v43  ;;  %v5385_v52 = vmul.f32 %v5365_v40, %v16629_v26  ;;  %v5386_v56 = vmul.f32 %v5365_v40, %v16636_v51 }
 0x353   :  { %v5466_v25 = vmax.f32 %v5434_v59, 0.0  ;;  %v5387_v20 = vmul.f32 %v5365_v40, %v16648_v6  ;;  %v5388_v7 = vmul.f32 %v5365_v40, %v16656_v35  ;;  %v5389_v16 = vmul.f32 %v5365_v40, %v16645_v60 }
 0x354   :  { %v5390_v14 = vmul.f32 %v5365_v40, %v16652_v30  ;;  %v5391_v17 = vmul.f32 %v5365_v40, %v16664_v58  ;;  %v5392_v62 = vmul.f32 %v5365_v40, %v16672_v15  ;;  %v5393_v31 = vmul.f32 %v5365_v40, %v16661_v63 }
 0x355   :  { %v12351_v43 = vpack.c.bf16 %v5466_v25, %v5466_v25  ;;  %v5394_v26 = vmul.f32 %v5365_v40, %v16668_v29  ;;  %v5395_v51 = vmul.f32 %v5365_v40, %v16680_v4  ;;  %v5397_v10 = vmul.f32 %v5365_v40, %v16677_v57 }
 0x356   :  { %v5398_v6 = vmul.f32 %v5365_v40, %v16684_v53  ;;  %v16925_v35 = vadd.f32 %v16896_v44, %v5367_v45  ;;  %v16928_v60 = vadd.f32 %v16896_v44, %v5368_v54  ;;  %v16931_v30 = vadd.f32 %v16896_v44, %v5369_v34  ;;  %v6099_v40 = vld [vmem:[#allocation2 + $0x124] sm:$0x1] }
 0x357   :  { %v5830_v58 = vshrl.u32 %v12351_v43, 16  ;;  %v5833_v63 = vshll.u32 %v12351_v43, 16  ;;  %v16934_v15 = vadd.f32 %v16896_v44, %v5370_v22  ;;  %v16937_v29 = vadd.f32 %v16896_v44, %v5371_v13 }
 0x358   :  { %v16940_v57 = vadd.f32 %v16896_v44, %v5372_v3  ;;  %v16943_v4 = vadd.f32 %v16896_v44, %v5373_v48  ;;  %v16946_v53 = vadd.f32 %v16896_v44, %v5374_v37  ;;  %v16949_v1 = vadd.f32 %v16896_v44, %v5375_v42 }
 0x359   :  { %v5832_v39 = vrot.slane %v5830_v58, 7  ;;  %v16952_v32 = vadd.f32 %v16896_v44, %v5376_v36  ;;  %v16955_v33 = vadd.f32 %v16896_v44, %v5377_v28  ;;  %v16958_v38 = vadd.f32 %v16896_v44, %v5378_v47 }
 0x35a   :  { %v16961_v2 = vadd.f32 %v16896_v44, %v5379_v23  ;;  %v16964_v8 = vadd.f32 %v16896_v44, %v5380_v9  ;;  %v16967_v45 = vadd.f32 %v16896_v44, %v5381_v11  ;;  %v16970_v54 = vadd.f32 %v16896_v44, %v5382_v5 }
 0x35b   :  { %v5835_v34 = vor.u32 %v5833_v63, %v5832_v39  ;;  %v5836_v22 = vrot.slane %v5832_v39, 4  ;;  %v16973_v13 = vadd.f32 %v16896_v44, %v5383_v46  ;;  %v16976_v3 = vadd.f32 %v16896_v44, %v5384_v49 }
 0x35c   :  { %v16979_v48 = vadd.f32 %v16896_v44, %v5385_v52  ;;  %v16982_v37 = vadd.f32 %v16896_v44, %v5386_v56  ;;  %v16985_v42 = vadd.f32 %v16896_v44, %v5387_v20  ;;  %v16988_v36 = vadd.f32 %v16896_v44, %v5388_v7 }
 0x35d   :  { %v6097_v47 = vsel %vm13936_vm10, %v5835_v34, %v6096_v24  ;;  %v6100_v59 = vsel %vm13900_vm3, %v5836_v22, %v6099_v40  ;;  %v16995_v9 = vadd.f32 %v16896_v44, %v5389_v16  ;;  %v16998_v11 = vadd.f32 %v16896_v44, %v5390_v14 }
 0x35e   :  { %6101 = vst [vmem:[#allocation2 + $0x124] sm:$0x1] %v6100_v59  ;;  %6098 = vst [vmem:[#allocation2 + $0x120] sm:$0xf] %v6097_v47  ;;  %v17001_v5 = vadd.f32 %v16896_v44, %v5391_v17  ;;  %v17004_v46 = vadd.f32 %v16896_v44, %v5392_v62  ;;  %v17007_v49 = vadd.f32 %v16896_v44, %v5393_v31  ;;  %v5437_v7 = vmax.f32 %v16925_v35, 0.0 }
 0x35f   :  { %v17010_v52 = vadd.f32 %v16896_v44, %v5394_v26  ;;  %v17013_v56 = vadd.f32 %v16896_v44, %v5395_v51  ;;  %v17016_v25 = vadd.f32 %v16896_v44, %v5397_v10  ;;  %v17019_v20 = vadd.f32 %v16896_v44, %v5398_v6 }
 0x360   :  { %v5438_v16 = vmax.f32 %v16928_v60, 0.0  ;;  %v5439_v14 = vmax.f32 %v16931_v30, 0.0  ;;  %v5440_v17 = vmax.f32 %v16934_v15, 0.0  ;;  %v5441_v62 = vmax.f32 %v16937_v29, 0.0 }
 0x361   :  { %v5442_v31 = vmax.f32 %v16940_v57, 0.0  ;;  %v5443_v43 = vmax.f32 %v16943_v4, 0.0  ;;  %v5444_v26 = vmax.f32 %v16946_v53, 0.0  ;;  %v5445_v51 = vmax.f32 %v16949_v1, 0.0 }
 0x362   :  { %v5446_v44 = vmax.f32 %v16952_v32, 0.0  ;;  %v5447_v10 = vmax.f32 %v16955_v33, 0.0  ;;  %v5448_v6 = vmax.f32 %v16958_v38, 0.0  ;;  %v5449_v35 = vmax.f32 %v16961_v2, 0.0 }
 0x363   :  { %v5450_v60 = vmax.f32 %v16964_v8, 0.0  ;;  %v5451_v30 = vmax.f32 %v16967_v45, 0.0  ;;  %v5452_v58 = vmax.f32 %v16970_v54, 0.0  ;;  %v5453_v63 = vmax.f32 %v16973_v13, 0.0 }
 0x364   :  { %v5454_v15 = vmax.f32 %v16976_v3, 0.0  ;;  %v5455_v29 = vmax.f32 %v16979_v48, 0.0  ;;  %v5456_v57 = vmax.f32 %v16982_v37, 0.0  ;;  %v5457_v4 = vmax.f32 %v16985_v42, 0.0 }
 0x365   :  { %v5458_v53 = vmax.f32 %v16988_v36, 0.0  ;;  %v5459_v1 = vmax.f32 %v16995_v9, 0.0  ;;  %v5460_v39 = vmax.f32 %v16998_v11, 0.0  ;;  %v5461_v32 = vmax.f32 %v17001_v5, 0.0 }
 0x366   :  { %v5462_v33 = vmax.f32 %v17004_v46, 0.0  ;;  %v5463_v38 = vmax.f32 %v17007_v49, 0.0  ;;  %v5464_v24 = vmax.f32 %v17010_v52, 0.0  ;;  %v5465_v40 = vmax.f32 %v17013_v56, 0.0 }
 0x367   :  { %v5467_v2 = vmax.f32 %v17016_v25, 0.0  ;;  %v5468_v8 = vmax.f32 %v17019_v20, 0.0  ;;  %v12322_v45 = vpack.c.bf16 %v5437_v7, %v5437_v7  ;;  %v12323_v54 = vpack.c.bf16 %v5438_v16, %v5438_v16 }
 0x368   :  { %v12324_v34 = vpack.c.bf16 %v5439_v14, %v5439_v14  ;;  %v12325_v22 = vpack.c.bf16 %v5440_v17, %v5440_v17  ;;  %v12326_v13 = vpack.c.bf16 %v5441_v62, %v5441_v62  ;;  %v12327_v3 = vpack.c.bf16 %v5442_v31, %v5442_v31 }
 0x369   :  { %v17052_v48 = vpack.c.bf16 %v5443_v43, %v5443_v43  ;;  %v17054_v37 = vpack.c.bf16 %v5444_v26, %v5444_v26  ;;  %v17056_v42 = vpack.c.bf16 %v5445_v51, %v5445_v51  ;;  %v17058_v36 = vpack.c.bf16 %v5446_v44, %v5446_v44 }
 0x36a   :  { %v17060_v47 = vpack.c.bf16 %v5447_v10, %v5447_v10  ;;  %v17062_v59 = vpack.c.bf16 %v5448_v6, %v5448_v6  ;;  %v17064_v9 = vpack.c.bf16 %v5449_v35, %v5449_v35  ;;  %v17066_v11 = vpack.c.bf16 %v5450_v60, %v5450_v60 }
 0x36b   :  { %v17068_v5 = vpack.c.bf16 %v5451_v30, %v5451_v30  ;;  %v17070_v46 = vpack.c.bf16 %v5452_v58, %v5452_v58  ;;  %v17072_v49 = vpack.c.bf16 %v5453_v63, %v5453_v63  ;;  %v17074_v52 = vpack.c.bf16 %v5454_v15, %v5454_v15 }
 0x36c   :  { %v17076_v56 = vpack.c.bf16 %v5455_v29, %v5455_v29  ;;  %v17078_v25 = vpack.c.bf16 %v5456_v57, %v5456_v57  ;;  %v17080_v20 = vpack.c.bf16 %v5457_v4, %v5457_v4  ;;  %v17082_v7 = vpack.c.bf16 %v5458_v53, %v5458_v53 }
 0x36d   :  { %v17084_v16 = vpack.c.bf16 %v5459_v1, %v5459_v1  ;;  %v17086_v14 = vpack.c.bf16 %v5460_v39, %v5460_v39  ;;  %v17088_v17 = vpack.c.bf16 %v5461_v32, %v5461_v32  ;;  %v17090_v62 = vpack.c.bf16 %v5462_v33, %v5462_v33 }
 0x36e   :  { %v17092_v31 = vpack.c.bf16 %v5463_v38, %v5463_v38  ;;  %v17094_v43 = vpack.c.bf16 %v5464_v24, %v5464_v24  ;;  %v17096_v26 = vpack.c.bf16 %v5465_v40, %v5465_v40  ;;  %v17098_v51 = vpack.c.bf16 %v5467_v2, %v5467_v2 }
 0x36f   :  { %v17100_v44 = vpack.c.bf16 %v5468_v8, %v5468_v8  ;;  %v5598_v10 = vshrl.u32 %v12322_v45, 16  ;;  %v5601_v6 = vshll.u32 %v12322_v45, 16  ;;  %v5606_v35 = vshrl.u32 %v12323_v54, 16 }
 0x370   :  { %v5609_v60 = vshll.u32 %v12323_v54, 16  ;;  %v5614_v30 = vshrl.u32 %v12324_v34, 16  ;;  %v5617_v58 = vshll.u32 %v12324_v34, 16  ;;  %v5622_v63 = vshrl.u32 %v12325_v22, 16 }
 0x371   :  { %v17102_v15 = vrot.slane %v5598_v10, 7  ;;  %v17104_v29 = vrot.slane %v5606_v35, 7  ;;  %v5625_v57 = vshll.u32 %v12325_v22, 16  ;;  %v5630_v4 = vshrl.u32 %v12326_v13, 16 }
 0x372   :  { %v17106_v53 = vrot.slane %v5614_v30, 7  ;;  %v17108_v1 = vrot.slane %v5622_v63, 7  ;;  %v5633_v39 = vshll.u32 %v12326_v13, 16  ;;  %v5638_v32 = vshrl.u32 %v12327_v3, 16 }
 0x373   :  { %v17111_v33 = vor.u32 %v5601_v6, %v17102_v15  ;;  %v17115_v24 = vor.u32 %v5609_v60, %v17104_v29  ;;  %v17126_v34 = vrot.slane %v5630_v4, 7  ;;  %v5641_v13 = vshll.u32 %v12327_v3, 16 }
 0x374   :  { %v17119_v2 = vor.u32 %v5617_v58, %v17106_v53  ;;  %v17123_v45 = vor.u32 %v5625_v57, %v17108_v1  ;;  %v17128_v22 = vrot.slane %v5638_v32, 7  ;;  %v5646_v10 = vshrl.u32 %v17052_v48, 16 }
 0x375   :  { %v5649_v6 = vshll.u32 %v17052_v48, 16  ;;  %v5654_v35 = vshrl.u32 %v17054_v37, 16  ;;  %v5657_v60 = vshll.u32 %v17054_v37, 16  ;;  %v5662_v30 = vshrl.u32 %v17056_v42, 16 }
 0x376   :  { %v17136_v58 = vor.u32 %v5633_v39, %v17126_v34  ;;  %v17140_v57 = vor.u32 %v5641_v13, %v17128_v22  ;;  %v17143_v4 = vrot.slane %v5646_v10, 7  ;;  %v5665_v37 = vshll.u32 %v17056_v42, 16  ;;  %v13610_v13 = vld [vmem:[%s19709_s1 + $0x400] sm:$0xff]  }
 0x377   :  { %v17145_v32 = vrot.slane %v5654_v35, 7  ;;  %v17147_v48 = vrot.slane %v5662_v30, 7  ;;  %v5670_v55 = vshrl.u32 %v17058_v36, 16  ;;  %v5673_v39 = vshll.u32 %v17058_v36, 16  ;;  %13194 = vmatprep.subr.bf16.mxu0 %v13610_v13 }
 0x378   :  { %v5678_v54 = vshrl.u32 %v17060_v47, 16  ;;  %v5681_v63 = vshll.u32 %v17060_v47, 16  ;;  %v17158_v10 = vor.u32 %v5649_v6, %v17143_v4  ;;  %v5686_v6 = vshrl.u32 %v17062_v59, 16 }
 0x379   :  { %v17162_v30 = vor.u32 %v5657_v60, %v17145_v32  ;;  %v17166_v36 = vor.u32 %v5665_v37, %v17147_v48  ;;  %v17169_v47 = vrot.slane %v5670_v55, 7  ;;  %v5689_v40 = vshll.u32 %v17062_v59, 16 }
 0x37a   :  { %v17171_v8 = vrot.slane %v5678_v54, 7  ;;  %v5694_v35 = vshrl.u32 %v17064_v9, 16  ;;  %v5697_v60 = vshll.u32 %v17064_v9, 16  ;;  %v17185_v54 = vrot.slane %v5686_v6, 7 }
 0x37b   :  { %v17178_v42 = vor.u32 %v5673_v39, %v17169_v47  ;;  %v5702_v59 = vshrl.u32 %v17066_v11, 16  ;;  %v5705_v38 = vshll.u32 %v17066_v11, 16  ;;  %v5710_v9 = vshrl.u32 %v17068_v5, 16 }
 0x37c   :  { %v17182_v3 = vor.u32 %v5681_v63, %v17171_v8  ;;  %v17187_v13 = vrot.slane %v5694_v35, 7  ;;  %v5713_v39 = vshll.u32 %v17068_v5, 16  ;;  %v5718_v21 = vshrl.u32 %v17070_v46, 16 }
 0x37d   :  { %v5721_v37 = vshll.u32 %v17070_v46, 16  ;;  %v17196_v63 = vor.u32 %v5689_v40, %v17185_v54  ;;  %v17203_v12 = vrot.slane %v5702_v59, 7  ;;  %v17205_v11 = vrot.slane %v5710_v9, 7 }
 0x37e   :  { %v17200_v35 = vor.u32 %v5697_v60, %v17187_v13  ;;  %v17207_v19 = vrot.slane %v5718_v21, 7  ;;  %v5726_v5 = vshrl.u32 %v17072_v49, 16  ;;  %v5729_v46 = vshll.u32 %v17072_v49, 16 }
 0x37f   :  { %v5734_v40 = vshrl.u32 %v17074_v52, 16  ;;  %v5737_v50 = vshll.u32 %v17074_v52, 16  ;;  %v5742_v6 = vshrl.u32 %v17076_v56, 16  ;;  %v17215_v60 = vor.u32 %v5705_v38, %v17203_v12 }
 0x380   :  { %v17219_v9 = vor.u32 %v5713_v39, %v17205_v11  ;;  %v17223_v55 = vor.u32 %v5721_v37, %v17207_v19  ;;  %v17226_v0 = vrot.slane %v5726_v5, 7  ;;  %v5745_v38 = vshll.u32 %v17076_v56, 16 }
 0x381   :  { %v17228_v52 = vrot.slane %v5734_v40, 7  ;;  %v17230_v61 = vrot.slane %v5742_v6, 7  ;;  %v5750_v59 = vshrl.u32 %v17078_v25, 16  ;;  %v5753_v39 = vshll.u32 %v17078_v25, 16 }
 0x382   :  { %20074 = vst [vmem:[#allocation28_spill] sm:$0xff] %v17226_v0  ;;  %v17236_v18 = vor.u32 %v5729_v46, %v17226_v0  ;;  %v5758_v49 = vshrl.u32 %v17080_v20, 16  ;;  %v5761_v25 = vshll.u32 %v17080_v20, 16  ;;  %v5766_v46 = vshrl.u32 %v17082_v7, 16 }
 0x383   :  { %20075 = vst [vmem:[#allocation53_spill] sm:$0xff] %v17228_v52  ;;  %20076 = vst [vmem:[#allocation55_spill] sm:$0xff] %v17230_v61  ;;  %v17240_v21 = vor.u32 %v5737_v50, %v17228_v52  ;;  %v17244_v40 = vor.u32 %v5745_v38, %v17230_v61  ;;  %v17247_v56 = vrot.slane %v5750_v59, 7  ;;  %v5769_v37 = vshll.u32 %v17082_v7, 16  ;;  %v5955_v52 = vld [vmem:[#allocation2 + $0x34] sm:$0x1] }
 0x384   :  { %20077 = vst [vmem:[#allocation56_spill] sm:$0xff] %v17236_v18  ;;  %v5774_v50 = vshrl.u32 %v17084_v16, 16  ;;  %v17258_v5 = vrot.slane %v5758_v49, 7  ;;  %v5777_v59 = vshll.u32 %v17084_v16, 16  ;;  %v17261_v6 = vrot.slane %v5766_v46, 7 }
 0x385   :  { %20078 = vst [vmem:[#allocation16_spill] sm:$0xff] %v17240_v21  ;;  %20079 = vst [vmem:[#allocation17_spill] sm:$0xff] %v17244_v40  ;;  %v17255_v41 = vor.u32 %v5753_v39, %v17247_v56  ;;  %v5782_v20 = vshrl.u32 %v17086_v14, 16  ;;  %v5785_v61 = vshll.u32 %v17086_v14, 16  ;;  %v5793_v49 = vshll.u32 %v17088_v17, 16 }
 0x386   :  { %20080 = vst [vmem:[#allocation31_spill] sm:$0xff] %v17247_v56  ;;  %20082 = vst [vmem:[#allocation36_spill] sm:$0xff] %v17258_v5  ;;  %v17263_v27 = vrot.slane %v5774_v50, 7  ;;  %v17268_v7 = vor.u32 %v5761_v25, %v17258_v5  ;;  %v17274_v38 = vor.u32 %v5769_v37, %v17261_v6  ;;  %v5798_v39 = vshrl.u32 %v17090_v62, 16  ;;  %v5937_v50 = vld [vmem:[#allocation2 + $0x1c] sm:$0x1] }
 0x387   :  { %20081 = vst [vmem:[#allocation33_spill] sm:$0xff] %v17255_v41  ;;  %20083 = vst [vmem:[#allocation23_spill] sm:$0xff] %v17261_v6  ;;  %v5790_v41 = vshrl.u32 %v17088_v17, 16  ;;  %v17281_v14 = vrot.slane %v5782_v20, 7  ;;  %v5801_v5 = vshll.u32 %v17090_v62, 16  ;;  %v5806_v17 = vshrl.u32 %v17092_v31, 16 }
 0x388   :  { %20084 = vst [vmem:[#allocation57_spill] sm:$0xff] %v17263_v27  ;;  %20085 = vst [vmem:[#allocation48_spill] sm:$0xff] %v17268_v7  ;;  %v17278_v46 = vor.u32 %v5777_v59, %v17263_v27  ;;  %v5809_v37 = vshll.u32 %v17092_v31, 16  ;;  %v5817_v16 = vshll.u32 %v17094_v43, 16  ;;  %v17299_v27 = vrot.slane %v5798_v39, 7 }
 0x389   :  { %20086 = vst [vmem:[#allocation49_spill] sm:$0xff] %v17274_v38  ;;  %20088 = vst [vmem:[#allocation51_spill] sm:$0xff] %v17281_v14  ;;  %v17283_v25 = vrot.slane %v5790_v41, 7  ;;  %v5814_v38 = vshrl.u32 %v17094_v43, 16  ;;  %v17292_v59 = vor.u32 %v5785_v61, %v17281_v14  ;;  %v17301_v62 = vrot.slane %v5806_v17, 7 }
 0x38a   :  { %20087 = vst [vmem:[#allocation50_spill] sm:$0xff] %v17278_v46  ;;  %20092 = vst [vmem:[#allocation27_spill] sm:$0xff] %v17299_v27  ;;  %v5822_v31 = vshrl.u32 %v17096_v26, 16  ;;  %v5925_v6 = vld [vmem:[#allocation2 + $0xc] sm:$0x1]  ;;  %v5825_v43 = vshll.u32 %v17096_v26, 16 }
 0x38b   :  { %20089 = vst [vmem:[#allocation52_spill] sm:$0xff] %v17283_v25  ;;  %20090 = vst [vmem:[#allocation25_spill] sm:$0xff] %v17292_v59  ;;  %v17296_v41 = vor.u32 %v5793_v49, %v17283_v25  ;;  %v17303_v46 = vrot.slane %v5814_v38, 7  ;;  %v5838_v61 = vshrl.u32 %v17098_v51, 16  ;;  %v5841_v20 = vshll.u32 %v17098_v51, 16 }
 0x38c   :  { %20093 = vst [vmem:[#allocation58_spill] sm:$0xff] %v17301_v62  ;;  %v5846_v49 = vshrl.u32 %v17100_v44, 16  ;;  %v5940_v39 = vld [vmem:[#allocation2 + $0x20] sm:$0xf]  ;;  %v5943_v25 = vld [vmem:[#allocation2 + $0x24] sm:$0x1]  ;;  %v17313_v38 = vor.u32 %v5801_v5, %v17299_v27  ;;  %v17317_v26 = vor.u32 %v5809_v37, %v17301_v62 }
 0x38d   :  { %20091 = vst [vmem:[#allocation26_spill] sm:$0xff] %v17296_v41  ;;  %20094 = vst [vmem:[#allocation59_spill] sm:$0xff] %v17303_v46  ;;  %v17310_v41 = vld [vmem:[#allocation2 + $0x18] sm:$0xf]  ;;  %v5928_v17 = vld [vmem:[#allocation2 + $0x10] sm:$0xf]  ;;  %v17323_v40 = vor.u32 %v5817_v16, %v17303_v46 }
 0x38e   :  { %v5931_v14 = vld [vmem:[#allocation2 + $0x14] sm:$0x1]  ;;  %20095 = vst [vmem:[#allocation60_spill] sm:$0xff] %v17313_v38  ;;  %20096 = vst [vmem:[#allocation29_spill] sm:$0xff] %v17317_v26  ;;  %v17320_v51 = vld [vmem:[#allocation2 + $0x28] sm:$0xf] }
 0x38f   :  { %v5949_v56 = vld [vmem:[#allocation2 + $0x2c] sm:$0x1]  ;;  %20097 = vst [vmem:[#allocation18_spill] sm:$0xff] %v17323_v40  ;;  %v17326_v21 = vrot.slane %v5822_v31, 7  ;;  %v17328_v0 = vrot.slane %v5838_v61, 7  ;;  %v17334_v7 = vrot.slane %v5846_v49, 7 }
 0x390   :  { %v17330_v5 = vld [vmem:[#allocation2 + $0x38] sm:$0xf]  ;;  %v5961_v59 = vld [vmem:[#allocation2 + $0x3c] sm:$0x1]  ;;  %v17332_v27 = vld [vmem:[#allocation2 + $0x40] sm:$0xf] }
 0x391   :  { %20098 = vst [vmem:[#allocation19_spill] sm:$0xff] %v17328_v0  ;;  %v5967_v37 = vld [vmem:[#allocation2 + $0x44] sm:$0x1]  ;;  %v5952_v26 = vld [vmem:[#allocation2 + $0x30] sm:$0xf]  ;;  %20099 = vst [vmem:[#allocation30_spill] sm:$0xff] %v17334_v7  ;;  %v17347_v40 = vor.u32 %v5825_v43, %v17326_v21 }
 0x392   :  { %v5849_v62 = vshll.u32 %v17100_v44, 16  ;;  %v13702_v38 = vld [vmem:[#allocation2 + $0x8] sm:$0xf]  ;;  %v20100_v31 = vrot.slane %v17102_v15, 4  ;;  %v17344_v46 = vld [vmem:[#allocation2 + $0x58] sm:$0xf]  ;;  %v17351_v44 = vor.u32 %v5841_v20, %v17328_v0  ;;  %v5929_v20 = vsel %vm13936_vm10, %v17115_v24, %v5928_v17 }
 0x393   :  { %v5920_v16 = vsel %vm13936_vm10, %v17111_v33, %v13702_v38  ;;  %v17354_v33 = vld [vmem:[#allocation2 + $0x68] sm:$0xf]  ;;  %v5985_v15 = vld [vmem:[#allocation2 + $0x6c] sm:$0x1]  ;;  %v5973_v38 = vld [vmem:[#allocation2 + $0x5c] sm:$0x1] }
 0x394   :  { %v5926_v61 = vsel %vm13900_vm3, %v20100_v31, %v5925_v6  ;;  %5921 = vst [vmem:[#allocation2 + $0x8] sm:$0xf] %v5920_v16  ;;  %v17356_v6 = vld [vmem:[#allocation2 + $0x70] sm:$0xf]  ;;  %v17359_v31 = vor.u32 %v5849_v62, %v17334_v7  ;;  %v20101_v49 = vrot.slane %v17104_v29, 4  ;;  %v5935_v62 = vsel %vm13936_vm10, %v17119_v2, %v17310_v41 }
 0x395   :  { %5927 = vst [vmem:[#allocation2 + $0xc] sm:$0x1] %v5926_v61  ;;  %v5991_v61 = vld [vmem:[#allocation2 + $0x74] sm:$0x1]  ;;  %v5976_v18 = vld [vmem:[#allocation2 + $0x60] sm:$0xf]  ;;  %v5941_v29 = vsel %vm13936_vm10, %v17123_v45, %v5940_v39 }
 0x396   :  { %v5932_v16 = vsel %vm13900_vm3, %v20101_v49, %v5931_v14  ;;  %v5979_v0 = vld [vmem:[#allocation2 + $0x64] sm:$0x1]  ;;  %v20102_v43 = vrot.slane %v17106_v53, 4  ;;  %v20103_v24 = vrot.slane %v17108_v1, 4  ;;  %5930 = vst [vmem:[#allocation2 + $0x10] sm:$0xf] %v5929_v20  ;;  %v5947_v1 = vsel %vm13936_vm10, %v17136_v58, %v17320_v51 }
 0x397   :  { %5933 = vst [vmem:[#allocation2 + $0x14] sm:$0x1] %v5932_v16  ;;  %v17384_v17 = vld [vmem:[#allocation2 + $0x88] sm:$0xf]  ;;  %v17386_v49 = vld [vmem:[#allocation2 + $0x8c] sm:$0x1] }
 0x398   :  { %v5938_v7 = vsel %vm13900_vm3, %v20102_v43, %v5937_v50  ;;  %v5944_v14 = vsel %vm13900_vm3, %v20103_v24, %v5943_v25  ;;  %v17388_v2 = vld [vmem:[#allocation2 + $0x78] sm:$0xf]  ;;  %v5997_v53 = vld [vmem:[#allocation2 + $0x7c] sm:$0x1]  ;;  %v17390_v41 = vld [vmem:[#allocation2 + $0x90] sm:$0xf]  ;;  %v5953_v25 = vsel %vm13936_vm10, %v17140_v57, %v5952_v26  ;;  %v5965_v57 = vsel %vm13936_vm10, %v17162_v30, %v17332_v27 }
 0x399   :  { %5939 = vst [vmem:[#allocation2 + $0x1c] sm:$0x1] %v5938_v7  ;;  %5945 = vst [vmem:[#allocation2 + $0x24] sm:$0x1] %v5944_v14  ;;  %v20104_v45 = vrot.slane %v17126_v34, 4  ;;  %v20105_v39 = vrot.slane %v17128_v22, 4  ;;  %v5959_v34 = vsel %vm13936_vm10, %v17158_v10, %v17330_v5  ;;  %v5971_v27 = vsel %vm13936_vm10, %v17166_v36, %v17344_v46 }
 0x39a   :  { %5936 = vst [vmem:[#allocation2 + $0x18] sm:$0xf] %v5935_v62  ;;  %5942 = vst [vmem:[#allocation2 + $0x20] sm:$0xf] %v5941_v29  ;;  %v6015_v43 = vld [vmem:[#allocation2 + $0x94] sm:$0x1] }
 0x39b   :  { %v5950_v50 = vsel %vm13900_vm3, %v20104_v45, %v5949_v56  ;;  %v5956_v7 = vsel %vm13900_vm3, %v20105_v39, %v5955_v52  ;;  %v6000_v20 = vld [vmem:[#allocation2 + $0x80] sm:$0xf]  ;;  %v6003_v16 = vld [vmem:[#allocation2 + $0x84] sm:$0x1]  ;;  %v20106_v58 = vrot.slane %v17143_v4, 4  ;;  %v20107_v52 = vrot.slane %v17145_v32, 4 }
 0x39c   :  { %5951 = vst [vmem:[#allocation2 + $0x2c] sm:$0x1] %v5950_v50  ;;  %5957 = vst [vmem:[#allocation2 + $0x34] sm:$0x1] %v5956_v7  ;;  %v17423_v26 = vld [vmem:[#allocation2 + $0xb8] sm:$0xf] }
 0x39d   :  { %v5962_v22 = vsel %vm13900_vm3, %v20106_v58, %v5961_v59  ;;  %v5968_v56 = vsel %vm13900_vm3, %v20107_v52, %v5967_v37  ;;  %5948 = vst [vmem:[#allocation2 + $0x28] sm:$0xf] %v5947_v1  ;;  %5954 = vst [vmem:[#allocation2 + $0x30] sm:$0xf] %v5953_v25  ;;  %v17425_v10 = vld [vmem:[#allocation2 + $0xbc] sm:$0x1]  ;;  %v5977_v59 = vsel %vm13936_vm10, %v17178_v42, %v5976_v18 }
 0x39e   :  { %v6018_v4 = vld [vmem:[#allocation2 + $0xa8] sm:$0xf]  ;;  %v6021_v51 = vld [vmem:[#allocation2 + $0xac] sm:$0x1]  ;;  %v17427_v5 = vld [vmem:[#allocation2 + $0xc0] sm:$0xf] }
 0x39f   :  { %5963 = vst [vmem:[#allocation2 + $0x3c] sm:$0x1] %v5962_v22  ;;  %5966 = vst [vmem:[#allocation2 + $0x40] sm:$0xf] %v5965_v57  ;;  %v20108_v32 = vrot.slane %v17147_v48, 4  ;;  %v20109_v37 = vrot.slane %v17169_v47, 4  ;;  %v5983_v48 = vsel %vm13936_vm10, %v17182_v3, %v17354_v33 }
 0x3a0   :  { %5969 = vst [vmem:[#allocation2 + $0x44] sm:$0x1] %v5968_v56  ;;  %5960 = vst [vmem:[#allocation2 + $0x38] sm:$0xf] %v5959_v34  ;;  %v6039_v29 = vld [vmem:[#allocation2 + $0xc4] sm:$0x1] }
 0x3a1   :  { %v5974_v30 = vsel %vm13900_vm3, %v20108_v32, %v5973_v38  ;;  %v5980_v62 = vsel %vm13900_vm3, %v20109_v37, %v5979_v0  ;;  %v6024_v24 = vld [vmem:[#allocation2 + $0xb0] sm:$0xf]  ;;  %v6027_v14 = vld [vmem:[#allocation2 + $0xb4] sm:$0x1]  ;;  %5972 = vst [vmem:[#allocation2 + $0x58] sm:$0xf] %v5971_v27  ;;  %v5989_v0 = vsel %vm13936_vm10, %v17196_v63, %v17356_v6  ;;  %v6001_v6 = vsel %vm13936_vm10, %v17215_v60, %v6000_v20 }
 0x3a2   :  { %5975 = vst [vmem:[#allocation2 + $0x5c] sm:$0x1] %v5974_v30  ;;  %5981 = vst [vmem:[#allocation2 + $0x64] sm:$0x1] %v5980_v62  ;;  %v20110_v36 = vrot.slane %v17171_v8, 4  ;;  %v20111_v42 = vrot.slane %v17185_v54, 4  ;;  %v5995_v54 = vsel %vm13936_vm10, %v17200_v35, %v17388_v2  ;;  %v6013_v60 = vsel %vm13936_vm10, %v17223_v55, %v17390_v41 }
 0x3a3   :  { %5978 = vst [vmem:[#allocation2 + $0x60] sm:$0xf] %v5977_v59  ;;  %v17460_v46 = vld [vmem:[#allocation2 + $0xd8] sm:$0xf]  ;;  %v17462_v38 = vld [vmem:[#allocation2 + $0xdc] sm:$0x1] }
 0x3a4   :  { %v5986_v18 = vsel %vm13900_vm3, %v20110_v36, %v5985_v15  ;;  %v5992_v47 = vsel %vm13900_vm3, %v20111_v42, %v5991_v61  ;;  %v17464_v3 = vld [vmem:[#allocation2 + $0xc8] sm:$0xf]  ;;  %v6045_v8 = vld [vmem:[#allocation2 + $0xcc] sm:$0x1]  ;;  %v17466_v33 = vld [vmem:[#allocation2 + $0xe0] sm:$0xf] }
 0x3a5   :  { %5987 = vst [vmem:[#allocation2 + $0x6c] sm:$0x1] %v5986_v18  ;;  %5993 = vst [vmem:[#allocation2 + $0x74] sm:$0x1] %v5992_v47  ;;  %v20112_v63 = vrot.slane %v17187_v13, 4  ;;  %v20113_v61 = vrot.slane %v17203_v12, 4  ;;  %v6007_v13 = vsel %vm13936_vm10, %v17219_v9, %v17384_v17 }
 0x3a6   :  { %5984 = vst [vmem:[#allocation2 + $0x68] sm:$0xf] %v5983_v48  ;;  %5990 = vst [vmem:[#allocation2 + $0x70] sm:$0xf] %v5989_v0  ;;  %v6063_v45 = vld [vmem:[#allocation2 + $0xe4] sm:$0x1] }
 0x3a7   :  { %v5998_v15 = vsel %vm13900_vm3, %v20112_v63, %v5997_v53  ;;  %v6004_v1 = vsel %vm13900_vm3, %v20113_v61, %v6003_v16  ;;  %v6048_v50 = vld [vmem:[#allocation2 + $0xd0] sm:$0xf]  ;;  %v6051_v25 = vld [vmem:[#allocation2 + $0xd4] sm:$0x1]  ;;  %v20114_v35 = vrot.slane %v17205_v11, 4  ;;  %v20115_v2 = vrot.slane %v17207_v19, 4 }
 0x3a8   :  { %5999 = vst [vmem:[#allocation2 + $0x7c] sm:$0x1] %v5998_v15  ;;  %6005 = vst [vmem:[#allocation2 + $0x84] sm:$0x1] %v6004_v1  ;;  %v17500_v39 = vld [vmem:[#allocation2 + $0x108] sm:$0xf] }
 0x3a9   :  { %v6010_v12 = vsel %vm13900_vm3, %v20114_v35, %v17386_v49  ;;  %v6016_v53 = vsel %vm13900_vm3, %v20115_v2, %v6015_v43  ;;  %5996 = vst [vmem:[#allocation2 + $0x78] sm:$0xf] %v5995_v54  ;;  %6002 = vst [vmem:[#allocation2 + $0x80] sm:$0xf] %v6001_v6  ;;  %v6081_v9 = vld [vmem:[#allocation2 + $0x10c] sm:$0x1] }
 0x3aa   :  { %v6066_v17 = vld [vmem:[#allocation2 + $0xf8] sm:$0xf]  ;;  %6011 = vst [vmem:[#allocation2 + $0x8c] sm:$0x1] %v6010_v12  ;;  %6014 = vst [vmem:[#allocation2 + $0x90] sm:$0xf] %v6013_v60 }
 0x3ab   :  { %6017 = vst [vmem:[#allocation2 + $0x94] sm:$0x1] %v6016_v53  ;;  %v20116_v11 = vld [vmem:[#allocation56_spill] sm:$0xff]  ;;  %v20120_v20 = vld [vmem:[#allocation53_spill] sm:$0xff]  ;;  %6008 = vst [vmem:[#allocation2 + $0x88] sm:$0xf] %v6007_v13 }
 0x3ac   :  { %v6019_v49 = vsel %vm13936_vm10, %v20116_v11, %v6018_v4  ;;  %v20117_v7 = vld [vmem:[#allocation28_spill] sm:$0xff]  ;;  %v20121_v16 = vrot.slane %v20120_v20, 4  ;;  %v6069_v58 = vld [vmem:[#allocation2 + $0xfc] sm:$0x1]  ;;  %v6072_v22 = vld [vmem:[#allocation2 + $0x100] sm:$0xf] }
 0x3ad   :  { %v20118_v55 = vrot.slane %v20117_v7, 4  ;;  %v20119_v41 = vld [vmem:[#allocation16_spill] sm:$0xff]  ;;  %v6075_v57 = vld [vmem:[#allocation2 + $0x104] sm:$0x1]  ;;  %6020 = vst [vmem:[#allocation2 + $0xa8] sm:$0xf] %v6019_v49 }
 0x3ae   :  { %v6025_v43 = vsel %vm13936_vm10, %v20119_v41, %v6024_v24  ;;  %v6028_v34 = vsel %vm13900_vm3, %v20121_v16, %v6027_v14  ;;  %v20122_v52 = vld [vmem:[#allocation17_spill] sm:$0xff]  ;;  %v20123_v4 = vld [vmem:[#allocation55_spill] sm:$0xff]  ;;  %v20128_v48 = vld [vmem:[#allocation48_spill] sm:$0xff] }
 0x3af   :  { %v6022_v19 = vsel %vm13900_vm3, %v20118_v55, %v6021_v51  ;;  %6029 = vst [vmem:[#allocation2 + $0xb4] sm:$0x1] %v6028_v34  ;;  %v6031_v56 = vsel %vm13936_vm10, %v20122_v52, %v17423_v26  ;;  %v20124_v51 = vrot.slane %v20123_v4, 4  ;;  %v20125_v32 = vld [vmem:[#allocation33_spill] sm:$0xff]  ;;  %v20126_v59 = vld [vmem:[#allocation31_spill] sm:$0xff]  ;;  %v20129_v36 = vld [vmem:[#allocation36_spill] sm:$0xff] }
 0x3b0   :  { %6023 = vst [vmem:[#allocation2 + $0xac] sm:$0x1] %v6022_v19  ;;  %v6037_v30 = vsel %vm13936_vm10, %v20125_v32, %v17427_v5  ;;  %v20127_v37 = vrot.slane %v20126_v59, 4  ;;  %6026 = vst [vmem:[#allocation2 + $0xb0] sm:$0xf] %v6025_v43  ;;  %v20130_v18 = vrot.slane %v20129_v36, 4 }
 0x3b1   :  { %v6034_v27 = vsel %vm13900_vm3, %v20124_v51, %v17425_v10  ;;  %v6084_v24 = vld [vmem:[#allocation2 + $0x110] sm:$0xf]  ;;  %v6087_v14 = vld [vmem:[#allocation2 + $0x114] sm:$0x1]  ;;  %v6102_v26 = vld [vmem:[#allocation2 + $0x128] sm:$0xf]  ;;  %v6043_v10 = vsel %vm13936_vm10, %v20128_v48, %v17464_v3 }
 0x3b2   :  { %v6040_v62 = vsel %vm13900_vm3, %v20127_v37, %v6039_v29  ;;  %6035 = vst [vmem:[#allocation2 + $0xbc] sm:$0x1] %v6034_v27  ;;  %v6046_v5 = vsel %vm13900_vm3, %v20130_v18, %v6045_v8  ;;  %v20131_v0 = vld [vmem:[#allocation49_spill] sm:$0xff]  ;;  %v20132_v42 = vld [vmem:[#allocation23_spill] sm:$0xff]  ;;  %6032 = vst [vmem:[#allocation2 + $0xb8] sm:$0xf] %v6031_v56 }
 0x3b3   :  { %6041 = vst [vmem:[#allocation2 + $0xc4] sm:$0x1] %v6040_v62  ;;  %v6049_v29 = vsel %vm13936_vm10, %v20131_v0, %v6048_v50  ;;  %v20133_v47 = vrot.slane %v20132_v42, 4  ;;  %6038 = vst [vmem:[#allocation2 + $0xc0] sm:$0xf] %v6037_v30  ;;  %v20134_v3 = vld [vmem:[#allocation50_spill] sm:$0xff]  ;;  %v6103_v30 = vsel %vm13936_vm10, %v17351_v44, %v6102_v26 }
 0x3b4   :  { %v6105_v63 = vld [vmem:[#allocation2 + $0x12c] sm:$0x1]  ;;  %v6090_v15 = vld [vmem:[#allocation2 + $0x118] sm:$0xf]  ;;  %v6093_v6 = vld [vmem:[#allocation2 + $0x11c] sm:$0x1]  ;;  %v6055_v8 = vsel %vm13936_vm10, %v20134_v3, %v17460_v46 }
 0x3b5   :  { %v6052_v54 = vsel %vm13900_vm3, %v20133_v47, %v6051_v25  ;;  %6047 = vst [vmem:[#allocation2 + $0xcc] sm:$0x1] %v6046_v5  ;;  %v20135_v61 = vld [vmem:[#allocation57_spill] sm:$0xff]  ;;  %v20138_v35 = vld [vmem:[#allocation51_spill] sm:$0xff]  ;;  %6044 = vst [vmem:[#allocation2 + $0xc8] sm:$0xf] %v6043_v10 }
 0x3b6   :  { %6053 = vst [vmem:[#allocation2 + $0xd4] sm:$0x1] %v6052_v54  ;;  %v20136_v1 = vrot.slane %v20135_v61, 4  ;;  %v20137_v25 = vld [vmem:[#allocation25_spill] sm:$0xff]  ;;  %v20139_v12 = vrot.slane %v20138_v35, 4  ;;  %v20140_v53 = vld [vmem:[#allocation26_spill] sm:$0xff] }
 0x3b7   :  { %v6061_v13 = vsel %vm13936_vm10, %v20137_v25, %v17466_v33  ;;  %6050 = vst [vmem:[#allocation2 + $0xd0] sm:$0xf] %v6049_v29  ;;  %v6108_v2 = vld [vmem:[#allocation2 + $0x130] sm:$0xf]  ;;  %v6111_v46 = vld [vmem:[#allocation2 + $0x134] sm:$0x1] }
 0x3b8   :  { %v6058_v50 = vsel %vm13900_vm3, %v20136_v1, %v17462_v38  ;;  %v6064_v60 = vsel %vm13900_vm3, %v20139_v12, %v6063_v45  ;;  %6062 = vst [vmem:[#allocation2 + $0xe0] sm:$0xf] %v6061_v13  ;;  %v6067_v38 = vsel %vm13936_vm10, %v20140_v53, %v6066_v17  ;;  %v20141_v11 = vld [vmem:[#allocation52_spill] sm:$0xff]  ;;  %v20144_v55 = vld [vmem:[#allocation27_spill] sm:$0xff]  ;;  %6056 = vst [vmem:[#allocation2 + $0xd8] sm:$0xf] %v6055_v8 }
 0x3b9   :  { %6059 = vst [vmem:[#allocation2 + $0xdc] sm:$0x1] %v6058_v50  ;;  %6065 = vst [vmem:[#allocation2 + $0xe4] sm:$0x1] %v6064_v60  ;;  %v20142_v49 = vrot.slane %v20141_v11, 4  ;;  %v20143_v7 = vld [vmem:[#allocation60_spill] sm:$0xff] }
 0x3ba   :  { %v6073_v45 = vsel %vm13936_vm10, %v20143_v7, %v6072_v22  ;;  %v20145_v19 = vrot.slane %v20144_v55, 4  ;;  %v6850_v43 = vld [vmem:[#allocation2 + $0x8] sm:$0xf]  ;;  %6068 = vst [vmem:[#allocation2 + $0xf8] sm:$0xf] %v6067_v38  ;;  %v20146_v17 = vld [vmem:[#allocation29_spill] sm:$0xff] }
 0x3bb   :  { %v6070_v33 = vsel %vm13900_vm3, %v20142_v49, %v6069_v58  ;;  %v6079_v20 = vsel %vm13936_vm10, %v20146_v17, %v17500_v39  ;;  %v20147_v16 = vld [vmem:[#allocation58_spill] sm:$0xff]  ;;  %6074 = vst [vmem:[#allocation2 + $0x100] sm:$0xf] %v6073_v45  ;;  %v6851_v51 = vld [vmem:[#allocation2 + $0x10] sm:$0xf]  ;;  %v6091_v39 = vsel %vm13936_vm10, %v17347_v40, %v6090_v15  ;;  %v20153_v59 = vld [vmem:[#allocation19_spill] sm:$0xff] }
 0x3bc   :  { %v6076_v41 = vsel %vm13900_vm3, %v20145_v19, %v6075_v57  ;;  %6071 = vst [vmem:[#allocation2 + $0xfc] sm:$0x1] %v6070_v33  ;;  %v20148_v34 = vrot.slane %v20147_v16, 4  ;;  %v20149_v22 = vld [vmem:[#allocation18_spill] sm:$0xff]  ;;  %v20150_v57 = vld [vmem:[#allocation59_spill] sm:$0xff]  ;;  %v20154_v37 = vrot.slane %v20153_v59, 4  ;;  %v11944_v0 = vcombine.low %v6850_v43, %v6851_v51 }
 0x3bd   :  { %6077 = vst [vmem:[#allocation2 + $0x104] sm:$0x1] %v6076_v41  ;;  %v6085_v52 = vsel %vm13936_vm10, %v20149_v22, %v6084_v24  ;;  %v20151_v56 = vrot.slane %v20150_v57, 4  ;;  %v6627_v27 = vld [vmem:[#allocation2 + $0x8] sm:$0xe]  ;;  %v20155_v40 = vld [vmem:[#allocation30_spill] sm:$0xff] }
 0x3be   :  { %v6082_v58 = vsel %vm13900_vm3, %v20148_v34, %v6081_v9  ;;  %v20152_v9 = vrot.slane %v17326_v21, 4  ;;  %v6106_v62 = vsel %vm13900_vm3, %v20154_v37, %v6105_v63  ;;  %6080 = vst [vmem:[#allocation2 + $0x108] sm:$0xf] %v6079_v20  ;;  %6086 = vst [vmem:[#allocation2 + $0x110] sm:$0xf] %v6085_v52  ;;  %v6109_v21 = vsel %vm13936_vm10, %v17359_v31, %v6108_v2  ;;  %v13612_v25 = vld [vmem:[%s19709_s1 + $0x3c0] sm:$0xff]  }
 0x3bf   :  { %v6088_v4 = vsel %vm13900_vm3, %v20151_v56, %v6087_v14  ;;  %6083 = vst [vmem:[#allocation2 + $0x10c] sm:$0x1] %v6082_v58  ;;  %v6147_v24 = vld [vmem:[#allocation2 + $0xc] sm:$0x1]  ;;  %v6852_v14 = vld [vmem:[#allocation2 + $0x18] sm:$0xf]  ;;  %9764 = vmatprep.mubr.bf16.mxu0 %v11944_v0 }
 0x3c0   :  { %6089 = vst [vmem:[#allocation2 + $0x114] sm:$0x1] %v6088_v4  ;;  %v6094_v32 = vsel %vm13900_vm3, %v20152_v9, %v6093_v6  ;;  %6107 = vst [vmem:[#allocation2 + $0x12c] sm:$0x1] %v6106_v62  ;;  %v20156_v48 = vrot.slane %v20155_v40, 4  ;;  %v6915_v26 = vshrl.u32 %v6850_v43, 16 }
 0x3c1   :  { %6095 = vst [vmem:[#allocation2 + $0x11c] sm:$0x1] %v6094_v32  ;;  %6092 = vst [vmem:[#allocation2 + $0x118] sm:$0xf] %v6091_v39  ;;  %v6918_v10 = vshll.u32 %v6850_v43, 16  ;;  %v6929_v18 = vshrl.u32 %v6851_v51, 16 }
 0x3c2   :  { %v6112_v44 = vsel %vm13900_vm3, %v20156_v48, %v6111_v46  ;;  %6104 = vst [vmem:[#allocation2 + $0x128] sm:$0xf] %v6103_v30  ;;  %v6853_v36 = vld [vmem:[#allocation2 + $0x20] sm:$0xf]  ;;  %6110 = vst [vmem:[#allocation2 + $0x130] sm:$0xf] %v6109_v21 }
 0x3c3   :  { %6113 = vst [vmem:[#allocation2 + $0x134] sm:$0x1] %v6112_v44  ;;  %v6932_v5 = vshll.u32 %v6851_v51, 16  ;;  %v11801_v29 = vrot.slane %v6627_v27, 9  ;;  %v6917_v42 = vrot.slane %v6915_v26, 4  ;;  %v6920_v47 = vrot.slane %v6918_v10, 5 }
 0x3c4   :  { %v6728_v28 = vrot.slane %v6147_v24, 5  ;;  %v6943_v31 = vshrl.u32 %v6852_v14, 16  ;;  %v6931_v54 = vrot.slane %v6929_v18, 4  ;;  %v6946_v23 = vshll.u32 %v6852_v14, 16  ;;  %v17615_v6 = vld [vmem:[#allocation2 + $0x8] sm:$0xf] }
 0x3c5   :  { %v6934_v63 = vrot.slane %v6932_v5, 5  ;;  %v6957_v15 = vshrl.u32 %v6853_v36, 16  ;;  %v6921_v3 = vor.u32 %v6920_v47, %v6917_v42  ;;  %v6960_v50 = vshll.u32 %v6853_v36, 16  ;;  %v13618_v13 = vld [vmem:[%s19709_s1 + $0x408] sm:$0xff]   ;;  %v20158_v12 = vld [vmem:[#allocation15_spill] sm:$0xff]  ;;  %v13626_v34 = vld [vmem:[%s19709_s1 + $0x410] sm:$0xff]  }
 0x3c6   :  { %v6729_v61 = vsel %vm13972_vm11, %v11801_v29, %v6728_v28  ;;  %v17619_v1 = vrot.slane %v6943_v31, 4  ;;  %v17628_v2 = vrot.slane %v6946_v23, 5  ;;  %v17632_v53 = vld [vmem:[#allocation2 + $0x10] sm:$0xf]  ;;  %v6148_v38 = vld [vmem:[#allocation2 + $0x14] sm:$0x1]  ;;  %v11945_v33 = vcombine.low %v6852_v14, %v6853_v36 }
 0x3c7   :  { %v6935_v35 = vor.u32 %v6934_v63, %v6931_v54  ;;  %v11928_v60 = vcombine.low %v20158_v12, %v6729_v61  ;;  %v17630_v46 = vrot.slane %v6957_v15, 4  ;;  %v17634_v11 = vrot.slane %v6921_v3, 4  ;;  %v17639_v45 = vld [vmem:[#allocation2 + $0x18] sm:$0xf]  ;;  %v13620_v55 = vld [vmem:[%s19709_s1 + $0x3c8] sm:$0xff]   ;;  %v13628_v18 = vld [vmem:[%s19709_s1 + $0x3d0] sm:$0xff]  }
 0x3c8   :  { %v17636_v49 = vrot.slane %v6960_v50, 5  ;;  %v6193_v7 = vshrl.u32 %v17615_v6, 16  ;;  %v6196_v41 = vshll.u32 %v17615_v6, 16  ;;  %v6202_v43 = vshll.u32 %v6147_v24, 16  ;;  %v17647_v17 = vld [vmem:[#allocation2] sm:$0xf] }
 0x3c9   :  { %v17644_v19 = vrot.slane %v6935_v35, 4  ;;  %9765 = vmatmul.mubr.bf16.vlgmr.msra.gmra.mrb[160].mxu0 %v11928_v60  ;;  %v11896_v20 = vcombine.low %v17647_v17, %v17615_v6  ;;  %v6149_v16 = vld [vmem:[#allocation2 + $0x1c] sm:$0x1]  ;;  %v6207_v22 = vshrl.u32 %v17632_v53, 16  ;;  %v6210_v52 = vshll.u32 %v17632_v53, 16  ;;  %v20161_v12 = vld [vmem:[#allocation47_spill] sm:$0xff] }
 0x3ca   :  { %9772 = vmatprep.mubr.bf16.mxu0 %v11945_v33  ;;  %v6195_v58 = vrot.slane %v6193_v7, 4  ;;  %v6216_v57 = vshll.u32 %v6148_v38, 16  ;;  %v6628_v56 = vld [vmem:[#allocation2 + $0x10] sm:$0xe]  ;;  %13195 = vmatpush3.bf16.msra.mxu0 %v13612_v25  ;;  %v6198_v4 = vrot.slane %v6196_v41, 5  ;;  %v6204_v51 = vrot.slane %v6202_v43, 5 }
 0x3cb   :  { %v6221_v27 = vshrl.u32 %v17639_v45, 16  ;;  %v6224_v39 = vshll.u32 %v17639_v45, 16  ;;  %v6629_v9 = vld [vmem:[#allocation2 + $0x18] sm:$0xe]  ;;  %13196 = vmatprep.subr.bf16.mxu0 %v13618_v13  ;;  %v6209_v32 = vrot.slane %v6207_v22, 4  ;;  %v6212_v30 = vrot.slane %v6210_v52, 5 }
 0x3cc   :  { %v6218_v59 = vrot.slane %v6216_v57, 5  ;;  %v6230_v37 = vshll.u32 %v6149_v16, 16  ;;  %v6854_v62 = vld [vmem:[#allocation2 + $0x28] sm:$0xf]  ;;  %v6199_v24 = vor.u32 %v6198_v4, %v6195_v58  ;;  %v11802_v40 = vrot.slane %v6628_v56, 9  ;;  %v13630_v47 = vld [vmem:[%s19709_s1 + $0x418] sm:$0xff]  }
 0x3cd   :  { %v6223_v14 = vrot.slane %v6221_v27, 4  ;;  %v6226_v21 = vrot.slane %v6224_v39, 5  ;;  %v6855_v48 = vld [vmem:[#allocation2 + $0x30] sm:$0xf]  ;;  %v6213_v44 = vor.u32 %v6212_v30, %v6209_v32  ;;  %v6732_v10 = vrot.slane %v6148_v38, 5  ;;  %v20160_v35 = vld [vmem:[#allocation46_spill] sm:$0xff] }
 0x3ce   :  { %v6232_v26 = vrot.slane %v6230_v37, 5  ;;  %v11803_v36 = vrot.slane %v6629_v9, 9  ;;  %13197 = vmatpush3.bf16.msra.mxu0 %v13620_v55  ;;  %v6200_v5 = vrot.slane %v6199_v24, 4  ;;  %v6736_v29 = vrot.slane %v6149_v16, 5  ;;  %v17672_v25 = vld [vmem:[#allocation2 + $0x20] sm:$0xf] }
 0x3cf   :  { %v6227_v0 = vor.u32 %v6226_v21, %v6223_v14  ;;  %v6971_v42 = vshrl.u32 %v6854_v62, 16  ;;  %13198 = vmatprep.subr.bf16.mxu0 %v13626_v34  ;;  %v6214_v28 = vrot.slane %v6213_v44, 4  ;;  %v6733_v31 = vsel %vm13972_vm11, %v11802_v40, %v6732_v10  ;;  %v17674_v13 = vld [vmem:[#allocation2 + $0x28] sm:$0xf]  ;;  %v13586_v55 = vld [vmem:[%s19709_s1 + $0x340] sm:$0xff]   ;;  %v13631_v4 = vld [vmem:[%s19709_s1 + $0x3d8] sm:$0xff]  }
 0x3d0   :  { %v6974_v54 = vshll.u32 %v6854_v62, 16  ;;  %v6985_v63 = vshrl.u32 %v6855_v48, 16  ;;  %v6205_v15 = vsel %vm13991_vm12, %v6200_v5, %v6204_v51  ;;  %v6737_v61 = vsel %vm13972_vm11, %v11803_v36, %v6736_v29  ;;  %v6150_v43 = vld [vmem:[#allocation2 + $0x24] sm:$0x1]  ;;  %v6151_v16 = vld [vmem:[#allocation2 + $0x2c] sm:$0x1] }
 0x3d1   :  { %v6228_v3 = vrot.slane %v6227_v0, 4  ;;  %v17670_v50 = vrot.slane %v6971_v42, 4  ;;  %v20162_v60 = vsel %vm13991_vm12, %v20160_v35, %v20161_v12  ;;  %v6219_v33 = vsel %vm13991_vm12, %v6214_v28, %v6218_v59  ;;  %v6630_v57 = vld [vmem:[#allocation2 + $0x20] sm:$0xe]  ;;  %v13591_v56 = vld [vmem:[%s19709_s1 + $0x388] sm:$0xff]   ;;  %v13598_v42 = vld [vmem:[%s19709_s1 + $0x350] sm:$0xff]  }
 0x3d2   :  { %v11912_v38 = vcombine.low %v20162_v60, %v6205_v15  ;;  %v11929_v7 = vcombine.low %v6733_v31, %v6737_v61  ;;  %v17686_v41 = vrot.slane %v6974_v54, 5  ;;  %13199 = vmatpush3.bf16.msra.mxu0 %v13628_v18  ;;  %v17690_v58 = vrot.slane %v6985_v63, 4  ;;  %v6631_v32 = vld [vmem:[#allocation2 + $0x28] sm:$0xe]  ;;  %v13633_v59 = vld [vmem:[%s19709_s1 + $0x420] sm:$0xff]  }
 0x3d3   :  { %v6233_v34 = vsel %vm13991_vm12, %v6228_v3, %v6232_v26  ;;  %v6988_v22 = vshll.u32 %v6855_v48, 16  ;;  %v11946_v52 = vcombine.low %v6854_v62, %v6855_v48  ;;  %13200 = vmatprep.subr.bf16.mxu0 %v13630_v47  ;;  %v11897_v27 = vcombine.low %v17632_v53, %v17639_v45  ;;  %v13592_v30 = vld [vmem:[%s19709_s1 + $0x348] sm:$0xff]   ;;  %v6856_v24 = vld [vmem:[#allocation2 + $0x38] sm:$0xf]  ;;  %v6857_v44 = vld [vmem:[#allocation2 + $0x40] sm:$0xf] }
 0x3d4   :  { %9603 = vmatprep.mubr.bf16.mxu1 %v11912_v38  ;;  %v11913_v51 = vcombine.low %v6219_v33, %v6233_v34  ;;  %9773 = vmatmul.mubr.bf16.gmra.mrb[164].mxu0 %v11929_v7  ;;  %v6235_v39 = vshrl.u32 %v17672_v25, 16  ;;  %v6238_v9 = vshll.u32 %v17672_v25, 16  ;;  %v6244_v53 = vshll.u32 %v6150_v43, 16  ;;  %v13635_v36 = vld [vmem:[%s19709_s1 + $0x3e0] sm:$0xff]   ;;  %v13636_v47 = vld [vmem:[%s19709_s1 + $0x428] sm:$0xff]   ;;  %v13603_v33 = vld [vmem:[%s19709_s1 + $0x398] sm:$0xff]  }
 0x3d5   :  { %9604 = vmatmul.mubr.bf16.vlgmr.msra.gmra.mrb[128].mxu1 %v11896_v20  ;;  %v17711_v37 = vrot.slane %v6988_v22, 5  ;;  %9780 = vmatprep.mubr.bf16.mxu0 %v11946_v52  ;;  %v6249_v45 = vshrl.u32 %v17674_v13, 16  ;;  %v6252_v62 = vshll.u32 %v17674_v13, 16  ;;  %v6258_v40 = vshll.u32 %v6151_v16, 16  ;;  %v13597_v20 = vld [vmem:[%s19709_s1 + $0x390] sm:$0xff]   ;;  %v13637_v22 = vld [vmem:[%s19709_s1 + $0x3e8] sm:$0xff]  }
 0x3d6   :  { %9611 = vmatprep.mubr.bf16.mxu1 %v11913_v51  ;;  %13083 = vmatpush3.bf16.msra.mxu1 %v13586_v55  ;;  %v6237_v14 = vrot.slane %v6235_v39, 4  ;;  %v6240_v21 = vrot.slane %v6238_v9, 5  ;;  %v11804_v48 = vrot.slane %v6630_v57, 9  ;;  %v6246_v26 = vrot.slane %v6244_v53, 5  ;;  %v17729_v15 = vld [vmem:[#allocation2 + $0x30] sm:$0xf] }
 0x3d7   :  { %v6251_v10 = vrot.slane %v6249_v45, 4  ;;  %v6254_v6 = vrot.slane %v6252_v62, 5  ;;  %v6740_v17 = vrot.slane %v6150_v43, 5  ;;  %13084 = vmatprep.subr.bf16.mxu1 %v13591_v56  ;;  %13201 = vmatpush3.bf16.msra.mxu0 %v13631_v4  ;;  %v6260_v5 = vrot.slane %v6258_v40, 5  ;;  %v17731_v3 = vld [vmem:[#allocation2 + $0x38] sm:$0xf] }
 0x3d8   :  { %v6241_v18 = vor.u32 %v6240_v21, %v6237_v14  ;;  %v11805_v0 = vrot.slane %v6631_v32, 9  ;;  %v6744_v29 = vrot.slane %v6151_v16, 5  ;;  %13202 = vmatprep.subr.bf16.mxu0 %v13633_v59  ;;  %v6999_v54 = vshrl.u32 %v6856_v24, 16  ;;  %v6152_v38 = vld [vmem:[#allocation2 + $0x34] sm:$0x1]  ;;  %v13604_v21 = vld [vmem:[%s19709_s1 + $0x358] sm:$0xff]  }
 0x3d9   :  { %v6255_v28 = vor.u32 %v6254_v6, %v6251_v10  ;;  %v6741_v31 = vsel %vm13972_vm11, %v11804_v48, %v6740_v17  ;;  %v7002_v63 = vshll.u32 %v6856_v24, 16  ;;  %v7013_v12 = vshrl.u32 %v6857_v44, 16  ;;  %v6153_v34 = vld [vmem:[#allocation2 + $0x3c] sm:$0x1]  ;;  %v6632_v51 = vld [vmem:[#allocation2 + $0x30] sm:$0xe] }
 0x3da   :  { %v6242_v61 = vrot.slane %v6241_v18, 4  ;;  %v6745_v35 = vsel %vm13972_vm11, %v11805_v0, %v6744_v29  ;;  %v7016_v60 = vshll.u32 %v6857_v44, 16  ;;  %13085 = vmatpush3.bf16.msra.mxu1 %v13592_v30  ;;  %v17738_v43 = vrot.slane %v6999_v54, 4  ;;  %v13641_v39 = vld [vmem:[%s19709_s1 + $0x430] sm:$0xff]   ;;  %v6633_v53 = vld [vmem:[#allocation2 + $0x38] sm:$0xe] }
 0x3db   :  { %v6256_v7 = vrot.slane %v6255_v28, 4  ;;  %v11930_v55 = vcombine.low %v6741_v31, %v6745_v35  ;;  %v17740_v16 = vrot.slane %v7002_v63, 5  ;;  %13086 = vmatprep.subr.bf16.mxu1 %v13597_v20  ;;  %13203 = vmatpush3.bf16.msra.mxu0 %v13635_v36  ;;  %v17747_v57 = vrot.slane %v7013_v12, 4  ;;  %v6859_v36 = vld [vmem:[#allocation2 + $0x60] sm:$0xf] }
 0x3dc   :  { %v6247_v52 = vsel %vm13991_vm12, %v6242_v61, %v6246_v26  ;;  %v17749_v56 = vrot.slane %v7016_v60, 5  ;;  %v11947_v4 = vcombine.low %v6856_v24, %v6857_v44  ;;  %13204 = vmatprep.subr.bf16.mxu0 %v13636_v47  ;;  %v11898_v32 = vcombine.low %v17672_v25, %v17674_v13  ;;  %v13609_v44 = vld [vmem:[%s19709_s1 + $0x3a0] sm:$0xff]   ;;  %v13642_v26 = vld [vmem:[%s19709_s1 + $0x3f0] sm:$0xff]  }
 0x3dd   :  { %9612 = vmatmul.mubr.bf16.gmra.mrb[132].mxu1 %v11897_v27  ;;  %v6261_v9 = vsel %vm13991_vm12, %v6256_v7, %v6260_v5  ;;  %9781 = vmatmul.mubr.bf16.gmra.mrb[168].mxu0 %v11930_v55  ;;  %v6263_v30 = vshrl.u32 %v17729_v15, 16  ;;  %v6266_v59 = vshll.u32 %v17729_v15, 16  ;;  %v6272_v62 = vshll.u32 %v6152_v38, 16  ;;  %v6858_v27 = vld [vmem:[#allocation2 + $0x58] sm:$0xf]  ;;  %v13611_v63 = vld [vmem:[%s19709_s1 + $0x360] sm:$0xff]  }
 0x3de   :  { %v11914_v45 = vcombine.low %v6247_v52, %v6261_v9  ;;  %9788 = vmatprep.mubr.bf16.mxu0 %v11947_v4  ;;  %v6277_v24 = vshrl.u32 %v17731_v3, 16  ;;  %v6280_v14 = vshll.u32 %v17731_v3, 16  ;;  %13087 = vmatpush3.bf16.msra.mxu1 %v13598_v42  ;;  %v6286_v13 = vshll.u32 %v6153_v34, 16  ;;  %v13643_v42 = vld [vmem:[%s19709_s1 + $0x438] sm:$0xff]   ;;  %v13709_v23 = vld [vmem:[#allocation2 + $0x34] sm:$0x1] }
 0x3df   :  { %v6265_v40 = vrot.slane %v6263_v30, 4  ;;  %v6268_v25 = vrot.slane %v6266_v59, 5  ;;  %v11806_v48 = vrot.slane %v6632_v51, 9  ;;  %13088 = vmatprep.subr.bf16.mxu1 %v13603_v33  ;;  %13205 = vmatpush3.bf16.msra.mxu0 %v13637_v22  ;;  %v6274_v10 = vrot.slane %v6272_v62, 5  ;;  %v13617_v33 = vld [vmem:[%s19709_s1 + $0x3a8] sm:$0xff]   ;;  %v13644_v4 = vld [vmem:[%s19709_s1 + $0x3f8] sm:$0xff]  }
 0x3e0   :  { %9619 = vmatprep.mubr.bf16.mxu1 %v11914_v45  ;;  %v6279_v6 = vrot.slane %v6277_v24, 4  ;;  %v6282_v17 = vrot.slane %v6280_v14, 5  ;;  %v6748_v20 = vrot.slane %v6152_v38, 5  ;;  %13206 = vmatprep.subr.bf16.mxu0 %v13641_v39  ;;  %v6288_v5 = vrot.slane %v6286_v13, 5  ;;  %v17781_v38 = vld [vmem:[#allocation2 + $0x58] sm:$0xf] }
 0x3e1   :  { %v6269_v18 = vor.u32 %v6268_v25, %v6265_v40  ;;  %v11807_v0 = vrot.slane %v6633_v53, 9  ;;  %v6752_v29 = vrot.slane %v6153_v34, 5  ;;  %v7027_v31 = vshrl.u32 %v6858_v27, 16  ;;  %v6155_v52 = vld [vmem:[#allocation2 + $0x5c] sm:$0x1]  ;;  %v20163_v62 = vld [vmem:[#allocation13_spill] sm:$0xff] }
 0x3e2   :  { %v6283_v47 = vor.u32 %v6282_v17, %v6279_v6  ;;  %v6749_v28 = vsel %vm13972_vm11, %v11806_v48, %v6748_v20  ;;  %v7030_v54 = vshll.u32 %v6858_v27, 16  ;;  %13089 = vmatpush3.bf16.msra.mxu1 %v13604_v21  ;;  %v7041_v12 = vshrl.u32 %v6859_v36, 16  ;;  %v6635_v59 = vld [vmem:[#allocation2 + $0x58] sm:$0xe]  ;;  %v6860_v40 = vld [vmem:[#allocation2 + $0x68] sm:$0xf] }
 0x3e3   :  { %v6270_v61 = vrot.slane %v6269_v18, 4  ;;  %v6753_v35 = vsel %vm13972_vm11, %v11807_v0, %v6752_v29  ;;  %v7044_v60 = vshll.u32 %v6859_v36, 16  ;;  %13090 = vmatprep.subr.bf16.mxu1 %v13609_v44  ;;  %13207 = vmatpush3.bf16.msra.mxu0 %v13642_v26  ;;  %v17786_v34 = vrot.slane %v7027_v31, 4  ;;  %v20164_v24 = vld [vmem:[#allocation14_spill] sm:$0xff]  ;;  %v13619_v25 = vld [vmem:[%s19709_s1 + $0x368] sm:$0xff]   ;;  %v13627_v20 = vld [vmem:[%s19709_s1 + $0x370] sm:$0xff]  }
 0x3e4   :  { %v6284_v7 = vrot.slane %v6283_v47, 4  ;;  %v11931_v55 = vcombine.low %v6749_v28, %v6753_v35  ;;  %v17788_v22 = vrot.slane %v7030_v54, 5  ;;  %13208 = vmatprep.subr.bf16.mxu0 %v13643_v42  ;;  %v17795_v39 = vrot.slane %v7041_v12, 4  ;;  %v6861_v26 = vld [vmem:[#allocation2 + $0x70] sm:$0xf]  ;;  %v20165_v35 = vld [vmem:[#allocation54_spill] sm:$0xff] }
 0x3e5   :  { %9620 = vmatmul.mubr.bf16.gmra.mrb[136].mxu1 %v11898_v32  ;;  %v6275_v51 = vsel %vm13991_vm12, %v6270_v61, %v6274_v10  ;;  %v17797_v9 = vrot.slane %v7044_v60, 5  ;;  %v11948_v30 = vcombine.low %v6858_v27, %v6859_v36  ;;  %v11899_v45 = vcombine.low %v17729_v15, %v17731_v3  ;;  %v13704_v32 = vld [vmem:[#allocation2 + $0x54] sm:$0x1]  ;;  %v17816_v29 = vld [vmem:[#allocation2 + $0x60] sm:$0xf] }
 0x3e6   :  { %v6289_v53 = vsel %vm13991_vm12, %v6284_v7, %v6288_v5  ;;  %9789 = vmatmul.mubr.bf16.gmra.mrb[172].mxu0 %v11931_v55  ;;  %v6297_v14 = vor.u32 %v20164_v24, %v20163_v62  ;;  %v6300_v21 = vshll.u32 %v13704_v32, 16  ;;  %13091 = vmatpush3.bf16.msra.mxu1 %v13611_v63  ;;  %v6305_v13 = vshrl.u32 %v17781_v38, 16  ;;  %v13625_v15 = vld [vmem:[%s19709_s1 + $0x3b0] sm:$0xff]   ;;  %v17822_v54 = vld [vmem:[#allocation2 + $0x68] sm:$0xf]  ;;  %v13639_v55 = vld [vmem:[%s19709_s1 + $0x3b8] sm:$0xff]  }
 0x3e7   :  { %v11915_v27 = vcombine.low %v6275_v51, %v6289_v53  ;;  %9796 = vmatprep.mubr.bf16.mxu0 %v11948_v30  ;;  %v6308_v48 = vshll.u32 %v17781_v38, 16  ;;  %v6314_v44 = vshll.u32 %v6155_v52, 16  ;;  %13092 = vmatprep.subr.bf16.mxu1 %v13617_v33  ;;  %v11809_v6 = vrot.slane %v6635_v59, 9  ;;  %v6156_v63 = vld [vmem:[#allocation2 + $0x64] sm:$0x1] }
 0x3e8   :  { %v6298_v3 = vrot.slane %v6297_v14, 4  ;;  %v6302_v10 = vrot.slane %v6300_v21, 5  ;;  %v6760_v17 = vrot.slane %v6155_v52, 5  ;;  %13209 = vmatpush3.bf16.msra.mxu0 %v13644_v4  ;;  %v6307_v36 = vrot.slane %v6305_v13, 4  ;;  %v6157_v7 = vld [vmem:[#allocation2 + $0x6c] sm:$0x1] }
 0x3e9   :  { %9627 = vmatprep.mubr.bf16.mxu1 %v11915_v27  ;;  %v6310_v18 = vrot.slane %v6308_v48, 5  ;;  %v6316_v5 = vrot.slane %v6314_v44, 5  ;;  %v7055_v0 = vshrl.u32 %v6860_v40, 16  ;;  %v7058_v28 = vshll.u32 %v6860_v40, 16  ;;  %v13705_v30 = vld [vmem:[#allocation2 + $0x50] sm:$0xf] }
 0x3ea   :  { %v6303_v42 = vsel %vm13991_vm12, %v6298_v3, %v6302_v10  ;;  %v6761_v47 = vsel %vm13972_vm11, %v11809_v6, %v6760_v17  ;;  %v7069_v31 = vshrl.u32 %v6861_v26, 16  ;;  %13093 = vmatpush3.bf16.msra.mxu1 %v13619_v25  ;;  %v7072_v33 = vshll.u32 %v6861_v26, 16  ;;  %v6636_v53 = vld [vmem:[#allocation2 + $0x60] sm:$0xe]  ;;  %v6637_v21 = vld [vmem:[#allocation2 + $0x68] sm:$0xe] }
 0x3eb   :  { %v6311_v61 = vor.u32 %v6310_v18, %v6307_v36  ;;  %v11932_v12 = vcombine.low %v20165_v35, %v6761_v47  ;;  %v17825_v60 = vrot.slane %v7055_v0, 4  ;;  %13094 = vmatprep.subr.bf16.mxu1 %v13625_v15  ;;  %v17830_v52 = vrot.slane %v7058_v28, 5  ;;  %v6862_v15 = vld [vmem:[#allocation2 + $0x78] sm:$0xf]  ;;  %v13647_v3 = vld [vmem:[%s19709_s1 + $0x440] sm:$0xff]  }
 0x3ec   :  { %v17832_v4 = vrot.slane %v7069_v31, 4  ;;  %v11949_v51 = vcombine.low %v6860_v40, %v6861_v26  ;;  %v11900_v59 = vcombine.low %v13705_v30, %v17781_v38  ;;  %v17835_v24 = vrot.slane %v7072_v33, 5  ;;  %v13640_v38 = vld [vmem:[%s19709_s1 + $0x378] sm:$0xff]   ;;  %v6863_v36 = vld [vmem:[#allocation2 + $0x80] sm:$0xf] }
 0x3ed   :  { %9628 = vmatmul.mubr.bf16.gmra.mrb[140].mxu1 %v11899_v45  ;;  %v6312_v62 = vrot.slane %v6311_v61, 4  ;;  %v6319_v14 = vshrl.u32 %v17816_v29, 16  ;;  %v6322_v32 = vshll.u32 %v17816_v29, 16  ;;  %v6328_v25 = vshll.u32 %v6156_v63, 16  ;;  %v17853_v30 = vld [vmem:[#allocation2 + $0x78] sm:$0xf] }
 0x3ee   :  { %9797 = vmatmul.mubr.bf16.gmra.mrb[176].mxu0 %v11932_v12  ;;  %v6333_v27 = vshrl.u32 %v17822_v54, 16  ;;  %v6336_v13 = vshll.u32 %v17822_v54, 16  ;;  %v6342_v40 = vshll.u32 %v6157_v7, 16  ;;  %13095 = vmatpush3.bf16.msra.mxu1 %v13627_v20  ;;  %v11810_v26 = vrot.slane %v6636_v53, 9  ;;  %v17849_v12 = vld [vmem:[#allocation2 + $0x70] sm:$0xf] }
 0x3ef   :  { %v6317_v45 = vsel %vm13991_vm12, %v6312_v62, %v6316_v5  ;;  %9804 = vmatprep.mubr.bf16.mxu0 %v11949_v51  ;;  %v6321_v48 = vrot.slane %v6319_v14, 4  ;;  %v6324_v44 = vrot.slane %v6322_v32, 5  ;;  %13096 = vmatprep.subr.bf16.mxu1 %v13639_v55  ;;  %v6330_v6 = vrot.slane %v6328_v25, 5  ;;  %v6158_v14 = vld [vmem:[#allocation2 + $0x74] sm:$0x1] }
 0x3f0   :  { %v11916_v10 = vcombine.low %v6303_v42, %v6317_v45  ;;  %v6335_v17 = vrot.slane %v6333_v27, 4  ;;  %v6338_v20 = vrot.slane %v6336_v13, 5  ;;  %v6344_v0 = vrot.slane %v6342_v40, 5  ;;  %v6159_v13 = vld [vmem:[#allocation2 + $0x7c] sm:$0x1] }
 0x3f1   :  { %v6325_v18 = vor.u32 %v6324_v44, %v6321_v48  ;;  %v6764_v47 = vrot.slane %v6156_v63, 5  ;;  %v11811_v28 = vrot.slane %v6637_v21, 9  ;;  %v6768_v31 = vrot.slane %v6157_v7, 5  ;;  %v6638_v40 = vld [vmem:[#allocation2 + $0x70] sm:$0xe] }
 0x3f2   :  { %9635 = vmatprep.mubr.bf16.mxu1 %v11916_v10  ;;  %v6339_v5 = vor.u32 %v6338_v20, %v6335_v17  ;;  %v7083_v61 = vshrl.u32 %v6862_v15, 16  ;;  %v7086_v35 = vshll.u32 %v6862_v15, 16  ;;  %13097 = vmatpush3.bf16.msra.mxu1 %v13640_v38  ;;  %v7097_v55 = vshrl.u32 %v6863_v36, 16 }
 0x3f3   :  { %v6326_v33 = vrot.slane %v6325_v18, 4  ;;  %v6765_v42 = vsel %vm13972_vm11, %v11810_v26, %v6764_v47  ;;  %v7100_v51 = vshll.u32 %v6863_v36, 16  ;;  %13378 = vmatprep.subr.bf16.mxu1 %v13647_v3  ;;  %v6769_v63 = vsel %vm13972_vm11, %v11811_v28, %v6768_v31  ;;  %v6865_v28 = vld [vmem:[#allocation2 + $0x90] sm:$0xf] }
 0x3f4   :  { %v6340_v53 = vrot.slane %v6339_v5, 4  ;;  %v17857_v62 = vrot.slane %v7083_v61, 4  ;;  %v17859_v7 = vrot.slane %v7086_v35, 5  ;;  %v11933_v21 = vcombine.low %v6765_v42, %v6769_v63 }
 0x3f5   :  { %9636 = vmatmul.mubr.bf16.gmra.mrb[144].mxu1 %v11900_v59  ;;  %v6331_v32 = vsel %vm13991_vm12, %v6326_v33, %v6330_v6  ;;  %v17863_v25 = vrot.slane %v7097_v55, 4  ;;  %v17865_v27 = vrot.slane %v7100_v51, 5  ;;  %v11950_v45 = vcombine.low %v6862_v15, %v6863_v36  ;;  %v6639_v6 = vld [vmem:[#allocation2 + $0x78] sm:$0xe]  ;;  %v6864_v15 = vld [vmem:[#allocation2 + $0x88] sm:$0xf] }
 0x3f6   :  { %v6345_v38 = vsel %vm13991_vm12, %v6340_v53, %v6344_v0  ;;  %v11901_v48 = vcombine.low %v17816_v29, %v17822_v54  ;;  %v6347_v44 = vshrl.u32 %v17849_v12, 16  ;;  %9805 = vmatmul.mubr.bf16.gmra.mrb[180].mxu0 %v11933_v21  ;;  %v6350_v26 = vshll.u32 %v17849_v12, 16 }
 0x3f7   :  { %v11917_v59 = vcombine.low %v6331_v32, %v6345_v38  ;;  %v6356_v3 = vshll.u32 %v6158_v14, 16  ;;  %v6361_v10 = vshrl.u32 %v17853_v30, 16  ;;  %9812 = vmatprep.mubr.bf16.mxu0 %v11950_v45  ;;  %v6364_v20 = vshll.u32 %v17853_v30, 16 }
 0x3f8   :  { %v6349_v17 = vrot.slane %v6347_v44, 4  ;;  %v6370_v18 = vshll.u32 %v6159_v13, 16  ;;  %v11812_v0 = vrot.slane %v6638_v40, 9  ;;  %v6352_v36 = vrot.slane %v6350_v26, 5  ;;  %v17879_v40 = vld [vmem:[#allocation2 + $0x80] sm:$0xf] }
 0x3f9   :  { %9643 = vmatprep.mubr.bf16.mxu1 %v11917_v59  ;;  %v6358_v29 = vrot.slane %v6356_v3, 5  ;;  %v6363_v54 = vrot.slane %v6361_v10, 4  ;;  %v6772_v47 = vrot.slane %v6158_v14, 5  ;;  %v6366_v5 = vrot.slane %v6364_v20, 5  ;;  %v17881_v14 = vld [vmem:[#allocation2 + $0x88] sm:$0xf] }
 0x3fa   :  { %v6372_v31 = vrot.slane %v6370_v18, 5  ;;  %v11813_v61 = vrot.slane %v6639_v6, 9  ;;  %v6776_v35 = vrot.slane %v6159_v13, 5  ;;  %v6353_v33 = vor.u32 %v6352_v36, %v6349_v17  ;;  %v6160_v59 = vld [vmem:[#allocation2 + $0x84] sm:$0x1] }
 0x3fb   :  { %v6773_v42 = vsel %vm13972_vm11, %v11812_v0, %v6772_v47  ;;  %v7111_v55 = vshrl.u32 %v6864_v15, 16  ;;  %v7114_v51 = vshll.u32 %v6864_v15, 16  ;;  %v6367_v53 = vor.u32 %v6366_v5, %v6363_v54  ;;  %v6161_v17 = vld [vmem:[#allocation2 + $0x8c] sm:$0x1]  ;;  %v6640_v36 = vld [vmem:[#allocation2 + $0x80] sm:$0xe] }
 0x3fc   :  { %v6777_v63 = vsel %vm13972_vm11, %v11813_v61, %v6776_v35  ;;  %v7125_v32 = vshrl.u32 %v6865_v28, 16  ;;  %v7128_v21 = vshll.u32 %v6865_v28, 16  ;;  %v6354_v38 = vrot.slane %v6353_v33, 4  ;;  %v6641_v5 = vld [vmem:[#allocation2 + $0x88] sm:$0xe] }
 0x3fd   :  { %9644 = vmatmul.mubr.bf16.gmra.mrb[148].mxu1 %v11901_v48  ;;  %v11934_v45 = vcombine.low %v6773_v42, %v6777_v63  ;;  %v17883_v13 = vrot.slane %v7111_v55, 4  ;;  %v17885_v44 = vrot.slane %v7114_v51, 5  ;;  %v6368_v26 = vrot.slane %v6367_v53, 4  ;;  %v6867_v53 = vld [vmem:[#allocation2 + $0xb0] sm:$0xf] }
 0x3fe   :  { %v17887_v3 = vrot.slane %v7125_v32, 4  ;;  %v17889_v10 = vrot.slane %v7128_v21, 5  ;;  %v11951_v6 = vcombine.low %v6864_v15, %v6865_v28  ;;  %v6359_v20 = vsel %vm13991_vm12, %v6354_v38, %v6358_v29 }
 0x3ff   :  { %9813 = vmatmul.mubr.bf16.gmra.mrb[184].mxu0 %v11934_v45  ;;  %v11902_v48 = vcombine.low %v17849_v12, %v17853_v30  ;;  %v6375_v18 = vshrl.u32 %v17879_v40, 16  ;;  %v6378_v0 = vshll.u32 %v17879_v40, 16  ;;  %v6373_v54 = vsel %vm13991_vm12, %v6368_v26, %v6372_v31  ;;  %v6866_v12 = vld [vmem:[#allocation2 + $0xa8] sm:$0xf] }
 0x400   :  { %20166 = vst [vmem:[#allocation32_spill] sm:$0xff] %v17887_v3  ;;  %20167 = vst [vmem:[#allocation37_spill] sm:$0xff] %v17889_v10  ;;  %9820 = vmatprep.mubr.bf16.mxu0 %v11951_v6  ;;  %v6384_v47 = vshll.u32 %v6160_v59, 16  ;;  %v6389_v15 = vshrl.u32 %v17881_v14, 16  ;;  %v6392_v28 = vshll.u32 %v17881_v14, 16  ;;  %v11918_v29 = vcombine.low %v6359_v20, %v6373_v54 }
 0x401   :  { %v6377_v61 = vrot.slane %v6375_v18, 4  ;;  %v6380_v35 = vrot.slane %v6378_v0, 5  ;;  %v6398_v33 = vshll.u32 %v6161_v17, 16  ;;  %v11814_v51 = vrot.slane %v6640_v36, 9  ;;  %v7364_v10 = vld [vmem:[#allocation2 + $0x18] sm:$0xe] }
 0x402   :  { %v6386_v30 = vrot.slane %v6384_v47, 5  ;;  %v6391_v42 = vrot.slane %v6389_v15, 4  ;;  %v6394_v55 = vrot.slane %v6392_v28, 5  ;;  %9651 = vmatprep.mubr.bf16.mxu1 %v11918_v29  ;;  %v6780_v32 = vrot.slane %v6160_v59, 5  ;;  %v17903_v47 = vld [vmem:[#allocation2 + $0xa0] sm:$0xf] }
 0x403   :  { %v6381_v63 = vor.u32 %v6380_v35, %v6377_v61  ;;  %v6400_v31 = vrot.slane %v6398_v33, 5  ;;  %v11815_v21 = vrot.slane %v6641_v5, 9  ;;  %v6784_v45 = vrot.slane %v6161_v17, 5  ;;  %v17911_v17 = vld [vmem:[#allocation2 + $0xa8] sm:$0xf] }
 0x404   :  { %v6395_v38 = vor.u32 %v6394_v55, %v6391_v42  ;;  %v7139_v26 = vshrl.u32 %v6866_v12, 16  ;;  %v7142_v6 = vshll.u32 %v6866_v12, 16  ;;  %v6781_v18 = vsel %vm13972_vm11, %v11814_v51, %v6780_v32  ;;  %v6163_v35 = vld [vmem:[#allocation2 + $0xac] sm:$0x1]  ;;  %v6642_v33 = vld [vmem:[#allocation2 + $0xa0] sm:$0xe] }
 0x405   :  { %9652 = vmatmul.mubr.bf16.gmra.mrb[152].mxu1 %v11902_v48  ;;  %v6382_v20 = vrot.slane %v6381_v63, 4  ;;  %v7153_v0 = vshrl.u32 %v6867_v53, 16  ;;  %v7156_v54 = vshll.u32 %v6867_v53, 16  ;;  %v6785_v15 = vsel %vm13972_vm11, %v11815_v21, %v6784_v45  ;;  %v6162_v63 = vld [vmem:[#allocation2 + $0xa4] sm:$0x1] }
 0x406   :  { %v6396_v36 = vrot.slane %v6395_v38, 4  ;;  %v17907_v28 = vrot.slane %v7139_v26, 4  ;;  %v17909_v59 = vrot.slane %v7142_v6, 5  ;;  %v11935_v5 = vcombine.low %v6781_v18, %v6785_v15  ;;  %v6643_v26 = vld [vmem:[#allocation2 + $0xa8] sm:$0xe] }
 0x407   :  { %v6387_v48 = vsel %vm13991_vm12, %v6382_v20, %v6386_v30  ;;  %v17915_v29 = vrot.slane %v7153_v0, 4  ;;  %v17917_v61 = vrot.slane %v7156_v54, 5  ;;  %v11952_v55 = vcombine.low %v6866_v12, %v6867_v53  ;;  %v6868_v53 = vld [vmem:[#allocation2 + $0xb8] sm:$0xf]  ;;  %v6869_v54 = vld [vmem:[#allocation2 + $0xc0] sm:$0xf] }
 0x408   :  { %20168 = vst [vmem:[#allocation20_spill] sm:$0xff] %v17907_v28  ;;  %20169 = vst [vmem:[#allocation21_spill] sm:$0xff] %v17909_v59  ;;  %v6401_v42 = vsel %vm13991_vm12, %v6396_v36, %v6400_v31  ;;  %v11903_v51 = vcombine.low %v17879_v40, %v17881_v14  ;;  %v6403_v32 = vshrl.u32 %v17903_v47, 16  ;;  %9821 = vmatmul.mubr.bf16.gmra.mrb[188].mxu0 %v11935_v5  ;;  %v6406_v30 = vshll.u32 %v17903_v47, 16 }
 0x409   :  { %20170 = vst [vmem:[#allocation38_spill] sm:$0xff] %v17915_v29  ;;  %20171 = vst [vmem:[#allocation24_spill] sm:$0xff] %v17917_v61  ;;  %v11919_v21 = vcombine.low %v6387_v48, %v6401_v42  ;;  %v6412_v38 = vshll.u32 %v6162_v63, 16  ;;  %v6417_v45 = vshrl.u32 %v17911_v17, 16  ;;  %9828 = vmatprep.mubr.bf16.mxu0 %v11952_v55  ;;  %v6420_v20 = vshll.u32 %v17911_v17, 16 }
 0x40a   :  { %v6405_v6 = vrot.slane %v6403_v32, 4  ;;  %v6426_v31 = vshll.u32 %v6163_v35, 16  ;;  %v11816_v12 = vrot.slane %v6642_v33, 9  ;;  %v6408_v40 = vrot.slane %v6406_v30, 5 }
 0x40b   :  { %9659 = vmatprep.mubr.bf16.mxu1 %v11919_v21  ;;  %v6414_v14 = vrot.slane %v6412_v38, 5  ;;  %v6419_v18 = vrot.slane %v6417_v45, 4  ;;  %v6788_v0 = vrot.slane %v6162_v63, 5  ;;  %v6422_v36 = vrot.slane %v6420_v20, 5  ;;  %v17931_v38 = vld [vmem:[#allocation2 + $0xb0] sm:$0xf] }
 0x40c   :  { %v6428_v15 = vrot.slane %v6426_v31, 5  ;;  %v11817_v48 = vrot.slane %v6643_v26, 9  ;;  %v6792_v5 = vrot.slane %v6163_v35, 5  ;;  %v6409_v42 = vor.u32 %v6408_v40, %v6405_v6  ;;  %v17933_v63 = vld [vmem:[#allocation2 + $0xb8] sm:$0xf] }
 0x40d   :  { %9660 = vmatmul.mubr.bf16.gmra.mrb[156].mxu1 %v11903_v51  ;;  %v6789_v55 = vsel %vm13972_vm11, %v11816_v12, %v6788_v0  ;;  %v7167_v32 = vshrl.u32 %v6868_v53, 16  ;;  %v7170_v61 = vshll.u32 %v6868_v53, 16  ;;  %v6423_v29 = vor.u32 %v6422_v36, %v6419_v18  ;;  %v6164_v6 = vld [vmem:[#allocation2 + $0xb4] sm:$0x1]  ;;  %v6165_v18 = vld [vmem:[#allocation2 + $0xbc] sm:$0x1] }
 0x40e   :  { %v6793_v33 = vsel %vm13972_vm11, %v11817_v48, %v6792_v5  ;;  %v7181_v21 = vshrl.u32 %v6869_v54, 16  ;;  %v7184_v30 = vshll.u32 %v6869_v54, 16  ;;  %v6410_v45 = vrot.slane %v6409_v42, 4  ;;  %v6644_v5 = vld [vmem:[#allocation2 + $0xb0] sm:$0xe] }
 0x40f   :  { %v11936_v26 = vcombine.low %v6789_v55, %v6793_v33  ;;  %v17935_v35 = vrot.slane %v7167_v32, 4  ;;  %v17937_v51 = vrot.slane %v7170_v61, 5  ;;  %v6424_v20 = vrot.slane %v6423_v29, 4  ;;  %v6645_v55 = vld [vmem:[#allocation2 + $0xb8] sm:$0xe] }
 0x410   :  { %v17939_v31 = vrot.slane %v7181_v21, 4  ;;  %v17941_v12 = vrot.slane %v7184_v30, 5  ;;  %v11953_v40 = vcombine.low %v6868_v53, %v6869_v54  ;;  %v6415_v0 = vsel %vm13991_vm12, %v6410_v45, %v6414_v14 }
 0x411   :  { %20172 = vst [vmem:[#allocation40_spill] sm:$0xff] %v17935_v35  ;;  %20173 = vst [vmem:[#allocation39_spill] sm:$0xff] %v17937_v51  ;;  %9829 = vmatmul.mubr.bf16.gmra.mrb[192].mxu0 %v11936_v26  ;;  %v11904_v36 = vcombine.low %v17903_v47, %v17911_v17  ;;  %v6431_v48 = vshrl.u32 %v17931_v38, 16  ;;  %v6434_v61 = vshll.u32 %v17931_v38, 16  ;;  %v6429_v29 = vsel %vm13991_vm12, %v6424_v20, %v6428_v15  ;;  %v6870_v47 = vld [vmem:[#allocation2 + $0xc8] sm:$0xf] }
 0x412   :  { %20174 = vst [vmem:[#allocation41_spill] sm:$0xff] %v17939_v31  ;;  %20175 = vst [vmem:[#allocation42_spill] sm:$0xff] %v17941_v12  ;;  %9836 = vmatprep.mubr.bf16.mxu0 %v11953_v40  ;;  %v6440_v42 = vshll.u32 %v6164_v6, 16  ;;  %v6445_v53 = vshrl.u32 %v17933_v63, 16  ;;  %v6448_v54 = vshll.u32 %v17933_v63, 16  ;;  %v11920_v14 = vcombine.low %v6415_v0, %v6429_v29 }
 0x413   :  { %v6433_v32 = vrot.slane %v6431_v48, 4  ;;  %v6436_v33 = vrot.slane %v6434_v61, 5  ;;  %v6454_v21 = vshll.u32 %v6165_v18, 16  ;;  %v11818_v26 = vrot.slane %v6644_v5, 9  ;;  %v6871_v12 = vld [vmem:[#allocation2 + $0xd0] sm:$0xf] }
 0x414   :  { %v6442_v17 = vrot.slane %v6440_v42, 5  ;;  %v6447_v30 = vrot.slane %v6445_v53, 4  ;;  %v6450_v45 = vrot.slane %v6448_v54, 5  ;;  %9667 = vmatprep.mubr.bf16.mxu1 %v11920_v14  ;;  %v6796_v20 = vrot.slane %v6164_v6, 5  ;;  %v17953_v0 = vld [vmem:[#allocation2 + $0xc0] sm:$0xf] }
 0x415   :  { %v6437_v31 = vor.u32 %v6436_v33, %v6433_v32  ;;  %v6456_v15 = vrot.slane %v6454_v21, 5  ;;  %v11819_v40 = vrot.slane %v6645_v55, 9  ;;  %9668 = vmatmul.mubr.bf16.gmra.mrb[160].mxu1 %v11904_v36  ;;  %v6800_v35 = vrot.slane %v6165_v18, 5  ;;  %v17957_v5 = vld [vmem:[#allocation2 + $0xc8] sm:$0xf] }
 0x416   :  { %v6451_v51 = vor.u32 %v6450_v45, %v6447_v30  ;;  %v7195_v59 = vshrl.u32 %v6870_v47, 16  ;;  %v7198_v28 = vshll.u32 %v6870_v47, 16  ;;  %v6797_v61 = vsel %vm13972_vm11, %v11818_v26, %v6796_v20  ;;  %v6166_v18 = vld [vmem:[#allocation2 + $0xc4] sm:$0x1]  ;;  %v6167_v33 = vld [vmem:[#allocation2 + $0xcc] sm:$0x1] }
 0x417   :  { %v6438_v48 = vrot.slane %v6437_v31, 4  ;;  %v7209_v29 = vshrl.u32 %v6871_v12, 16  ;;  %v7212_v42 = vshll.u32 %v6871_v12, 16  ;;  %v6801_v6 = vsel %vm13972_vm11, %v11819_v40, %v6800_v35  ;;  %v6646_v21 = vld [vmem:[#allocation2 + $0xc0] sm:$0xe] }
 0x418   :  { %v6452_v53 = vrot.slane %v6451_v51, 4  ;;  %v17961_v54 = vrot.slane %v7195_v59, 4  ;;  %v17963_v36 = vrot.slane %v7198_v28, 5  ;;  %v11937_v31 = vcombine.low %v6797_v61, %v6801_v6  ;;  %v6647_v20 = vld [vmem:[#allocation2 + $0xc8] sm:$0xe] }
 0x419   :  { %v6443_v55 = vsel %vm13991_vm12, %v6438_v48, %v6442_v17  ;;  %v17967_v14 = vrot.slane %v7209_v29, 4  ;;  %v17969_v32 = vrot.slane %v7212_v42, 5  ;;  %v11954_v30 = vcombine.low %v6870_v47, %v6871_v12  ;;  %v6872_v12 = vld [vmem:[#allocation2 + $0xd8] sm:$0xf]  ;;  %v6873_v42 = vld [vmem:[#allocation2 + $0xe0] sm:$0xf] }
 0x41a   :  { %20176 = vst [vmem:[#allocation43_spill] sm:$0xff] %v17961_v54  ;;  %20177 = vst [vmem:[#allocation34_spill] sm:$0xff] %v17963_v36  ;;  %v6457_v51 = vsel %vm13991_vm12, %v6452_v53, %v6456_v15  ;;  %v11905_v59 = vcombine.low %v17931_v38, %v17933_v63  ;;  %v6459_v28 = vshrl.u32 %v17953_v0, 16  ;;  %9837 = vmatmul.mubr.bf16.gmra.mrb[196].mxu0 %v11937_v31  ;;  %v6462_v17 = vshll.u32 %v17953_v0, 16 }
 0x41b   :  { %20178 = vst [vmem:[#allocation35_spill] sm:$0xff] %v17967_v14  ;;  %20179 = vst [vmem:[#allocation44_spill] sm:$0xff] %v17969_v32  ;;  %v11921_v35 = vcombine.low %v6443_v55, %v6457_v51  ;;  %v6468_v45 = vshll.u32 %v6166_v18, 16  ;;  %v6473_v26 = vshrl.u32 %v17957_v5, 16  ;;  %9844 = vmatprep.mubr.bf16.mxu0 %v11954_v30  ;;  %v6476_v48 = vshll.u32 %v17957_v5, 16 }
 0x41c   :  { %v6461_v40 = vrot.slane %v6459_v28, 4  ;;  %v6482_v61 = vshll.u32 %v6167_v33, 16  ;;  %v11820_v15 = vrot.slane %v6646_v21, 9  ;;  %v6464_v47 = vrot.slane %v6462_v17, 5 }
 0x41d   :  { %9675 = vmatprep.mubr.bf16.mxu1 %v11921_v35  ;;  %v6470_v38 = vrot.slane %v6468_v45, 5  ;;  %v6475_v63 = vrot.slane %v6473_v26, 4  ;;  %v6804_v29 = vrot.slane %v6166_v18, 5  ;;  %v6478_v53 = vrot.slane %v6476_v48, 5  ;;  %v17983_v45 = vld [vmem:[#allocation2 + $0xd0] sm:$0xf] }
 0x41e   :  { %9676 = vmatmul.mubr.bf16.gmra.mrb[164].mxu1 %v11905_v59  ;;  %v6484_v6 = vrot.slane %v6482_v61, 5  ;;  %v11821_v55 = vrot.slane %v6647_v20, 9  ;;  %v6808_v31 = vrot.slane %v6167_v33, 5  ;;  %v6465_v51 = vor.u32 %v6464_v47, %v6461_v40  ;;  %v17985_v18 = vld [vmem:[#allocation2 + $0xd8] sm:$0xf] }
 0x41f   :  { %v6805_v30 = vsel %vm13972_vm11, %v11820_v15, %v6804_v29  ;;  %v7223_v28 = vshrl.u32 %v6872_v12, 16  ;;  %v7226_v32 = vshll.u32 %v6872_v12, 16  ;;  %v6479_v14 = vor.u32 %v6478_v53, %v6475_v63  ;;  %v6168_v40 = vld [vmem:[#allocation2 + $0xd4] sm:$0x1]  ;;  %v6169_v63 = vld [vmem:[#allocation2 + $0xdc] sm:$0x1] }
 0x420   :  { %v6809_v21 = vsel %vm13972_vm11, %v11821_v55, %v6808_v31  ;;  %v7237_v35 = vshrl.u32 %v6873_v42, 16  ;;  %v7240_v17 = vshll.u32 %v6873_v42, 16  ;;  %v6466_v59 = vrot.slane %v6465_v51, 4  ;;  %v6648_v31 = vld [vmem:[#allocation2 + $0xd0] sm:$0xe] }
 0x421   :  { %v11938_v26 = vcombine.low %v6805_v30, %v6809_v21  ;;  %v17987_v20 = vrot.slane %v7223_v28, 4  ;;  %v17989_v33 = vrot.slane %v7226_v32, 5  ;;  %v6480_v48 = vrot.slane %v6479_v14, 4  ;;  %v6649_v30 = vld [vmem:[#allocation2 + $0xd8] sm:$0xe] }
 0x422   :  { %v17991_v61 = vrot.slane %v7237_v35, 4  ;;  %v17993_v15 = vrot.slane %v7240_v17, 5  ;;  %v11955_v47 = vcombine.low %v6872_v12, %v6873_v42  ;;  %v6471_v29 = vsel %vm13991_vm12, %v6466_v59, %v6470_v38 }
 0x423   :  { %20180 = vst [vmem:[#allocation22_spill] sm:$0xff] %v17987_v20  ;;  %20181 = vst [vmem:[#allocation12_spill] sm:$0xff] %v17989_v33  ;;  %9845 = vmatmul.mubr.bf16.gmra.mrb[200].mxu0 %v11938_v26  ;;  %v11906_v53 = vcombine.low %v17953_v0, %v17957_v5  ;;  %v6487_v55 = vshrl.u32 %v17983_v45, 16  ;;  %v6490_v32 = vshll.u32 %v17983_v45, 16  ;;  %v6485_v14 = vsel %vm13991_vm12, %v6480_v48, %v6484_v6  ;;  %v6874_v0 = vld [vmem:[#allocation2 + $0xf8] sm:$0xf] }
 0x424   :  { %20182 = vst [vmem:[#allocation11_spill] sm:$0xff] %v17991_v61  ;;  %20183 = vst [vmem:[#allocation8_spill] sm:$0xff] %v17993_v15  ;;  %9852 = vmatprep.mubr.bf16.mxu0 %v11955_v47  ;;  %v6496_v51 = vshll.u32 %v6168_v40, 16  ;;  %v6501_v12 = vshrl.u32 %v17985_v18, 16  ;;  %v6504_v42 = vshll.u32 %v17985_v18, 16  ;;  %v11922_v38 = vcombine.low %v6471_v29, %v6485_v14 }
 0x425   :  { %v6489_v28 = vrot.slane %v6487_v55, 4  ;;  %v6492_v21 = vrot.slane %v6490_v32, 5  ;;  %v6510_v35 = vshll.u32 %v6169_v63, 16  ;;  %v11822_v26 = vrot.slane %v6648_v31, 9  ;;  %v6875_v15 = vld [vmem:[#allocation2 + $0x100] sm:$0xf] }
 0x426   :  { %v6498_v5 = vrot.slane %v6496_v51, 5  ;;  %v6503_v17 = vrot.slane %v6501_v12, 4  ;;  %v6506_v59 = vrot.slane %v6504_v42, 5  ;;  %9683 = vmatprep.mubr.bf16.mxu1 %v11922_v38  ;;  %v6812_v48 = vrot.slane %v6168_v40, 5  ;;  %v18007_v51 = vld [vmem:[#allocation2 + $0xf0] sm:$0xf] }
 0x427   :  { %v6493_v61 = vor.u32 %v6492_v21, %v6489_v28  ;;  %v6512_v6 = vrot.slane %v6510_v35, 5  ;;  %v11823_v47 = vrot.slane %v6649_v30, 9  ;;  %9684 = vmatmul.mubr.bf16.gmra.mrb[168].mxu1 %v11906_v53  ;;  %v6816_v20 = vrot.slane %v6169_v63, 5  ;;  %v18015_v53 = vld [vmem:[#allocation2 + $0xf8] sm:$0xf] }
 0x428   :  { %v6507_v33 = vor.u32 %v6506_v59, %v6503_v17  ;;  %v7251_v36 = vshrl.u32 %v6874_v0, 16  ;;  %v7254_v54 = vshll.u32 %v6874_v0, 16  ;;  %v6813_v55 = vsel %vm13972_vm11, %v11822_v26, %v6812_v48  ;;  %v6171_v28 = vld [vmem:[#allocation2 + $0xfc] sm:$0x1]  ;;  %v6650_v21 = vld [vmem:[#allocation2 + $0xf0] sm:$0xe] }
 0x429   :  { %v6494_v29 = vrot.slane %v6493_v61, 4  ;;  %v7265_v32 = vshrl.u32 %v6875_v15, 16  ;;  %v7268_v14 = vshll.u32 %v6875_v15, 16  ;;  %v6817_v12 = vsel %vm13972_vm11, %v11823_v47, %v6816_v20  ;;  %v6651_v48 = vld [vmem:[#allocation2 + $0xf8] sm:$0xe] }
 0x42a   :  { %v6508_v31 = vrot.slane %v6507_v33, 4  ;;  %v18011_v42 = vrot.slane %v7251_v36, 4  ;;  %v18013_v40 = vrot.slane %v7254_v54, 5  ;;  %v11939_v63 = vcombine.low %v6813_v55, %v6817_v12  ;;  %v6170_v36 = vld [vmem:[#allocation2 + $0xf4] sm:$0x1] }
 0x42b   :  { %v6499_v61 = vsel %vm13991_vm12, %v6494_v29, %v6498_v5  ;;  %v18019_v30 = vrot.slane %v7265_v32, 4  ;;  %v18021_v38 = vrot.slane %v7268_v14, 5  ;;  %v11956_v20 = vcombine.low %v6874_v0, %v6875_v15  ;;  %v6876_v0 = vld [vmem:[#allocation2 + $0x108] sm:$0xf]  ;;  %v6877_v14 = vld [vmem:[#allocation2 + $0x110] sm:$0xf] }
 0x42c   :  { %20184 = vst [vmem:[#allocation7_spill] sm:$0xff] %v18011_v42  ;;  %20185 = vst [vmem:[#allocation56_spill] sm:$0xff] %v18013_v40  ;;  %v6513_v33 = vsel %vm13991_vm12, %v6508_v31, %v6512_v6  ;;  %v11907_v54 = vcombine.low %v17983_v45, %v17985_v18  ;;  %v6515_v35 = vshrl.u32 %v18007_v51, 16  ;;  %9853 = vmatmul.mubr.bf16.gmra.mrb[204].mxu0 %v11939_v63  ;;  %v6518_v5 = vshll.u32 %v18007_v51, 16 }
 0x42d   :  { %20186 = vst [vmem:[#allocation28_spill] sm:$0xff] %v18019_v30  ;;  %20187 = vst [vmem:[#allocation16_spill] sm:$0xff] %v18021_v38  ;;  %v11923_v17 = vcombine.low %v6499_v61, %v6513_v33  ;;  %v6524_v59 = vshll.u32 %v6170_v36, 16  ;;  %v6529_v26 = vshrl.u32 %v18015_v53, 16  ;;  %9860 = vmatprep.mubr.bf16.mxu0 %v11956_v20  ;;  %v6532_v29 = vshll.u32 %v18015_v53, 16 }
 0x42e   :  { %v6517_v47 = vrot.slane %v6515_v35, 4  ;;  %v6538_v6 = vshll.u32 %v6171_v28, 16  ;;  %v11824_v15 = vrot.slane %v6650_v21, 9  ;;  %v6520_v45 = vrot.slane %v6518_v5, 5 }
 0x42f   :  { %9691 = vmatprep.mubr.bf16.mxu1 %v11923_v17  ;;  %v6526_v18 = vrot.slane %v6524_v59, 5  ;;  %v6531_v55 = vrot.slane %v6529_v26, 4  ;;  %v6820_v32 = vrot.slane %v6170_v36, 5  ;;  %v6534_v31 = vrot.slane %v6532_v29, 5  ;;  %v18035_v59 = vld [vmem:[#allocation2 + $0x100] sm:$0xf] }
 0x430   :  { %9692 = vmatmul.mubr.bf16.gmra.mrb[172].mxu1 %v11907_v54  ;;  %v6540_v12 = vrot.slane %v6538_v6, 5  ;;  %v11825_v61 = vrot.slane %v6651_v48, 9  ;;  %v6824_v63 = vrot.slane %v6171_v28, 5  ;;  %v6521_v33 = vor.u32 %v6520_v45, %v6517_v47  ;;  %v18037_v36 = vld [vmem:[#allocation2 + $0x108] sm:$0xf] }
 0x431   :  { %v6821_v20 = vsel %vm13972_vm11, %v11824_v15, %v6820_v32  ;;  %v7279_v35 = vshrl.u32 %v6876_v0, 16  ;;  %v7282_v38 = vshll.u32 %v6876_v0, 16  ;;  %v6535_v30 = vor.u32 %v6534_v31, %v6531_v55  ;;  %v6172_v47 = vld [vmem:[#allocation2 + $0x104] sm:$0x1]  ;;  %v6173_v55 = vld [vmem:[#allocation2 + $0x10c] sm:$0x1] }
 0x432   :  { %v6825_v21 = vsel %vm13972_vm11, %v11825_v61, %v6824_v63  ;;  %v7293_v17 = vshrl.u32 %v6877_v14, 16  ;;  %v7296_v5 = vshll.u32 %v6877_v14, 16  ;;  %v6522_v54 = vrot.slane %v6521_v33, 4  ;;  %v6652_v63 = vld [vmem:[#allocation2 + $0x100] sm:$0xe] }
 0x433   :  { %v11940_v26 = vcombine.low %v6821_v20, %v6825_v21  ;;  %v18039_v48 = vrot.slane %v7279_v35, 4  ;;  %v18041_v28 = vrot.slane %v7282_v38, 5  ;;  %v6536_v29 = vrot.slane %v6535_v30, 4  ;;  %v6653_v20 = vld [vmem:[#allocation2 + $0x108] sm:$0xe] }
 0x434   :  { %v18043_v6 = vrot.slane %v7293_v17, 4  ;;  %v18045_v15 = vrot.slane %v7296_v5, 5  ;;  %v11957_v45 = vcombine.low %v6876_v0, %v6877_v14  ;;  %v6527_v32 = vsel %vm13991_vm12, %v6522_v54, %v6526_v18 }
 0x435   :  { %20188 = vst [vmem:[#allocation53_spill] sm:$0xff] %v18039_v48  ;;  %20189 = vst [vmem:[#allocation17_spill] sm:$0xff] %v18041_v28  ;;  %9861 = vmatmul.mubr.bf16.gmra.mrb[208].mxu0 %v11940_v26  ;;  %v11908_v31 = vcombine.low %v18007_v51, %v18015_v53  ;;  %v6543_v61 = vshrl.u32 %v18035_v59, 16  ;;  %v6546_v38 = vshll.u32 %v18035_v59, 16  ;;  %v6541_v30 = vsel %vm13991_vm12, %v6536_v29, %v6540_v12  ;;  %v6878_v51 = vld [vmem:[#allocation2 + $0x118] sm:$0xf] }
 0x436   :  { %20190 = vst [vmem:[#allocation55_spill] sm:$0xff] %v18043_v6  ;;  %20191 = vst [vmem:[#allocation33_spill] sm:$0xff] %v18045_v15  ;;  %9868 = vmatprep.mubr.bf16.mxu0 %v11957_v45  ;;  %v6552_v33 = vshll.u32 %v6172_v47, 16  ;;  %v6557_v0 = vshrl.u32 %v18037_v36, 16  ;;  %v6560_v14 = vshll.u32 %v18037_v36, 16  ;;  %v11924_v18 = vcombine.low %v6527_v32, %v6541_v30 }
 0x437   :  { %v6545_v35 = vrot.slane %v6543_v61, 4  ;;  %v6548_v21 = vrot.slane %v6546_v38, 5  ;;  %v6566_v17 = vshll.u32 %v6173_v55, 16  ;;  %v11826_v26 = vrot.slane %v6652_v63, 9  ;;  %v6879_v15 = vld [vmem:[#allocation2 + $0x120] sm:$0xf] }
 0x438   :  { %v6554_v53 = vrot.slane %v6552_v33, 5  ;;  %v6559_v5 = vrot.slane %v6557_v0, 4  ;;  %v6562_v54 = vrot.slane %v6560_v14, 5  ;;  %9699 = vmatprep.mubr.bf16.mxu1 %v11924_v18  ;;  %v6828_v29 = vrot.slane %v6172_v47, 5  ;;  %v18057_v32 = vld [vmem:[#allocation2 + $0x110] sm:$0xf] }
 0x439   :  { %v6549_v6 = vor.u32 %v6548_v21, %v6545_v35  ;;  %v6568_v12 = vrot.slane %v6566_v17, 5  ;;  %v11827_v45 = vrot.slane %v6653_v20, 9  ;;  %9700 = vmatmul.mubr.bf16.gmra.mrb[176].mxu1 %v11908_v31  ;;  %v6832_v48 = vrot.slane %v6173_v55, 5  ;;  %v18061_v63 = vld [vmem:[#allocation2 + $0x118] sm:$0xf] }
 0x43a   :  { %v6563_v28 = vor.u32 %v6562_v54, %v6559_v5  ;;  %v7307_v40 = vshrl.u32 %v6878_v51, 16  ;;  %v7310_v42 = vshll.u32 %v6878_v51, 16  ;;  %v6829_v38 = vsel %vm13972_vm11, %v11826_v26, %v6828_v29  ;;  %v6174_v55 = vld [vmem:[#allocation2 + $0x114] sm:$0x1]  ;;  %v6175_v21 = vld [vmem:[#allocation2 + $0x11c] sm:$0x1] }
 0x43b   :  { %v6550_v61 = vrot.slane %v6549_v6, 4  ;;  %v7321_v30 = vshrl.u32 %v6879_v15, 16  ;;  %v7324_v33 = vshll.u32 %v6879_v15, 16  ;;  %v6833_v47 = vsel %vm13972_vm11, %v11827_v45, %v6832_v48  ;;  %v6654_v17 = vld [vmem:[#allocation2 + $0x110] sm:$0xe] }
 0x43c   :  { %v6564_v0 = vrot.slane %v6563_v28, 4  ;;  %v18065_v14 = vrot.slane %v7307_v40, 4  ;;  %v18067_v31 = vrot.slane %v7310_v42, 5  ;;  %v11941_v6 = vcombine.low %v6829_v38, %v6833_v47  ;;  %v6655_v29 = vld [vmem:[#allocation2 + $0x118] sm:$0xe] }
 0x43d   :  { %v6555_v20 = vsel %vm13991_vm12, %v6550_v61, %v6554_v53  ;;  %v18071_v18 = vrot.slane %v7321_v30, 4  ;;  %v18073_v35 = vrot.slane %v7324_v33, 5  ;;  %v11958_v5 = vcombine.low %v6878_v51, %v6879_v15  ;;  %v6880_v15 = vld [vmem:[#allocation2 + $0x128] sm:$0xf]  ;;  %v6881_v33 = vld [vmem:[#allocation2 + $0x130] sm:$0xf] }
 0x43e   :  { %20192 = vst [vmem:[#allocation31_spill] sm:$0xff] %v18065_v14  ;;  %20193 = vst [vmem:[#allocation48_spill] sm:$0xff] %v18067_v31  ;;  %v6569_v28 = vsel %vm13991_vm12, %v6564_v0, %v6568_v12  ;;  %v11909_v40 = vcombine.low %v18035_v59, %v18037_v36  ;;  %v6571_v42 = vshrl.u32 %v18057_v32, 16  ;;  %9869 = vmatmul.mubr.bf16.gmra.mrb[212].mxu0 %v11941_v6  ;;  %v6574_v53 = vshll.u32 %v18057_v32, 16  ;;  %v7619_v14 = vld [vmem:[#allocation2 + $0x1c] sm:$0x1] }
 0x43f   :  { %20194 = vst [vmem:[#allocation36_spill] sm:$0xff] %v18071_v18  ;;  %20195 = vst [vmem:[#allocation49_spill] sm:$0xff] %v18073_v35  ;;  %v11925_v48 = vcombine.low %v6555_v20, %v6569_v28  ;;  %v6580_v54 = vshll.u32 %v6174_v55, 16  ;;  %v6585_v26 = vshrl.u32 %v18061_v63, 16  ;;  %9876 = vmatprep.mubr.bf16.mxu0 %v11958_v5  ;;  %v6588_v61 = vshll.u32 %v18061_v63, 16 }
 0x440   :  { %v6573_v45 = vrot.slane %v6571_v42, 4  ;;  %v6594_v38 = vshll.u32 %v6175_v21, 16  ;;  %v11828_v12 = vrot.slane %v6654_v17, 9  ;;  %v6576_v51 = vrot.slane %v6574_v53, 5 }
 0x441   :  { %9707 = vmatprep.mubr.bf16.mxu1 %v11925_v48  ;;  %v6582_v59 = vrot.slane %v6580_v54, 5  ;;  %v6587_v36 = vrot.slane %v6585_v26, 4  ;;  %v6836_v30 = vrot.slane %v6174_v55, 5  ;;  %v6590_v0 = vrot.slane %v6588_v61, 5  ;;  %v18087_v54 = vld [vmem:[#allocation2 + $0x120] sm:$0xf] }
 0x442   :  { %9708 = vmatmul.mubr.bf16.gmra.mrb[180].mxu1 %v11909_v40  ;;  %v6596_v47 = vrot.slane %v6594_v38, 5  ;;  %v11829_v20 = vrot.slane %v6655_v29, 9  ;;  %v6840_v6 = vrot.slane %v6175_v21, 5  ;;  %v6577_v28 = vor.u32 %v6576_v51, %v6573_v45  ;;  %v18089_v55 = vld [vmem:[#allocation2 + $0x128] sm:$0xf] }
 0x443   :  { %v6837_v5 = vsel %vm13972_vm11, %v11828_v12, %v6836_v30  ;;  %v7335_v42 = vshrl.u32 %v6880_v15, 16  ;;  %v7338_v35 = vshll.u32 %v6880_v15, 16  ;;  %v6591_v18 = vor.u32 %v6590_v0, %v6587_v36  ;;  %v6176_v45 = vld [vmem:[#allocation2 + $0x124] sm:$0x1]  ;;  %v6177_v36 = vld [vmem:[#allocation2 + $0x12c] sm:$0x1] }
 0x444   :  { %v6841_v17 = vsel %vm13972_vm11, %v11829_v20, %v6840_v6  ;;  %v7349_v48 = vshrl.u32 %v6881_v33, 16  ;;  %v7352_v53 = vshll.u32 %v6881_v33, 16  ;;  %v6578_v40 = vrot.slane %v6577_v28, 4  ;;  %v6656_v6 = vld [vmem:[#allocation2 + $0x120] sm:$0xe] }
 0x445   :  { %v11942_v26 = vcombine.low %v6837_v5, %v6841_v17  ;;  %v18091_v29 = vrot.slane %v7335_v42, 4  ;;  %v18093_v21 = vrot.slane %v7338_v35, 5  ;;  %v6592_v61 = vrot.slane %v6591_v18, 4  ;;  %v6657_v28 = vld [vmem:[#allocation2 + $0x128] sm:$0xe] }
 0x446   :  { %v18095_v38 = vrot.slane %v7349_v48, 4  ;;  %v18097_v12 = vrot.slane %v7352_v53, 5  ;;  %v11959_v51 = vcombine.low %v6880_v15, %v6881_v33  ;;  %v6583_v30 = vsel %vm13991_vm12, %v6578_v40, %v6582_v59  ;;  %v18109_v59 = vld [vmem:[#allocation2 + $0x10] sm:$0xf]  ;;  %v18111_v48 = vld [vmem:[#allocation2 + $0x18] sm:$0xf] }
 0x447   :  { %20196 = vst [vmem:[#allocation23_spill] sm:$0xff] %v18091_v29  ;;  %20197 = vst [vmem:[#allocation50_spill] sm:$0xff] %v18093_v21  ;;  %9877 = vmatmul.mubr.bf16.gmra.mrb[216].mxu0 %v11942_v26  ;;  %v11910_v0 = vcombine.low %v18057_v32, %v18061_v63  ;;  %v6599_v20 = vshrl.u32 %v18087_v54, 16  ;;  %v6602_v35 = vshll.u32 %v18087_v54, 16  ;;  %v6597_v18 = vsel %vm13991_vm12, %v6592_v61, %v6596_v47 }
 0x448   :  { %20198 = vst [vmem:[#allocation57_spill] sm:$0xff] %v18095_v38  ;;  %20199 = vst [vmem:[#allocation25_spill] sm:$0xff] %v18097_v12  ;;  %9884 = vmatprep.mubr.bf16.mxu0 %v11959_v51  ;;  %v6608_v5 = vshll.u32 %v6176_v45, 16  ;;  %v6613_v15 = vshrl.u32 %v18089_v55, 16  ;;  %v6616_v33 = vshll.u32 %v18089_v55, 16  ;;  %v11926_v42 = vcombine.low %v6583_v30, %v6597_v18 }
 0x449   :  { %v6601_v17 = vrot.slane %v6599_v20, 4  ;;  %v6604_v32 = vrot.slane %v6602_v35, 5  ;;  %v6622_v63 = vshll.u32 %v6177_v36, 16  ;;  %v11830_v12 = vrot.slane %v6656_v6, 9  ;;  %v7618_v38 = vld [vmem:[#allocation2 + $0x14] sm:$0x1] }
 0x44a   :  { %v6610_v53 = vrot.slane %v6608_v5, 5  ;;  %v6615_v40 = vrot.slane %v6613_v15, 4  ;;  %v6618_v26 = vrot.slane %v6616_v33, 5  ;;  %9715 = vmatprep.mubr.bf16.mxu1 %v11926_v42  ;;  %v6844_v51 = vrot.slane %v6176_v45, 5  ;;  %v6882_v15 = vld [vmem:[#allocation2 + $0xc] sm:$0x1] }
 0x44b   :  { %v6605_v47 = vor.u32 %v6604_v32, %v6601_v17  ;;  %v6624_v61 = vrot.slane %v6622_v63, 5  ;;  %v11831_v21 = vrot.slane %v6657_v28, 9  ;;  %9716 = vmatmul.mubr.bf16.gmra.mrb[184].mxu1 %v11910_v0  ;;  %v6848_v31 = vrot.slane %v6177_v36, 5  ;;  %v6883_v36 = vld [vmem:[#allocation2 + $0x14] sm:$0x1] }
 0x44c   :  { %v6619_v29 = vor.u32 %v6618_v26, %v6615_v40  ;;  %v7651_v30 = vshrl.u32 %v18109_v59, 16  ;;  %v7654_v20 = vshll.u32 %v18109_v59, 16  ;;  %v6845_v18 = vsel %vm13972_vm11, %v11830_v12, %v6844_v51  ;;  %v7362_v40 = vld [vmem:[#allocation2 + $0x8] sm:$0xe] }
 0x44d   :  { %v6606_v35 = vrot.slane %v6605_v47, 4  ;;  %v7660_v5 = vshll.u32 %v7618_v38, 16  ;;  %v7665_v6 = vshrl.u32 %v18111_v48, 16  ;;  %v6849_v45 = vsel %vm13972_vm11, %v11831_v21, %v6848_v31  ;;  %v7363_v47 = vld [vmem:[#allocation2 + $0x10] sm:$0xe] }
 0x44e   :  { %v6620_v33 = vrot.slane %v6619_v29, 4  ;;  %v7653_v0 = vrot.slane %v7651_v30, 4  ;;  %v7656_v28 = vrot.slane %v7654_v20, 5  ;;  %v11943_v17 = vcombine.low %v6845_v18, %v6849_v45 }
 0x44f   :  { %v6611_v42 = vsel %vm13991_vm12, %v6606_v35, %v6610_v53  ;;  %v7662_v32 = vrot.slane %v7660_v5, 5  ;;  %v7667_v63 = vrot.slane %v7665_v6, 4  ;;  %v7668_v26 = vshll.u32 %v18111_v48, 16  ;;  %v18127_v53 = vld [vmem:[#allocation2 + $0x20] sm:$0xf] }
 0x450   :  { %v6625_v38 = vsel %vm13991_vm12, %v6620_v33, %v6624_v61  ;;  %v7657_v12 = vor.u32 %v7656_v28, %v7653_v0  ;;  %v7674_v29 = vshll.u32 %v7619_v14, 16  ;;  %9885 = vmatmul.mubr.bf16.gmra.mrb[220].mxu0 %v11943_v17  ;;  %v11911_v31 = vcombine.low %v18087_v54, %v18089_v55  ;;  %v7620_v6 = vld [vmem:[#allocation2 + $0x24] sm:$0x1]  ;;  %v18129_v0 = vld [vmem:[#allocation2 + $0x28] sm:$0xf] }
 0x451   :  { %v11927_v51 = vcombine.low %v6611_v42, %v6625_v38  ;;  %v6924_v21 = vshll.u32 %v6882_v15, 16  ;;  %v6938_v30 = vshll.u32 %v6883_v36, 16  ;;  %v7670_v35 = vrot.slane %v7668_v26, 5 }
 0x452   :  { %v7658_v20 = vrot.slane %v7657_v12, 4  ;;  %v7676_v18 = vrot.slane %v7674_v29, 5  ;;  %v11832_v5 = vrot.slane %v7362_v40, 9  ;;  %v7460_v45 = vrot.slane %v6882_v15, 5  ;;  %v7621_v40 = vld [vmem:[#allocation2 + $0x2c] sm:$0x1] }
 0x453   :  { %9723 = vmatprep.mubr.bf16.mxu1 %v11927_v51  ;;  %v6926_v61 = vrot.slane %v6924_v21, 5  ;;  %v6940_v33 = vrot.slane %v6938_v30, 5  ;;  %v11833_v14 = vrot.slane %v7363_v47, 9  ;;  %v7671_v54 = vor.u32 %v7670_v35, %v7667_v63  ;;  %v8100_v63 = vld [vmem:[#allocation2 + $0x20] sm:$0xe] }
 0x454   :  { %v7663_v28 = vsel %vm13991_vm12, %v7658_v20, %v7662_v32  ;;  %9724 = vmatmul.mubr.bf16.gmra.mrb[188].mxu1 %v11911_v31  ;;  %v7464_v55 = vrot.slane %v6883_v36, 5  ;;  %v11992_v42 = vcombine.low %v18109_v59, %v18111_v48  ;;  %v7461_v17 = vsel %vm13972_vm11, %v11832_v5, %v7460_v45  ;;  %v8101_v31 = vld [vmem:[#allocation2 + $0x28] sm:$0xe] }
 0x455   :  { %v7679_v38 = vshrl.u32 %v18127_v53, 16  ;;  %v7682_v15 = vshll.u32 %v18127_v53, 16  ;;  %v7688_v12 = vshll.u32 %v7620_v6, 16  ;;  %v7672_v26 = vrot.slane %v7671_v54, 4 }
 0x456   :  { %v7465_v29 = vsel %vm13972_vm11, %v11833_v14, %v7464_v55  ;;  %v7693_v32 = vshrl.u32 %v18129_v0, 16  ;;  %v7696_v36 = vshll.u32 %v18129_v0, 16  ;;  %v7702_v35 = vshll.u32 %v7621_v40, 16  ;;  %v18145_v55 = vld [vmem:[#allocation2 + $0x1c] sm:$0x1] }
 0x457   :  { %v11976_v47 = vcombine.low %v7461_v17, %v7465_v29  ;;  %v7681_v59 = vrot.slane %v7679_v38, 4  ;;  %v7684_v48 = vrot.slane %v7682_v15, 5  ;;  %v7690_v51 = vrot.slane %v7688_v12, 5  ;;  %v7365_v12 = vld [vmem:[#allocation2 + $0x20] sm:$0xe] }
 0x458   :  { %v7677_v21 = vsel %vm13991_vm12, %v7672_v26, %v7676_v18  ;;  %v7695_v30 = vrot.slane %v7693_v32, 4  ;;  %v7698_v20 = vrot.slane %v7696_v36, 5  ;;  %v11866_v14 = vrot.slane %v8100_v63, 9  ;;  %v6885_v26 = vld [vmem:[#allocation2 + $0x24] sm:$0x1] }
 0x459   :  { %v12008_v5 = vcombine.low %v7663_v28, %v7677_v21  ;;  %9925 = vmatprep.mubr.bf16.mxu1 %v11976_v47  ;;  %v7685_v45 = vor.u32 %v7684_v48, %v7681_v59  ;;  %v8204_v54 = vrot.slane %v7620_v6, 5  ;;  %v7704_v17 = vrot.slane %v7702_v35, 5  ;;  %v18157_v32 = vld [vmem:[#allocation2 + $0x30] sm:$0xf]  ;;  %v7622_v59 = vld [vmem:[#allocation2 + $0x34] sm:$0x1] }
 0x45a   :  { %v7699_v3 = vor.u32 %v7698_v20, %v7695_v30  ;;  %v11867_v38 = vrot.slane %v8101_v31, 9  ;;  %v8208_v15 = vrot.slane %v7621_v40, 5  ;;  %v6927_v28 = vsel %vm13991_vm12, %v17634_v11, %v6926_v61  ;;  %v13650_v11 = vld [vmem:[%s19709_s1 + $0x448] sm:$0xff]   ;;  %v7623_v21 = vld [vmem:[#allocation2 + $0x3c] sm:$0x1]  ;;  %v13706_v35 = vld [vmem:[%s19709_s1 + $0x440] sm:$0xff]  }
 0x45b   :  { %10086 = vmatprep.mubr.bf16.mxu0 %v12008_v5  ;;  %v7686_v29 = vrot.slane %v7685_v45, 4  ;;  %v18149_v18 = vsel %vm13972_vm11, %v11866_v14, %v8204_v54  ;;  %v6941_v6 = vsel %vm13991_vm12, %v17644_v19, %v6940_v33  ;;  %v11834_v47 = vrot.slane %v7364_v10, 9 }
 0x45c   :  { %20200 = vst [vmem:[#allocation51_spill] sm:$0xff] %v18149_v18  ;;  %10087 = vmatmul.mubr.bf16.vlgmr.msra.gmra.mrb[224].mxu0 %v11992_v42  ;;  %v7700_v40 = vrot.slane %v7699_v3, 4  ;;  %v18161_v36 = vsel %vm13972_vm11, %v11867_v38, %v8208_v15  ;;  %v11960_v63 = vcombine.low %v6927_v28, %v6941_v6  ;;  %v7468_v33 = vrot.slane %v18145_v55, 5  ;;  %v18171_v42 = vld [vmem:[#allocation2 + $0x38] sm:$0xf] }
 0x45d   :  { %20201 = vst [vmem:[#allocation26_spill] sm:$0xff] %v18161_v36  ;;  %v7691_v61 = vsel %vm13991_vm12, %v7686_v29, %v7690_v51  ;;  %v11835_v3 = vrot.slane %v7365_v12, 9  ;;  %v7472_v10 = vrot.slane %v6885_v26, 5  ;;  %v11993_v31 = vcombine.low %v18127_v53, %v18129_v0  ;;  %v7366_v28 = vld [vmem:[#allocation2 + $0x28] sm:$0xe] }
 0x45e   :  { %v7705_v48 = vsel %vm13991_vm12, %v7700_v40, %v7704_v17  ;;  %9926 = vmatmul.mubr.bf16.vlgmr.msra.gmra.mrb[192].mxu1 %v11960_v63  ;;  %v7707_v30 = vshrl.u32 %v18157_v32, 16  ;;  %v7469_v20 = vsel %vm13972_vm11, %v11834_v47, %v7468_v33  ;;  %v7710_v5 = vshll.u32 %v18157_v32, 16  ;;  %v13653_v17 = vld [vmem:[%s19709_s1 + $0x450] sm:$0xff]  }
 0x45f   :  { %v12009_v51 = vcombine.low %v7691_v61, %v7705_v48  ;;  %13379 = vmatpush3.bf16.msra.mxu1 %v13706_v35  ;;  %v7716_v45 = vshll.u32 %v7622_v59, 16  ;;  %v7473_v14 = vsel %vm13972_vm11, %v11835_v3, %v7472_v10  ;;  %v7721_v53 = vshrl.u32 %v18171_v42, 16  ;;  %v18194_v59 = vld [vmem:[#allocation2 + $0x2c] sm:$0x1]  ;;  %v18198_v10 = vld [vmem:[#allocation2 + $0x34] sm:$0x1] }
 0x460   :  { %v7709_v54 = vrot.slane %v7707_v30, 4  ;;  %v7724_v0 = vshll.u32 %v18171_v42, 16  ;;  %13380 = vmatprep.subr.bf16.mxu1 %v13650_v11  ;;  %v11977_v38 = vcombine.low %v7469_v20, %v7473_v14  ;;  %v7712_v15 = vrot.slane %v7710_v5, 5  ;;  %v7624_v14 = vld [vmem:[#allocation2 + $0x44] sm:$0x1] }
 0x461   :  { %10094 = vmatprep.mubr.bf16.mxu0 %v12009_v51  ;;  %v7718_v12 = vrot.slane %v7716_v45, 5  ;;  %v7730_v29 = vshll.u32 %v7623_v21, 16  ;;  %v7723_v6 = vrot.slane %v7721_v53, 4  ;;  %v6949_v63 = vor.u32 %v17628_v2, %v17619_v1  ;;  %v7367_v21 = vld [vmem:[#allocation2 + $0x30] sm:$0xe]  ;;  %v13656_v2 = vld [vmem:[%s19709_s1 + $0x458] sm:$0xff]  }
 0x462   :  { %v7726_v40 = vrot.slane %v7724_v0, 5  ;;  %v6952_v47 = vshll.u32 %v18145_v55, 16  ;;  %9933 = vmatprep.mubr.bf16.mxu1 %v11977_v38  ;;  %v7713_v61 = vor.u32 %v7712_v15, %v7709_v54  ;;  %v6963_v3 = vor.u32 %v17636_v49, %v17630_v46  ;;  %v18204_v49 = vld [vmem:[#allocation2 + $0x40] sm:$0xf]  ;;  %v18217_v15 = vld [vmem:[#allocation2 + $0x48] sm:$0xf] }
 0x463   :  { %v7732_v33 = vrot.slane %v7730_v29, 5  ;;  %v6966_v48 = vshll.u32 %v6885_v26, 16  ;;  %13381 = vmatpush3.bf16.msra.mxu1 %v13650_v11  ;;  %v6950_v51 = vrot.slane %v6949_v63, 4  ;;  %v11836_v1 = vrot.slane %v7366_v28, 9  ;;  %v8104_v63 = vld [vmem:[#allocation2 + $0x40] sm:$0xe] }
 0x464   :  { %10095 = vmatmul.mubr.bf16.gmra.mrb[228].mxu0 %v11993_v31  ;;  %v7727_v30 = vor.u32 %v7726_v40, %v7723_v6  ;;  %v6954_v20 = vrot.slane %v6952_v47, 5  ;;  %13382 = vmatprep.subr.bf16.mxu1 %v13653_v17  ;;  %v7714_v55 = vrot.slane %v7713_v61, 4  ;;  %v6964_v35 = vrot.slane %v6963_v3, 4 }
 0x465   :  { %v6968_v5 = vrot.slane %v6966_v48, 5  ;;  %v7476_v46 = vrot.slane %v18194_v59, 5  ;;  %v11837_v31 = vrot.slane %v7367_v21, 9  ;;  %v7480_v45 = vrot.slane %v18198_v10, 5 }
 0x466   :  { %v7728_v26 = vrot.slane %v7727_v30, 4  ;;  %v6955_v11 = vsel %vm13991_vm12, %v6950_v51, %v6954_v20  ;;  %v7719_v54 = vsel %vm13991_vm12, %v7714_v55, %v7718_v12  ;;  %v11994_v38 = vcombine.low %v18157_v32, %v18171_v42  ;;  %v7625_v12 = vld [vmem:[#allocation2 + $0x4c] sm:$0x1]  ;;  %v8105_v42 = vld [vmem:[#allocation2 + $0x48] sm:$0xe] }
 0x467   :  { %v6969_v53 = vsel %vm13991_vm12, %v6964_v35, %v6968_v5  ;;  %v7477_v0 = vsel %vm13972_vm11, %v11836_v1, %v7476_v46  ;;  %13383 = vmatpush3.bf16.msra.mxu1 %v13653_v17  ;;  %v7481_v6 = vsel %vm13972_vm11, %v11837_v31, %v7480_v45  ;;  %v7735_v40 = vshrl.u32 %v18204_v49, 16  ;;  %v13660_v17 = vld [vmem:[%s19709_s1 + $0x460] sm:$0xff]  }
 0x468   :  { %v7733_v29 = vsel %vm13991_vm12, %v7728_v26, %v7732_v33  ;;  %v11961_v28 = vcombine.low %v6955_v11, %v6969_v53  ;;  %13384 = vmatprep.subr.bf16.mxu1 %v13656_v2  ;;  %v11978_v61 = vcombine.low %v7477_v0, %v7481_v6  ;;  %v7738_v3 = vshll.u32 %v18204_v49, 16  ;;  %v7368_v11 = vld [vmem:[#allocation2 + $0x38] sm:$0xe]  ;;  %v7369_v6 = vld [vmem:[#allocation2 + $0x40] sm:$0xe] }
 0x469   :  { %v12010_v47 = vcombine.low %v7719_v54, %v7733_v29  ;;  %v7744_v32 = vshll.u32 %v7624_v14, 16  ;;  %v7737_v33 = vrot.slane %v7735_v40, 4  ;;  %v7749_v48 = vshrl.u32 %v18217_v15, 16 }
 0x46a   :  { %9934 = vmatmul.mubr.bf16.gmra.mrb[196].mxu1 %v11961_v28  ;;  %v7752_v21 = vshll.u32 %v18217_v15, 16  ;;  %v7758_v30 = vshll.u32 %v7625_v12, 16  ;;  %v7740_v51 = vrot.slane %v7738_v3, 5  ;;  %v11870_v1 = vrot.slane %v8104_v63, 9  ;;  %v6888_v28 = vld [vmem:[#allocation2 + $0x3c] sm:$0x1] }
 0x46b   :  { %10102 = vmatprep.mubr.bf16.mxu0 %v12010_v47  ;;  %9941 = vmatprep.mubr.bf16.mxu1 %v11978_v61  ;;  %v7746_v20 = vrot.slane %v7744_v32, 5  ;;  %v8220_v55 = vrot.slane %v7624_v14, 5  ;;  %v7751_v35 = vrot.slane %v7749_v48, 4  ;;  %v11871_v26 = vrot.slane %v8105_v42, 9  ;;  %v13663_v14 = vld [vmem:[%s19709_s1 + $0x468] sm:$0xff]   ;;  %v13666_v48 = vld [vmem:[%s19709_s1 + $0x470] sm:$0xff]  }
 0x46c   :  { %10103 = vmatmul.mubr.bf16.gmra.mrb[232].mxu0 %v11994_v38  ;;  %v7754_v5 = vrot.slane %v7752_v21, 5  ;;  %v7760_v46 = vrot.slane %v7758_v30, 5  ;;  %13385 = vmatpush3.bf16.msra.mxu1 %v13656_v2  ;;  %v7741_v31 = vor.u32 %v7740_v51, %v7737_v33  ;;  %v8224_v54 = vrot.slane %v7625_v12, 5  ;;  %v18249_v32 = vld [vmem:[#allocation2 + $0x60] sm:$0xf] }
 0x46d   :  { %v18232_v45 = vsel %vm13972_vm11, %v11870_v1, %v8220_v55  ;;  %v6977_v53 = vor.u32 %v17686_v41, %v17670_v50  ;;  %13386 = vmatprep.subr.bf16.mxu1 %v13660_v17  ;;  %v6980_v38 = vshll.u32 %v18194_v59, 16  ;;  %v6991_v2 = vor.u32 %v17711_v37, %v17690_v58  ;;  %v6889_v41 = vld [vmem:[#allocation2 + $0x44] sm:$0x1] }
 0x46e   :  { %20202 = vst [vmem:[#allocation52_spill] sm:$0xff] %v18232_v45  ;;  %v7755_v0 = vor.u32 %v7754_v5, %v7751_v35  ;;  %v6994_v29 = vshll.u32 %v18198_v10, 16  ;;  %v7742_v40 = vrot.slane %v7741_v31, 4  ;;  %v18245_v12 = vsel %vm13972_vm11, %v11871_v26, %v8224_v54  ;;  %v7626_v33 = vld [vmem:[#allocation2 + $0x64] sm:$0x1] }
 0x46f   :  { %20203 = vst [vmem:[#allocation60_spill] sm:$0xff] %v18245_v12  ;;  %v6978_v50 = vrot.slane %v6977_v53, 4  ;;  %v11838_v63 = vrot.slane %v7368_v11, 9  ;;  %v6982_v59 = vrot.slane %v6980_v38, 5  ;;  %v6992_v3 = vrot.slane %v6991_v2, 4 }
 0x470   :  { %v7756_v47 = vrot.slane %v7755_v0, 4  ;;  %13387 = vmatpush3.bf16.msra.mxu1 %v13660_v17  ;;  %v7747_v58 = vsel %vm13991_vm12, %v7742_v40, %v7746_v20  ;;  %v6996_v37 = vrot.slane %v6994_v29, 5  ;;  %v7484_v10 = vrot.slane %v6888_v28, 5  ;;  %v18262_v20 = vld [vmem:[#allocation2 + $0x68] sm:$0xf] }
 0x471   :  { %v11839_v42 = vrot.slane %v7369_v6, 9  ;;  %13388 = vmatprep.subr.bf16.mxu1 %v13663_v14  ;;  %v6983_v30 = vsel %vm13991_vm12, %v6978_v50, %v6982_v59  ;;  %v7488_v51 = vrot.slane %v6889_v41, 5  ;;  %v11995_v17 = vcombine.low %v18204_v49, %v18217_v15  ;;  %v7627_v5 = vld [vmem:[#allocation2 + $0x6c] sm:$0x1]  ;;  %v18274_v38 = vld [vmem:[#allocation2 + $0x5c] sm:$0x1] }
 0x472   :  { %v7761_v21 = vsel %vm13991_vm12, %v7756_v47, %v7760_v46  ;;  %v6997_v55 = vsel %vm13991_vm12, %v6992_v3, %v6996_v37  ;;  %v7485_v35 = vsel %vm13972_vm11, %v11838_v63, %v7484_v10  ;;  %v7763_v26 = vshrl.u32 %v18249_v32, 16  ;;  %v7370_v50 = vld [vmem:[#allocation2 + $0x58] sm:$0xe]  ;;  %v7371_v3 = vld [vmem:[#allocation2 + $0x60] sm:$0xe] }
 0x473   :  { %v12011_v1 = vcombine.low %v7747_v58, %v7761_v21  ;;  %v11962_v46 = vcombine.low %v6983_v30, %v6997_v55  ;;  %v7489_v11 = vsel %vm13972_vm11, %v11839_v42, %v7488_v51  ;;  %v7766_v31 = vshll.u32 %v18249_v32, 16 }
 0x474   :  { %v7772_v54 = vshll.u32 %v7626_v33, 16  ;;  %13389 = vmatpush3.bf16.msra.mxu1 %v13663_v14  ;;  %v11979_v49 = vcombine.low %v7485_v35, %v7489_v11  ;;  %v7765_v15 = vrot.slane %v7763_v26, 4  ;;  %v7777_v53 = vshrl.u32 %v18262_v20, 16  ;;  %v18280_v33 = vld [vmem:[#allocation2 + $0x64] sm:$0x1] }
 0x475   :  { %10110 = vmatprep.mubr.bf16.mxu0 %v12011_v1  ;;  %v7780_v0 = vshll.u32 %v18262_v20, 16  ;;  %13390 = vmatprep.subr.bf16.mxu1 %v13666_v48  ;;  %v7768_v2 = vrot.slane %v7766_v31, 5  ;;  %v7786_v6 = vshll.u32 %v7627_v5, 16  ;;  %v7005_v40 = vor.u32 %v17740_v16, %v17738_v43  ;;  %v18282_v16 = vld [vmem:[#allocation2 + $0x70] sm:$0xf] }
 0x476   :  { %9942 = vmatmul.mubr.bf16.gmra.mrb[200].mxu1 %v11962_v46  ;;  %10111 = vmatmul.mubr.bf16.gmra.mrb[236].mxu0 %v11995_v17  ;;  %v7774_v29 = vrot.slane %v7772_v54, 5  ;;  %v7779_v14 = vrot.slane %v7777_v53, 4  ;;  %v7008_v47 = vshll.u32 %v6888_v28, 16  ;;  %v7019_v59 = vor.u32 %v17749_v56, %v17747_v57  ;;  %v13669_v57 = vld [vmem:[%s19709_s1 + $0x478] sm:$0xff]   ;;  %v7628_v5 = vld [vmem:[#allocation2 + $0x74] sm:$0x1] }
 0x477   :  { %9949 = vmatprep.mubr.bf16.mxu1 %v11979_v49  ;;  %v7782_v63 = vrot.slane %v7780_v0, 5  ;;  %v7769_v58 = vor.u32 %v7768_v2, %v7765_v15  ;;  %v7788_v37 = vrot.slane %v7786_v6, 5  ;;  %v7006_v10 = vrot.slane %v7005_v40, 4  ;;  %v18299_v31 = vld [vmem:[#allocation2 + $0x78] sm:$0xf] }
 0x478   :  { %v7022_v42 = vshll.u32 %v6889_v41, 16  ;;  %13391 = vmatpush3.bf16.msra.mxu1 %v13666_v48  ;;  %v7010_v30 = vrot.slane %v7008_v47, 5  ;;  %v7020_v51 = vrot.slane %v7019_v59, 4  ;;  %v11840_v43 = vrot.slane %v7370_v50, 9  ;;  %v7629_v54 = vld [vmem:[#allocation2 + $0x7c] sm:$0x1] }
 0x479   :  { %v7783_v21 = vor.u32 %v7782_v63, %v7779_v14  ;;  %v7770_v17 = vrot.slane %v7769_v58, 4  ;;  %v7492_v28 = vrot.slane %v18274_v38, 5  ;;  %v11841_v55 = vrot.slane %v7371_v3, 9  ;;  %13392 = vmatprep.subr.bf16.mxu1 %v13669_v57  ;;  %v8108_v0 = vld [vmem:[#allocation2 + $0x70] sm:$0xe] }
 0x47a   :  { %v7024_v1 = vrot.slane %v7022_v42, 5  ;;  %v7011_v41 = vsel %vm13991_vm12, %v7006_v10, %v7010_v30  ;;  %v7496_v48 = vrot.slane %v18280_v33, 5  ;;  %v11996_v35 = vcombine.low %v18249_v32, %v18262_v20  ;;  %v8109_v2 = vld [vmem:[#allocation2 + $0x78] sm:$0xe] }
 0x47b   :  { %v7784_v56 = vrot.slane %v7783_v21, 4  ;;  %v7775_v26 = vsel %vm13991_vm12, %v7770_v17, %v7774_v29  ;;  %v7493_v11 = vsel %vm13972_vm11, %v11840_v43, %v7492_v28  ;;  %v7791_v49 = vshrl.u32 %v18282_v16, 16  ;;  %v7372_v43 = vld [vmem:[#allocation2 + $0x68] sm:$0xe] }
 0x47c   :  { %v7025_v46 = vsel %vm13991_vm12, %v7020_v51, %v7024_v1  ;;  %v7497_v20 = vsel %vm13972_vm11, %v11841_v55, %v7496_v48  ;;  %v7794_v53 = vshll.u32 %v18282_v16, 16  ;;  %13393 = vmatpush3.bf16.msra.mxu1 %v13669_v57  ;;  %v7800_v50 = vshll.u32 %v7628_v5, 16  ;;  %v6892_v57 = vld [vmem:[#allocation2 + $0x6c] sm:$0x1] }
 0x47d   :  { %v7789_v15 = vsel %vm13991_vm12, %v7784_v56, %v7788_v37  ;;  %v11963_v32 = vcombine.low %v7011_v41, %v7025_v46  ;;  %v11980_v6 = vcombine.low %v7493_v11, %v7497_v20  ;;  %v7793_v40 = vrot.slane %v7791_v49, 4 }
 0x47e   :  { %v12012_v29 = vcombine.low %v7775_v26, %v7789_v15  ;;  %v7796_v14 = vrot.slane %v7794_v53, 5  ;;  %v7805_v63 = vshrl.u32 %v18299_v31, 16  ;;  %v7808_v47 = vshll.u32 %v18299_v31, 16  ;;  %v7373_v26 = vld [vmem:[#allocation2 + $0x70] sm:$0xe] }
 0x47f   :  { %9950 = vmatmul.mubr.bf16.gmra.mrb[204].mxu1 %v11963_v32  ;;  %v7814_v59 = vshll.u32 %v7629_v54, 16  ;;  %v7802_v3 = vrot.slane %v7800_v50, 5  ;;  %v11874_v58 = vrot.slane %v8108_v0, 9  ;;  %v8236_v37 = vrot.slane %v7628_v5, 5  ;;  %v6893_v5 = vld [vmem:[#allocation2 + $0x74] sm:$0x1] }
 0x480   :  { %10118 = vmatprep.mubr.bf16.mxu0 %v12012_v29  ;;  %9957 = vmatprep.mubr.bf16.mxu1 %v11980_v6  ;;  %v11875_v10 = vrot.slane %v8109_v2, 9  ;;  %v7797_v42 = vor.u32 %v7796_v14, %v7793_v40  ;;  %v7807_v21 = vrot.slane %v7805_v63, 4  ;;  %v7810_v30 = vrot.slane %v7808_v47, 5  ;;  %v7630_v53 = vld [vmem:[#allocation2 + $0x84] sm:$0x1] }
 0x481   :  { %10119 = vmatmul.mubr.bf16.gmra.mrb[240].mxu0 %v11996_v35  ;;  %v7816_v51 = vrot.slane %v7814_v59, 5  ;;  %v18311_v17 = vsel %vm13972_vm11, %v11874_v58, %v8236_v37  ;;  %v8240_v1 = vrot.slane %v7629_v54, 5  ;;  %v7033_v28 = vor.u32 %v17788_v22, %v17786_v34  ;;  %v18323_v34 = vld [vmem:[#allocation2 + $0x80] sm:$0xf]  ;;  %v18335_v6 = vld [vmem:[#allocation2 + $0x88] sm:$0xf] }
 0x482   :  { %20204 = vst [vmem:[#allocation27_spill] sm:$0xff] %v18311_v17  ;;  %v7036_v55 = vshll.u32 %v18274_v38, 16  ;;  %v7798_v56 = vrot.slane %v7797_v42, 4  ;;  %v7811_v41 = vor.u32 %v7810_v30, %v7807_v21  ;;  %v7047_v48 = vor.u32 %v17797_v9, %v17795_v39  ;;  %v7631_v47 = vld [vmem:[#allocation2 + $0x8c] sm:$0x1] }
 0x483   :  { %v7050_v35 = vshll.u32 %v18280_v33, 16  ;;  %v18321_v46 = vsel %vm13972_vm11, %v11875_v10, %v8240_v1  ;;  %v7034_v11 = vrot.slane %v7033_v28, 4  ;;  %v11842_v49 = vrot.slane %v7372_v43, 9  ;;  %v7374_v28 = vld [vmem:[#allocation2 + $0x78] sm:$0xe] }
 0x484   :  { %20205 = vst [vmem:[#allocation29_spill] sm:$0xff] %v18321_v46  ;;  %v7038_v54 = vrot.slane %v7036_v55, 5  ;;  %v7803_v22 = vsel %vm13991_vm12, %v7798_v56, %v7802_v3  ;;  %v7812_v38 = vrot.slane %v7811_v41, 4  ;;  %v7048_v9 = vrot.slane %v7047_v48, 4 }
 0x485   :  { %v7052_v15 = vrot.slane %v7050_v35, 5  ;;  %v7500_v32 = vrot.slane %v6892_v57, 5  ;;  %v11843_v20 = vrot.slane %v7373_v26, 9  ;;  %v7504_v2 = vrot.slane %v6893_v5, 5  ;;  %v18351_v35 = vld [vmem:[#allocation2 + $0x7c] sm:$0x1] }
 0x486   :  { %v7039_v33 = vsel %vm13991_vm12, %v7034_v11, %v7038_v54  ;;  %v7817_v0 = vsel %vm13991_vm12, %v7812_v38, %v7816_v51  ;;  %v11997_v29 = vcombine.low %v18282_v16, %v18299_v31  ;;  %v7819_v40 = vshrl.u32 %v18323_v34, 16  ;;  %v7375_v26 = vld [vmem:[#allocation2 + $0x80] sm:$0xe]  ;;  %v18353_v38 = vld [vmem:[#allocation2 + $0x84] sm:$0x1] }
 0x487   :  { %v12013_v50 = vcombine.low %v7803_v22, %v7817_v0  ;;  %v7053_v14 = vsel %vm13991_vm12, %v7048_v9, %v7052_v15  ;;  %v7501_v63 = vsel %vm13972_vm11, %v11842_v49, %v7500_v32  ;;  %v7822_v59 = vshll.u32 %v18323_v34, 16 }
 0x488   :  { %v11964_v3 = vcombine.low %v7039_v33, %v7053_v14  ;;  %v7505_v58 = vsel %vm13972_vm11, %v11843_v20, %v7504_v2  ;;  %v7821_v37 = vrot.slane %v7819_v40, 4  ;;  %v7828_v16 = vshll.u32 %v7630_v53, 16  ;;  %v18355_v33 = vld [vmem:[#allocation2 + $0x90] sm:$0xf]  ;;  %v7632_v20 = vld [vmem:[#allocation2 + $0x94] sm:$0x1] }
 0x489   :  { %10126 = vmatprep.mubr.bf16.mxu0 %v12013_v50  ;;  %v11981_v31 = vcombine.low %v7501_v63, %v7505_v58  ;;  %v7824_v10 = vrot.slane %v7822_v59, 5  ;;  %v7833_v42 = vshrl.u32 %v18335_v6, 16  ;;  %v7836_v21 = vshll.u32 %v18335_v6, 16  ;;  %v18369_v50 = vld [vmem:[#allocation2 + $0x98] sm:$0xf] }
 0x48a   :  { %9958 = vmatmul.mubr.bf16.gmra.mrb[208].mxu1 %v11964_v3  ;;  %10127 = vmatmul.mubr.bf16.gmra.mrb[244].mxu0 %v11997_v29  ;;  %v7830_v30 = vrot.slane %v7828_v16, 5  ;;  %v7842_v51 = vshll.u32 %v7631_v47, 16  ;;  %v7061_v43 = vor.u32 %v17830_v52, %v17825_v60  ;;  %v7064_v1 = vshll.u32 %v6892_v57, 16  ;;  %v8113_v58 = vld [vmem:[#allocation2 + $0x98] sm:$0xe] }
 0x48b   :  { %9965 = vmatprep.mubr.bf16.mxu1 %v11981_v31  ;;  %v7825_v55 = vor.u32 %v7824_v10, %v7821_v37  ;;  %v7835_v56 = vrot.slane %v7833_v42, 4  ;;  %v7838_v41 = vrot.slane %v7836_v21, 5  ;;  %v7075_v48 = vor.u32 %v17835_v24, %v17832_v4  ;;  %v7633_v31 = vld [vmem:[#allocation2 + $0x9c] sm:$0x1] }
 0x48c   :  { %v7844_v11 = vrot.slane %v7842_v51, 5  ;;  %v7062_v54 = vrot.slane %v7061_v43, 4  ;;  %v7066_v49 = vrot.slane %v7064_v1, 5  ;;  %v7078_v22 = vshll.u32 %v6893_v5, 16 }
 0x48d   :  { %v7826_v9 = vrot.slane %v7825_v55, 4  ;;  %v7839_v60 = vor.u32 %v7838_v41, %v7835_v56  ;;  %v7076_v52 = vrot.slane %v7075_v48, 4  ;;  %v11844_v57 = vrot.slane %v7374_v28, 9 }
 0x48e   :  { %v7067_v15 = vsel %vm13991_vm12, %v7062_v54, %v7066_v49  ;;  %v7080_v32 = vrot.slane %v7078_v22, 5  ;;  %v7508_v4 = vrot.slane %v18351_v35, 5  ;;  %v11845_v24 = vrot.slane %v7375_v26, 9 }
 0x48f   :  { %v7831_v53 = vsel %vm13991_vm12, %v7826_v9, %v7830_v30  ;;  %v7840_v5 = vrot.slane %v7839_v60, 4  ;;  %v7512_v0 = vrot.slane %v18353_v38, 5  ;;  %v11998_v2 = vcombine.low %v18323_v34, %v18335_v6  ;;  %v8112_v6 = vld [vmem:[#allocation2 + $0x90] sm:$0xe]  ;;  %v6896_v60 = vld [vmem:[#allocation2 + $0x8c] sm:$0x1] }
 0x490   :  { %v7081_v29 = vsel %vm13991_vm12, %v7076_v52, %v7080_v32  ;;  %v7509_v40 = vsel %vm13972_vm11, %v11844_v57, %v7508_v4  ;;  %v7847_v14 = vshrl.u32 %v18355_v33, 16  ;;  %v7850_v63 = vshll.u32 %v18355_v33, 16  ;;  %v7376_v52 = vld [vmem:[#allocation2 + $0x88] sm:$0xe] }
 0x491   :  { %v7845_v47 = vsel %vm13991_vm12, %v7840_v5, %v7844_v11  ;;  %v11965_v59 = vcombine.low %v7067_v15, %v7081_v29  ;;  %v7513_v3 = vsel %vm13972_vm11, %v11845_v24, %v7512_v0  ;;  %v7856_v34 = vshll.u32 %v7632_v20, 16  ;;  %v18393_v24 = vld [vmem:[#allocation2 + $0x94] sm:$0x1]  ;;  %v18399_v5 = vld [vmem:[#allocation2 + $0xb0] sm:$0xf] }
 0x492   :  { %v12014_v37 = vcombine.low %v7831_v53, %v7845_v47  ;;  %v11982_v16 = vcombine.low %v7509_v40, %v7513_v3  ;;  %v7849_v10 = vrot.slane %v7847_v14, 4  ;;  %v7852_v42 = vrot.slane %v7850_v63, 5  ;;  %v7634_v63 = vld [vmem:[#allocation2 + $0xb4] sm:$0x1] }
 0x493   :  { %9966 = vmatmul.mubr.bf16.gmra.mrb[212].mxu1 %v11965_v59  ;;  %v7858_v21 = vrot.slane %v7856_v34, 5  ;;  %v7861_v30 = vshrl.u32 %v18369_v50, 16  ;;  %v7864_v51 = vshll.u32 %v18369_v50, 16  ;;  %v7870_v43 = vshll.u32 %v7633_v31, 16  ;;  %v18410_v34 = vld [vmem:[#allocation2 + $0xb8] sm:$0xf] }
 0x494   :  { %10134 = vmatprep.mubr.bf16.mxu0 %v12014_v37  ;;  %9973 = vmatprep.mubr.bf16.mxu1 %v11982_v16  ;;  %v7853_v1 = vor.u32 %v7852_v42, %v7849_v10  ;;  %v11878_v28 = vrot.slane %v8112_v6, 9  ;;  %v8252_v55 = vrot.slane %v7632_v20, 5  ;;  %v11879_v56 = vrot.slane %v8113_v58, 9  ;;  %v7377_v20 = vld [vmem:[#allocation2 + $0x90] sm:$0xe] }
 0x495   :  { %10135 = vmatmul.mubr.bf16.gmra.mrb[248].mxu0 %v11998_v2  ;;  %v7863_v41 = vrot.slane %v7861_v30, 4  ;;  %v7866_v48 = vrot.slane %v7864_v51, 5  ;;  %v7872_v26 = vrot.slane %v7870_v43, 5  ;;  %v8256_v11 = vrot.slane %v7633_v31, 5  ;;  %v7635_v6 = vld [vmem:[#allocation2 + $0xbc] sm:$0x1] }
 0x496   :  { %v7854_v54 = vrot.slane %v7853_v1, 4  ;;  %v18381_v49 = vsel %vm13972_vm11, %v11878_v28, %v8252_v55  ;;  %v7089_v22 = vor.u32 %v17859_v7, %v17857_v62  ;;  %v7092_v9 = vshll.u32 %v18351_v35, 16  ;;  %v20219_v7 = vld [vmem:[#allocation42_spill] sm:$0xff] }
 0x497   :  { %20206 = vst [vmem:[#allocation58_spill] sm:$0xff] %v18381_v49  ;;  %v7867_v57 = vor.u32 %v7866_v48, %v7863_v41  ;;  %v18388_v15 = vsel %vm13972_vm11, %v11879_v56, %v8256_v11  ;;  %v7103_v32 = vor.u32 %v17865_v27, %v17863_v25  ;;  %v7106_v4 = vshll.u32 %v18353_v38, 16  ;;  %v18428_v41 = vld [vmem:[#allocation2 + $0xac] sm:$0x1] }
 0x498   :  { %20207 = vst [vmem:[#allocation18_spill] sm:$0xff] %v18388_v15  ;;  %v7859_v62 = vsel %vm13991_vm12, %v7854_v54, %v7858_v21  ;;  %v7090_v35 = vrot.slane %v7089_v22, 4  ;;  %v7094_v53 = vrot.slane %v7092_v9, 5  ;;  %v11846_v40 = vrot.slane %v7376_v52, 9  ;;  %v18434_v9 = vld [vmem:[#allocation2 + $0xb4] sm:$0x1] }
 0x499   :  { %v7868_v0 = vrot.slane %v7867_v57, 4  ;;  %v7104_v2 = vrot.slane %v7103_v32, 4  ;;  %v7108_v29 = vrot.slane %v7106_v4, 5  ;;  %v7516_v27 = vrot.slane %v6896_v60, 5  ;;  %v7378_v52 = vld [vmem:[#allocation2 + $0xa8] sm:$0xe] }
 0x49a   :  { %v7095_v25 = vsel %vm13991_vm12, %v7090_v35, %v7094_v53  ;;  %v11847_v38 = vrot.slane %v7377_v20, 9  ;;  %v7520_v14 = vrot.slane %v18393_v24, 5  ;;  %v11999_v3 = vcombine.low %v18355_v33, %v18369_v50  ;;  %v20208_v20 = vld [vmem:[#allocation32_spill] sm:$0xff]  ;;  %v7379_v53 = vld [vmem:[#allocation2 + $0xb0] sm:$0xe] }
 0x49b   :  { %v7873_v47 = vsel %vm13991_vm12, %v7868_v0, %v7872_v26  ;;  %v7109_v59 = vsel %vm13991_vm12, %v7104_v2, %v7108_v29  ;;  %v7875_v58 = vshrl.u32 %v18399_v5, 16  ;;  %v7517_v10 = vsel %vm13972_vm11, %v11846_v40, %v7516_v27  ;;  %v8121_v15 = vld [vmem:[#allocation2 + $0xe8] sm:$0xe] }
 0x49c   :  { %v18413_v37 = vpop.f32.mrb[160].mxu0  ;;  %v12015_v16 = vcombine.low %v7859_v62, %v7873_v47  ;;  %v11966_v31 = vcombine.low %v7095_v25, %v7109_v59  ;;  %v7521_v42 = vsel %vm13972_vm11, %v11847_v38, %v7520_v14  ;;  %v7878_v33 = vshll.u32 %v18399_v5, 16  ;;  %v20209_v62 = vld [vmem:[#allocation37_spill] sm:$0xff]  ;;  %v18439_v25 = vld [vmem:[#allocation2 + $0xc0] sm:$0xf] }
 0x49d   :  { %v18419_v21 = vpop.f32.mrb[161].mxu0  ;;  %v11983_v30 = vcombine.low %v7517_v10, %v7521_v42  ;;  %v7877_v51 = vrot.slane %v7875_v58, 4  ;;  %v7884_v50 = vshll.u32 %v7634_v63, 16  ;;  %v7889_v1 = vshrl.u32 %v18410_v34, 16  ;;  %v7636_v38 = vld [vmem:[#allocation2 + $0xc4] sm:$0x1] }
 0x49e   :  { %v18422_v43 = vpop.f32.mrb[162].mxu0  ;;  %10142 = vmatprep.mubr.bf16.mxu0 %v12015_v16  ;;  %9974 = vmatmul.mubr.bf16.gmra.mrb[216].mxu1 %v11966_v31  ;;  %v7892_v28 = vshll.u32 %v18410_v34, 16  ;;  %v7898_v55 = vshll.u32 %v7635_v6, 16  ;;  %v12000_v56 = vcombine.low %v18399_v5, %v18410_v34  ;;  %v7880_v26 = vrot.slane %v7878_v33, 5  ;;  %v18447_v58 = vld [vmem:[#allocation2 + $0xc8] sm:$0xf] }
 0x49f   :  { %v18430_v48 = vpop.f32.mrb[163].mxu0  ;;  %9981 = vmatprep.mubr.bf16.mxu1 %v11983_v30  ;;  %10143 = vmatmul.mubr.bf16.gmra.mrb[252].mxu0 %v11999_v3  ;;  %v7886_v11 = vrot.slane %v7884_v50, 5  ;;  %v7117_v54 = vor.u32 %v17885_v44, %v17883_v13  ;;  %v7120_v22 = vshll.u32 %v6896_v60, 16  ;;  %v7891_v57 = vrot.slane %v7889_v1, 4  ;;  %v7637_v42 = vld [vmem:[#allocation2 + $0xcc] sm:$0x1] }
 0x4a0   :  { %v7894_v32 = vrot.slane %v7892_v28, 5  ;;  %v7900_v4 = vrot.slane %v7898_v55, 5  ;;  %v7131_v35 = vor.u32 %v20209_v62, %v20208_v20  ;;  %v7881_v0 = vor.u32 %v7880_v26, %v7877_v51  ;;  %v8116_v33 = vld [vmem:[#allocation2 + $0xc0] sm:$0xe]  ;;  %v8117_v26 = vld [vmem:[#allocation2 + $0xc8] sm:$0xe] }
 0x4a1   :  { %v7118_v2 = vrot.slane %v7117_v54, 4  ;;  %v7122_v29 = vrot.slane %v7120_v22, 5  ;;  %v7134_v40 = vshll.u32 %v18393_v24, 16  ;;  %v11848_v44 = vrot.slane %v7378_v52, 9  ;;  %v20212_v5 = vld [vmem:[#allocation20_spill] sm:$0xff]  ;;  %v20213_v34 = vld [vmem:[#allocation21_spill] sm:$0xff] }
 0x4a2   :  { %v7895_v27 = vor.u32 %v7894_v32, %v7891_v57  ;;  %v7132_v13 = vrot.slane %v7131_v35, 4  ;;  %v7524_v60 = vrot.slane %v18428_v41, 5  ;;  %v7882_v14 = vrot.slane %v7881_v0, 4 }
 0x4a3   :  { %v7123_v63 = vsel %vm13991_vm12, %v7118_v2, %v7122_v29  ;;  %v7136_v47 = vrot.slane %v7134_v40, 5  ;;  %v11849_v59 = vrot.slane %v7379_v53, 9  ;;  %v7528_v24 = vrot.slane %v18434_v9, 5 }
 0x4a4   :  { %v7896_v3 = vrot.slane %v7895_v27, 4  ;;  %v7525_v6 = vsel %vm13972_vm11, %v11848_v44, %v7524_v60  ;;  %v7903_v16 = vshrl.u32 %v18439_v25, 16  ;;  %v7887_v31 = vsel %vm13991_vm12, %v7882_v14, %v7886_v11 }
 0x4a5   :  { %v7137_v10 = vsel %vm13991_vm12, %v7132_v13, %v7136_v47  ;;  %v7906_v30 = vshll.u32 %v18439_v25, 16  ;;  %v7912_v51 = vshll.u32 %v7636_v38, 16  ;;  %v7529_v28 = vsel %vm13972_vm11, %v11849_v59, %v7528_v24 }
 0x4a6   :  { %v7901_v50 = vsel %vm13991_vm12, %v7896_v3, %v7900_v4  ;;  %v11967_v1 = vcombine.low %v7123_v63, %v7137_v10  ;;  %v7905_v55 = vrot.slane %v7903_v16, 4  ;;  %v11984_v22 = vcombine.low %v7525_v6, %v7529_v28  ;;  %v7380_v3 = vld [vmem:[#allocation2 + $0xb8] sm:$0xe]  ;;  %v18494_v10 = vld [vmem:[#allocation2 + $0xc4] sm:$0x1] }
 0x4a7   :  { %v18459_v54 = vpop.f32.mrb[164].mxu0  ;;  %v12016_v11 = vcombine.low %v7887_v31, %v7901_v50  ;;  %v7908_v52 = vrot.slane %v7906_v30, 5  ;;  %v7914_v57 = vrot.slane %v7912_v51, 5  ;;  %v7917_v62 = vshrl.u32 %v18447_v58, 16  ;;  %v18492_v31 = vld [vmem:[#allocation2 + $0xbc] sm:$0x1] }
 0x4a8   :  { %v18461_v32 = vpop.f32.mrb[128].mxu1  ;;  %v18463_v20 = vpop.f32.mrb[165].mxu0  ;;  %9982 = vmatmul.mubr.bf16.gmra.mrb[220].mxu1 %v11967_v1  ;;  %v7920_v4 = vshll.u32 %v18447_v58, 16  ;;  %v7926_v35 = vshll.u32 %v7637_v42, 16  ;;  %v11882_v53 = vrot.slane %v8116_v33, 9  ;;  %v8268_v40 = vrot.slane %v7636_v38, 5 }
 0x4a9   :  { %v18467_v0 = vpop.f32.mrb[129].mxu1  ;;  %v18469_v2 = vpop.f32.mrb[166].mxu0  ;;  %10150 = vmatprep.mubr.bf16.mxu0 %v12016_v11  ;;  %9989 = vmatprep.mubr.bf16.mxu1 %v11984_v22  ;;  %v7909_v29 = vor.u32 %v7908_v52, %v7905_v55  ;;  %v11883_v27 = vrot.slane %v8117_v26, 9  ;;  %v8272_v13 = vrot.slane %v7637_v42, 5  ;;  %v7919_v14 = vrot.slane %v7917_v62, 4  ;;  %v20214_v30 = vld [vmem:[#allocation38_spill] sm:$0xff] }
 0x4aa   :  { %v18471_v44 = vpop.f32.mrb[130].mxu1  ;;  %v18473_v60 = vpop.f32.mrb[167].mxu0  ;;  %10151 = vmatmul.mubr.bf16.gmra.mrb[0].mxu0 %v12000_v56  ;;  %v7922_v63 = vrot.slane %v7920_v4, 5  ;;  %v7928_v47 = vrot.slane %v7926_v35, 5  ;;  %v12001_v59 = vcombine.low %v18439_v25, %v18447_v58  ;;  %v18484_v24 = vsel %vm13972_vm11, %v11882_v53, %v8268_v40  ;;  %v20215_v51 = vld [vmem:[#allocation24_spill] sm:$0xff]  ;;  %v20218_v58 = vld [vmem:[#allocation41_spill] sm:$0xff] }
 0x4ab   :  { %v18480_v6 = vpop.f32.mrb[131].mxu1  ;;  %v7910_v38 = vrot.slane %v7909_v29, 4  ;;  %20210 = vst [vmem:[#allocation59_spill] sm:$0xff] %v18484_v24  ;;  %v18488_v16 = vsel %vm13972_vm11, %v11883_v27, %v8272_v13  ;;  %v7145_v56 = vor.u32 %v20213_v34, %v20212_v5  ;;  %v7148_v42 = vshll.u32 %v18428_v41, 16  ;;  %v7381_v50 = vld [vmem:[#allocation2 + $0xc0] sm:$0xe] }
 0x4ac   :  { %20211 = vst [vmem:[#allocation19_spill] sm:$0xff] %v18488_v16  ;;  %v7923_v25 = vor.u32 %v7922_v63, %v7919_v14  ;;  %v7159_v33 = vor.u32 %v20215_v51, %v20214_v30  ;;  %v18501_v1 = vld [vmem:[#allocation2 + $0xd0] sm:$0xf]  ;;  %v7162_v26 = vshll.u32 %v18434_v9, 16  ;;  %v11850_v11 = vrot.slane %v7380_v3, 9 }
 0x4ad   :  { %v7915_v28 = vsel %vm13991_vm12, %v7910_v38, %v7914_v57  ;;  %v7146_v55 = vrot.slane %v7145_v56, 4  ;;  %v7150_v52 = vrot.slane %v7148_v42, 5  ;;  %v7532_v4 = vrot.slane %v18492_v31, 5  ;;  %v18507_v35 = vld [vmem:[#allocation2 + $0xd8] sm:$0xf] }
 0x4ae   :  { %v7924_v22 = vrot.slane %v7923_v25, 4  ;;  %v7160_v62 = vrot.slane %v7159_v33, 4  ;;  %v7638_v41 = vld [vmem:[#allocation2 + $0xd4] sm:$0x1]  ;;  %v7164_v53 = vrot.slane %v7162_v26, 5  ;;  %v11851_v29 = vrot.slane %v7381_v50, 9 }
 0x4af   :  { %v7536_v40 = vrot.slane %v18494_v10, 5  ;;  %v7931_v27 = vshrl.u32 %v18501_v1, 16  ;;  %v7151_v14 = vsel %vm13991_vm12, %v7146_v55, %v7150_v52  ;;  %v7533_v63 = vsel %vm13972_vm11, %v11850_v11, %v7532_v4  ;;  %v7639_v3 = vld [vmem:[#allocation2 + $0xdc] sm:$0x1]  ;;  %v7641_v16 = vld [vmem:[#allocation2 + $0xec] sm:$0x1] }
 0x4b0   :  { %v18511_v13 = vpop.f32.mrb[132].mxu1  ;;  %v18513_v57 = vpop.f32.mrb[168].mxu0  ;;  %v7929_v9 = vsel %vm13991_vm12, %v7924_v22, %v7928_v47  ;;  %v7934_v38 = vshll.u32 %v18501_v1, 16  ;;  %v7165_v25 = vsel %vm13991_vm12, %v7160_v62, %v7164_v53  ;;  %v7940_v26 = vshll.u32 %v7638_v41, 16  ;;  %v18542_v53 = vld [vmem:[#allocation2 + $0xcc] sm:$0x1] }
 0x4b1   :  { %v18522_v5 = vpop.f32.mrb[133].mxu1  ;;  %v18524_v34 = vpop.f32.mrb[169].mxu0  ;;  %v12017_v56 = vcombine.low %v7915_v28, %v7929_v9  ;;  %v7537_v47 = vsel %vm13972_vm11, %v11851_v29, %v7536_v40  ;;  %v7933_v42 = vrot.slane %v7931_v27, 4  ;;  %v11968_v33 = vcombine.low %v7151_v14, %v7165_v25  ;;  %v20216_v41 = vld [vmem:[#allocation40_spill] sm:$0xff]  ;;  %v20217_v27 = vld [vmem:[#allocation39_spill] sm:$0xff] }
 0x4b2   :  { %v18530_v30 = vpop.f32.mrb[134].mxu1  ;;  %v18532_v51 = vpop.f32.mrb[170].mxu0  ;;  %v11985_v50 = vcombine.low %v7533_v63, %v7537_v47  ;;  %v7936_v55 = vrot.slane %v7934_v38, 5  ;;  %v7945_v28 = vshrl.u32 %v18507_v35, 16  ;;  %v7948_v52 = vshll.u32 %v18507_v35, 16 }
 0x4b3   :  { %v18534_v11 = vpop.f32.mrb[135].mxu1  ;;  %v18536_v22 = vpop.f32.mrb[171].mxu0  ;;  %10158 = vmatprep.mubr.bf16.mxu0 %v12017_v56  ;;  %v7954_v62 = vshll.u32 %v7639_v3, 16  ;;  %9990 = vmatmul.mubr.bf16.gmra.mrb[224].mxu1 %v11968_v33  ;;  %v7942_v40 = vrot.slane %v7940_v26, 5  ;;  %v7173_v9 = vor.u32 %v20217_v27, %v20216_v41  ;;  %v7176_v14 = vshll.u32 %v18492_v31, 16 }
 0x4b4   :  { %10159 = vmatmul.mubr.bf16.gmra.mrb[4].mxu0 %v12001_v59  ;;  %v7937_v29 = vor.u32 %v7936_v55, %v7933_v42  ;;  %v18547_v63 = vld [vmem:[#allocation2 + $0xd4] sm:$0x1]  ;;  %v7382_v38 = vld [vmem:[#allocation2 + $0xc8] sm:$0xe]  ;;  %v7383_v56 = vld [vmem:[#allocation2 + $0xd0] sm:$0xe]  ;;  %9997 = vmatprep.mubr.bf16.mxu1 %v11985_v50  ;;  %v7187_v39 = vor.u32 %v20219_v7, %v20218_v58 }
 0x4b5   :  { %v7947_v3 = vrot.slane %v7945_v28, 4  ;;  %v7950_v25 = vrot.slane %v7948_v52, 5  ;;  %v7956_v47 = vrot.slane %v7954_v62, 5  ;;  %v18551_v33 = vld [vmem:[#allocation2 + $0xe0] sm:$0xf]  ;;  %v7174_v42 = vrot.slane %v7173_v9, 4 }
 0x4b6   :  { %v7938_v59 = vrot.slane %v7937_v29, 4  ;;  %v7178_v55 = vrot.slane %v7176_v14, 5  ;;  %v7190_v26 = vshll.u32 %v18494_v10, 16  ;;  %v18554_v41 = vld [vmem:[#allocation2 + $0xe8] sm:$0xf]  ;;  %v7188_v27 = vrot.slane %v7187_v39, 4 }
 0x4b7   :  { %v7951_v31 = vor.u32 %v7950_v25, %v7947_v3  ;;  %v11852_v61 = vrot.slane %v7382_v38, 9  ;;  %v7540_v50 = vrot.slane %v18542_v53, 5  ;;  %v7640_v28 = vld [vmem:[#allocation2 + $0xe4] sm:$0x1]  ;;  %v11853_v29 = vrot.slane %v7383_v56, 9 }
 0x4b8   :  { %v18557_v52 = vpop.f32.mrb[136].mxu1  ;;  %v7943_v7 = vsel %vm13991_vm12, %v7938_v59, %v7942_v40  ;;  %v7179_v58 = vsel %vm13991_vm12, %v7174_v42, %v7178_v55  ;;  %v7192_v62 = vrot.slane %v7190_v26, 5  ;;  %v8120_v9 = vld [vmem:[#allocation2 + $0xe0] sm:$0xe]  ;;  %v7544_v3 = vrot.slane %v18547_v63, 5 }
 0x4b9   :  { %v18563_v10 = vpop.f32.mrb[137].mxu1  ;;  %v18565_v14 = vpop.f32.mrb[172].mxu0  ;;  %v7952_v39 = vrot.slane %v7951_v31, 4  ;;  %v7541_v38 = vsel %vm13972_vm11, %v11852_v61, %v7540_v50  ;;  %v7959_v25 = vshrl.u32 %v18551_v33, 16  ;;  %v7962_v59 = vshll.u32 %v18551_v33, 16 }
 0x4ba   :  { %v18571_v19 = vpop.f32.mrb[138].mxu1  ;;  %v18573_v40 = vpop.f32.mrb[173].mxu0  ;;  %v7193_v56 = vsel %vm13991_vm12, %v7188_v27, %v7192_v62  ;;  %v7968_v42 = vshll.u32 %v7640_v28, 16  ;;  %v7973_v55 = vshrl.u32 %v18554_v41, 16  ;;  %v7545_v4 = vsel %vm13972_vm11, %v11853_v29, %v7544_v3  ;;  %v18590_v3 = vld [vmem:[#allocation2 + $0xdc] sm:$0x1] }
 0x4bb   :  { %v18579_v26 = vpop.f32.mrb[139].mxu1  ;;  %v18581_v31 = vpop.f32.mrb[174].mxu0  ;;  %v7957_v61 = vsel %vm13991_vm12, %v7952_v39, %v7956_v47  ;;  %v11969_v50 = vcombine.low %v7179_v58, %v7193_v56  ;;  %v7961_v24 = vrot.slane %v7959_v25, 4  ;;  %v11986_v49 = vcombine.low %v7541_v38, %v7545_v4  ;;  %v7385_v56 = vld [vmem:[#allocation2 + $0xe0] sm:$0xe] }
 0x4bc   :  { %v18587_v27 = vpop.f32.mrb[175].mxu0  ;;  %v12018_v62 = vcombine.low %v7943_v7, %v7957_v61  ;;  %v7964_v46 = vrot.slane %v7962_v59, 5  ;;  %v7970_v17 = vrot.slane %v7968_v42, 5  ;;  %v7975_v12 = vrot.slane %v7973_v55, 4  ;;  %v20225_v42 = vld [vmem:[#allocation35_spill] sm:$0xff]  ;;  %v20226_v55 = vld [vmem:[#allocation44_spill] sm:$0xff] }
 0x4bd   :  { %9998 = vmatmul.mubr.bf16.gmra.mrb[228].mxu1 %v11969_v50  ;;  %v7976_v45 = vshll.u32 %v18554_v41, 16  ;;  %v7982_v36 = vshll.u32 %v7641_v16, 16  ;;  %v11886_v18 = vrot.slane %v8120_v9, 9  ;;  %v8284_v58 = vrot.slane %v7640_v28, 5 }
 0x4be   :  { %10166 = vmatprep.mubr.bf16.mxu0 %v12018_v62  ;;  %10005 = vmatprep.mubr.bf16.mxu1 %v11986_v49  ;;  %v7965_v47 = vor.u32 %v7964_v46, %v7961_v24  ;;  %v11887_v29 = vrot.slane %v8121_v15, 9  ;;  %v8288_v39 = vrot.slane %v7641_v16, 5  ;;  %v20220_v7 = vcombine.low %v18501_v1, %v18507_v35  ;;  %v7384_v49 = vld [vmem:[#allocation2 + $0xd8] sm:$0xe]  ;;  %v18635_v62 = vld [vmem:[#allocation2 + $0x100] sm:$0xf] }
 0x4bf   :  { %v7978_v4 = vrot.slane %v7976_v45, 5  ;;  %v7984_v38 = vrot.slane %v7982_v36, 5  ;;  %v12003_v25 = vcombine.low %v18551_v33, %v18554_v41  ;;  %v18599_v9 = vadd.f32 %v18419_v21, %v18413_v37  ;;  %v18615_v45 = vld [vmem:[#allocation2 + $0xe4] sm:$0x1]  ;;  %v20224_v33 = vld [vmem:[#allocation34_spill] sm:$0xff] }
 0x4c0   :  { %10167 = vmatmul.mubr.bf16.gmra.mrb[8].mxu0 %v20220_v7  ;;  %v18601_v46 = vpop.f32.mrb[140].mxu1  ;;  %v7966_v15 = vrot.slane %v7965_v47, 4  ;;  %v18605_v24 = vsel %vm13972_vm11, %v11886_v18, %v8284_v58  ;;  %v18609_v16 = vsel %vm13972_vm11, %v11887_v29, %v8288_v39  ;;  %v18613_v36 = vadd.f32 %v18430_v48, %v18422_v43  ;;  %v20223_v18 = vld [vmem:[#allocation43_spill] sm:$0xff] }
 0x4c1   :  { %20221 = vst [vmem:[#allocation30_spill] sm:$0xff] %v18605_v24  ;;  %20222 = vst [vmem:[#allocation9_spill] sm:$0xff] %v18609_v16  ;;  %v18617_v37 = vpop.f32.mrb[141].mxu1  ;;  %v18619_v21 = vpop.f32.mrb[176].mxu0  ;;  %v7979_v1 = vor.u32 %v7978_v4, %v7975_v12  ;;  %v7201_v41 = vor.u32 %v20224_v33, %v20223_v18  ;;  %v7204_v28 = vshll.u32 %v18542_v53, 16  ;;  %v7215_v61 = vor.u32 %v20226_v55, %v20225_v42 }
 0x4c2   :  { %v18626_v59 = vpop.f32.mrb[142].mxu1  ;;  %v18628_v43 = vpop.f32.mrb[177].mxu0  ;;  %v7971_v48 = vsel %vm13991_vm12, %v7966_v15, %v7970_v17  ;;  %v7218_v12 = vshll.u32 %v18547_v63, 16  ;;  %v11854_v50 = vrot.slane %v7384_v49, 9  ;;  %v7548_v7 = vrot.slane %v18590_v3, 5 }
 0x4c3   :  { %v18637_v47 = vpop.f32.mrb[143].mxu1  ;;  %v18639_v58 = vpop.f32.mrb[178].mxu0  ;;  %v7980_v53 = vrot.slane %v7979_v1, 4  ;;  %v7202_v29 = vrot.slane %v7201_v41, 4  ;;  %v7206_v39 = vrot.slane %v7204_v28, 5  ;;  %v7216_v17 = vrot.slane %v7215_v61, 4 }
 0x4c4   :  { %v18642_v4 = vpop.f32.mrb[179].mxu0  ;;  %v7220_v15 = vrot.slane %v7218_v12, 5  ;;  %v11855_v18 = vrot.slane %v7385_v56, 9  ;;  %v7552_v33 = vrot.slane %v18615_v45, 5  ;;  %v18645_v63 = vld [vmem:[#allocation2 + $0x104] sm:$0x1]  ;;  %v7549_v1 = vsel %vm13972_vm11, %v11854_v50, %v7548_v7 }
 0x4c5   :  { %20227 = vst [vmem:[#allocation15_spill] sm:$0xff] %v18645_v63  ;;  %v7985_v49 = vsel %vm13991_vm12, %v7980_v53, %v7984_v38  ;;  %v7207_v42 = vsel %vm13991_vm12, %v7202_v29, %v7206_v39  ;;  %v18653_v41 = vld [vmem:[#allocation2 + $0x108] sm:$0xf]  ;;  %v18655_v28 = vld [vmem:[#allocation2 + $0x10c] sm:$0x1]  ;;  %v7987_v55 = vshrl.u32 %v18635_v62, 16 }
 0x4c6   :  { %20228 = vst [vmem:[#allocation10_spill] sm:$0xff] %v18655_v28  ;;  %v12019_v56 = vcombine.low %v7971_v48, %v7985_v49  ;;  %v7221_v61 = vsel %vm13991_vm12, %v7216_v17, %v7220_v15  ;;  %v7553_v12 = vsel %vm13972_vm11, %v11855_v18, %v7552_v33  ;;  %v7990_v38 = vshll.u32 %v18635_v62, 16 }
 0x4c7   :  { %v11970_v53 = vcombine.low %v7207_v42, %v7221_v61  ;;  %v11987_v29 = vcombine.low %v7549_v1, %v7553_v12  ;;  %v7989_v39 = vrot.slane %v7987_v55, 4  ;;  %v7996_v50 = vshll.u32 %v18645_v63, 16  ;;  %v7386_v1 = vld [vmem:[#allocation2 + $0xf8] sm:$0xe] }
 0x4c8   :  { %v18664_v7 = vpop.f32.mrb[144].mxu1  ;;  %10174 = vmatprep.mubr.bf16.mxu0 %v12019_v56  ;;  %v7992_v35 = vrot.slane %v7990_v38, 5  ;;  %v8001_v16 = vshrl.u32 %v18653_v41, 16  ;;  %v8004_v48 = vshll.u32 %v18653_v41, 16  ;;  %v8010_v17 = vshll.u32 %v18655_v28, 16 }
 0x4c9   :  { %v18669_v15 = vpop.f32.mrb[145].mxu1  ;;  %10006 = vmatmul.mubr.bf16.gmra.mrb[232].mxu1 %v11970_v53  ;;  %10175 = vmatmul.mubr.bf16.gmra.mrb[12].mxu0 %v12003_v25  ;;  %v7998_v18 = vrot.slane %v7996_v50, 5  ;;  %v12876_v49 = vadd.f32 %v18467_v0, %v18461_v32  ;;  %v18677_v42 = vadd.f32 %v18463_v20, %v18459_v54  ;;  %v18679_v55 = vpop.f32.mrb[180].mxu0  ;;  %v12879_v54 = vadd.f32 %v18480_v6, %v18471_v44  ;;  %v20231_v0 = vld [vmem:[#allocation22_spill] sm:$0xff]  ;;  %v7387_v6 = vld [vmem:[#allocation2 + $0x100] sm:$0xe] }
 0x4ca   :  { %v18681_v56 = vpop.f32.mrb[146].mxu1  ;;  %10013 = vmatprep.mubr.bf16.mxu1 %v11987_v29  ;;  %v7993_v61 = vor.u32 %v7992_v35, %v7989_v39  ;;  %v8003_v12 = vrot.slane %v8001_v16, 4  ;;  %v8006_v25 = vrot.slane %v8004_v48, 5  ;;  %v8012_v38 = vrot.slane %v8010_v17, 5  ;;  %v18683_v53 = vpop.f32.mrb[181].mxu0  ;;  %v20232_v29 = vld [vmem:[#allocation12_spill] sm:$0xff] }
 0x4cb   :  { %v18685_v50 = vpop.f32.mrb[147].mxu1  ;;  %v18688_v32 = vadd.f32 %v18599_v9, %v12876_v49  ;;  %v18694_v20 = vadd.f32 %v18473_v60, %v18469_v2  ;;  %v7229_v35 = vor.u32 %v20232_v29, %v20231_v0  ;;  %v18698_v16 = vld [vmem:[#allocation2 + $0xfc] sm:$0x1]  ;;  %v18700_v39 = vld [vmem:[#allocation2 + $0x104] sm:$0x1]  ;;  %v18702_v48 = vpop.f32.mrb[182].mxu0  ;;  %v18710_v2 = vadd.f32 %v18613_v36, %v12879_v54 }
 0x4cc   :  { %20229 = vst [vmem:[#allocation46_spill] sm:$0xff] %v18685_v50  ;;  %20233 = vst [vmem:[#allocation13_spill] sm:$0xff] %v18702_v48  ;;  %v7994_v17 = vrot.slane %v7993_v61, 4  ;;  %v8007_v33 = vor.u32 %v8006_v25, %v8003_v12  ;;  %v7232_v9 = vshll.u32 %v18590_v3, 16  ;;  %v20234_v49 = vld [vmem:[#allocation11_spill] sm:$0xff]  ;;  %v18707_v24 = vpop.f32.mrb[183].mxu0 }
 0x4cd   :  { %20230 = vst [vmem:[#allocation47_spill] sm:$0xff] %v18688_v32  ;;  %v20235_v32 = vld [vmem:[#allocation8_spill] sm:$0xff]  ;;  %20236 = vst [vmem:[#allocation14_spill] sm:$0xff] %v18707_v24  ;;  %v7230_v60 = vrot.slane %v7229_v35, 4  ;;  %v7246_v0 = vshll.u32 %v18615_v45, 16  ;;  %v11856_v29 = vrot.slane %v7386_v1, 9 }
 0x4ce   :  { %v7243_v44 = vor.u32 %v20235_v32, %v20234_v49  ;;  %20237 = vst [vmem:[#allocation54_spill] sm:$0xff] %v18710_v2  ;;  %v18713_v28 = vld [vmem:[#allocation2 + $0x110] sm:$0xf]  ;;  %v7999_v61 = vsel %vm13991_vm12, %v7994_v17, %v7998_v18  ;;  %v8008_v12 = vrot.slane %v8007_v33, 4  ;;  %v7234_v3 = vrot.slane %v7232_v9, 5 }
 0x4cf   :  { %v18717_v63 = vld [vmem:[#allocation2 + $0x118] sm:$0xf]  ;;  %v7644_v32 = vld [vmem:[#allocation2 + $0x114] sm:$0x1]  ;;  %v7248_v49 = vrot.slane %v7246_v0, 5  ;;  %v7556_v24 = vrot.slane %v18698_v16, 5 }
 0x4d0   :  { %v7244_v25 = vrot.slane %v7243_v44, 4  ;;  %v11857_v36 = vrot.slane %v7387_v6, 9  ;;  %v7560_v54 = vrot.slane %v18700_v39, 5  ;;  %v18721_v35 = vpop.f32.mrb[148].mxu1  ;;  %v8013_v45 = vsel %vm13991_vm12, %v8008_v12, %v8012_v38  ;;  %v7645_v33 = vld [vmem:[#allocation2 + $0x11c] sm:$0x1] }
 0x4d1   :  { %20238 = vst [vmem:[#allocation32_spill] sm:$0xff] %v18721_v35  ;;  %v7235_v18 = vsel %vm13991_vm12, %v7230_v60, %v7234_v3  ;;  %v8015_v1 = vshrl.u32 %v18713_v28, 16  ;;  %v8018_v17 = vshll.u32 %v18713_v28, 16  ;;  %v18729_v9 = vpop.f32.mrb[149].mxu1  ;;  %v12020_v44 = vcombine.low %v7999_v61, %v8013_v45  ;;  %v8124_v12 = vld [vmem:[#allocation2 + $0x110] sm:$0xe] }
 0x4d2   :  { %20239 = vst [vmem:[#allocation37_spill] sm:$0xff] %v18729_v9  ;;  %v7249_v6 = vsel %vm13991_vm12, %v7244_v25, %v7248_v49  ;;  %v7557_v0 = vsel %vm13972_vm11, %v11856_v29, %v7556_v24  ;;  %v7561_v38 = vsel %vm13972_vm11, %v11857_v36, %v7560_v54  ;;  %v8125_v2 = vld [vmem:[#allocation2 + $0x118] sm:$0xe]  ;;  %v18737_v60 = vpop.f32.mrb[184].mxu0  ;;  %v18739_v3 = vpop.f32.mrb[150].mxu1  ;;  %v8024_v25 = vshll.u32 %v7644_v32, 16 }
 0x4d3   :  { %20240 = vst [vmem:[#allocation20_spill] sm:$0xff] %v18739_v3  ;;  %v11971_v35 = vcombine.low %v7235_v18, %v7249_v6  ;;  %v11988_v48 = vcombine.low %v7557_v0, %v7561_v38  ;;  %v8017_v50 = vrot.slane %v8015_v1, 4  ;;  %v8020_v9 = vrot.slane %v8018_v17, 5  ;;  %v18741_v61 = vpop.f32.mrb[185].mxu0  ;;  %v18743_v45 = vpop.f32.mrb[151].mxu1  ;;  %10182 = vmatprep.mubr.bf16.mxu0 %v12020_v44 }
 0x4d4   :  { %20241 = vst [vmem:[#allocation21_spill] sm:$0xff] %v18741_v61  ;;  %20242 = vst [vmem:[#allocation38_spill] sm:$0xff] %v18743_v45  ;;  %v8029_v24 = vshrl.u32 %v18717_v63, 16  ;;  %v8032_v29 = vshll.u32 %v18717_v63, 16  ;;  %v8038_v49 = vshll.u32 %v7645_v33, 16  ;;  %v18747_v36 = vpop.f32.mrb[186].mxu0  ;;  %v20244_v54 = vcombine.low %v18635_v62, %v18653_v41 }
 0x4d5   :  { %20243 = vst [vmem:[#allocation24_spill] sm:$0xff] %v18747_v36  ;;  %10014 = vmatmul.mubr.bf16.gmra.mrb[236].mxu1 %v11971_v35  ;;  %v8021_v18 = vor.u32 %v8020_v9, %v8017_v50  ;;  %v11890_v1 = vrot.slane %v8124_v12, 9  ;;  %v8300_v17 = vrot.slane %v7644_v32, 5  ;;  %v11891_v6 = vrot.slane %v8125_v2, 9  ;;  %v18752_v0 = vpop.f32.mrb[187].mxu0 }
 0x4d6   :  { %10183 = vmatmul.mubr.bf16.gmra.mrb[16].mxu0 %v20244_v54  ;;  %10021 = vmatprep.mubr.bf16.mxu1 %v11988_v48  ;;  %v8026_v44 = vrot.slane %v8024_v25, 5  ;;  %v8031_v38 = vrot.slane %v8029_v24, 4  ;;  %v8034_v45 = vrot.slane %v8032_v29, 5  ;;  %v8040_v3 = vrot.slane %v8038_v49, 5  ;;  %v18768_v32 = vld [vmem:[#allocation2 + $0x10c] sm:$0x1] }
 0x4d7   :  { %v8022_v61 = vrot.slane %v8021_v18, 4  ;;  %v18756_v36 = vsel %vm13972_vm11, %v11890_v1, %v8300_v17  ;;  %v8304_v35 = vrot.slane %v7645_v33, 5  ;;  %v12005_v62 = vcombine.low %v18713_v28, %v18717_v63  ;;  %v7388_v28 = vld [vmem:[#allocation2 + $0x108] sm:$0xe]  ;;  %v18794_v24 = vld [vmem:[#allocation2 + $0x114] sm:$0x1] }
 0x4d8   :  { %20245 = vst [vmem:[#allocation40_spill] sm:$0xff] %v18756_v36  ;;  %v8035_v41 = vor.u32 %v8034_v45, %v8031_v38  ;;  %v12882_v50 = vadd.f32 %v18522_v5, %v18511_v13  ;;  %v18764_v48 = vadd.f32 %v18524_v34, %v18513_v57  ;;  %v12885_v2 = vadd.f32 %v18534_v11, %v18530_v30  ;;  %v18770_v9 = vpop.f32.mrb[152].mxu1  ;;  %v20247_v57 = vld [vmem:[#allocation7_spill] sm:$0xff]  ;;  %v20248_v5 = vld [vmem:[#allocation56_spill] sm:$0xff]  ;;  %v7389_v30 = vld [vmem:[#allocation2 + $0x110] sm:$0xe] }
 0x4d9   :  { %v8027_v33 = vsel %vm13991_vm12, %v8022_v61, %v8026_v44  ;;  %v18776_v63 = vsel %vm13972_vm11, %v11891_v6, %v8304_v35  ;;  %v18780_v13 = vadd.f32 %v18536_v22, %v18532_v51  ;;  %v7257_v34 = vor.u32 %v20248_v5, %v20247_v57  ;;  %v18784_v11 = vpop.f32.mrb[153].mxu1  ;;  %v18796_v51 = vld [vmem:[#allocation2 + $0x120] sm:$0xf]  ;;  %v20251_v54 = vld [vmem:[#allocation28_spill] sm:$0xff]  ;;  %v7648_v36 = vld [vmem:[#allocation2 + $0x134] sm:$0x1] }
 0x4da   :  { %20246 = vst [vmem:[#allocation39_spill] sm:$0xff] %v18776_v63  ;;  %v8036_v12 = vrot.slane %v8035_v41, 4  ;;  %v18789_v61 = vadd.f32 %v18677_v42, %v12882_v50  ;;  %v18792_v25 = vadd.f32 %v18694_v20, %v12885_v2  ;;  %v18798_v22 = vpop.f32.mrb[154].mxu1  ;;  %v7260_v49 = vshll.u32 %v18698_v16, 16  ;;  %v20252_v18 = vld [vmem:[#allocation16_spill] sm:$0xff] }
 0x4db   :  { %v7258_v29 = vrot.slane %v7257_v34, 4  ;;  %v7271_v1 = vor.u32 %v20252_v18, %v20251_v54  ;;  %v7274_v17 = vshll.u32 %v18700_v39, 16  ;;  %v18804_v6 = vld [vmem:[#allocation2 + $0x128] sm:$0xf]  ;;  %v18806_v42 = vpop.f32.mrb[155].mxu1  ;;  %v11858_v44 = vrot.slane %v7388_v28, 9 }
 0x4dc   :  { %20249 = vst [vmem:[#allocation41_spill] sm:$0xff] %v18789_v61  ;;  %20250 = vst [vmem:[#allocation42_spill] sm:$0xff] %v18792_v25  ;;  %v8041_v20 = vsel %vm13991_vm12, %v8036_v12, %v8040_v3  ;;  %v7564_v38 = vrot.slane %v18768_v32, 5  ;;  %v11859_v35 = vrot.slane %v7389_v30, 9  ;;  %v18811_v41 = vld [vmem:[#allocation2 + $0x124] sm:$0x1] }
 0x4dd   :  { %20253 = vst [vmem:[#allocation43_spill] sm:$0xff] %v18811_v41  ;;  %v18813_v50 = vpop.f32.mrb[188].mxu0  ;;  %v12021_v16 = vcombine.low %v8027_v33, %v8041_v20  ;;  %v7262_v2 = vrot.slane %v7260_v49, 5  ;;  %v7272_v57 = vrot.slane %v7271_v1, 4  ;;  %v7276_v5 = vrot.slane %v7274_v17, 5 }
 0x4de   :  { %v18815_v39 = vpop.f32.mrb[189].mxu0  ;;  %v7565_v34 = vsel %vm13972_vm11, %v11858_v44, %v7564_v38  ;;  %v7568_v54 = vrot.slane %v18794_v24, 5  ;;  %v8043_v3 = vshrl.u32 %v18796_v51, 16  ;;  %v8046_v28 = vshll.u32 %v18796_v51, 16  ;;  %v18828_v49 = vld [vmem:[#allocation2 + $0x12c] sm:$0x1] }
 0x4df   :  { %v18822_v30 = vpop.f32.mrb[190].mxu0  ;;  %10190 = vmatprep.mubr.bf16.mxu0 %v12021_v16  ;;  %v7263_v33 = vsel %vm13991_vm12, %v7258_v29, %v7262_v2  ;;  %v7277_v12 = vsel %vm13991_vm12, %v7272_v57, %v7276_v5  ;;  %20254 = vst [vmem:[#allocation34_spill] sm:$0xff] %v18828_v49  ;;  %v8052_v18 = vshll.u32 %v18811_v41, 16  ;;  %v8057_v1 = vshrl.u32 %v18804_v6, 16 }
 0x4e0   :  { %v18832_v17 = vpop.f32.mrb[191].mxu0  ;;  %v11972_v20 = vcombine.low %v7263_v33, %v7277_v12  ;;  %v7569_v44 = vsel %vm13972_vm11, %v11859_v35, %v7568_v54  ;;  %10191 = vmatmul.mubr.bf16.gmra.mrb[20].mxu0 %v12005_v62  ;;  %v8045_v38 = vrot.slane %v8043_v3, 4  ;;  %v8048_v16 = vrot.slane %v8046_v28, 5  ;;  %v18836_v45 = vpop.f32.mrb[156].mxu1  ;;  %v18858_v12 = vld [vmem:[#allocation2 + $0x11c] sm:$0x1] }
 0x4e1   :  { %v11989_v29 = vcombine.low %v7565_v34, %v7569_v44  ;;  %v8054_v2 = vrot.slane %v8052_v18, 5  ;;  %v8059_v57 = vrot.slane %v8057_v1, 4  ;;  %v8060_v5 = vshll.u32 %v18804_v6, 16  ;;  %v18839_v25 = vpop.f32.mrb[157].mxu1  ;;  %v7390_v18 = vld [vmem:[#allocation2 + $0x118] sm:$0xe] }
 0x4e2   :  { %10022 = vmatmul.mubr.bf16.gmra.mrb[240].mxu1 %v11972_v20  ;;  %v8049_v61 = vor.u32 %v8048_v16, %v8045_v38  ;;  %v8066_v63 = vshll.u32 %v18828_v49, 16  ;;  %v12888_v62 = vadd.f32 %v18563_v10, %v18557_v52  ;;  %v18846_v35 = vpop.f32.mrb[158].mxu1  ;;  %v18850_v54 = vadd.f32 %v18573_v40, %v18565_v14  ;;  %v20256_v44 = vld [vmem:[#allocation53_spill] sm:$0xff]  ;;  %v18867_v38 = vld [vmem:[#allocation2 + $0x124] sm:$0x1] }
 0x4e3   :  { %10029 = vmatprep.mubr.bf16.mxu1 %v11989_v29  ;;  %v8062_v34 = vrot.slane %v8060_v5, 5  ;;  %v12891_v3 = vadd.f32 %v18579_v26, %v18571_v19  ;;  %v18856_v28 = vadd.f32 %v18587_v27, %v18581_v31  ;;  %v18860_v1 = vpop.f32.mrb[159].mxu1  ;;  %v20257_v14 = vld [vmem:[#allocation17_spill] sm:$0xff]  ;;  %v7288_v27 = vshll.u32 %v18768_v32, 16  ;;  %v20259_v16 = vld [vmem:[#allocation55_spill] sm:$0xff] }
 0x4e4   :  { %v8050_v52 = vrot.slane %v8049_v61, 4  ;;  %v8068_v10 = vrot.slane %v8066_v63, 5  ;;  %v18863_v20 = vadd.f32 %v18764_v48, %v12888_v62  ;;  %v7285_v40 = vor.u32 %v20257_v14, %v20256_v44  ;;  %v18869_v19 = vpop.f32.mrb[192].mxu0  ;;  %v20260_v29 = vld [vmem:[#allocation33_spill] sm:$0xff]  ;;  %v7391_v63 = vld [vmem:[#allocation2 + $0x120] sm:$0xe] }
 0x4e5   :  { %v8063_v26 = vor.u32 %v8062_v34, %v8059_v57  ;;  %v18872_v31 = vadd.f32 %v18780_v13, %v12891_v3  ;;  %v7299_v61 = vor.u32 %v20260_v29, %v20259_v16  ;;  %v18877_v5 = vld [vmem:[#allocation2 + $0x130] sm:$0xf]  ;;  %v18879_v48 = vpop.f32.mrb[193].mxu0  ;;  %v7302_v14 = vshll.u32 %v18794_v24, 16  ;;  %v8129_v49 = vld [vmem:[#allocation2 + $0x138] sm:$0xe] }
 0x4e6   :  { %20255 = vst [vmem:[#allocation35_spill] sm:$0xff] %v18863_v20  ;;  %v8055_v62 = vsel %vm13991_vm12, %v8050_v52, %v8054_v2  ;;  %v7286_v44 = vrot.slane %v7285_v40, 4  ;;  %v11860_v57 = vrot.slane %v7390_v18, 9  ;;  %v18884_v34 = vpop.f32.mrb[194].mxu0  ;;  %v7290_v3 = vrot.slane %v7288_v27, 5 }
 0x4e7   :  { %20258 = vst [vmem:[#allocation44_spill] sm:$0xff] %v18872_v31  ;;  %20261 = vst [vmem:[#allocation22_spill] sm:$0xff] %v18884_v34  ;;  %v8064_v13 = vrot.slane %v8063_v26, 4  ;;  %v7300_v32 = vrot.slane %v7299_v61, 4  ;;  %v7572_v33 = vrot.slane %v18858_v12, 5  ;;  %v18887_v16 = vpop.f32.mrb[195].mxu0 }
 0x4e8   :  { %20262 = vst [vmem:[#allocation12_spill] sm:$0xff] %v18887_v16  ;;  %v7304_v29 = vrot.slane %v7302_v14, 5  ;;  %v11861_v31 = vrot.slane %v7391_v63, 9  ;;  %v7576_v20 = vrot.slane %v18867_v38, 5  ;;  %v8071_v2 = vshrl.u32 %v18877_v5, 16  ;;  %v18900_v61 = vpop.f32.mrb[160].mxu1 }
 0x4e9   :  { %v8069_v24 = vsel %vm13991_vm12, %v8064_v13, %v8068_v10  ;;  %v7291_v18 = vsel %vm13991_vm12, %v7286_v44, %v7290_v3  ;;  %v7573_v52 = vsel %vm13972_vm11, %v11860_v57, %v7572_v33  ;;  %v18897_v40 = vld [vmem:[#allocation2 + $0x138] sm:$0xf]  ;;  %v8074_v26 = vshll.u32 %v18877_v5, 16  ;;  %v8128_v27 = vld [vmem:[#allocation2 + $0x130] sm:$0xe]  ;;  %20263 = vst [vmem:[#allocation11_spill] sm:$0xff] %v18900_v61 }
 0x4ea   :  { %v12022_v63 = vcombine.low %v8055_v62, %v8069_v24  ;;  %v7305_v14 = vsel %vm13991_vm12, %v7300_v32, %v7304_v29  ;;  %v7577_v10 = vsel %vm13972_vm11, %v11861_v31, %v7576_v20  ;;  %v8073_v13 = vrot.slane %v8071_v2, 4  ;;  %v18906_v44 = vpop.f32.mrb[161].mxu1  ;;  %v7649_v57 = vld [vmem:[#allocation2 + $0x13c] sm:$0x1] }
 0x4eb   :  { %20264 = vst [vmem:[#allocation8_spill] sm:$0xff] %v18906_v44  ;;  %v11973_v3 = vcombine.low %v7291_v18, %v7305_v14  ;;  %v11990_v33 = vcombine.low %v7573_v52, %v7577_v10  ;;  %v8076_v41 = vrot.slane %v8074_v26, 5  ;;  %v8080_v16 = vshll.u32 %v7648_v36, 16  ;;  %v18908_v34 = vpop.f32.mrb[162].mxu1 }
 0x4ec   :  { %20265 = vst [vmem:[#allocation7_spill] sm:$0xff] %v18908_v34  ;;  %10198 = vmatprep.mubr.bf16.mxu0 %v12022_v63  ;;  %v8085_v62 = vshrl.u32 %v18897_v40, 16  ;;  %v8088_v24 = vshll.u32 %v18897_v40, 16  ;;  %v8094_v32 = vshll.u32 %v7649_v57, 16  ;;  %v11894_v29 = vrot.slane %v8128_v27, 9  ;;  %v18912_v61 = vpop.f32.mrb[163].mxu1 }
 0x4ed   :  { %10030 = vmatmul.mubr.bf16.gmra.mrb[244].mxu1 %v11973_v3  ;;  %v20266_v20 = vcombine.low %v18796_v51, %v18804_v6  ;;  %v8077_v31 = vor.u32 %v8076_v41, %v8073_v13  ;;  %v8082_v2 = vrot.slane %v8080_v16, 5  ;;  %v8316_v18 = vrot.slane %v7648_v36, 5  ;;  %v18917_v34 = vpop.f32.mrb[196].mxu0  ;;  %v6912_v3 = vld [vmem:[#allocation2 + $0x12c] sm:$0x1] }
 0x4ee   :  { %v11895_v52 = vrot.slane %v8129_v49, 9  ;;  %10037 = vmatprep.mubr.bf16.mxu1 %v11990_v33  ;;  %v8087_v26 = vrot.slane %v8085_v62, 4  ;;  %v8090_v63 = vrot.slane %v8088_v24, 5  ;;  %v8096_v14 = vrot.slane %v8094_v32, 5  ;;  %v18927_v36 = vpop.f32.mrb[197].mxu0  ;;  %v20267_v24 = vld [vmem:[#allocation31_spill] sm:$0xff] }
 0x4ef   :  { %10199 = vmatmul.mubr.bf16.gmra.mrb[24].mxu0 %v20266_v20  ;;  %v8320_v10 = vrot.slane %v7649_v57, 5  ;;  %v8078_v44 = vrot.slane %v8077_v31, 4  ;;  %v18921_v27 = vsel %vm13972_vm11, %v11894_v29, %v8316_v18  ;;  %v12007_v51 = vcombine.low %v18877_v5, %v18897_v40  ;;  %v7392_v33 = vld [vmem:[#allocation2 + $0x128] sm:$0xe]  ;;  %v18937_v57 = vpop.f32.mrb[198].mxu0  ;;  %v20270_v31 = vld [vmem:[#allocation49_spill] sm:$0xff] }
 0x4f0   :  { %v12894_v6 = vadd.f32 %v18617_v37, %v18601_v46  ;;  %v8091_v41 = vor.u32 %v8090_v63, %v8087_v26  ;;  %v13012_v16 = vadd.f32 %v18628_v43, %v18619_v21  ;;  %v12897_v13 = vadd.f32 %v18637_v47, %v18626_v59  ;;  %v7393_v21 = vld [vmem:[#allocation2 + $0x130] sm:$0xe]  ;;  %v18948_v43 = vpop.f32.mrb[199].mxu0 }
 0x4f1   :  { %v18931_v49 = vsel %vm13972_vm11, %v11895_v52, %v8320_v10  ;;  %v8083_v46 = vsel %vm13991_vm12, %v8078_v44, %v8082_v2  ;;  %v13015_v40 = vadd.f32 %v18642_v4, %v18639_v58  ;;  %v18950_v59 = vpop.f32.mrb[164].mxu1  ;;  %v20268_v44 = vld [vmem:[#allocation48_spill] sm:$0xff]  ;;  %v7316_v29 = vshll.u32 %v18858_v12, 16  ;;  %v6913_v4 = vld [vmem:[#allocation2 + $0x134] sm:$0x1] }
 0x4f2   :  { %v12039_v37 = vcombine.low %v18921_v27, %v18931_v49  ;;  %v18944_v5 = vadd.f32 %v18850_v54, %v12894_v6  ;;  %v8092_v47 = vrot.slane %v8091_v41, 4  ;;  %v18953_v62 = vadd.f32 %v18856_v28, %v12897_v13  ;;  %v18958_v20 = vpop.f32.mrb[165].mxu1  ;;  %v20269_v54 = vld [vmem:[#allocation36_spill] sm:$0xff] }
 0x4f3   :  { %v7313_v32 = vor.u32 %v20268_v44, %v20267_v24  ;;  %v7327_v2 = vor.u32 %v20270_v31, %v20269_v54  ;;  %v7330_v58 = vshll.u32 %v18867_v38, 16  ;;  %v11862_v18 = vrot.slane %v7392_v33, 9  ;;  %v18963_v26 = vpop.f32.mrb[166].mxu1  ;;  %v20273_v31 = vld [vmem:[#allocation14_spill] sm:$0xff]  ;;  %v20319_v27 = vld [vmem:[#allocation44_spill] sm:$0xff] }
 0x4f4   :  { %v7580_v52 = vrot.slane %v6912_v3, 5  ;;  %v8097_v28 = vsel %vm13991_vm12, %v8092_v47, %v8096_v14  ;;  %v7318_v10 = vrot.slane %v7316_v29, 5  ;;  %v11863_v6 = vrot.slane %v7393_v21, 9  ;;  %v18967_v41 = vpop.f32.mrb[167].mxu1  ;;  %v20271_v21 = vld [vmem:[#allocation46_spill] sm:$0xff]  ;;  %v20272_v29 = vld [vmem:[#allocation13_spill] sm:$0xff] }
 0x4f5   :  { %v7314_v63 = vrot.slane %v7313_v32, 4  ;;  %v12023_v12 = vcombine.low %v8083_v46, %v8097_v28  ;;  %v7328_v13 = vrot.slane %v7327_v2, 4  ;;  %v7332_v24 = vrot.slane %v7330_v58, 5  ;;  %v20274_v58 = vld [vmem:[#allocation23_spill] sm:$0xff]  ;;  %v8098_v28 = vld [vmem:[#allocation2 + $0x10] sm:$0xe] }
 0x4f6   :  { %v7581_v44 = vsel %vm13972_vm11, %v11862_v18, %v7580_v52  ;;  %v7584_v33 = vrot.slane %v6913_v4, 5  ;;  %v12900_v54 = vadd.f32 %v18669_v15, %v18664_v7  ;;  %v13018_v14 = vadd.f32 %v18683_v53, %v18679_v55  ;;  %v18977_v47 = vpop.f32.mrb[200].mxu0  ;;  %v20275_v18 = vld [vmem:[#allocation50_spill] sm:$0xff] }
 0x4f7   :  { %v7319_v38 = vsel %vm13991_vm12, %v7314_v63, %v7318_v10  ;;  %10206 = vmatprep.mubr.bf16.mxu0 %v12023_v12  ;;  %v7333_v46 = vsel %vm13991_vm12, %v7328_v13, %v7332_v24  ;;  %v12903_v32 = vadd.f32 %v20271_v21, %v18681_v56  ;;  %v13021_v2 = vadd.f32 %v20273_v31, %v20272_v29  ;;  %v18987_v7 = vpop.f32.mrb[201].mxu0  ;;  %v8099_v10 = vld [vmem:[#allocation2 + $0x18] sm:$0xe]  ;;  %v20276_v21 = vld [vmem:[#allocation57_spill] sm:$0xff] }
 0x4f8   :  { %v7341_v52 = vor.u32 %v20275_v18, %v20274_v58  ;;  %v11974_v15 = vcombine.low %v7319_v38, %v7333_v46  ;;  %v7585_v55 = vsel %vm13972_vm11, %v11863_v6, %v7584_v33  ;;  %10207 = vmatmul.mubr.bf16.gmra.mrb[28].mxu0 %v12007_v51  ;;  %v18991_v53 = vadd.f32 %v13012_v16, %v12900_v54  ;;  %v18993_v12 = vpop.f32.mrb[202].mxu0  ;;  %v20277_v29 = vld [vmem:[#allocation25_spill] sm:$0xff]  ;;  %v13708_v54 = vld [vmem:[#allocation2 + $0x1c] sm:$0x1] }
 0x4f9   :  { %v7344_v63 = vshll.u32 %v6912_v3, 16  ;;  %v11991_v56 = vcombine.low %v7581_v44, %v7585_v55  ;;  %v18995_v13 = vadd.f32 %v13015_v40, %v12903_v32  ;;  %v7355_v31 = vor.u32 %v20277_v29, %v20276_v21  ;;  %v18999_v58 = vpop.f32.mrb[203].mxu0  ;;  %v13707_v51 = vld [vmem:[#allocation2 + $0x14] sm:$0x1]  ;;  %v20278_v44 = vld [vmem:[#allocation32_spill] sm:$0xff] }
 0x4fa   :  { %v7342_v24 = vrot.slane %v7341_v52, 4  ;;  %10038 = vmatmul.mubr.bf16.gmra.mrb[248].mxu1 %v11974_v15  ;;  %v7358_v46 = vshll.u32 %v6913_v4, 16  ;;  %v11864_v6 = vrot.slane %v8098_v28, 9  ;;  %v8196_v16 = vrot.slane %v13707_v51, 5  ;;  %v20279_v40 = vld [vmem:[#allocation37_spill] sm:$0xff]  ;;  %v19003_v52 = vpop.f32.mrb[168].mxu1 }
 0x4fb   :  { %v7346_v38 = vrot.slane %v7344_v63, 5  ;;  %10045 = vmatprep.mubr.bf16.mxu1 %v11991_v56  ;;  %v7356_v3 = vrot.slane %v7355_v31, 4  ;;  %v11865_v33 = vrot.slane %v8099_v10, 9  ;;  %v8200_v18 = vrot.slane %v13708_v54, 5  ;;  %v20280_v28 = vld [vmem:[#allocation21_spill] sm:$0xff]  ;;  %v19011_v63 = vpop.f32.mrb[169].mxu1 }
 0x4fc   :  { %v12906_v32 = vadd.f32 %v20279_v40, %v20278_v44  ;;  %v7360_v21 = vrot.slane %v7358_v46, 5  ;;  %v8197_v4 = vsel %vm13972_vm11, %v11864_v6, %v8196_v16  ;;  %v13024_v15 = vadd.f32 %v20280_v28, %v18737_v60  ;;  %v20281_v29 = vld [vmem:[#allocation20_spill] sm:$0xff]  ;;  %v20282_v31 = vld [vmem:[#allocation38_spill] sm:$0xff]  ;;  %v19021_v46 = vpop.f32.mrb[170].mxu1 }
 0x4fd   :  { %v7347_v55 = vsel %vm13991_vm12, %v7342_v24, %v7346_v38  ;;  %v8201_v10 = vsel %vm13972_vm11, %v11865_v33, %v8200_v18  ;;  %v12909_v51 = vadd.f32 %v20282_v31, %v20281_v29  ;;  %v20283_v54 = vld [vmem:[#allocation24_spill] sm:$0xff]  ;;  %v8102_v38 = vld [vmem:[#allocation2 + $0x30] sm:$0xe]  ;;  %v8103_v60 = vld [vmem:[#allocation2 + $0x38] sm:$0xe]  ;;  %v19025_v16 = vpop.f32.mrb[171].mxu1  ;;  %v12912_v18 = vadd.f32 %v18784_v11, %v18770_v9 }
 0x4fe   :  { %v19015_v56 = vadd.f32 %v13018_v14, %v12906_v32  ;;  %v13027_v24 = vadd.f32 %v18752_v0, %v20283_v54  ;;  %v7361_v6 = vsel %vm13991_vm12, %v7356_v3, %v7360_v21  ;;  %v12024_v40 = vcombine.low %v8197_v4, %v8201_v10  ;;  %v13710_v29 = vld [vmem:[#allocation2 + $0x3c] sm:$0x1] }
 0x4ff   :  { %v11975_v44 = vcombine.low %v7347_v55, %v7361_v6  ;;  %v19027_v33 = vadd.f32 %v13021_v2, %v12909_v51  ;;  %v11868_v14 = vrot.slane %v8102_v38, 9  ;;  %v13030_v0 = vadd.f32 %v18815_v39, %v18813_v50  ;;  %v13052_v28 = vpop.f32.mrb[204].mxu0  ;;  %v8106_v38 = vld [vmem:[#allocation2 + $0x60] sm:$0xe] }
 0x500   :  { %v12915_v32 = vadd.f32 %v18806_v42, %v18798_v22  ;;  %v8212_v3 = vrot.slane %v13709_v23, 5  ;;  %v11869_v21 = vrot.slane %v8103_v60, 9  ;;  %v8216_v31 = vrot.slane %v13710_v29, 5  ;;  %v13053_v55 = vpop.f32.mrb[205].mxu0  ;;  %v20286_v6 = vld [vmem:[#allocation11_spill] sm:$0xff]  ;;  %v20287_v60 = vld [vmem:[#allocation8_spill] sm:$0xff] }
 0x501   :  { %v13033_v2 = vadd.f32 %v18832_v17, %v18822_v30  ;;  %v19037_v4 = vadd.f32 %v13024_v15, %v12912_v18  ;;  %v13055_v11 = vpop.f32.mrb[206].mxu0  ;;  %v12918_v22 = vadd.f32 %v18839_v25, %v18836_v45  ;;  %v13036_v42 = vadd.f32 %v18879_v48, %v18869_v19  ;;  %v20284_v30 = vld [vmem:[#allocation22_spill] sm:$0xff]  ;;  %v20285_v17 = vld [vmem:[#allocation12_spill] sm:$0xff]  ;;  %v13711_v23 = vld [vmem:[#allocation2 + $0x64] sm:$0x1] }
 0x502   :  { %10046 = vmatmul.mubr.bf16.gmra.mrb[252].mxu1 %v11975_v44  ;;  %v19039_v9 = vadd.f32 %v13027_v24, %v12915_v32  ;;  %v13056_v50 = vpop.f32.mrb[207].mxu0  ;;  %v12921_v10 = vadd.f32 %v18860_v1, %v18846_v35  ;;  %v13039_v51 = vadd.f32 %v20285_v17, %v20284_v30  ;;  %v8213_v54 = vsel %vm13972_vm11, %v11868_v14, %v8212_v3  ;;  %v8107_v19 = vld [vmem:[#allocation2 + $0x68] sm:$0xe]  ;;  %v20290_v30 = vld [vmem:[#allocation26_spill] sm:$0xff] }
 0x503   :  { %13394 = vmatprep.mubr.bf16.mxu1 %v12024_v40  ;;  %v12940_v39 = vpop.f32.mrb[172].mxu1  ;;  %v8217_v24 = vsel %vm13972_vm11, %v11869_v21, %v8216_v31  ;;  %v19053_v45 = vadd.f32 %v13030_v0, %v12918_v22  ;;  %v12924_v35 = vadd.f32 %v20287_v60, %v20286_v6  ;;  %v13042_v44 = vadd.f32 %v18927_v36, %v18917_v34  ;;  %v20288_v40 = vld [vmem:[#allocation7_spill] sm:$0xff] }
 0x504   :  { %v12941_v15 = vpop.f32.mrb[173].mxu1  ;;  %v19055_v48 = vadd.f32 %v13033_v2, %v12921_v10  ;;  %v12927_v14 = vadd.f32 %v18912_v61, %v20288_v40  ;;  %v13045_v18 = vadd.f32 %v18948_v43, %v18937_v57  ;;  %v12026_v32 = vcombine.low %v8213_v54, %v8217_v24  ;;  %v13712_v2 = vld [vmem:[#allocation2 + $0x6c] sm:$0x1]  ;;  %v20289_v61 = vld [vmem:[#allocation51_spill] sm:$0xff] }
 0x505   :  { %v12943_v25 = vpop.f32.mrb[174].mxu1  ;;  %v11872_v0 = vrot.slane %v8106_v38, 9  ;;  %v8228_v3 = vrot.slane %v13711_v23, 5  ;;  %v19065_v21 = vadd.f32 %v13036_v42, %v12924_v35  ;;  %v11873_v31 = vrot.slane %v8107_v19, 9  ;;  %v8126_v6 = vld [vmem:[#allocation2 + $0x120] sm:$0xe] }
 0x506   :  { %v12944_v1 = vpop.f32.mrb[175].mxu1  ;;  %v8232_v22 = vrot.slane %v13712_v2, 5  ;;  %v19067_v10 = vadd.f32 %v13039_v51, %v12927_v14  ;;  %v12930_v34 = vadd.f32 %v18958_v20, %v18950_v59  ;;  %v20291_v17 = vcombine.low %v20289_v61, %v20290_v30  ;;  %v8110_v20 = vld [vmem:[#allocation2 + $0x80] sm:$0xe]  ;;  %v20294_v2 = vld [vmem:[#allocation60_spill] sm:$0xff] }
 0x507   :  { %v13048_v57 = vadd.f32 %v18987_v7, %v18977_v47  ;;  %v12933_v43 = vadd.f32 %v18967_v41, %v18963_v26  ;;  %v13051_v42 = vadd.f32 %v18999_v58, %v18993_v12  ;;  %v8229_v59 = vsel %vm13972_vm11, %v11872_v0, %v8228_v3  ;;  %v8111_v7 = vld [vmem:[#allocation2 + $0x88] sm:$0xe] }
 0x508   :  { %v13058_v29 = vpop.f32.mrb[208].mxu0  ;;  %v19080_v51 = vadd.f32 %v13042_v44, %v12930_v34  ;;  %v8233_v47 = vsel %vm13972_vm11, %v11873_v31, %v8232_v22  ;;  %v12936_v26 = vadd.f32 %v19011_v63, %v19003_v52  ;;  %v13054_v41 = vadd.f32 %v13053_v55, %v13052_v28  ;;  %v13713_v44 = vld [vmem:[#allocation2 + $0x84] sm:$0x1]  ;;  %v20293_v31 = vld [vmem:[#allocation52_spill] sm:$0xff] }
 0x509   :  { %v13059_v36 = vpop.f32.mrb[209].mxu0  ;;  %v19084_v38 = vadd.f32 %v13045_v18, %v12933_v43  ;;  %v12939_v12 = vadd.f32 %v19025_v16, %v19021_v46  ;;  %v13057_v19 = vadd.f32 %v13056_v50, %v13055_v11  ;;  %v11876_v35 = vrot.slane %v8110_v20, 9  ;;  %v20292_v11 = vld [vmem:[#allocation43_spill] sm:$0xff]  ;;  %v13714_v34 = vld [vmem:[#allocation2 + $0x8c] sm:$0x1] }
 0x50a   :  { %13395 = vmatmul.mubr.bf16.vlgmr.msra.gmra.mrb[0].mxu1 %v20291_v17  ;;  %v13061_v54 = vpop.f32.mrb[210].mxu0  ;;  %v8244_v40 = vrot.slane %v13713_v44, 5  ;;  %v19092_v14 = vadd.f32 %v13048_v57, %v12936_v26  ;;  %v12028_v23 = vcombine.low %v8229_v59, %v8233_v47  ;;  %v11877_v3 = vrot.slane %v8111_v7, 9  ;;  %v20296_v57 = vld [vmem:[#allocation34_spill] sm:$0xff] }
 0x50b   :  { %13398 = vmatprep.mubr.bf16.mxu1 %v12026_v32  ;;  %v13062_v24 = vpop.f32.mrb[211].mxu0  ;;  %v19094_v18 = vadd.f32 %v13051_v42, %v12939_v12  ;;  %v8127_v32 = vld [vmem:[#allocation2 + $0x128] sm:$0xe]  ;;  %v12942_v52 = vadd.f32 %v12941_v15, %v12940_v39  ;;  %v13060_v63 = vadd.f32 %v13059_v36, %v13058_v29  ;;  %v12945_v55 = vadd.f32 %v12944_v1, %v12943_v25 }
 0x50c   :  { %v12946_v58 = vpop.f32.mrb[176].mxu1  ;;  %v13063_v46 = vadd.f32 %v13062_v24, %v13061_v54  ;;  %v11892_v16 = vrot.slane %v8126_v6, 9  ;;  %v8308_v50 = vrot.slane %v20292_v11, 5  ;;  %v20295_v22 = vcombine.low %v20293_v31, %v20294_v2  ;;  %v8114_v6 = vld [vmem:[#allocation2 + $0xb0] sm:$0xe] }
 0x50d   :  { %v12947_v60 = vpop.f32.mrb[177].mxu1  ;;  %v8248_v61 = vrot.slane %v13714_v34, 5  ;;  %v19100_v30 = vadd.f32 %v13054_v41, %v12942_v52  ;;  %v11893_v17 = vrot.slane %v8127_v32, 9  ;;  %v8312_v43 = vrot.slane %v20296_v57, 5  ;;  %v13716_v11 = vld [vmem:[#allocation2 + $0xbc] sm:$0x1] }
 0x50e   :  { %v12949_v0 = vpop.f32.mrb[178].mxu1  ;;  %v19103_v39 = vadd.f32 %v13057_v19, %v12945_v55  ;;  %v19107_v15 = vsel %vm13972_vm11, %v11892_v16, %v8308_v50  ;;  %v12948_v25 = vadd.f32 %v12947_v60, %v12946_v58  ;;  %v8245_v26 = vsel %vm13972_vm11, %v11876_v35, %v8244_v40  ;;  %v8115_v60 = vld [vmem:[#allocation2 + $0xb8] sm:$0xe]  ;;  %v20298_v55 = vld [vmem:[#allocation29_spill] sm:$0xff] }
 0x50f   :  { %v12950_v28 = vpop.f32.mrb[179].mxu1  ;;  %v19111_v29 = vsel %vm13972_vm11, %v11893_v17, %v8312_v43  ;;  %v8249_v41 = vsel %vm13972_vm11, %v11877_v3, %v8248_v61  ;;  %v11880_v35 = vrot.slane %v8114_v6, 9  ;;  %v13715_v40 = vld [vmem:[#allocation2 + $0xb4] sm:$0x1]  ;;  %v8264_v50 = vrot.slane %v13716_v11, 5 }
 0x510   :  { %v12951_v54 = vadd.f32 %v12950_v28, %v12949_v0  ;;  %v12038_v59 = vcombine.low %v19107_v15, %v19111_v29  ;;  %v19115_v20 = vadd.f32 %v13060_v63, %v12948_v25  ;;  %v20297_v28 = vld [vmem:[#allocation27_spill] sm:$0xff]  ;;  %v8260_v3 = vrot.slane %v13715_v40, 5  ;;  %v8118_v25 = vld [vmem:[#allocation2 + $0xd0] sm:$0xe]  ;;  %v13717_v6 = vld [vmem:[#allocation2 + $0xd4] sm:$0x1] }
 0x511   :  { %v13064_v42 = vpop.f32.mrb[212].mxu0  ;;  %v20299_v16 = vcombine.low %v20297_v28, %v20298_v55  ;;  %v20317_v15 = vld [vmem:[#allocation42_spill] sm:$0xff] }
 0x512   :  { %13399 = vmatmul.mubr.bf16.gmra.mrb[4].mxu1 %v20295_v22  ;;  %v13065_v1 = vpop.f32.mrb[213].mxu0  ;;  %v19121_v12 = vadd.f32 %v13063_v46, %v12951_v54  ;;  %v11881_v46 = vrot.slane %v8115_v60, 9  ;;  %v8261_v57 = vsel %vm13972_vm11, %v11880_v35, %v8260_v3  ;;  %v8276_v60 = vrot.slane %v13717_v6, 5 }
 0x513   :  { %13402 = vmatprep.mubr.bf16.mxu1 %v12028_v23  ;;  %v13066_v36 = vadd.f32 %v13065_v1, %v13064_v42  ;;  %v13067_v24 = vpop.f32.mrb[214].mxu0  ;;  %v12030_v23 = vcombine.low %v8245_v26, %v8249_v41  ;;  %v8119_v1 = vld [vmem:[#allocation2 + $0xd8] sm:$0xe] }
 0x514   :  { %v13068_v47 = vpop.f32.mrb[215].mxu0  ;;  %v8265_v43 = vsel %vm13972_vm11, %v11881_v46, %v8264_v50  ;;  %v20300_v26 = vld [vmem:[#allocation58_spill] sm:$0xff]  ;;  %v8122_v50 = vld [vmem:[#allocation2 + $0x100] sm:$0xe] }
 0x515   :  { %v12952_v7 = vpop.f32.mrb[180].mxu1  ;;  %v13069_v58 = vadd.f32 %v13068_v47, %v13067_v24  ;;  %v12032_v24 = vcombine.low %v8261_v57, %v8265_v43  ;;  %v20301_v41 = vld [vmem:[#allocation18_spill] sm:$0xff] }
 0x516   :  { %v12953_v19 = vpop.f32.mrb[181].mxu1 }
 0x517   :  { %v12954_v44 = vadd.f32 %v12953_v19, %v12952_v7  ;;  %v12955_v32 = vpop.f32.mrb[182].mxu1  ;;  %v11884_v19 = vrot.slane %v8118_v25, 9 }
 0x518   :  { %v12956_v0 = vpop.f32.mrb[183].mxu1 }
 0x519   :  { %v19123_v52 = vadd.f32 %v13066_v36, %v12954_v44  ;;  %v12957_v63 = vadd.f32 %v12956_v0, %v12955_v32  ;;  %v11885_v44 = vrot.slane %v8119_v1, 9  ;;  %v13718_v32 = vld [vmem:[#allocation2 + $0xdc] sm:$0x1]  ;;  %v8277_v40 = vsel %vm13972_vm11, %v11884_v19, %v8276_v60  ;;  %v20303_v1 = vld [vmem:[#allocation59_spill] sm:$0xff] }
 0x51a   :  { %13403 = vmatmul.mubr.bf16.gmra.mrb[8].mxu1 %v20299_v16  ;;  %v13070_v31 = vpop.f32.mrb[216].mxu0  ;;  %v8280_v0 = vrot.slane %v13718_v32, 5 }
 0x51b   :  { %13406 = vmatprep.mubr.bf16.mxu1 %v12030_v23  ;;  %v13071_v2 = vpop.f32.mrb[217].mxu0  ;;  %v19128_v22 = vadd.f32 %v13069_v58, %v12957_v63  ;;  %v20302_v58 = vcombine.low %v20300_v26, %v20301_v41  ;;  %v20307_v26 = vld [vmem:[#allocation10_spill] sm:$0xff] }
 0x51c   :  { %v13072_v34 = vadd.f32 %v13071_v2, %v13070_v31  ;;  %v13073_v61 = vpop.f32.mrb[218].mxu0  ;;  %v8281_v3 = vsel %vm13972_vm11, %v11885_v44, %v8280_v0  ;;  %v8123_v31 = vld [vmem:[#allocation2 + $0x108] sm:$0xe]  ;;  %v8296_v41 = vrot.slane %v20307_v26, 5 }
 0x51d   :  { %v13074_v17 = vpop.f32.mrb[219].mxu0  ;;  %v12034_v57 = vcombine.low %v8277_v40, %v8281_v3  ;;  %v20308_v3 = vld [vmem:[#allocation30_spill] sm:$0xff] }
 0x51e   :  { %v13075_v42 = vadd.f32 %v13074_v17, %v13073_v61  ;;  %v12958_v36 = vpop.f32.mrb[184].mxu1 }
 0x51f   :  { %v12959_v54 = vpop.f32.mrb[185].mxu1 }
 0x520   :  { %v12960_v47 = vadd.f32 %v12959_v54, %v12958_v36  ;;  %v12961_v7 = vpop.f32.mrb[186].mxu1  ;;  %v11888_v54 = vrot.slane %v8122_v50, 9 }
 0x521   :  { %v12962_v23 = vpop.f32.mrb[187].mxu1 }
 0x522   :  { %13407 = vmatmul.mubr.bf16.gmra.mrb[12].mxu1 %v20302_v58  ;;  %v19137_v63 = vadd.f32 %v13072_v34, %v12960_v47  ;;  %v12963_v28 = vadd.f32 %v12962_v23, %v12961_v7  ;;  %v11889_v7 = vrot.slane %v8123_v31, 9 }
 0x523   :  { %13410 = vmatprep.mubr.bf16.mxu1 %v12032_v24  ;;  %v13076_v55 = vpop.f32.mrb[220].mxu0  ;;  %v20306_v24 = vld [vmem:[#allocation15_spill] sm:$0xff] }
 0x524   :  { %v13077_v16 = vpop.f32.mrb[221].mxu0  ;;  %v19139_v35 = vadd.f32 %v13075_v42, %v12963_v28  ;;  %v20304_v42 = vld [vmem:[#allocation19_spill] sm:$0xff]  ;;  %v8292_v47 = vrot.slane %v20306_v24, 5  ;;  %v8297_v32 = vsel %vm13972_vm11, %v11889_v7, %v8296_v41 }
 0x525   :  { %v13078_v46 = vadd.f32 %v13077_v16, %v13076_v55  ;;  %v13079_v11 = vpop.f32.mrb[222].mxu0  ;;  %v20305_v36 = vcombine.low %v20303_v1, %v20304_v42  ;;  %v20312_v1 = vld [vmem:[#allocation54_spill] sm:$0xff]  ;;  %v20314_v7 = vld [vmem:[#allocation39_spill] sm:$0xff] }
 0x526   :  { %v13080_v2 = vpop.f32.mrb[223].mxu0  ;;  %v8293_v44 = vsel %vm13972_vm11, %v11888_v54, %v8292_v47  ;;  %v20313_v47 = vld [vmem:[#allocation40_spill] sm:$0xff] }
 0x527   :  { %v12964_v61 = vpop.f32.mrb[188].mxu1  ;;  %v13081_v17 = vadd.f32 %v13080_v2, %v13079_v11  ;;  %v12036_v28 = vcombine.low %v8293_v44, %v8297_v32  ;;  %v20309_v11 = vld [vmem:[#allocation9_spill] sm:$0xff]  ;;  %v20315_v26 = vcombine.low %v20313_v47, %v20314_v7  ;;  %v20318_v7 = vld [vmem:[#allocation35_spill] sm:$0xff] }
 0x528   :  { %v12965_v34 = vpop.f32.mrb[189].mxu1 }
 0x529   :  { %v12966_v43 = vadd.f32 %v12965_v34, %v12964_v61  ;;  %v12967_v25 = vpop.f32.mrb[190].mxu1  ;;  %v20311_v34 = vld [vmem:[#allocation47_spill] sm:$0xff] }
 0x52a   :  { %13411 = vmatmul.mubr.bf16.gmra.mrb[16].mxu1 %v20305_v36  ;;  %v12968_v58 = vpop.f32.mrb[191].mxu1 }
 0x52b   :  { %13414 = vmatprep.mubr.bf16.mxu1 %v12034_v57  ;;  %v19150_v19 = vadd.f32 %v13078_v46, %v12966_v43  ;;  %v12969_v6 = vadd.f32 %v12968_v58, %v12967_v25  ;;  %v20310_v46 = vcombine.low %v20308_v3, %v20309_v11 }
 0x52d   :  { %v19152_v60 = vadd.f32 %v13081_v17, %v12969_v6 }
 0x52f   :  { %v13210_v0 = vpop.f32.mrb[224].mxu0 }
 0x530   :  { %v13211_v23 = vpop.f32.mrb[225].mxu0 }
 0x531   :  { %v19158_v55 = vadd.f32 %v13211_v23, %v13210_v0  ;;  %v13213_v16 = vpop.f32.mrb[226].mxu0  ;;  %v13098_v40 = vpop.f32.mrb[192].mxu1 }
 0x532   :  { %13415 = vmatmul.mubr.bf16.gmra.mrb[20].mxu1 %v20310_v46  ;;  %v13214_v50 = vpop.f32.mrb[227].mxu0  ;;  %v13099_v31 = vpop.f32.mrb[193].mxu1 }
 0x533   :  { %13418 = vmatprep.mubr.bf16.mxu1 %v12036_v28  ;;  %v19163_v2 = vadd.f32 %v13214_v50, %v13213_v16  ;;  %v13100_v61 = vadd.f32 %v13099_v31, %v13098_v40  ;;  %v13101_v17 = vpop.f32.mrb[194].mxu1  ;;  %v20316_v40 = vld [vmem:[#allocation41_spill] sm:$0xff] }
 0x534   :  { %v13102_v8 = vpop.f32.mrb[195].mxu1 }
 0x535   :  { %v9928_v57 = vadd.f32 %v13100_v61, %v20311_v34  ;;  %v13103_v43 = vadd.f32 %v13102_v8, %v13101_v17 }
 0x537   :  { %v13216_v25 = vpop.f32.mrb[228].mxu0  ;;  %v9931_v42 = vadd.f32 %v13103_v43, %v20312_v1 }
 0x538   :  { %v13217_v36 = vpop.f32.mrb[229].mxu0 }
 0x539   :  { %v13218_v54 = vadd.f32 %v13217_v36, %v13216_v25  ;;  %v13219_v24 = vpop.f32.mrb[230].mxu0 }
 0x53a   :  { %13419 = vmatmul.mubr.bf16.gmra.mrb[24].mxu1 %v20315_v26  ;;  %v13220_v41 = vpop.f32.mrb[231].mxu0 }
 0x53b   :  { %13422 = vmatprep.mubr.bf16.mxu1 %v12038_v59  ;;  %v13221_v58 = vadd.f32 %v13220_v41, %v13219_v24 }
 0x53d   :  { %v13104_v6 = vpop.f32.mrb[196].mxu1 }
 0x53e   :  { %v13105_v44 = vpop.f32.mrb[197].mxu1 }
 0x53f   :  { %v13106_v32 = vadd.f32 %v13105_v44, %v13104_v6  ;;  %v13222_v0 = vpop.f32.mrb[232].mxu0  ;;  %v13107_v23 = vpop.f32.mrb[198].mxu1 }
 0x540   :  { %v13223_v28 = vpop.f32.mrb[233].mxu0  ;;  %v13108_v16 = vpop.f32.mrb[199].mxu1 }
 0x541   :  { %v9936_v3 = vadd.f32 %v13106_v32, %v20316_v40  ;;  %v13224_v11 = vadd.f32 %v13223_v28, %v13222_v0  ;;  %v13109_v46 = vadd.f32 %v13108_v16, %v13107_v23  ;;  %v13225_v50 = vpop.f32.mrb[234].mxu0 }
 0x542   :  { %13423 = vmatmul.mubr.bf16.gmra.mrb[28].mxu1 %v12039_v37  ;;  %v13226_v31 = vpop.f32.mrb[235].mxu0 }
 0x543   :  { %v9939_v29 = vadd.f32 %v13109_v46, %v20317_v15  ;;  %v13227_v59 = vadd.f32 %v13226_v31, %v13225_v50 }
 0x549   :  { %v13110_v61 = vpop.f32.mrb[200].mxu1  ;;  %v13228_v17 = vpop.f32.mrb[236].mxu0 }
 0x54a   :  { %v13111_v8 = vpop.f32.mrb[201].mxu1  ;;  %v13229_v34 = vpop.f32.mrb[237].mxu0 }
 0x54b   :  { %v13112_v43 = vadd.f32 %v13111_v8, %v13110_v61  ;;  %v13113_v25 = vpop.f32.mrb[202].mxu1  ;;  %v13230_v1 = vadd.f32 %v13229_v34, %v13228_v17  ;;  %v13231_v36 = vpop.f32.mrb[238].mxu0  ;;  %v19182_v8 = vadd.f32 %v13218_v54, %v9936_v3 }
 0x54c   :  { %v13114_v24 = vpop.f32.mrb[203].mxu1  ;;  %v13232_v47 = vpop.f32.mrb[239].mxu0 }
 0x54d   :  { %v9944_v26 = vadd.f32 %v13112_v43, %v20318_v7  ;;  %v13115_v41 = vadd.f32 %v13114_v24, %v13113_v25  ;;  %v13233_v6 = vadd.f32 %v13232_v47, %v13231_v36  ;;  %v19185_v25 = vadd.f32 %v19158_v55, %v9928_v57 }
 0x54e   :  { %v19187_v47 = vadd.f32 %v13221_v58, %v9939_v29 }
 0x54f   :  { %v9947_v49 = vadd.f32 %v13115_v41, %v20319_v27 }
 0x552   :  { %v13116_v37 = vpop.f32.mrb[204].mxu1 }
 0x553   :  { %v13117_v44 = vpop.f32.mrb[205].mxu1 }
 0x554   :  { %v13118_v32 = vadd.f32 %v13117_v44, %v13116_v37  ;;  %v13234_v0 = vpop.f32.mrb[240].mxu0  ;;  %v13119_v23 = vpop.f32.mrb[206].mxu1  ;;  %v19190_v37 = vadd.f32 %v19163_v2, %v9931_v42  ;;  %v19200_v2 = vadd.f32 %v13227_v59, %v9947_v49 }
 0x555   :  { %v13235_v28 = vpop.f32.mrb[241].mxu0  ;;  %v13120_v16 = vpop.f32.mrb[207].mxu1 }
 0x556   :  { %v9952_v40 = vadd.f32 %v13118_v32, %v18944_v5  ;;  %v13236_v46 = vadd.f32 %v13235_v28, %v13234_v0  ;;  %v13121_v50 = vadd.f32 %v13120_v16, %v13119_v23  ;;  %v13237_v31 = vpop.f32.mrb[242].mxu0  ;;  %v19196_v0 = vadd.f32 %v13224_v11, %v9944_v26 }
 0x557   :  { %v13238_v15 = vpop.f32.mrb[243].mxu0 }
 0x558   :  { %v9955_v61 = vadd.f32 %v13121_v50, %v18953_v62  ;;  %v13239_v17 = vadd.f32 %v13238_v15, %v13237_v31  ;;  %v19194_v57 = vadd.f32 %v13230_v1, %v9952_v40 }
 0x55a   :  { %v19198_v50 = vadd.f32 %v13233_v6, %v9955_v61 }
 0x55d   :  { %v13122_v34 = vpop.f32.mrb[208].mxu1  ;;  %v13240_v43 = vpop.f32.mrb[244].mxu0 }
 0x55e   :  { %v13123_v36 = vpop.f32.mrb[209].mxu1  ;;  %v13241_v24 = vpop.f32.mrb[245].mxu0 }
 0x55f   :  { %v13124_v7 = vadd.f32 %v13123_v36, %v13122_v34  ;;  %v13125_v5 = vpop.f32.mrb[210].mxu1  ;;  %v13242_v41 = vadd.f32 %v13241_v24, %v13240_v43  ;;  %v13243_v27 = vpop.f32.mrb[246].mxu0 }
 0x560   :  { %v13126_v62 = vpop.f32.mrb[211].mxu1  ;;  %v13244_v44 = vpop.f32.mrb[247].mxu0 }
 0x561   :  { %v9960_v54 = vadd.f32 %v13124_v7, %v18991_v53  ;;  %v13127_v3 = vadd.f32 %v13126_v62, %v13125_v5  ;;  %v13245_v32 = vadd.f32 %v13244_v44, %v13243_v27 }
 0x563   :  { %v9963_v55 = vadd.f32 %v13127_v3, %v18995_v13  ;;  %v19206_v43 = vadd.f32 %v13236_v46, %v9960_v54 }
 0x565   :  { %v19210_v6 = vadd.f32 %v13239_v17, %v9963_v55 }
 0x566   :  { %v13128_v58 = vpop.f32.mrb[212].mxu1 }
 0x567   :  { %v13129_v29 = vpop.f32.mrb[213].mxu1 }
 0x568   :  { %v13130_v23 = vadd.f32 %v13129_v29, %v13128_v58  ;;  %v13246_v28 = vpop.f32.mrb[248].mxu0  ;;  %v13131_v16 = vpop.f32.mrb[214].mxu1 }
 0x569   :  { %v13247_v42 = vpop.f32.mrb[249].mxu0  ;;  %v13132_v31 = vpop.f32.mrb[215].mxu1 }
 0x56a   :  { %v9968_v53 = vadd.f32 %v13130_v23, %v19015_v56  ;;  %v13248_v15 = vadd.f32 %v13247_v42, %v13246_v28  ;;  %v13133_v34 = vadd.f32 %v13132_v31, %v13131_v16  ;;  %v13249_v13 = vpop.f32.mrb[250].mxu0 }
 0x56b   :  { %v13250_v1 = vpop.f32.mrb[251].mxu0 }
 0x56c   :  { %v9971_v11 = vadd.f32 %v13133_v34, %v19027_v33  ;;  %v13251_v26 = vadd.f32 %v13250_v1, %v13249_v13  ;;  %v19204_v40 = vadd.f32 %v13242_v41, %v9968_v53 }
 0x56e   :  { %v19208_v36 = vadd.f32 %v13245_v32, %v9971_v11 }
 0x571   :  { %v13134_v59 = vpop.f32.mrb[216].mxu1 }
 0x572   :  { %v13135_v49 = vpop.f32.mrb[217].mxu1  ;;  %v13252_v61 = vpop.f32.mrb[252].mxu0 }
 0x573   :  { %v13136_v24 = vadd.f32 %v13135_v49, %v13134_v59  ;;  %v13137_v56 = vpop.f32.mrb[218].mxu1  ;;  %v13253_v7 = vpop.f32.mrb[253].mxu0 }
 0x574   :  { %v13254_v5 = vadd.f32 %v13253_v7, %v13252_v61  ;;  %v13138_v27 = vpop.f32.mrb[219].mxu1  ;;  %v13255_v62 = vpop.f32.mrb[254].mxu0 }
 0x575   :  { %v9976_v33 = vadd.f32 %v13136_v24, %v19037_v4  ;;  %v13139_v44 = vadd.f32 %v13138_v27, %v13137_v56  ;;  %v13256_v41 = vpop.f32.mrb[255].mxu0 }
 0x576   :  { %v13257_v3 = vadd.f32 %v13256_v41, %v13255_v62 }
 0x577   :  { %v9979_v46 = vadd.f32 %v13139_v44, %v19039_v9  ;;  %v19214_v54 = vadd.f32 %v13248_v15, %v9976_v33 }
 0x579   :  { %v19216_v17 = vadd.f32 %v13251_v26, %v9979_v46 }
 0x57b   :  { %v13140_v32 = vpop.f32.mrb[220].mxu1 }
 0x57c   :  { %v13141_v55 = vpop.f32.mrb[221].mxu1 }
 0x57d   :  { %v13142_v58 = vadd.f32 %v13141_v55, %v13140_v32  ;;  %v13258_v29 = vpop.f32.mrb[0].mxu0  ;;  %v13143_v23 = vpop.f32.mrb[222].mxu1 }
 0x57e   :  { %v13259_v28 = vpop.f32.mrb[1].mxu0  ;;  %v13144_v16 = vpop.f32.mrb[223].mxu1 }
 0x57f   :  { %v9984_v42 = vadd.f32 %v13142_v58, %v19053_v45  ;;  %v13260_v31 = vadd.f32 %v13259_v28, %v13258_v29  ;;  %v13145_v4 = vadd.f32 %v13144_v16, %v13143_v23  ;;  %v13261_v53 = vpop.f32.mrb[2].mxu0 }
 0x580   :  { %v13262_v34 = vpop.f32.mrb[3].mxu0 }
 0x581   :  { %v9987_v13 = vadd.f32 %v13145_v4, %v19055_v48  ;;  %v13263_v9 = vadd.f32 %v13262_v34, %v13261_v53  ;;  %v19220_v15 = vadd.f32 %v13254_v5, %v9984_v42 }
 0x583   :  { %v19222_v1 = vadd.f32 %v13257_v3, %v9987_v13 }
 0x586   :  { %v13146_v11 = vpop.f32.mrb[224].mxu1 }
 0x587   :  { %v13264_v26 = vpop.f32.mrb[4].mxu0  ;;  %v13147_v59 = vpop.f32.mrb[225].mxu1 }
 0x588   :  { %v13265_v49 = vpop.f32.mrb[5].mxu0  ;;  %v13148_v61 = vadd.f32 %v13147_v59, %v13146_v11  ;;  %v13149_v24 = vpop.f32.mrb[226].mxu1 }
 0x589   :  { %v13266_v56 = vadd.f32 %v13265_v49, %v13264_v26  ;;  %v13267_v7 = vpop.f32.mrb[6].mxu0  ;;  %v13150_v45 = vpop.f32.mrb[227].mxu1 }
 0x58a   :  { %v13268_v27 = vpop.f32.mrb[7].mxu0  ;;  %v9992_v62 = vadd.f32 %v13148_v61, %v19065_v21  ;;  %v13151_v33 = vadd.f32 %v13150_v45, %v13149_v24 }
 0x58b   :  { %v13269_v44 = vadd.f32 %v13268_v27, %v13267_v7 }
 0x58c   :  { %v9995_v48 = vadd.f32 %v13151_v33, %v19067_v10  ;;  %v19226_v5 = vadd.f32 %v13260_v31, %v9992_v62 }
 0x58e   :  { %v19228_v41 = vadd.f32 %v13263_v9, %v9995_v48 }
 0x590   :  { %v13152_v3 = vpop.f32.mrb[228].mxu1 }
 0x591   :  { %v13153_v46 = vpop.f32.mrb[229].mxu1 }
 0x592   :  { %v13154_v32 = vadd.f32 %v13153_v46, %v13152_v3  ;;  %v13155_v58 = vpop.f32.mrb[230].mxu1 }
 0x593   :  { %v13270_v55 = vpop.f32.mrb[8].mxu0  ;;  %v13156_v23 = vpop.f32.mrb[231].mxu1 }
 0x594   :  { %v13271_v29 = vpop.f32.mrb[9].mxu0  ;;  %v10000_v28 = vadd.f32 %v13154_v32, %v19080_v51  ;;  %v13157_v42 = vadd.f32 %v13156_v23, %v13155_v58 }
 0x595   :  { %v13272_v16 = vadd.f32 %v13271_v29, %v13270_v55  ;;  %v13273_v21 = vpop.f32.mrb[10].mxu0 }
 0x596   :  { %v13274_v4 = vpop.f32.mrb[11].mxu0  ;;  %v10003_v53 = vadd.f32 %v13157_v42, %v19084_v38  ;;  %v19232_v31 = vadd.f32 %v13266_v56, %v10000_v28 }
 0x597   :  { %v13275_v10 = vadd.f32 %v13274_v4, %v13273_v21 }
 0x598   :  { %v19234_v34 = vadd.f32 %v13269_v44, %v10003_v53 }
 0x59c   :  { %v13158_v13 = vpop.f32.mrb[232].mxu1  ;;  %v13276_v9 = vpop.f32.mrb[12].mxu0 }
 0x59d   :  { %v13159_v11 = vpop.f32.mrb[233].mxu1  ;;  %v13277_v26 = vpop.f32.mrb[13].mxu0 }
 0x59e   :  { %v13160_v59 = vadd.f32 %v13159_v11, %v13158_v13  ;;  %v13161_v49 = vpop.f32.mrb[234].mxu1  ;;  %v13278_v61 = vadd.f32 %v13277_v26, %v13276_v9  ;;  %v13279_v24 = vpop.f32.mrb[14].mxu0 }
 0x59f   :  { %v13162_v51 = vpop.f32.mrb[235].mxu1  ;;  %v13280_v7 = vpop.f32.mrb[15].mxu0 }
 0x5a0   :  { %v10008_v45 = vadd.f32 %v13160_v59, %v19092_v14  ;;  %v13163_v27 = vadd.f32 %v13162_v51, %v13161_v49  ;;  %v13281_v62 = vadd.f32 %v13280_v7, %v13279_v24 }
 0x5a2   :  { %v10011_v38 = vadd.f32 %v13163_v27, %v19094_v18  ;;  %v19238_v56 = vadd.f32 %v13272_v16, %v10008_v45 }
 0x5a4   :  { %v19240_v33 = vadd.f32 %v13275_v10, %v10011_v38 }
 0x5a8   :  { %v13164_v44 = vpop.f32.mrb[236].mxu1 }
 0x5a9   :  { %v13282_v48 = vpop.f32.mrb[16].mxu0  ;;  %v13165_v3 = vpop.f32.mrb[237].mxu1 }
 0x5aa   :  { %v13283_v46 = vpop.f32.mrb[17].mxu0  ;;  %v13166_v32 = vadd.f32 %v13165_v3, %v13164_v44  ;;  %v13167_v55 = vpop.f32.mrb[238].mxu1 }
 0x5ab   :  { %v13284_v58 = vadd.f32 %v13283_v46, %v13282_v48  ;;  %v13285_v29 = vpop.f32.mrb[18].mxu0  ;;  %v13168_v23 = vpop.f32.mrb[239].mxu1 }
 0x5ac   :  { %v13286_v28 = vpop.f32.mrb[19].mxu0  ;;  %v10016_v14 = vadd.f32 %v13166_v32, %v19100_v30  ;;  %v13169_v42 = vadd.f32 %v13168_v23, %v13167_v55 }
 0x5ad   :  { %v13287_v21 = vadd.f32 %v13286_v28, %v13285_v29 }
 0x5ae   :  { %v10019_v18 = vadd.f32 %v13169_v42, %v19103_v39  ;;  %v19244_v16 = vadd.f32 %v13278_v61, %v10016_v14 }
 0x5b0   :  { %v19246_v4 = vadd.f32 %v13281_v62, %v10019_v18 }
 0x5b3   :  { %v13288_v53 = vpop.f32.mrb[20].mxu0 }
 0x5b4   :  { %v13289_v10 = vpop.f32.mrb[21].mxu0 }
 0x5b5   :  { %v13170_v13 = vpop.f32.mrb[240].mxu1  ;;  %v13290_v9 = vadd.f32 %v13289_v10, %v13288_v53  ;;  %v13291_v11 = vpop.f32.mrb[22].mxu0 }
 0x5b6   :  { %v13171_v26 = vpop.f32.mrb[241].mxu1  ;;  %v13292_v59 = vpop.f32.mrb[23].mxu0 }
 0x5b7   :  { %v13172_v49 = vadd.f32 %v13171_v26, %v13170_v13  ;;  %v13173_v24 = vpop.f32.mrb[242].mxu1  ;;  %v13293_v51 = vadd.f32 %v13292_v59, %v13291_v11 }
 0x5b8   :  { %v13174_v7 = vpop.f32.mrb[243].mxu1 }
 0x5b9   :  { %v10024_v30 = vadd.f32 %v13172_v49, %v19115_v20  ;;  %v13175_v45 = vadd.f32 %v13174_v7, %v13173_v24 }
 0x5bb   :  { %v10027_v39 = vadd.f32 %v13175_v45, %v19121_v12  ;;  %v19250_v61 = vadd.f32 %v13284_v58, %v10024_v30 }
 0x5bd   :  { %v19252_v27 = vadd.f32 %v13287_v21, %v10027_v39 }
 0x5c0   :  { %v13176_v62 = vpop.f32.mrb[244].mxu1 }
 0x5c1   :  { %v13177_v44 = vpop.f32.mrb[245].mxu1 }
 0x5c2   :  { %v13294_v38 = vpop.f32.mrb[24].mxu0  ;;  %v13178_v3 = vadd.f32 %v13177_v44, %v13176_v62  ;;  %v13179_v46 = vpop.f32.mrb[246].mxu1 }
 0x5c3   :  { %v13295_v48 = vpop.f32.mrb[25].mxu0  ;;  %v13180_v29 = vpop.f32.mrb[247].mxu1 }
 0x5c4   :  { %v13296_v32 = vadd.f32 %v13295_v48, %v13294_v38  ;;  %v13297_v55 = vpop.f32.mrb[26].mxu0  ;;  %v10032_v28 = vadd.f32 %v13178_v3, %v19123_v52  ;;  %v13181_v20 = vadd.f32 %v13180_v29, %v13179_v46 }
 0x5c5   :  { %v13298_v23 = vpop.f32.mrb[27].mxu0 }
 0x5c6   :  { %v13299_v14 = vadd.f32 %v13298_v23, %v13297_v55  ;;  %v10035_v12 = vadd.f32 %v13181_v20, %v19128_v22  ;;  %v19256_v58 = vadd.f32 %v13290_v9, %v10032_v28 }
 0x5c8   :  { %v19258_v42 = vadd.f32 %v13293_v51, %v10035_v12 }
 0x5cb   :  { %v13300_v21 = vpop.f32.mrb[28].mxu0 }
 0x5cc   :  { %v13301_v18 = vpop.f32.mrb[29].mxu0 }
 0x5cd   :  { %v13182_v53 = vpop.f32.mrb[248].mxu1  ;;  %v13302_v10 = vadd.f32 %v13301_v18, %v13300_v21  ;;  %v13303_v13 = vpop.f32.mrb[30].mxu0 }
 0x5ce   :  { %v13183_v11 = vpop.f32.mrb[249].mxu1  ;;  %v13304_v26 = vpop.f32.mrb[31].mxu0 }
 0x5cf   :  { %v13184_v59 = vadd.f32 %v13183_v11, %v13182_v53  ;;  %v13185_v49 = vpop.f32.mrb[250].mxu1  ;;  %v13305_v24 = vadd.f32 %v13304_v26, %v13303_v13 }
 0x5d0   :  { %v13186_v7 = vpop.f32.mrb[251].mxu1 }
 0x5d1   :  { %v10040_v52 = vadd.f32 %v13184_v59, %v19137_v63  ;;  %v13187_v30 = vadd.f32 %v13186_v7, %v13185_v49 }
 0x5d3   :  { %v10043_v22 = vadd.f32 %v13187_v30, %v19139_v35  ;;  %v19262_v9 = vadd.f32 %v13296_v32, %v10040_v52 }
 0x5d5   :  { %v13188_v51 = vpop.f32.mrb[252].mxu1  ;;  %v19264_v45 = vadd.f32 %v13299_v14, %v10043_v22 }
 0x5d6   :  { %v13189_v39 = vpop.f32.mrb[253].mxu1 }
 0x5d7   :  { %v13190_v62 = vadd.f32 %v13189_v39, %v13188_v51  ;;  %v13191_v38 = vpop.f32.mrb[254].mxu1 }
 0x5d8   :  { %v13192_v44 = vpop.f32.mrb[255].mxu1 }
 0x5d9   :  { %v10048_v48 = vadd.f32 %v13190_v62, %v19150_v19  ;;  %v13193_v3 = vadd.f32 %v13192_v44, %v13191_v38 }
 0x5db   :  { %v10051_v46 = vadd.f32 %v13193_v3, %v19152_v60  ;;  %v19268_v55 = vadd.f32 %v13302_v10, %v10048_v48 }
 0x5dd   :  { %v13396_v63 = vpop.f32.mrb[0].mxu1  ;;  %v19270_v29 = vadd.f32 %v13305_v24, %v10051_v46 }
 0x5de   :  { %v19273_v35 = vadd.f32 %v13396_v63, %v19182_v8  ;;  %v10249_v32 = vpop.f32.mrb[1].mxu1 }
 0x5df   :  { %v19276_v23 = vadd.f32 %v10249_v32, %v19185_v25  ;;  %v13397_v28 = vpop.f32.mrb[2].mxu1 }
 0x5e0   :  { %v19279_v20 = vadd.f32 %v13397_v28, %v19187_v47  ;;  %v10252_v19 = vpop.f32.mrb[3].mxu1 }
 0x5e1   :  { %v19282_v14 = vadd.f32 %v10252_v19, %v19190_v37 }
 0x5e3   :  { %v10376_v60 = vadd.f32 %v19282_v14, %v19276_v23 }
 0x5e5   :  { %v10377_v12 = vadd.f32 %v10376_v60, %v19273_v35  ;;  %v13400_v21 = vpop.f32.mrb[4].mxu1 }
 0x5e6   :  { %v19288_v8 = vadd.f32 %v13400_v21, %v19194_v57  ;;  %v10265_v18 = vpop.f32.mrb[5].mxu1 }
 0x5e7   :  { %v19291_v25 = vadd.f32 %v10265_v18, %v19196_v0  ;;  %v10378_v47 = vadd.f32 %v10377_v12, %v19279_v20  ;;  %v13401_v53 = vpop.f32.mrb[6].mxu1 }
 0x5e8   :  { %v19295_v10 = vadd.f32 %v13401_v53, %v19198_v50  ;;  %v10268_v37 = vpop.f32.mrb[7].mxu1 }
 0x5e9   :  { %v10379_v13 = vadd.f32 %v10378_v47, %v19291_v25  ;;  %v19299_v11 = vadd.f32 %v10268_v37, %v19200_v2 }
 0x5eb   :  { %v10380_v26 = vadd.f32 %v10379_v13, %v19299_v11 }
 0x5ed   :  { %v10381_v57 = vadd.f32 %v10380_v26, %v19288_v8  ;;  %v13404_v59 = vpop.f32.mrb[8].mxu1 }
 0x5ee   :  { %v19304_v0 = vadd.f32 %v13404_v59, %v19204_v40  ;;  %v10281_v49 = vpop.f32.mrb[9].mxu1 }
 0x5ef   :  { %v19307_v24 = vadd.f32 %v10281_v49, %v19206_v43  ;;  %v10382_v50 = vadd.f32 %v10381_v57, %v19295_v10  ;;  %v13405_v7 = vpop.f32.mrb[10].mxu1 }
 0x5f0   :  { %v19311_v52 = vadd.f32 %v13405_v7, %v19208_v36  ;;  %v10284_v2 = vpop.f32.mrb[11].mxu1 }
 0x5f1   :  { %v10383_v30 = vadd.f32 %v10382_v50, %v19307_v24  ;;  %v19315_v22 = vadd.f32 %v10284_v2, %v19210_v6 }
 0x5f3   :  { %v10384_v51 = vadd.f32 %v10383_v30, %v19315_v22 }
 0x5f5   :  { %v10385_v40 = vadd.f32 %v10384_v51, %v19304_v0  ;;  %v13408_v39 = vpop.f32.mrb[12].mxu1 }
 0x5f6   :  { %v19320_v43 = vadd.f32 %v13408_v39, %v19220_v15  ;;  %v10297_v62 = vpop.f32.mrb[13].mxu1 }
 0x5f7   :  { %v19323_v38 = vadd.f32 %v10297_v62, %v19214_v54  ;;  %v10386_v36 = vadd.f32 %v10385_v40, %v19311_v52  ;;  %v13409_v44 = vpop.f32.mrb[14].mxu1 }
 0x5f8   :  { %v19327_v48 = vadd.f32 %v13409_v44, %v19222_v1  ;;  %v10300_v6 = vpop.f32.mrb[15].mxu1 }
 0x5f9   :  { %v10387_v3 = vadd.f32 %v10386_v36, %v19323_v38  ;;  %v19331_v46 = vadd.f32 %v10300_v6, %v19216_v17 }
 0x5fb   :  { %v10388_v63 = vadd.f32 %v10387_v3, %v19331_v46 }
 0x5fd   :  { %v10389_v15 = vadd.f32 %v10388_v63, %v19320_v43  ;;  %v13412_v32 = vpop.f32.mrb[16].mxu1 }
 0x5fe   :  { %v19336_v54 = vadd.f32 %v13412_v32, %v19232_v31  ;;  %v10313_v28 = vpop.f32.mrb[17].mxu1 }
 0x5ff   :  { %v19339_v19 = vadd.f32 %v10313_v28, %v19226_v5  ;;  %v10390_v1 = vadd.f32 %v10389_v15, %v19327_v48  ;;  %v13413_v60 = vpop.f32.mrb[18].mxu1 }
 0x600   :  { %v19343_v12 = vadd.f32 %v13413_v60, %v19234_v34  ;;  %v10316_v17 = vpop.f32.mrb[19].mxu1 }
 0x601   :  { %v10391_v21 = vadd.f32 %v10390_v1, %v19339_v19  ;;  %v19347_v18 = vadd.f32 %v10316_v17, %v19228_v41 }
 0x603   :  { %v10392_v47 = vadd.f32 %v10391_v21, %v19347_v18 }
 0x605   :  { %v10393_v31 = vadd.f32 %v10392_v47, %v19336_v54  ;;  %v13416_v53 = vpop.f32.mrb[20].mxu1 }
 0x606   :  { %v19352_v5 = vadd.f32 %v13416_v53, %v19244_v16  ;;  %v10329_v37 = vpop.f32.mrb[21].mxu1 }
 0x607   :  { %v19355_v13 = vadd.f32 %v10329_v37, %v19238_v56  ;;  %v10394_v34 = vadd.f32 %v10393_v31, %v19343_v12  ;;  %v13417_v26 = vpop.f32.mrb[22].mxu1 }
 0x608   :  { %v19359_v57 = vadd.f32 %v13417_v26, %v19246_v4  ;;  %v10332_v41 = vpop.f32.mrb[23].mxu1 }
 0x609   :  { %v10395_v59 = vadd.f32 %v10394_v34, %v19355_v13  ;;  %v19363_v49 = vadd.f32 %v10332_v41, %v19240_v33 }
 0x60b   :  { %v10396_v50 = vadd.f32 %v10395_v59, %v19363_v49 }
 0x60d   :  { %v10397_v16 = vadd.f32 %v10396_v50, %v19352_v5  ;;  %v13420_v7 = vpop.f32.mrb[24].mxu1 }
 0x60e   :  { %v19368_v56 = vadd.f32 %v13420_v7, %v19256_v58  ;;  %v10345_v2 = vpop.f32.mrb[25].mxu1 }
 0x60f   :  { %v19371_v30 = vadd.f32 %v10345_v2, %v19250_v61  ;;  %v10398_v4 = vadd.f32 %v10397_v16, %v19359_v57  ;;  %v13421_v51 = vpop.f32.mrb[26].mxu1 }
 0x610   :  { %v19375_v40 = vadd.f32 %v13421_v51, %v19258_v42  ;;  %v10348_v33 = vpop.f32.mrb[27].mxu1 }
 0x611   :  { %v10399_v39 = vadd.f32 %v10398_v4, %v19371_v30  ;;  %v19379_v62 = vadd.f32 %v10348_v33, %v19252_v27 }
 0x613   :  { %v10400_v36 = vadd.f32 %v10399_v39, %v19379_v62 }
 0x615   :  { %v10401_v58 = vadd.f32 %v10400_v36, %v19368_v56  ;;  %v13424_v44 = vpop.f32.mrb[28].mxu1 }
 0x616   :  { %v19384_v61 = vadd.f32 %v13424_v44, %v19268_v55  ;;  %v10361_v6 = vpop.f32.mrb[29].mxu1 }
 0x617   :  { %v19387_v3 = vadd.f32 %v10361_v6, %v19262_v9  ;;  %v10402_v42 = vadd.f32 %v10401_v58, %v19375_v40  ;;  %v13425_v63 = vpop.f32.mrb[30].mxu1 }
 0x618   :  { %v19391_v15 = vadd.f32 %v13425_v63, %v19270_v29  ;;  %v10364_v27 = vpop.f32.mrb[31].mxu1 }
 0x619   :  { %v10403_v32 = vadd.f32 %v10402_v42, %v19387_v3  ;;  %v19395_v28 = vadd.f32 %v10364_v27, %v19264_v45 }
 0x61b   :  { %v10404_v1 = vadd.f32 %v10403_v32, %v19395_v28 }
 0x61d   :  { %v10405_v55 = vadd.f32 %v10404_v1, %v19384_v61 }
 0x61f   :  { %v10406_v60 = vadd.f32 %v10405_v55, %v19391_v15 }
 0x621   :  { %v10407_v9 = vrot.slane %v10406_v60, 4 }
 0x623   :  { %v10408_v17 = vadd.f32 %v10407_v9, %v10406_v60 }
 0x625   :  { %v10409_v21 = vrot.slane %v10408_v17, 2 }
 0x627   :  { %v10410_v47 = vadd.f32 %v10409_v21, %v10408_v17 }
 0x629   :  { %v10411_v31 = vrot.slane %v10410_v47, 1 }
 0x62b   :  { %v10412_v53 = vadd.f32 %v10411_v31, %v10410_v47 }
 0x62d   :  { %v19400_v29 = vmul.f32 0.00390625, %v10412_v53 }
 0x62f   :  { %v10414_v37 = vsub.f32 %v19276_v23, %v19400_v29  ;;  %v10415_v45 = vsub.f32 %v19282_v14, %v19400_v29  ;;  %v10416_v34 = vsub.f32 %v19273_v35, %v19400_v29  ;;  %v10417_v59 = vsub.f32 %v19279_v20, %v19400_v29 }
 0x630   :  { %v10418_v50 = vsub.f32 %v19291_v25, %v19400_v29  ;;  %v10419_v2 = vsub.f32 %v19299_v11, %v19400_v29  ;;  %v10420_v33 = vsub.f32 %v19288_v8, %v19400_v29  ;;  %v10421_v58 = vsub.f32 %v19295_v10, %v19400_v29 }
 0x631   :  { %v10446_v26 = vmul.f32 %v10414_v37, %v10414_v37  ;;  %v10447_v41 = vmul.f32 %v10415_v45, %v10415_v45  ;;  %v10448_v16 = vmul.f32 %v10416_v34, %v10416_v34  ;;  %v10449_v4 = vmul.f32 %v10417_v59, %v10417_v59 }
 0x632   :  { %v10450_v39 = vmul.f32 %v10418_v50, %v10418_v50  ;;  %v10451_v44 = vmul.f32 %v10419_v2, %v10419_v2  ;;  %v10422_v42 = vsub.f32 %v19307_v24, %v19400_v29  ;;  %v10452_v63 = vmul.f32 %v10420_v33, %v10420_v33 }
 0x633   :  { %v10478_v7 = vadd.f32 %v10447_v41, %v10446_v26  ;;  %v10423_v32 = vsub.f32 %v19315_v22, %v19400_v29  ;;  %v10453_v1 = vmul.f32 %v10421_v58, %v10421_v58  ;;  %v10424_v60 = vsub.f32 %v19304_v0, %v19400_v29 }
 0x634   :  { %v10454_v9 = vmul.f32 %v10422_v42, %v10422_v42  ;;  %v10425_v21 = vsub.f32 %v19311_v52, %v19400_v29  ;;  %v10426_v53 = vsub.f32 %v19323_v38, %v19400_v29  ;;  %v10427_v34 = vsub.f32 %v19331_v46, %v19400_v29 }
 0x635   :  { %v10479_v51 = vadd.f32 %v10478_v7, %v10448_v16  ;;  %v10455_v47 = vmul.f32 %v10423_v32, %v10423_v32  ;;  %v10456_v37 = vmul.f32 %v10424_v60, %v10424_v60  ;;  %v10428_v59 = vsub.f32 %v19320_v43, %v19400_v29 }
 0x636   :  { %v10457_v26 = vmul.f32 %v10425_v21, %v10425_v21  ;;  %v10458_v50 = vmul.f32 %v10426_v53, %v10426_v53  ;;  %v10429_v7 = vsub.f32 %v19327_v48, %v19400_v29  ;;  %v10459_v2 = vmul.f32 %v10427_v34, %v10427_v34 }
 0x637   :  { %v10480_v36 = vadd.f32 %v10479_v51, %v10449_v4  ;;  %v10430_v51 = vsub.f32 %v19339_v19, %v19400_v29  ;;  %v10460_v33 = vmul.f32 %v10428_v59, %v10428_v59 }
 0x638   :  { %v10461_v58 = vmul.f32 %v10429_v7, %v10429_v7 }
 0x639   :  { %v10481_v6 = vadd.f32 %v10480_v36, %v10450_v39  ;;  %v10431_v36 = vsub.f32 %v19347_v18, %v19400_v29  ;;  %v10462_v42 = vmul.f32 %v10430_v51, %v10430_v51 }
 0x63b   :  { %v10482_v27 = vadd.f32 %v10481_v6, %v10451_v44  ;;  %v10432_v6 = vsub.f32 %v19336_v54, %v19400_v29  ;;  %v10463_v32 = vmul.f32 %v10431_v36, %v10431_v36 }
 0x63d   :  { %v10483_v55 = vadd.f32 %v10482_v27, %v10452_v63  ;;  %v10433_v27 = vsub.f32 %v19343_v12, %v19400_v29  ;;  %v10464_v60 = vmul.f32 %v10432_v6, %v10432_v6 }
 0x63f   :  { %v10484_v17 = vadd.f32 %v10483_v55, %v10453_v1  ;;  %v10434_v55 = vsub.f32 %v19355_v13, %v19400_v29  ;;  %v10465_v21 = vmul.f32 %v10433_v27, %v10433_v27 }
 0x641   :  { %v10485_v31 = vadd.f32 %v10484_v17, %v10454_v9  ;;  %v10435_v17 = vsub.f32 %v19363_v49, %v19400_v29  ;;  %v10466_v53 = vmul.f32 %v10434_v55, %v10434_v55 }
 0x643   :  { %v10486_v45 = vadd.f32 %v10485_v31, %v10455_v47  ;;  %v10436_v31 = vsub.f32 %v19352_v5, %v19400_v29  ;;  %v10467_v34 = vmul.f32 %v10435_v17, %v10435_v17 }
 0x645   :  { %v10487_v41 = vadd.f32 %v10486_v45, %v10456_v37  ;;  %v10437_v45 = vsub.f32 %v19359_v57, %v19400_v29  ;;  %v10468_v59 = vmul.f32 %v10436_v31, %v10436_v31 }
 0x647   :  { %v10488_v16 = vadd.f32 %v10487_v41, %v10457_v26  ;;  %v10438_v41 = vsub.f32 %v19371_v30, %v19400_v29  ;;  %v10469_v7 = vmul.f32 %v10437_v45, %v10437_v45 }
 0x649   :  { %v10489_v4 = vadd.f32 %v10488_v16, %v10458_v50  ;;  %v10439_v16 = vsub.f32 %v19379_v62, %v19400_v29  ;;  %v10470_v51 = vmul.f32 %v10438_v41, %v10438_v41 }
 0x64b   :  { %v10490_v39 = vadd.f32 %v10489_v4, %v10459_v2  ;;  %v10440_v4 = vsub.f32 %v19368_v56, %v19400_v29  ;;  %v10471_v36 = vmul.f32 %v10439_v16, %v10439_v16 }
 0x64d   :  { %v10491_v44 = vadd.f32 %v10490_v39, %v10460_v33  ;;  %v10441_v39 = vsub.f32 %v19375_v40, %v19400_v29  ;;  %v10472_v6 = vmul.f32 %v10440_v4, %v10440_v4  ;;  %v12256_v4 = vld [vmem:[%s19710_s2 + $0x1] sm:$0x1] }
 0x64f   :  { %v10492_v63 = vadd.f32 %v10491_v44, %v10461_v58  ;;  %v10442_v44 = vsub.f32 %v19387_v3, %v19400_v29  ;;  %v10473_v27 = vmul.f32 %v10441_v39, %v10441_v39  ;;  %v12257_v39 = vld [vmem:[%s19711_s3 + $0x1] sm:$0x1] }
 0x651   :  { %v10493_v1 = vadd.f32 %v10492_v63, %v10462_v42  ;;  %v10443_v63 = vsub.f32 %v19395_v28, %v19400_v29  ;;  %v10474_v55 = vmul.f32 %v10442_v44, %v10442_v44 }
 0x653   :  { %v10494_v9 = vadd.f32 %v10493_v1, %v10463_v32  ;;  %v10444_v1 = vsub.f32 %v19384_v61, %v19400_v29  ;;  %v10475_v17 = vmul.f32 %v10443_v63, %v10443_v63 }
 0x655   :  { %v10495_v47 = vadd.f32 %v10494_v9, %v10464_v60  ;;  %v10445_v9 = vsub.f32 %v19391_v15, %v19400_v29 }
 0x657   :  { %v10496_v37 = vadd.f32 %v10495_v47, %v10465_v21  ;;  %v10476_v47 = vmul.f32 %v10444_v1, %v10444_v1 }
 0x659   :  { %v10497_v26 = vadd.f32 %v10496_v37, %v10466_v53  ;;  %v10477_v53 = vmul.f32 %v10445_v9, %v10445_v9 }
 0x65b   :  { %v10498_v50 = vadd.f32 %v10497_v26, %v10467_v34 }
 0x65d   :  { %v10499_v2 = vadd.f32 %v10498_v50, %v10468_v59 }
 0x65f   :  { %v10500_v33 = vadd.f32 %v10499_v2, %v10469_v7 }
 0x661   :  { %v10501_v58 = vadd.f32 %v10500_v33, %v10470_v51 }
 0x663   :  { %v10502_v42 = vadd.f32 %v10501_v58, %v10471_v36  ;;  %v20320_v58 = vld [vmem:[#allocation45_spill] sm:$0xff] }
 0x665   :  { %v10503_v32 = vadd.f32 %v10502_v42, %v10472_v6 }
 0x667   :  { %v10504_v60 = vadd.f32 %v10503_v32, %v10473_v27 }
 0x669   :  { %v10505_v21 = vadd.f32 %v10504_v60, %v10474_v55 }
 0x66b   :  { %v10506_v31 = vadd.f32 %v10505_v21, %v10475_v17 }
 0x66d   :  { %v10507_v37 = vadd.f32 %v10506_v31, %v10476_v47 }
 0x66f   :  { %v10508_v45 = vadd.f32 %v10507_v37, %v10477_v53 }
 0x671   :  { %v10509_v34 = vrot.slane %v10508_v45, 4 }
 0x673   :  { %v10510_v26 = vadd.f32 %v10509_v34, %v10508_v45 }
 0x675   :  { %v10511_v41 = vrot.slane %v10510_v26, 2 }
 0x677   :  { %v10512_v59 = vadd.f32 %v10511_v41, %v10510_v26 }
 0x679   :  { %v10513_v50 = vrot.slane %v10512_v59, 1 }
 0x67b   :  { %v10514_v16 = vadd.f32 %v10513_v50, %v10512_v59 }
 0x67d   :  { %v10515_v7 = vmul.f32 0.00390625, %v10514_v16 }
 0x67f   :  { %v10518_v2 = vadd.f32 1e-05, %v10515_v7 }
 0x681   :  { %13672 = vrsqrt.f32 %v10518_v2 }
 0x68b   :  { %v13673_v51 = vpop.eup %13672 }
 0x68c   :  { %v10520_v33 = vmul.f32 %v13673_v51, %v12256_v4 }
 0x68e   :  { %v10523_v36 = vmul.f32 %v10520_v33, %v19400_v29  ;;  %v10529_v44 = vrot.slane %v10520_v33, %v20320_v58 }
 0x690   :  { %v10524_v6 = vsub.f32 %v12257_v39, %v10523_v36  ;;  %v10560_v42 = vmul.f32 %v10529_v44, %v19395_v28  ;;  %v10531_v63 = vmul.f32 %v10529_v44, %v19276_v23  ;;  %v10532_v27 = vmul.f32 %v10529_v44, %v19282_v14 }
 0x691   :  { %v10533_v32 = vmul.f32 %v10529_v44, %v19273_v35  ;;  %v10534_v1 = vmul.f32 %v10529_v44, %v19279_v20  ;;  %v10535_v55 = vmul.f32 %v10529_v44, %v19291_v25  ;;  %v10536_v60 = vmul.f32 %v10529_v44, %v19299_v11 }
 0x692   :  { %v10567_v9 = vrot.slane %v10524_v6, %v20320_v58  ;;  %v10537_v29 = vmul.f32 %v10529_v44, %v19288_v8  ;;  %v10538_v17 = vmul.f32 %v10529_v44, %v19295_v10  ;;  %v10539_v28 = vmul.f32 %v10529_v44, %v19307_v24 }
 0x693   :  { %v10540_v23 = vmul.f32 %v10529_v44, %v19315_v22  ;;  %v10541_v14 = vmul.f32 %v10529_v44, %v19304_v0  ;;  %v10542_v35 = vmul.f32 %v10529_v44, %v19311_v52  ;;  %v10543_v20 = vmul.f32 %v10529_v44, %v19323_v38  ;;  %v13719_v0 = vld [vmem:[%s19708_s0 + $0xe8] sm:$0xff] }
 0x694   :  { %v10598_v21 = vadd.f32 %v10567_v9, %v10560_v42  ;;  %v10544_v25 = vmul.f32 %v10529_v44, %v19331_v46  ;;  %v10545_v11 = vmul.f32 %v10529_v44, %v19320_v43  ;;  %v10546_v47 = vmul.f32 %v10529_v44, %v19327_v48 }
 0x695   :  { %v10547_v8 = vmul.f32 %v10529_v44, %v19339_v19  ;;  %v10548_v10 = vmul.f32 %v10529_v44, %v19347_v18  ;;  %v10549_v24 = vmul.f32 %v10529_v44, %v19336_v54  ;;  %v10550_v22 = vmul.f32 %v10529_v44, %v19343_v12 }
 0x696   :  { %v10662_v52 = vadd.f32 %v13719_v0, %v10598_v21  ;;  %v10551_v38 = vmul.f32 %v10529_v44, %v19355_v13  ;;  %v10552_v46 = vmul.f32 %v10529_v44, %v19363_v49  ;;  %v10553_v43 = vmul.f32 %v10529_v44, %v19352_v5 }
 0x697   :  { %v10554_v48 = vmul.f32 %v10529_v44, %v19359_v57  ;;  %v10555_v19 = vmul.f32 %v10529_v44, %v19371_v30  ;;  %v10556_v18 = vmul.f32 %v10529_v44, %v19379_v62  ;;  %v10557_v54 = vmul.f32 %v10529_v44, %v19368_v56 }
 0x698   :  { %v10694_v12 = vmax.f32 %v10662_v52, 0.0  ;;  %v10558_v31 = vmul.f32 %v10529_v44, %v19375_v40  ;;  %v10559_v53 = vmul.f32 %v10529_v44, %v19387_v3  ;;  %v10561_v37 = vmul.f32 %v10529_v44, %v19384_v61  ;;  %v13730_v52 = vld [vmem:[%s19708_s0 + $0x50] sm:$0xff] }
 0x699   :  { %v10562_v13 = vmul.f32 %v10529_v44, %v19391_v15  ;;  %v10569_v49 = vadd.f32 %v10567_v9, %v10531_v63  ;;  %v10570_v45 = vadd.f32 %v10567_v9, %v10532_v27  ;;  %v10571_v5 = vadd.f32 %v10567_v9, %v10533_v32 }
 0x69a   :  { %11405 = vst [vmem:[#allocation4 + $0xe8] sm:$0xff] %v10694_v12  ;;  %v10572_v57 = vadd.f32 %v10567_v9, %v10534_v1  ;;  %v10573_v34 = vadd.f32 %v10567_v9, %v10535_v55  ;;  %v10574_v30 = vadd.f32 %v10567_v9, %v10536_v60  ;;  %v10575_v26 = vadd.f32 %v10567_v9, %v10537_v29  ;;  %v13720_v1 = vld [vmem:[%s19708_s0] sm:$0xff]  ;;  %v13721_v60 = vld [vmem:[%s19708_s0 + $0x8] sm:$0xff]  ;;  %v13734_v12 = vld [vmem:[%s19708_s0 + $0x70] sm:$0xff] }
 0x69b   :  { %v10576_v62 = vadd.f32 %v10567_v9, %v10538_v17  ;;  %v10577_v41 = vadd.f32 %v10567_v9, %v10539_v28  ;;  %v10578_v56 = vadd.f32 %v10567_v9, %v10540_v23  ;;  %v10579_v59 = vadd.f32 %v10567_v9, %v10541_v14  ;;  %v13722_v17 = vld [vmem:[%s19708_s0 + $0x10] sm:$0xff]  ;;  %v13724_v14 = vld [vmem:[%s19708_s0 + $0x20] sm:$0xff] }
 0x69c   :  { %v10580_v50 = vadd.f32 %v10567_v9, %v10542_v35  ;;  %v10581_v40 = vadd.f32 %v10567_v9, %v10543_v20  ;;  %v10582_v16 = vadd.f32 %v10567_v9, %v10544_v25  ;;  %v10583_v3 = vadd.f32 %v10567_v9, %v10545_v11  ;;  %v13725_v20 = vld [vmem:[%s19708_s0 + $0x28] sm:$0xff]  ;;  %v13726_v25 = vld [vmem:[%s19708_s0 + $0x30] sm:$0xff] }
 0x69d   :  { %v10584_v7 = vadd.f32 %v10567_v9, %v10546_v47  ;;  %v10585_v61 = vadd.f32 %v10567_v9, %v10547_v8  ;;  %v10586_v2 = vadd.f32 %v10567_v9, %v10548_v10  ;;  %v10587_v15 = vadd.f32 %v10567_v9, %v10549_v24  ;;  %v13727_v47 = vld [vmem:[%s19708_s0 + $0x38] sm:$0xff]  ;;  %v13728_v10 = vld [vmem:[%s19708_s0 + $0x40] sm:$0xff] }
 0x69e   :  { %v10588_v4 = vadd.f32 %v10567_v9, %v10550_v22  ;;  %v10589_v51 = vadd.f32 %v10567_v9, %v10551_v38  ;;  %v10590_v33 = vadd.f32 %v10567_v9, %v10552_v46  ;;  %v10591_v39 = vadd.f32 %v10567_v9, %v10553_v43  ;;  %v13729_v22 = vld [vmem:[%s19708_s0 + $0x48] sm:$0xff]  ;;  %v13731_v46 = vld [vmem:[%s19708_s0 + $0x58] sm:$0xff] }
 0x69f   :  { %v10592_v36 = vadd.f32 %v10567_v9, %v10554_v48  ;;  %v10593_v58 = vadd.f32 %v10567_v9, %v10555_v19  ;;  %v10594_v44 = vadd.f32 %v10567_v9, %v10556_v18  ;;  %v10595_v6 = vadd.f32 %v10567_v9, %v10557_v54  ;;  %v13732_v48 = vld [vmem:[%s19708_s0 + $0x60] sm:$0xff]  ;;  %v13733_v18 = vld [vmem:[%s19708_s0 + $0x68] sm:$0xff] }
 0x6a0   :  { %v10596_v42 = vadd.f32 %v10567_v9, %v10558_v31  ;;  %v10597_v63 = vadd.f32 %v10567_v9, %v10559_v53  ;;  %v10599_v27 = vadd.f32 %v10567_v9, %v10561_v37  ;;  %v10600_v32 = vadd.f32 %v10567_v9, %v10562_v13  ;;  %v13723_v9 = vld [vmem:[%s19708_s0 + $0x18] sm:$0xff]  ;;  %v13736_v13 = vld [vmem:[%s19708_s0 + $0x80] sm:$0xff] }
 0x6a1   :  { %v19513_v55 = vadd.f32 %v13720_v1, %v10569_v49  ;;  %v19518_v29 = vadd.f32 %v13721_v60, %v10570_v45  ;;  %v19523_v28 = vadd.f32 %v13722_v17, %v10571_v5  ;;  %v19528_v23 = vadd.f32 %v13723_v9, %v10572_v57  ;;  %v13735_v53 = vld [vmem:[%s19708_s0 + $0x78] sm:$0xff]  ;;  %v13737_v45 = vld [vmem:[%s19708_s0 + $0x88] sm:$0xff]  ;;  %v13738_v57 = vld [vmem:[%s19708_s0 + $0x90] sm:$0xff] }
 0x6a2   :  { %v19533_v35 = vadd.f32 %v13724_v14, %v10573_v34  ;;  %v19538_v21 = vadd.f32 %v13725_v20, %v10574_v30  ;;  %v19543_v11 = vadd.f32 %v13726_v25, %v10575_v26  ;;  %v19548_v8 = vadd.f32 %v13727_v47, %v10576_v62  ;;  %v13739_v30 = vld [vmem:[%s19708_s0 + $0x98] sm:$0xff]  ;;  %v13740_v62 = vld [vmem:[%s19708_s0 + $0xa0] sm:$0xff] }
 0x6a3   :  { %v19553_v24 = vadd.f32 %v13728_v10, %v10577_v41  ;;  %v19558_v0 = vadd.f32 %v13729_v22, %v10578_v56  ;;  %v19563_v38 = vadd.f32 %v13730_v52, %v10579_v59  ;;  %v19568_v43 = vadd.f32 %v13731_v46, %v10580_v50  ;;  %v13741_v56 = vld [vmem:[%s19708_s0 + $0xa8] sm:$0xff]  ;;  %v13742_v50 = vld [vmem:[%s19708_s0 + $0xb0] sm:$0xff] }
 0x6a4   :  { %v19573_v19 = vadd.f32 %v13732_v48, %v10581_v40  ;;  %v19578_v54 = vadd.f32 %v13733_v18, %v10582_v16  ;;  %v19583_v31 = vadd.f32 %v13734_v12, %v10583_v3  ;;  %v19588_v37 = vadd.f32 %v13735_v53, %v10584_v7  ;;  %v13743_v16 = vld [vmem:[%s19708_s0 + $0xb8] sm:$0xff]  ;;  %v13744_v7 = vld [vmem:[%s19708_s0 + $0xc0] sm:$0xff] }
 0x6a5   :  { %v19593_v49 = vadd.f32 %v13736_v13, %v10585_v61  ;;  %v19598_v5 = vadd.f32 %v13737_v45, %v10586_v2  ;;  %v19603_v34 = vadd.f32 %v13738_v57, %v10587_v15  ;;  %v19608_v26 = vadd.f32 %v13739_v30, %v10588_v4  ;;  %v13745_v2 = vld [vmem:[%s19708_s0 + $0xc8] sm:$0xff]  ;;  %v13746_v4 = vld [vmem:[%s19708_s0 + $0xd0] sm:$0xff] }
 0x6a6   :  { %v19613_v41 = vadd.f32 %v13740_v62, %v10589_v51  ;;  %v19618_v59 = vadd.f32 %v13741_v56, %v10590_v33  ;;  %v19623_v40 = vadd.f32 %v13742_v50, %v10591_v39  ;;  %v19628_v3 = vadd.f32 %v13743_v16, %v10592_v36  ;;  %v13747_v33 = vld [vmem:[%s19708_s0 + $0xd8] sm:$0xff]  ;;  %v13748_v36 = vld [vmem:[%s19708_s0 + $0xe0] sm:$0xff] }
 0x6a7   :  { %v19633_v61 = vadd.f32 %v13744_v7, %v10593_v58  ;;  %v19638_v15 = vadd.f32 %v13745_v2, %v10594_v44  ;;  %v19643_v51 = vadd.f32 %v13746_v4, %v10595_v6  ;;  %v19648_v39 = vadd.f32 %v13747_v33, %v10596_v42  ;;  %v13749_v44 = vld [vmem:[%s19708_s0 + $0xf0] sm:$0xff]  ;;  %v13750_v6 = vld [vmem:[%s19708_s0 + $0xf8] sm:$0xff]  ;;  %s13776_s0 = smov [#allocation4]  }
 0x6a8   :  { %v19653_v58 = vadd.f32 %v13748_v36, %v10597_v63  ;;  %v19658_v1 = vadd.f32 %v13749_v44, %v10599_v27  ;;  %v19663_v60 = vadd.f32 %v13750_v6, %v10600_v32  ;;  %v10665_v42 = vmax.f32 %v19513_v55, 0.0  ;;  %s11413_s18 = sshll.u32 %s13776_s0, 4  ;;  %s11414_s18 = int_to_ptr.vmem [resolvable:$true] %s11413_s18 }
 0x6a9   :  { %v10666_v17 = vmax.f32 %v19518_v29, 0.0  ;;  %v10667_v9 = vmax.f32 %v19523_v28, 0.0  ;;  %v10668_v63 = vmax.f32 %v19528_v23, 0.0  ;;  %v10669_v14 = vmax.f32 %v19533_v35, 0.0  ;;  %s13751_s19 = scalar_lea.vmem %s11414_s18, 4096  ;;  %p13756_p1 = scmp.lt.s32.totalorder %s11414_s18, %s11414_s18 }
 0x6aa   :  { %v10670_v20 = vmax.f32 %v19538_v21, 0.0  ;;  %v10671_v27 = vmax.f32 %v19543_v11, 0.0  ;;  %v10672_v25 = vmax.f32 %v19548_v8, 0.0  ;;  %v10673_v47 = vmax.f32 %v19553_v24, 0.0  ;;  %11376 = vst [vmem:[#allocation4] sm:$0xff] %v10665_v42  ;;  %p13752_p0 = scmp.ne.s32.totalorder %s11414_s18, %s13751_s19  ;;  %p13757_p2 = scmp.lt.s32.totalorder %s13751_s19, %s13751_s19 }
 0x6ab   :  { %v10674_v32 = vmax.f32 %v19558_v0, 0.0  ;;  %v10675_v55 = vmax.f32 %v19563_v38, 0.0  ;;  %v10676_v29 = vmax.f32 %v19568_v43, 0.0  ;;  %v10677_v28 = vmax.f32 %v19573_v19, 0.0  ;;  %11377 = vst [vmem:[#allocation4 + $0x8] sm:$0xff] %v10666_v17  ;;  %11378 = vst [vmem:[#allocation4 + $0x10] sm:$0xff] %v10667_v9 }
 0x6ac   :  { %11379 = vst [vmem:[#allocation4 + $0x18] sm:$0xff] %v10668_v63  ;;  %11380 = vst [vmem:[#allocation4 + $0x20] sm:$0xff] %v10669_v14  ;;  %v10678_v23 = vmax.f32 %v19578_v54, 0.0  ;;  %v10679_v35 = vmax.f32 %v19583_v31, 0.0  ;;  %v10680_v21 = vmax.f32 %v19588_v37, 0.0  ;;  %v10681_v11 = vmax.f32 %v19593_v49, 0.0  ;;  %p13758_p3 = por %p13757_p2, %p13756_p1 }
 0x6ad   :  { %11381 = vst [vmem:[#allocation4 + $0x28] sm:$0xff] %v10670_v20  ;;  %11382 = vst [vmem:[#allocation4 + $0x30] sm:$0xff] %v10671_v27  ;;  %v10682_v8 = vmax.f32 %v19598_v5, 0.0  ;;  %v10683_v10 = vmax.f32 %v19603_v34, 0.0  ;;  %v10684_v24 = vmax.f32 %v19608_v26, 0.0  ;;  %v10685_v22 = vmax.f32 %v19613_v41, 0.0 }
 0x6ae   :  { %11383 = vst [vmem:[#allocation4 + $0x38] sm:$0xff] %v10672_v25  ;;  %11384 = vst [vmem:[#allocation4 + $0x40] sm:$0xff] %v10673_v47  ;;  %v10686_v0 = vmax.f32 %v19618_v59, 0.0  ;;  %v10687_v52 = vmax.f32 %v19623_v40, 0.0  ;;  %v10688_v38 = vmax.f32 %v19628_v3, 0.0  ;;  %v10689_v46 = vmax.f32 %v19633_v61, 0.0  ;;  %p13759_p4 = pnand %p13758_p3, %p13752_p0 }
 0x6af   :  { %11385 = vst [vmem:[#allocation4 + $0x48] sm:$0xff] %v10674_v32  ;;  %11386 = vst [vmem:[#allocation4 + $0x50] sm:$0xff] %v10675_v55  ;;  %v10690_v43 = vmax.f32 %v19638_v15, 0.0  ;;  %v10691_v48 = vmax.f32 %v19643_v51, 0.0  ;;  %v10692_v19 = vmax.f32 %v19648_v39, 0.0  ;;  %v10693_v18 = vmax.f32 %v19653_v58, 0.0 }
 0x6b0   :  { %11387 = vst [vmem:[#allocation4 + $0x58] sm:$0xff] %v10676_v29  ;;  %11388 = vst [vmem:[#allocation4 + $0x60] sm:$0xff] %v10677_v28  ;;  %v10695_v54 = vmax.f32 %v19658_v1, 0.0  ;;  %v10696_v12 = vmax.f32 %v19663_v60, 0.0 }
 0x6b1   :  { %11389 = vst [vmem:[#allocation4 + $0x68] sm:$0xff] %v10678_v23  ;;  %11390 = vst [vmem:[#allocation4 + $0x70] sm:$0xff] %v10679_v35 }
 0x6b2   :  { %11391 = vst [vmem:[#allocation4 + $0x78] sm:$0xff] %v10680_v21  ;;  %11392 = vst [vmem:[#allocation4 + $0x80] sm:$0xff] %v10681_v11 }
 0x6b3   :  { %11393 = vst [vmem:[#allocation4 + $0x88] sm:$0xff] %v10682_v8  ;;  %11394 = vst [vmem:[#allocation4 + $0x90] sm:$0xff] %v10683_v10 }
 0x6b4   :  { %11395 = vst [vmem:[#allocation4 + $0x98] sm:$0xff] %v10684_v24  ;;  %11396 = vst [vmem:[#allocation4 + $0xa0] sm:$0xff] %v10685_v22 }
 0x6b5   :  { %11397 = vst [vmem:[#allocation4 + $0xa8] sm:$0xff] %v10686_v0  ;;  %11398 = vst [vmem:[#allocation4 + $0xb0] sm:$0xff] %v10687_v52 }
 0x6b6   :  { %11399 = vst [vmem:[#allocation4 + $0xb8] sm:$0xff] %v10688_v38  ;;  %11400 = vst [vmem:[#allocation4 + $0xc0] sm:$0xff] %v10689_v46 }
 0x6b7   :  { %11401 = vst [vmem:[#allocation4 + $0xc8] sm:$0xff] %v10690_v43  ;;  %11402 = vst [vmem:[#allocation4 + $0xd0] sm:$0xff] %v10691_v48 }
 0x6b8   :  { %11403 = vst [vmem:[#allocation4 + $0xd8] sm:$0xff] %v10692_v19  ;;  %11404 = vst [vmem:[#allocation4 + $0xe0] sm:$0xff] %v10693_v18 }
 0x6b9   :  { %11406 = vst [vmem:[#allocation4 + $0xf0] sm:$0xff] %v10695_v54  ;;  %11407 = vst [vmem:[#allocation4 + $0xf8] sm:$0xff] %v10696_v12 }
 0x6ba   :  { %13762 = shalt.err (!%p13759_p4)
}
 0x6bb   :  { %s13763_s22 = scalar_lea.hbm %s19712_s4, 4096 }
 0x6bc   :  { %p13764_p5 = scmp.ne.s32.totalorder %s19712_s4, %s13763_s22  ;;  %p13767_p6 = scmp.lt.u32.totalorder %s13763_s22, %s19712_s4 }
 0x6be   :  { %p13769_p7 = pnand %p13767_p6, %p13764_p5 }
 0x6c0   :  { %13772 = shalt.err (!%p13769_p7)
}
 0x6c1   :  { %s13777_s27 = smov 128   ;;  %s13778_s28 = smov 8  }
 0x6c2   :  { %11419 = dma.vmem_to_hbm [thread:$0]  %s11414_s18, 4096, %s19712_s4, [#allocation5], %s13777_s27, %s13777_s27, %s13778_s28  }
 0x6c3   :  { %13773 = dma.done.wait [#allocation5], 4096  }
 0x6c4   :  { %13774 = vsyncadd [#allocation5], 4294963200 }
 0x6c5   :  { %11423 = vsyncpa [#allocation5], 1 }

</bundles_post_ra>
